<compile_context>
chip_gen: v5e
topology: v5e:2x2
jax: 0.10.0
libtpu: 0.0.40
codegen_flags: <defaults>
</compile_context>

<pallas_src>
import functools

import jax
import jax.numpy as jnp
from jax import lax
from jax.experimental import pallas as pl
from jax.experimental.pallas import tpu as pltpu

_EPS = 1e-5
_SLOPE = 0.2


def _round_up(x, m):
    return (x + m - 1) // m * m


def _compiler_params():
    return pltpu.CompilerParams(
        dimension_semantics=("parallel",),
        vmem_limit_bytes=64 * 1024 * 1024)


# ------------------------------ Pallas kernels ------------------------------

def _matmul_in_lrelu_kernel(x_ref, w_ref, o_ref, *, inv_count):
    """One canonical (Cp,K)@(K,L) matmul + fused InstanceNorm3d + LeakyReLU.

    x columns are an exact im2col (no wrap garbage); zero-padded lanes and
    zero-padded Cout rows contribute 0 to both sums, so no mask is needed.
    """
    y = jnp.dot(w_ref[...], x_ref[...], preferred_element_type=jnp.float32)
    s1 = jnp.sum(y, axis=1, keepdims=True)
    s2 = jnp.sum(y * y, axis=1, keepdims=True)
    mean = s1 * inv_count
    var = jnp.maximum(s2 * inv_count - mean * mean, 0.0)
    yn = (y - mean) * lax.rsqrt(var + _EPS)
    o_ref[...] = jnp.maximum(yn, _SLOPE * yn).astype(o_ref.dtype)


def _matmul_bias_kernel(x_ref, w_ref, b_ref, o_ref):
    """Final conv: one matmul + per-channel bias, no norm / activation."""
    y = jnp.dot(w_ref[...], x_ref[...], preferred_element_type=jnp.float32)
    o_ref[...] = (y + b_ref[...]).astype(o_ref.dtype)


def _tapstack_in_lrelu_kernel(x_ref, w_ref, mask_ref, o_ref, *, offsets, cout,
                              l_pad, inv_count):
    """Tap-stacked stride-2 conv + fused InstanceNorm3d + LeakyReLU.

    x_ref:    (K, N_ext) bf16   channels-first space-to-depth slab
    w_ref:    (8*Cout, K) bf16  8 taps stacked along M
    mask_ref: (1, L_pad) f32    valid-column mask (wrap/pad columns excluded)
    o_ref:    (Cout, L_pad)
    """
    # single large aligned matmul (good MXU row fill), f32 accumulation
    p = jnp.dot(w_ref[...], x_ref[...], preferred_element_type=jnp.float32)
    # fold tap partials with lane-shifted adds on the small output
    acc = p[0:cout, offsets[0]:offsets[0] + l_pad]
    for t in range(1, len(offsets)):
        off = offsets[t]
        acc = acc + p[t * cout:(t + 1) * cout, off:off + l_pad]
    # masked single-pass InstanceNorm stats (f32) + LeakyReLU
    m = mask_ref[...]
    ym = acc * m
    s1 = jnp.sum(ym, axis=1, keepdims=True)
    s2 = jnp.sum(ym * ym, axis=1, keepdims=True)
    mean = s1 * inv_count
    var = jnp.maximum(s2 * inv_count - mean * mean, 0.0)
    yn = (acc - mean) * lax.rsqrt(var + _EPS)
    o_ref[...] = jnp.maximum(yn, _SLOPE * yn).astype(o_ref.dtype)


# --------------------------- layers (glue + kernels) -------------------------

def conv1_s2_in_lrelu(x, w):
    """First Conv3d(k=4,s=2,p=1) [bias cancelled by IN] + InstanceNorm + LReLU.

    Full receptive field concatenated along K (K = Cin*64) so the lone matmul
    has a dense, aligned contraction; the 8x blowup only touches the tiny
    input_nc-channel input.
    """
    n, cin, d, h, wdim = x.shape
    cout = w.shape[0]
    assert d % 2 == 0 and h % 2 == 0 and wdim % 2 == 0
    cpad = _round_up(cout, 16)                     # bf16 sublane tile
    do, ho, wo = d // 2, h // 2, wdim // 2
    db, hb, wb = do + 1, ho + 1, wo + 1

    xp = jnp.pad(x.astype(jnp.bfloat16),
                 ((0, 0), (0, 0), (1, 1), (1, 1), (1, 1)))
    xs = xp.reshape(n, cin, db, 2, hb, 2, wb, 2)
    xs = xs.transpose(0, 1, 3, 5, 7, 2, 4, 6).reshape(n, cin * 8, db, hb, wb)
    cols = [xs[:, :, bd:bd + do, bh:bh + ho, bw:bw + wo]
            for bd in (0, 1) for bh in (0, 1) for bw in (0, 1)]
    l = do * ho * wo
    l_pad = _round_up(l, 128)
    xi = jnp.concatenate(cols, axis=1).reshape(n, cin * 64, l)
    xi = jnp.pad(xi, ((0, 0), (0, 0), (0, l_pad - l)))
    k = cin * 64

    w2 = w.reshape(cout, cin, 2, 2, 2, 2, 2, 2)    # (co,ci,bd,pd,bh,ph,bw,pw)
    w2 = w2.transpose(0, 2, 4, 6, 1, 3, 5, 7).reshape(cout, k)
    w2 = jnp.pad(w2, ((0, cpad - cout), (0, 0))).astype(jnp.bfloat16)

    kernel = functools.partial(_matmul_in_lrelu_kernel, inv_count=1.0 / float(l))
    y = pl.pallas_call(
        kernel,
        out_shape=jax.ShapeDtypeStruct((n, cpad, l_pad), jnp.bfloat16),
        grid=(n,),
        in_specs=[pl.BlockSpec((None, k, l_pad), lambda i: (i, 0, 0)),
                  pl.BlockSpec((cpad, k), lambda i: (0, 0))],
        out_specs=pl.BlockSpec((None, cpad, l_pad), lambda i: (i, 0, 0)),
        compiler_params=_compiler_params(),
        cost_estimate=pl.CostEstimate(
            flops=int(2 * n * cpad * k * l_pad),
            transcendentals=int(n * cpad),
            bytes_accessed=int(n * (k * l_pad * 2 + cpad * l_pad * 2)
                               + cpad * k * 2)),
    )(xi, w2)
    return y[:, :cout, :l].reshape(n, cout, do, ho, wo)


def conv_s2_in_lrelu_tapstacked(x, w):
    """Middle Conv3d(k=4,s=2,p=1) [bias cancelled by IN] + InstanceNorm + LReLU.

    Stride-2 conv as a stride-1 2x2x2 conv over Cin*8 channels: one matmul
    with the 8 taps stacked along M, then output-side lane-shifted adds.
    """
    n, cin, d, h, wdim = x.shape
    cout = w.shape[0]
    assert cout % 8 == 0 and d % 2 == 0 and h % 2 == 0 and wdim % 2 == 0

    xp = jnp.pad(x.astype(jnp.bfloat16),
                 ((0, 0), (0, 0), (1, 1), (1, 1), (1, 1)))
    db, hb, wb = (d + 2) // 2, (h + 2) // 2, (wdim + 2) // 2
    do, ho, wo = db - 1, hb - 1, wb - 1

    # channels-first space-to-depth slab: (N, K, S) with spatial blocks on lanes
    xs = xp.reshape(n, cin, db, 2, hb, 2, wb, 2)
    xs = xs.transpose(0, 1, 3, 5, 7, 2, 4, 6).reshape(n, cin * 8, db * hb * wb)

    offsets = [bd * hb * wb + bh * wb + bw
               for bd in (0, 1) for bh in (0, 1) for bw in (0, 1)]
    l_ext = do * hb * wb                           # extended output columns
    l_pad = _round_up(l_ext, 128)                  # lane-aligned output width
    n_ext = l_pad + _round_up(max(offsets) + 1, 128)
    xs = jnp.pad(xs, ((0, 0), (0, 0), (0, n_ext - db * hb * wb)))
    k = cin * 8

    # taps stacked along M: W8[t*Cout+co, ci*8+pd*4+ph*2+pw]
    w8 = w.reshape(cout, cin, 2, 2, 2, 2, 2, 2)
    w8 = w8.transpose(2, 4, 6, 0, 1, 3, 5, 7).reshape(8 * cout, k)
    w8 = w8.astype(jnp.bfloat16)

    # valid-column mask for IN stats (wrap-around + pad columns excluded)
    e = jnp.arange(l_pad)
    mask = ((e < l_ext) & ((e // wb) % hb < ho) & (e % wb < wo))
    mask = mask.astype(jnp.float32)[None, :]
    inv_count = 1.0 / float(do * ho * wo)

    kernel = functools.partial(
        _tapstack_in_lrelu_kernel, offsets=tuple(offsets), cout=cout,
        l_pad=l_pad, inv_count=inv_count)
    y = pl.pallas_call(
        kernel,
        out_shape=jax.ShapeDtypeStruct((n, cout, l_pad), jnp.bfloat16),
        grid=(n,),
        in_specs=[pl.BlockSpec((None, k, n_ext), lambda i: (i, 0, 0)),
                  pl.BlockSpec((8 * cout, k), lambda i: (0, 0)),
                  pl.BlockSpec((1, l_pad), lambda i: (0, 0))],
        out_specs=pl.BlockSpec((None, cout, l_pad), lambda i: (i, 0, 0)),
        compiler_params=_compiler_params(),
        cost_estimate=pl.CostEstimate(
            flops=int(2 * n * 8 * cout * k * n_ext),
            transcendentals=int(n * cout),
            bytes_accessed=int(n * (k * n_ext * 2 + cout * l_pad * 2)
                               + 8 * cout * k * 2 + l_pad * 4)),
    )(xs, w8, mask)
    # drop wrap columns; output is already channels-first
    return y[:, :, :l_ext].reshape(n, cout, do, hb, wb)[:, :, :, :ho, :wo]


def conv_final_s1(x, w, b):
    """Final Conv3d(k=4, s=1, p=1) with bias, no norm/activation -> f32.

    Feature map is tiny at this stage: classic im2col (K = Cin*64) in glue and
    a single matmul + bias in the kernel.
    """
    n, cin, d, h, wdim = x.shape
    cout = w.shape[0]
    cpad = _round_up(cout, 8)                      # f32 sublane tile

    xp = jnp.pad(x.astype(jnp.bfloat16),
                 ((0, 0), (0, 0), (1, 1), (1, 1), (1, 1)))
    dp, hp, wp = d + 2, h + 2, wdim + 2
    do, ho, wo = dp - 3, hp - 3, wp - 3
    cols = [xp[:, :, kd:kd + do, kh:kh + ho, kw:kw + wo]
            for kd in range(4) for kh in range(4) for kw in range(4)]
    l = do * ho * wo
    l_pad = _round_up(l, 128)
    xi = jnp.concatenate(cols, axis=1).reshape(n, cin * 64, l)
    xi = jnp.pad(xi, ((0, 0), (0, 0), (0, l_pad - l)))
    k = cin * 64

    w2 = w.reshape(cout, cin, 64).transpose(0, 2, 1).reshape(cout, k)
    w2 = jnp.pad(w2, ((0, cpad - cout), (0, 0))).astype(jnp.bfloat16)
    b2 = jnp.pad(b.reshape(cout, 1), ((0, cpad - cout), (0, 0))).astype(jnp.float32)

    y = pl.pallas_call(
        _matmul_bias_kernel,
        out_shape=jax.ShapeDtypeStruct((n, cpad, l_pad), jnp.float32),
        grid=(n,),
        in_specs=[pl.BlockSpec((None, k, l_pad), lambda i: (i, 0, 0)),
                  pl.BlockSpec((cpad, k), lambda i: (0, 0)),
                  pl.BlockSpec((cpad, 1), lambda i: (0, 0))],
        out_specs=pl.BlockSpec((None, cpad, l_pad), lambda i: (i, 0, 0)),
        compiler_params=_compiler_params(),
        cost_estimate=pl.CostEstimate(
            flops=int(2 * n * cpad * k * l_pad),
            transcendentals=0,
            bytes_accessed=int(n * (k * l_pad * 2 + cpad * l_pad * 4)
                               + cpad * k * 2)),
    )(xi, w2, b2)
    return y[:, :cout, :l].reshape(n, cout, do, ho, wo)


# --------------------------- model: params + forward -------------------------

def init_params(key, input_nc, ndf=32, n_layers=3):
    """Deterministic synthetic parameters; shapes follow the PyTorch __init__."""
    chans = [(input_nc, ndf)]
    nf_mult = 1
    for nl in range(1, n_layers):
        nf_prev, nf_mult = nf_mult, min(2 ** nl, 8)
        chans.append((ndf * nf_prev, ndf * nf_mult))
    nf_prev, nf_mult = nf_mult, min(2 ** n_layers, 8)
    chans.append((ndf * nf_prev, ndf * nf_mult))
    chans.append((ndf * nf_mult, 1))               # final 1-channel conv

    params = []
    for cin, cout in chans:
        key, k1, k2 = jax.random.split(key, 3)
        w = 0.05 * jax.random.normal(k1, (cout, cin, 4, 4, 4), jnp.float32)
        b = 0.01 * jax.random.normal(k2, (cout,), jnp.float32)
        params.append((w, b))
    return params


def patchgan_forward(x, params, use_sigmoid=False):
    (w0, _b0), *mid, (w_last, b_last) = params
    # conv biases on IN layers intentionally unused: the per-channel mean
    # subtraction of InstanceNorm cancels them exactly.
    h = conv1_s2_in_lrelu(x, w0)
    for w, _b in mid:
        h = conv_s2_in_lrelu_tapstacked(h, w)
    y = conv_final_s1(h, w_last, b_last)
    if use_sigmoid:
        y = jax.nn.sigmoid(y)
    return y


# ----------------------- plain-JAX reference (validation) --------------------

def reference_forward(x, params, use_sigmoid=False):
    """XLA reference with the same bf16-in / f32-accumulate dtype policy."""
    h = x
    n_conv = len(params)
    for i, (w, b) in enumerate(params):
        last = i == n_conv - 1
        y = lax.conv_general_dilated(
            h.astype(jnp.bfloat16), w.astype(jnp.bfloat16),
            window_strides=(1, 1, 1) if last else (2, 2, 2),
            padding=[(1, 1)] * 3,
            dimension_numbers=("NCDHW", "OIDHW", "NCDHW"),
            preferred_element_type=jnp.float32)
        y = y + b.reshape(1, -1, 1, 1, 1)
        if last:
            h = y
        else:
            mean = jnp.mean(y, axis=(2, 3, 4), keepdims=True)
            var = jnp.mean(jnp.square(y - mean), axis=(2, 3, 4), keepdims=True)
            y = (y - mean) * lax.rsqrt(var + _EPS)
            h = jnp.where(y >= 0.0, y, _SLOPE * y).astype(jnp.bfloat16)
    if use_sigmoid:
        h = jax.nn.sigmoid(h)
    return h


# ----------------------------------- main ------------------------------------

if __name__ == "__main__":
    key = jax.random.PRNGKey(0)
    kx, kp = jax.random.split(key)

    # 4 stride-2 convs (with IN + LeakyReLU) then a stride-1 k=4 conv:
    # spatial 32 -> 16 -> 8 -> 4 -> 2 -> 1.
    input_nc, ndf, n_layers = 2, 8, 3
    x = jax.random.normal(kx, (2, input_nc, 32, 32, 32), jnp.float32)
    params = init_params(kp, input_nc, ndf=ndf, n_layers=n_layers)

    fwd = jax.jit(lambda xx: patchgan_forward(xx, params, use_sigmoid=False))
    out = jax.block_until_ready(fwd(x))

    assert out.shape == (2, 1, 1, 1, 1), out.shape
    assert bool(jnp.all(jnp.isfinite(out)))

    ref = jax.jit(lambda xx: reference_forward(xx, params, use_sigmoid=False))(x)
    assert bool(jnp.allclose(out, ref, atol=5e-2, rtol=5e-2)), (out, ref)

    print("KERNEL_OK")
</pallas_src>

<mosaic_0001>
module attributes {stable_mosaic.version = 11 : i64} {
  func.func @_matmul_in_lrelu_kernel(%arg0: i32, %arg1: memref<1x128x4096xbf16, #tpu.memory_space<vmem>>, %arg2: memref<16x128xbf16, #tpu.memory_space<vmem>>, %arg3: memref<1x16x4096xbf16, #tpu.memory_space<vmem>>) attributes {dimension_semantics = [#tpu.dimension_semantics<parallel>], iteration_bounds = array<i64: 2>, scalar_prefetch = 0 : i64, scratch_operands = 0 : i64, tpu.core_type = #tpu.core_type<tc>, window_params = [{transform_indices = @transform_0, window_bounds = array<i64: 1, 128, 4096>}, {pipeline_mode = #tpu.pipeline_mode<synchronous>, transform_indices = @transform_1, window_bounds = array<i64: 16, 128>}, {transform_indices = @transform_2, window_bounds = array<i64: 1, 16, 4096>}]} {
    %c0 = arith.constant 0 : index
    %c0_0 = arith.constant 0 : index
    %0 = vector.load %arg2[%c0, %c0_0] : memref<16x128xbf16, #tpu.memory_space<vmem>>, vector<16x128xbf16>
    %c0_1 = arith.constant 0 : index
    %c0_2 = arith.constant 0 : index
    %c0_3 = arith.constant 0 : index
    %1 = vector.load %arg1[%c0_1, %c0_2, %c0_3] : memref<1x128x4096xbf16, #tpu.memory_space<vmem>>, vector<1x128x4096xbf16>
    %2 = vector.shape_cast %1 : vector<1x128x4096xbf16> to vector<128x4096xbf16>
    %cst = arith.constant dense<0.000000e+00> : vector<16x4096xf32>
    %3 = tpu.matmul %0, %2, %cst {dimension_numbers = #tpu.dot_dimension_numbers<[1], [0], [0], [1], [0, 0, 1, 1], [], []>} : vector<16x128xbf16>, vector<128x4096xbf16>, vector<16x4096xf32> -> vector<16x4096xf32>
    %cst_4 = arith.constant dense<0.000000e+00> : vector<16xf32>
    %4 = vector.multi_reduction <add>, %3, %cst_4 [1] : vector<16x4096xf32> to vector<16xf32>
    %5 = vector.shape_cast %4 : vector<16xf32> to vector<16x1xf32>
    %6 = arith.mulf %3, %3 : vector<16x4096xf32>
    %cst_5 = arith.constant dense<0.000000e+00> : vector<16xf32>
    %7 = vector.multi_reduction <add>, %6, %cst_5 [1] : vector<16x4096xf32> to vector<16xf32>
    %8 = vector.shape_cast %7 : vector<16xf32> to vector<16x1xf32>
    %cst_6 = arith.constant 2.44140625E-4 : f32
    %9 = vector.broadcast %cst_6 : f32 to vector<16x1xf32>
    %10 = arith.mulf %5, %9 : vector<16x1xf32>
    %cst_7 = arith.constant 2.44140625E-4 : f32
    %11 = vector.broadcast %cst_7 : f32 to vector<16x1xf32>
    %12 = arith.mulf %8, %11 : vector<16x1xf32>
    %13 = arith.mulf %10, %10 : vector<16x1xf32>
    %14 = arith.subf %12, %13 : vector<16x1xf32>
    %cst_8 = arith.constant 0.000000e+00 : f32
    %15 = vector.broadcast %cst_8 : f32 to vector<16x1xf32>
    %16 = arith.maximumf %14, %15 : vector<16x1xf32>
    %17 = vector.broadcast %10 : vector<16x1xf32> to vector<16x4096xf32>
    %18 = arith.subf %3, %17 : vector<16x4096xf32>
    %cst_9 = arith.constant 9.99999974E-6 : f32
    %19 = vector.broadcast %cst_9 : f32 to vector<16x1xf32>
    %20 = arith.addf %16, %19 : vector<16x1xf32>
    %21 = math.rsqrt %20 : vector<16x1xf32>
    %22 = vector.broadcast %21 : vector<16x1xf32> to vector<16x4096xf32>
    %23 = arith.mulf %18, %22 : vector<16x4096xf32>
    %cst_10 = arith.constant 2.000000e-01 : f32
    %24 = vector.broadcast %cst_10 : f32 to vector<16x4096xf32>
    %25 = arith.mulf %24, %23 : vector<16x4096xf32>
    %26 = arith.maximumf %23, %25 : vector<16x4096xf32>
    %27 = arith.truncf %26 : vector<16x4096xf32> to vector<16x4096xbf16>
    %c0_11 = arith.constant 0 : index
    %c0_12 = arith.constant 0 : index
    %c0_13 = arith.constant 0 : index
    %28 = vector.load %arg3[%c0_11, %c0_12, %c0_13] : memref<1x16x4096xbf16, #tpu.memory_space<vmem>>, vector<1x16x4096xbf16>
    %29 = vector.shape_cast %28 : vector<1x16x4096xbf16> to vector<16x4096xbf16>
    %30 = vector.shape_cast %27 : vector<16x4096xbf16> to vector<1x16x4096xbf16>
    tpu.vector_store %arg3[%c0_11, %c0_12, %c0_13], %30 {strides = array<i32>} : memref<1x16x4096xbf16, #tpu.memory_space<vmem>>, vector<1x16x4096xbf16>,
    return
  }
  func.func @transform_0(%arg0: i32) -> (i32, i32, i32) {
    %c0_i32 = arith.constant 0 : i32
    %c0_i32_0 = arith.constant 0 : i32
    %c0_i32_1 = arith.constant 0 : i32
    return %arg0, %c0_i32, %c0_i32_0 : i32, i32, i32
  }
  func.func @transform_1(%arg0: i32) -> (i32, i32) {
    %c0_i32 = arith.constant 0 : i32
    %c0_i32_0 = arith.constant 0 : i32
    %c0_i32_1 = arith.constant 0 : i32
    return %c0_i32, %c0_i32_0 : i32, i32
  }
  func.func @transform_2(%arg0: i32) -> (i32, i32, i32) {
    %c0_i32 = arith.constant 0 : i32
    %c0_i32_0 = arith.constant 0 : i32
    %c0_i32_1 = arith.constant 0 : i32
    return %arg0, %c0_i32, %c0_i32_0 : i32, i32, i32
  }
}

module attributes {stable_mosaic.version = 11 : i64} {
  func.func @_tapstack_in_lrelu_kernel(%arg0: i32, %arg1: memref<1x64x896xbf16, #tpu.memory_space<vmem>>, %arg2: memref<128x64xbf16, #tpu.memory_space<vmem>>, %arg3: memref<1x768xf32, #tpu.memory_space<vmem>>, %arg4: memref<1x16x768xbf16, #tpu.memory_space<vmem>>) attributes {dimension_semantics = [#tpu.dimension_semantics<parallel>], iteration_bounds = array<i64: 2>, scalar_prefetch = 0 : i64, scratch_operands = 0 : i64, tpu.core_type = #tpu.core_type<tc>, window_params = [{transform_indices = @transform_0, window_bounds = array<i64: 1, 64, 896>}, {pipeline_mode = #tpu.pipeline_mode<synchronous>, transform_indices = @transform_1, window_bounds = array<i64: 128, 64>}, {pipeline_mode = #tpu.pipeline_mode<synchronous>, transform_indices = @transform_2, window_bounds = array<i64: 1, 768>}, {transform_indices = @transform_3, window_bounds = array<i64: 1, 16, 768>}]} {
    %c0 = arith.constant 0 : index
    %c0_0 = arith.constant 0 : index
    %0 = vector.load %arg2[%c0, %c0_0] : memref<128x64xbf16, #tpu.memory_space<vmem>>, vector<128x64xbf16>
    %c0_1 = arith.constant 0 : index
    %c0_2 = arith.constant 0 : index
    %c0_3 = arith.constant 0 : index
    %1 = vector.load %arg1[%c0_1, %c0_2, %c0_3] : memref<1x64x896xbf16, #tpu.memory_space<vmem>>, vector<1x64x896xbf16>
    %2 = vector.shape_cast %1 : vector<1x64x896xbf16> to vector<64x896xbf16>
    %cst = arith.constant dense<0.000000e+00> : vector<128x896xf32>
    %3 = tpu.matmul %0, %2, %cst {dimension_numbers = #tpu.dot_dimension_numbers<[1], [0], [0], [1], [0, 0, 1, 1], [], []>} : vector<128x64xbf16>, vector<64x896xbf16>, vector<128x896xf32> -> vector<128x896xf32>
    %4 = vector.extract_strided_slice %3 {offsets = [0, 0], sizes = [16, 768], strides = [1, 1]} : vector<128x896xf32> to vector<16x768xf32>
    %5 = vector.extract_strided_slice %3 {offsets = [16, 1], sizes = [16, 768], strides = [1, 1]} : vector<128x896xf32> to vector<16x768xf32>
    %6 = arith.addf %4, %5 : vector<16x768xf32>
    %7 = vector.extract_strided_slice %3 {offsets = [32, 9], sizes = [16, 768], strides = [1, 1]} : vector<128x896xf32> to vector<16x768xf32>
    %8 = arith.addf %6, %7 : vector<16x768xf32>
    %9 = vector.extract_strided_slice %3 {offsets = [48, 10], sizes = [16, 768], strides = [1, 1]} : vector<128x896xf32> to vector<16x768xf32>
    %10 = arith.addf %8, %9 : vector<16x768xf32>
    %11 = vector.extract_strided_slice %3 {offsets = [64, 81], sizes = [16, 768], strides = [1, 1]} : vector<128x896xf32> to vector<16x768xf32>
    %12 = arith.addf %10, %11 : vector<16x768xf32>
    %13 = vector.extract_strided_slice %3 {offsets = [80, 82], sizes = [16, 768], strides = [1, 1]} : vector<128x896xf32> to vector<16x768xf32>
    %14 = arith.addf %12, %13 : vector<16x768xf32>
    %15 = vector.extract_strided_slice %3 {offsets = [96, 90], sizes = [16, 768], strides = [1, 1]} : vector<128x896xf32> to vector<16x768xf32>
    %16 = arith.addf %14, %15 : vector<16x768xf32>
    %17 = vector.extract_strided_slice %3 {offsets = [112, 91], sizes = [16, 768], strides = [1, 1]} : vector<128x896xf32> to vector<16x768xf32>
    %18 = arith.addf %16, %17 : vector<16x768xf32>
    %c0_4 = arith.constant 0 : index
    %c0_5 = arith.constant 0 : index
    %19 = vector.load %arg3[%c0_4, %c0_5] : memref<1x768xf32, #tpu.memory_space<vmem>>, vector<1x768xf32>
    %20 = vector.broadcast %19 : vector<1x768xf32> to vector<16x768xf32>
    %21 = arith.mulf %18, %20 : vector<16x768xf32>
    %cst_6 = arith.constant dense<0.000000e+00> : vector<16xf32>
    %22 = vector.multi_reduction <add>, %21, %cst_6 [1] : vector<16x768xf32> to vector<16xf32>
    %23 = vector.shape_cast %22 : vector<16xf32> to vector<16x1xf32>
    %24 = arith.mulf %21, %21 : vector<16x768xf32>
    %cst_7 = arith.constant dense<0.000000e+00> : vector<16xf32>
    %25 = vector.multi_reduction <add>, %24, %cst_7 [1] : vector<16x768xf32> to vector<16xf32>
    %26 = vector.shape_cast %25 : vector<16xf32> to vector<16x1xf32>
    %cst_8 = arith.constant 0.001953125 : f32
    %27 = vector.broadcast %cst_8 : f32 to vector<16x1xf32>
    %28 = arith.mulf %23, %27 : vector<16x1xf32>
    %cst_9 = arith.constant 0.001953125 : f32
    %29 = vector.broadcast %cst_9 : f32 to vector<16x1xf32>
    %30 = arith.mulf %26, %29 : vector<16x1xf32>
    %31 = arith.mulf %28, %28 : vector<16x1xf32>
    %32 = arith.subf %30, %31 : vector<16x1xf32>
    %cst_10 = arith.constant 0.000000e+00 : f32
    %33 = vector.broadcast %cst_10 : f32 to vector<16x1xf32>
    %34 = arith.maximumf %32, %33 : vector<16x1xf32>
    %35 = vector.broadcast %28 : vector<16x1xf32> to vector<16x768xf32>
    %36 = arith.subf %18, %35 : vector<16x768xf32>
    %cst_11 = arith.constant 9.99999974E-6 : f32
    %37 = vector.broadcast %cst_11 : f32 to vector<16x1xf32>
    %38 = arith.addf %34, %37 : vector<16x1xf32>
    %39 = math.rsqrt %38 : vector<16x1xf32>
    %40 = vector.broadcast %39 : vector<16x1xf32> to vector<16x768xf32>
    %41 = arith.mulf %36, %40 : vector<16x768xf32>
    %cst_12 = arith.constant 2.000000e-01 : f32
    %42 = vector.broadcast %cst_12 : f32 to vector<16x768xf32>
    %43 = arith.mulf %42, %41 : vector<16x768xf32>
    %44 = arith.maximumf %41, %43 : vector<16x768xf32>
    %45 = arith.truncf %44 : vector<16x768xf32> to vector<16x768xbf16>
    %c0_13 = arith.constant 0 : index
    %c0_14 = arith.constant 0 : index
    %c0_15 = arith.constant 0 : index
    %46 = vector.load %arg4[%c0_13, %c0_14, %c0_15] : memref<1x16x768xbf16, #tpu.memory_space<vmem>>, vector<1x16x768xbf16>
    %47 = vector.shape_cast %46 : vector<1x16x768xbf16> to vector<16x768xbf16>
    %48 = vector.shape_cast %45 : vector<16x768xbf16> to vector<1x16x768xbf16>
    tpu.vector_store %arg4[%c0_13, %c0_14, %c0_15], %48 {strides = array<i32>} : memref<1x16x768xbf16, #tpu.memory_space<vmem>>, vector<1x16x768xbf16>,
    return
  }
  func.func @transform_0(%arg0: i32) -> (i32, i32, i32) {
    %c0_i32 = arith.constant 0 : i32
    %c0_i32_0 = arith.constant 0 : i32
    %c0_i32_1 = arith.constant 0 : i32
    return %arg0, %c0_i32, %c0_i32_0 : i32, i32, i32
  }
  func.func @transform_1(%arg0: i32) -> (i32, i32) {
    %c0_i32 = arith.constant 0 : i32
    %c0_i32_0 = arith.constant 0 : i32
    %c0_i32_1 = arith.constant 0 : i32
    return %c0_i32, %c0_i32_0 : i32, i32
  }
  func.func @transform_2(%arg0: i32) -> (i32, i32) {
    %c0_i32 = arith.constant 0 : i32
    %c0_i32_0 = arith.constant 0 : i32
    %c0_i32_1 = arith.constant 0 : i32
    return %c0_i32, %c0_i32_0 : i32, i32
  }
  func.func @transform_3(%arg0: i32) -> (i32, i32, i32) {
    %c0_i32 = arith.constant 0 : i32
    %c0_i32_0 = arith.constant 0 : i32
    %c0_i32_1 = arith.constant 0 : i32
    return %arg0, %c0_i32, %c0_i32_0 : i32, i32, i32
  }
}

module attributes {stable_mosaic.version = 11 : i64} {
  func.func @_tapstack_in_lrelu_kernel(%arg0: i32, %arg1: memref<1x128x256xbf16, #tpu.memory_space<vmem>>, %arg2: memref<256x128xbf16, #tpu.memory_space<vmem>>, %arg3: memref<1x128xf32, #tpu.memory_space<vmem>>, %arg4: memref<1x32x128xbf16, #tpu.memory_space<vmem>>) attributes {dimension_semantics = [#tpu.dimension_semantics<parallel>], iteration_bounds = array<i64: 2>, scalar_prefetch = 0 : i64, scratch_operands = 0 : i64, tpu.core_type = #tpu.core_type<tc>, window_params = [{transform_indices = @transform_0, window_bounds = array<i64: 1, 128, 256>}, {pipeline_mode = #tpu.pipeline_mode<synchronous>, transform_indices = @transform_1, window_bounds = array<i64: 256, 128>}, {pipeline_mode = #tpu.pipeline_mode<synchronous>, transform_indices = @transform_2, window_bounds = array<i64: 1, 128>}, {transform_indices = @transform_3, window_bounds = array<i64: 1, 32, 128>}]} {
    %c0 = arith.constant 0 : index
    %c0_0 = arith.constant 0 : index
    %0 = vector.load %arg2[%c0, %c0_0] : memref<256x128xbf16, #tpu.memory_space<vmem>>, vector<256x128xbf16>
    %c0_1 = arith.constant 0 : index
    %c0_2 = arith.constant 0 : index
    %c0_3 = arith.constant 0 : index
    %1 = vector.load %arg1[%c0_1, %c0_2, %c0_3] : memref<1x128x256xbf16, #tpu.memory_space<vmem>>, vector<1x128x256xbf16>
    %2 = vector.shape_cast %1 : vector<1x128x256xbf16> to vector<128x256xbf16>
    %cst = arith.constant dense<0.000000e+00> : vector<256x256xf32>
    %3 = tpu.matmul %0, %2, %cst {dimension_numbers = #tpu.dot_dimension_numbers<[1], [0], [0], [1], [0, 0, 1, 1], [], []>} : vector<256x128xbf16>, vector<128x256xbf16>, vector<256x256xf32> -> vector<256x256xf32>
    %4 = vector.extract_strided_slice %3 {offsets = [0, 0], sizes = [32, 128], strides = [1, 1]} : vector<256x256xf32> to vector<32x128xf32>
    %5 = vector.extract_strided_slice %3 {offsets = [32, 1], sizes = [32, 128], strides = [1, 1]} : vector<256x256xf32> to vector<32x128xf32>
    %6 = arith.addf %4, %5 : vector<32x128xf32>
    %7 = vector.extract_strided_slice %3 {offsets = [64, 5], sizes = [32, 128], strides = [1, 1]} : vector<256x256xf32> to vector<32x128xf32>
    %8 = arith.addf %6, %7 : vector<32x128xf32>
    %9 = vector.extract_strided_slice %3 {offsets = [96, 6], sizes = [32, 128], strides = [1, 1]} : vector<256x256xf32> to vector<32x128xf32>
    %10 = arith.addf %8, %9 : vector<32x128xf32>
    %11 = vector.extract_strided_slice %3 {offsets = [128, 25], sizes = [32, 128], strides = [1, 1]} : vector<256x256xf32> to vector<32x128xf32>
    %12 = arith.addf %10, %11 : vector<32x128xf32>
    %13 = vector.extract_strided_slice %3 {offsets = [160, 26], sizes = [32, 128], strides = [1, 1]} : vector<256x256xf32> to vector<32x128xf32>
    %14 = arith.addf %12, %13 : vector<32x128xf32>
    %15 = vector.extract_strided_slice %3 {offsets = [192, 30], sizes = [32, 128], strides = [1, 1]} : vector<256x256xf32> to vector<32x128xf32>
    %16 = arith.addf %14, %15 : vector<32x128xf32>
    %17 = vector.extract_strided_slice %3 {offsets = [224, 31], sizes = [32, 128], strides = [1, 1]} : vector<256x256xf32> to vector<32x128xf32>
    %18 = arith.addf %16, %17 : vector<32x128xf32>
    %c0_4 = arith.constant 0 : index
    %c0_5 = arith.constant 0 : index
    %19 = vector.load %arg3[%c0_4, %c0_5] : memref<1x128xf32, #tpu.memory_space<vmem>>, vector<1x128xf32>
    %20 = vector.broadcast %19 : vector<1x128xf32> to vector<32x128xf32>
    %21 = arith.mulf %18, %20 : vector<32x128xf32>
    %cst_6 = arith.constant dense<0.000000e+00> : vector<32xf32>
    %22 = vector.multi_reduction <add>, %21, %cst_6 [1] : vector<32x128xf32> to vector<32xf32>
    %23 = vector.shape_cast %22 : vector<32xf32> to vector<32x1xf32>
    %24 = arith.mulf %21, %21 : vector<32x128xf32>
    %cst_7 = arith.constant dense<0.000000e+00> : vector<32xf32>
    %25 = vector.multi_reduction <add>, %24, %cst_7 [1] : vector<32x128xf32> to vector<32xf32>
    %26 = vector.shape_cast %25 : vector<32xf32> to vector<32x1xf32>
    %cst_8 = arith.constant 1.562500e-02 : f32
    %27 = vector.broadcast %cst_8 : f32 to vector<32x1xf32>
    %28 = arith.mulf %23, %27 : vector<32x1xf32>
    %cst_9 = arith.constant 1.562500e-02 : f32
    %29 = vector.broadcast %cst_9 : f32 to vector<32x1xf32>
    %30 = arith.mulf %26, %29 : vector<32x1xf32>
    %31 = arith.mulf %28, %28 : vector<32x1xf32>
    %32 = arith.subf %30, %31 : vector<32x1xf32>
    %cst_10 = arith.constant 0.000000e+00 : f32
    %33 = vector.broadcast %cst_10 : f32 to vector<32x1xf32>
    %34 = arith.maximumf %32, %33 : vector<32x1xf32>
    %35 = vector.broadcast %28 : vector<32x1xf32> to vector<32x128xf32>
    %36 = arith.subf %18, %35 : vector<32x128xf32>
    %cst_11 = arith.constant 9.99999974E-6 : f32
    %37 = vector.broadcast %cst_11 : f32 to vector<32x1xf32>
    %38 = arith.addf %34, %37 : vector<32x1xf32>
    %39 = math.rsqrt %38 : vector<32x1xf32>
    %40 = vector.broadcast %39 : vector<32x1xf32> to vector<32x128xf32>
    %41 = arith.mulf %36, %40 : vector<32x128xf32>
    %cst_12 = arith.constant 2.000000e-01 : f32
    %42 = vector.broadcast %cst_12 : f32 to vector<32x128xf32>
    %43 = arith.mulf %42, %41 : vector<32x128xf32>
    %44 = arith.maximumf %41, %43 : vector<32x128xf32>
    %45 = arith.truncf %44 : vector<32x128xf32> to vector<32x128xbf16>
    %c0_13 = arith.constant 0 : index
    %c0_14 = arith.constant 0 : index
    %c0_15 = arith.constant 0 : index
    %46 = vector.load %arg4[%c0_13, %c0_14, %c0_15] : memref<1x32x128xbf16, #tpu.memory_space<vmem>>, vector<1x32x128xbf16>
    %47 = vector.shape_cast %46 : vector<1x32x128xbf16> to vector<32x128xbf16>
    %48 = vector.shape_cast %45 : vector<32x128xbf16> to vector<1x32x128xbf16>
    tpu.vector_store %arg4[%c0_13, %c0_14, %c0_15], %48 {strides = array<i32>} : memref<1x32x128xbf16, #tpu.memory_space<vmem>>, vector<1x32x128xbf16>,
    return
  }
  func.func @transform_0(%arg0: i32) -> (i32, i32, i32) {
    %c0_i32 = arith.constant 0 : i32
    %c0_i32_0 = arith.constant 0 : i32
    %c0_i32_1 = arith.constant 0 : i32
    return %arg0, %c0_i32, %c0_i32_0 : i32, i32, i32
  }
  func.func @transform_1(%arg0: i32) -> (i32, i32) {
    %c0_i32 = arith.constant 0 : i32
    %c0_i32_0 = arith.constant 0 : i32
    %c0_i32_1 = arith.constant 0 : i32
    return %c0_i32, %c0_i32_0 : i32, i32
  }
  func.func @transform_2(%arg0: i32) -> (i32, i32) {
    %c0_i32 = arith.constant 0 : i32
    %c0_i32_0 = arith.constant 0 : i32
    %c0_i32_1 = arith.constant 0 : i32
    return %c0_i32, %c0_i32_0 : i32, i32
  }
  func.func @transform_3(%arg0: i32) -> (i32, i32, i32) {
    %c0_i32 = arith.constant 0 : i32
    %c0_i32_0 = arith.constant 0 : i32
    %c0_i32_1 = arith.constant 0 : i32
    return %arg0, %c0_i32, %c0_i32_0 : i32, i32, i32
  }
}

module attributes {stable_mosaic.version = 11 : i64} {
  func.func @_tapstack_in_lrelu_kernel(%arg0: i32, %arg1: memref<1x256x256xbf16, #tpu.memory_space<vmem>>, %arg2: memref<512x256xbf16, #tpu.memory_space<vmem>>, %arg3: memref<1x128xf32, #tpu.memory_space<vmem>>, %arg4: memref<1x64x128xbf16, #tpu.memory_space<vmem>>) attributes {dimension_semantics = [#tpu.dimension_semantics<parallel>], iteration_bounds = array<i64: 2>, scalar_prefetch = 0 : i64, scratch_operands = 0 : i64, tpu.core_type = #tpu.core_type<tc>, window_params = [{transform_indices = @transform_0, window_bounds = array<i64: 1, 256, 256>}, {pipeline_mode = #tpu.pipeline_mode<synchronous>, transform_indices = @transform_1, window_bounds = array<i64: 512, 256>}, {pipeline_mode = #tpu.pipeline_mode<synchronous>, transform_indices = @transform_2, window_bounds = array<i64: 1, 128>}, {transform_indices = @transform_3, window_bounds = array<i64: 1, 64, 128>}]} {
    %c0 = arith.constant 0 : index
    %c0_0 = arith.constant 0 : index
    %0 = vector.load %arg2[%c0, %c0_0] : memref<512x256xbf16, #tpu.memory_space<vmem>>, vector<512x256xbf16>
    %c0_1 = arith.constant 0 : index
    %c0_2 = arith.constant 0 : index
    %c0_3 = arith.constant 0 : index
    %1 = vector.load %arg1[%c0_1, %c0_2, %c0_3] : memref<1x256x256xbf16, #tpu.memory_space<vmem>>, vector<1x256x256xbf16>
    %2 = vector.shape_cast %1 : vector<1x256x256xbf16> to vector<256x256xbf16>
    %cst = arith.constant dense<0.000000e+00> : vector<512x256xf32>
    %3 = tpu.matmul %0, %2, %cst {dimension_numbers = #tpu.dot_dimension_numbers<[1], [0], [0], [1], [0, 0, 1, 1], [], []>} : vector<512x256xbf16>, vector<256x256xbf16>, vector<512x256xf32> -> vector<512x256xf32>
    %4 = vector.extract_strided_slice %3 {offsets = [0, 0], sizes = [64, 128], strides = [1, 1]} : vector<512x256xf32> to vector<64x128xf32>
    %5 = vector.extract_strided_slice %3 {offsets = [64, 1], sizes = [64, 128], strides = [1, 1]} : vector<512x256xf32> to vector<64x128xf32>
    %6 = arith.addf %4, %5 : vector<64x128xf32>
    %7 = vector.extract_strided_slice %3 {offsets = [128, 3], sizes = [64, 128], strides = [1, 1]} : vector<512x256xf32> to vector<64x128xf32>
    %8 = arith.addf %6, %7 : vector<64x128xf32>
    %9 = vector.extract_strided_slice %3 {offsets = [192, 4], sizes = [64, 128], strides = [1, 1]} : vector<512x256xf32> to vector<64x128xf32>
    %10 = arith.addf %8, %9 : vector<64x128xf32>
    %11 = vector.extract_strided_slice %3 {offsets = [256, 9], sizes = [64, 128], strides = [1, 1]} : vector<512x256xf32> to vector<64x128xf32>
    %12 = arith.addf %10, %11 : vector<64x128xf32>
    %13 = vector.extract_strided_slice %3 {offsets = [320, 10], sizes = [64, 128], strides = [1, 1]} : vector<512x256xf32> to vector<64x128xf32>
    %14 = arith.addf %12, %13 : vector<64x128xf32>
    %15 = vector.extract_strided_slice %3 {offsets = [384, 12], sizes = [64, 128], strides = [1, 1]} : vector<512x256xf32> to vector<64x128xf32>
    %16 = arith.addf %14, %15 : vector<64x128xf32>
    %17 = vector.extract_strided_slice %3 {offsets = [448, 13], sizes = [64, 128], strides = [1, 1]} : vector<512x256xf32> to vector<64x128xf32>
    %18 = arith.addf %16, %17 : vector<64x128xf32>
    %c0_4 = arith.constant 0 : index
    %c0_5 = arith.constant 0 : index
    %19 = vector.load %arg3[%c0_4, %c0_5] : memref<1x128xf32, #tpu.memory_space<vmem>>, vector<1x128xf32>
    %20 = vector.broadcast %19 : vector<1x128xf32> to vector<64x128xf32>
    %21 = arith.mulf %18, %20 : vector<64x128xf32>
    %cst_6 = arith.constant dense<0.000000e+00> : vector<64xf32>
    %22 = vector.multi_reduction <add>, %21, %cst_6 [1] : vector<64x128xf32> to vector<64xf32>
    %23 = vector.shape_cast %22 : vector<64xf32> to vector<64x1xf32>
    %24 = arith.mulf %21, %21 : vector<64x128xf32>
    %cst_7 = arith.constant dense<0.000000e+00> : vector<64xf32>
    %25 = vector.multi_reduction <add>, %24, %cst_7 [1] : vector<64x128xf32> to vector<64xf32>
    %26 = vector.shape_cast %25 : vector<64xf32> to vector<64x1xf32>
    %cst_8 = arith.constant 1.250000e-01 : f32
    %27 = vector.broadcast %cst_8 : f32 to vector<64x1xf32>
    %28 = arith.mulf %23, %27 : vector<64x1xf32>
    %cst_9 = arith.constant 1.250000e-01 : f32
    %29 = vector.broadcast %cst_9 : f32 to vector<64x1xf32>
    %30 = arith.mulf %26, %29 : vector<64x1xf32>
    %31 = arith.mulf %28, %28 : vector<64x1xf32>
    %32 = arith.subf %30, %31 : vector<64x1xf32>
    %cst_10 = arith.constant 0.000000e+00 : f32
    %33 = vector.broadcast %cst_10 : f32 to vector<64x1xf32>
    %34 = arith.maximumf %32, %33 : vector<64x1xf32>
    %35 = vector.broadcast %28 : vector<64x1xf32> to vector<64x128xf32>
    %36 = arith.subf %18, %35 : vector<64x128xf32>
    %cst_11 = arith.constant 9.99999974E-6 : f32
    %37 = vector.broadcast %cst_11 : f32 to vector<64x1xf32>
    %38 = arith.addf %34, %37 : vector<64x1xf32>
    %39 = math.rsqrt %38 : vector<64x1xf32>
    %40 = vector.broadcast %39 : vector<64x1xf32> to vector<64x128xf32>
    %41 = arith.mulf %36, %40 : vector<64x128xf32>
    %cst_12 = arith.constant 2.000000e-01 : f32
    %42 = vector.broadcast %cst_12 : f32 to vector<64x128xf32>
    %43 = arith.mulf %42, %41 : vector<64x128xf32>
    %44 = arith.maximumf %41, %43 : vector<64x128xf32>
    %45 = arith.truncf %44 : vector<64x128xf32> to vector<64x128xbf16>
    %c0_13 = arith.constant 0 : index
    %c0_14 = arith.constant 0 : index
    %c0_15 = arith.constant 0 : index
    %46 = vector.load %arg4[%c0_13, %c0_14, %c0_15] : memref<1x64x128xbf16, #tpu.memory_space<vmem>>, vector<1x64x128xbf16>
    %47 = vector.shape_cast %46 : vector<1x64x128xbf16> to vector<64x128xbf16>
    %48 = vector.shape_cast %45 : vector<64x128xbf16> to vector<1x64x128xbf16>
    tpu.vector_store %arg4[%c0_13, %c0_14, %c0_15], %48 {strides = array<i32>} : memref<1x64x128xbf16, #tpu.memory_space<vmem>>, vector<1x64x128xbf16>,
    return
  }
  func.func @transform_0(%arg0: i32) -> (i32, i32, i32) {
    %c0_i32 = arith.constant 0 : i32
    %c0_i32_0 = arith.constant 0 : i32
    %c0_i32_1 = arith.constant 0 : i32
    return %arg0, %c0_i32, %c0_i32_0 : i32, i32, i32
  }
  func.func @transform_1(%arg0: i32) -> (i32, i32) {
    %c0_i32 = arith.constant 0 : i32
    %c0_i32_0 = arith.constant 0 : i32
    %c0_i32_1 = arith.constant 0 : i32
    return %c0_i32, %c0_i32_0 : i32, i32
  }
  func.func @transform_2(%arg0: i32) -> (i32, i32) {
    %c0_i32 = arith.constant 0 : i32
    %c0_i32_0 = arith.constant 0 : i32
    %c0_i32_1 = arith.constant 0 : i32
    return %c0_i32, %c0_i32_0 : i32, i32
  }
  func.func @transform_3(%arg0: i32) -> (i32, i32, i32) {
    %c0_i32 = arith.constant 0 : i32
    %c0_i32_0 = arith.constant 0 : i32
    %c0_i32_1 = arith.constant 0 : i32
    return %arg0, %c0_i32, %c0_i32_0 : i32, i32, i32
  }
}

module attributes {stable_mosaic.version = 11 : i64} {
  func.func @_matmul_bias_kernel(%arg0: i32, %arg1: memref<1x4096x128xbf16, #tpu.memory_space<vmem>>, %arg2: memref<8x4096xbf16, #tpu.memory_space<vmem>>, %arg3: memref<8x1xf32, #tpu.memory_space<vmem>>, %arg4: memref<1x8x128xf32, #tpu.memory_space<vmem>>) attributes {dimension_semantics = [#tpu.dimension_semantics<parallel>], iteration_bounds = array<i64: 2>, scalar_prefetch = 0 : i64, scratch_operands = 0 : i64, tpu.core_type = #tpu.core_type<tc>, window_params = [{transform_indices = @transform_0, window_bounds = array<i64: 1, 4096, 128>}, {pipeline_mode = #tpu.pipeline_mode<synchronous>, transform_indices = @transform_1, window_bounds = array<i64: 8, 4096>}, {pipeline_mode = #tpu.pipeline_mode<synchronous>, transform_indices = @transform_2, window_bounds = array<i64: 8, 1>}, {transform_indices = @transform_3, window_bounds = array<i64: 1, 8, 128>}]} {
    %c0 = arith.constant 0 : index
    %c0_0 = arith.constant 0 : index
    %0 = vector.load %arg2[%c0, %c0_0] : memref<8x4096xbf16, #tpu.memory_space<vmem>>, vector<8x4096xbf16>
    %c0_1 = arith.constant 0 : index
    %c0_2 = arith.constant 0 : index
    %c0_3 = arith.constant 0 : index
    %1 = vector.load %arg1[%c0_1, %c0_2, %c0_3] : memref<1x4096x128xbf16, #tpu.memory_space<vmem>>, vector<1x4096x128xbf16>
    %2 = vector.shape_cast %1 : vector<1x4096x128xbf16> to vector<4096x128xbf16>
    %cst = arith.constant dense<0.000000e+00> : vector<8x128xf32>
    %3 = tpu.matmul %0, %2, %cst {dimension_numbers = #tpu.dot_dimension_numbers<[1], [0], [0], [1], [0, 0, 1, 1], [], []>} : vector<8x4096xbf16>, vector<4096x128xbf16>, vector<8x128xf32> -> vector<8x128xf32>
    %c0_4 = arith.constant 0 : index
    %c0_5 = arith.constant 0 : index
    %4 = vector.load %arg3[%c0_4, %c0_5] : memref<8x1xf32, #tpu.memory_space<vmem>>, vector<8x1xf32>
    %5 = vector.broadcast %4 : vector<8x1xf32> to vector<8x128xf32>
    %6 = arith.addf %3, %5 : vector<8x128xf32>
    %c0_6 = arith.constant 0 : index
    %c0_7 = arith.constant 0 : index
    %c0_8 = arith.constant 0 : index
    %7 = vector.load %arg4[%c0_6, %c0_7, %c0_8] : memref<1x8x128xf32, #tpu.memory_space<vmem>>, vector<1x8x128xf32>
    %8 = vector.shape_cast %7 : vector<1x8x128xf32> to vector<8x128xf32>
    %9 = vector.shape_cast %6 : vector<8x128xf32> to vector<1x8x128xf32>
    tpu.vector_store %arg4[%c0_6, %c0_7, %c0_8], %9 {strides = array<i32>} : memref<1x8x128xf32, #tpu.memory_space<vmem>>, vector<1x8x128xf32>,
    return
  }
  func.func @transform_0(%arg0: i32) -> (i32, i32, i32) {
    %c0_i32 = arith.constant 0 : i32
    %c0_i32_0 = arith.constant 0 : i32
    %c0_i32_1 = arith.constant 0 : i32
    return %arg0, %c0_i32, %c0_i32_0 : i32, i32, i32
  }
  func.func @transform_1(%arg0: i32) -> (i32, i32) {
    %c0_i32 = arith.constant 0 : i32
    %c0_i32_0 = arith.constant 0 : i32
    %c0_i32_1 = arith.constant 0 : i32
    return %c0_i32, %c0_i32_0 : i32, i32
  }
  func.func @transform_2(%arg0: i32) -> (i32, i32) {
    %c0_i32 = arith.constant 0 : i32
    %c0_i32_0 = arith.constant 0 : i32
    %c0_i32_1 = arith.constant 0 : i32
    return %c0_i32, %c0_i32_0 : i32, i32
  }
  func.func @transform_3(%arg0: i32) -> (i32, i32, i32) {
    %c0_i32 = arith.constant 0 : i32
    %c0_i32_0 = arith.constant 0 : i32
    %c0_i32_1 = arith.constant 0 : i32
    return %arg0, %c0_i32, %c0_i32_0 : i32, i32, i32
  }
}

</mosaic_0001>

<bundles_post_ra>
// kernel: _lambda_.5
= control target key start
LH: loop header
LB: loop body
LE: loop exit
PB: predicated region body
PF: predicated region fallthrough
CT: control target
= control target key end

     0   :  { %s4073_s9 = smov 0   ;;  %s5418_s0 = inlined_call_operand.vmem [shape: bf16[2,128,4096], index: 0, kind: input, shape index: {}]   ;;  %s5419_s1 = inlined_call_operand.vmem [shape: bf16[16,128], index: 1, kind: input, shape index: {}]   ;;  %s5420_s2 = inlined_call_operand.vmem [shape: bf16[2,16,4096], index: 2, kind: output, shape index: {}]  }
   0x1 LB: > { %s2739_s10 = sadd.s32 4294967295, %s4056_s9   ;;  %p2743_p0 = scmp.ge.s32.totalorder %s4056_s9, 1  ;;  %s4056_s9 = sphi %s4073_s9, %s12_s9  }
   0x2   : > { %p112_p1 = scmp.lt.s32.totalorder %s4056_s9, 3 }
   0x4   : > { %p113_p2 = pnand %p2743_p0, %p112_p1 }
   0x6   : > { %116 = sbr.rel (%p113_p2) target bundleno = 630 (0x276), region = 28 }
   0xb   : > { %p134_p3 = scmp.lt.s32.totalorder %s2739_s10, 1 }
   0xd   : > { %s5526_s10 = smov (!%p134_p3, %s2739_s10), 1 }
   0xe   : > { %s3778_s11 = sshll.u32 %s5526_s10, 11  ;;  %s3779_s19 = sshll.u32 %s5526_s10, 8 }
   0xf   : > { %s4087_s14 = scalar_lea.vmem %s5418_s0, %s3778_s11  ;;  %s5153_s22 = scalar_lea.vmem %s5420_s2, %s3779_s19 }
  0x10   : > { %v3650_v0 = vld [vmem:[%s4087_s14 + $0x700] sm:$0xf]  ;;  %v4005_v2 = vld [vmem:[%s4087_s14 + $0x704] sm:$0xf]  ;;  %v3658_v5 = vld [vmem:[%s4087_s14 + $0x708] sm:$0xf] }
  0x11   : > { %v4021_v1 = vld [vmem:[%s4087_s14 + $0x77c] sm:$0xf0]  ;;  %v3652_v4 = vld [vmem:[%s4087_s14 + $0x780] sm:$0xf0]  ;;  %v4022_v6 = vld [vmem:[%s4087_s14 + $0x784] sm:$0xf0] }
  0x12   : > { %v3651_v3 = vor.u32 %v4021_v1, %v3650_v0  ;;  %v3655_v7 = vor.u32 %v4005_v2, %v3652_v4  ;;  %v3659_v8 = vor.u32 %v4022_v6, %v3658_v5  ;;  %v4006_v9 = vld [vmem:[%s4087_s14 + $0x70c] sm:$0xf]  ;;  %v3522_v11 = vld [vmem:[%s4087_s14 + $0x600] sm:$0xf]  ;;  %v3973_v14 = vld [vmem:[%s4087_s14 + $0x604] sm:$0xf] }
  0x13   : > { %v3660_v10 = vld [vmem:[%s4087_s14 + $0x788] sm:$0xf0]  ;;  %v3989_v13 = vld [vmem:[%s4087_s14 + $0x67c] sm:$0xf0]  ;;  %v3524_v15 = vld [vmem:[%s4087_s14 + $0x680] sm:$0xf0] }
  0x14   : > { %1688 = vmatpush.bf16.msra.mxu0 %v3651_v3  ;;  %v3663_v12 = vor.u32 %v4006_v9, %v3660_v10  ;;  %1702 = vmatpush.bf16.msra.mxu1 %v3655_v7  ;;  %v3523_v16 = vor.u32 %v3989_v13, %v3522_v11  ;;  %v3527_v17 = vor.u32 %v3973_v14, %v3524_v15  ;;  %v3530_v18 = vld [vmem:[%s4087_s14 + $0x608] sm:$0xf]  ;;  %v3974_v20 = vld [vmem:[%s4087_s14 + $0x60c] sm:$0xf]  ;;  %v3394_v23 = vld [vmem:[%s4087_s14 + $0x500] sm:$0xf] }
  0x15   : > { %1716 = vmatpush.bf16.msra.mxu2 %v3659_v8  ;;  %v3990_v19 = vld [vmem:[%s4087_s14 + $0x684] sm:$0xf0]  ;;  %v3532_v22 = vld [vmem:[%s4087_s14 + $0x688] sm:$0xf0]  ;;  %v3957_v24 = vld [vmem:[%s4087_s14 + $0x57c] sm:$0xf0] }
  0x16   : > { %1730 = vmatpush.bf16.msra.mxu3 %v3663_v12  ;;  %v3531_v21 = vor.u32 %v3990_v19, %v3530_v18  ;;  %v3535_v25 = vor.u32 %v3974_v20, %v3532_v22  ;;  %v3941_v26 = vld [vmem:[%s4087_s14 + $0x504] sm:$0xf]  ;;  %v3402_v28 = vld [vmem:[%s4087_s14 + $0x508] sm:$0xf]  ;;  %v3395_v29 = vor.u32 %v3957_v24, %v3394_v23  ;;  %v3942_v31 = vld [vmem:[%s4087_s14 + $0x50c] sm:$0xf] }
  0x17   : > { %v3396_v27 = vld [vmem:[%s4087_s14 + $0x580] sm:$0xf0]  ;;  %v3958_v30 = vld [vmem:[%s4087_s14 + $0x584] sm:$0xf0]  ;;  %v3404_v32 = vld [vmem:[%s4087_s14 + $0x588] sm:$0xf0] }
  0x18   : > { %1689 = vmatpush.bf16.msra.mxu0 %v3523_v16  ;;  %1703 = vmatpush.bf16.msra.mxu1 %v3527_v17  ;;  %v3399_v33 = vor.u32 %v3941_v26, %v3396_v27  ;;  %v3403_v34 = vor.u32 %v3958_v30, %v3402_v28  ;;  %v3266_v35 = vld [vmem:[%s4087_s14 + $0x400] sm:$0xf]  ;;  %v3909_v37 = vld [vmem:[%s4087_s14 + $0x404] sm:$0xf]  ;;  %v3407_v38 = vor.u32 %v3942_v31, %v3404_v32  ;;  %v3274_v40 = vld [vmem:[%s4087_s14 + $0x408] sm:$0xf] }
  0x19   : > { %1717 = vmatpush.bf16.msra.mxu2 %v3531_v21  ;;  %v3925_v36 = vld [vmem:[%s4087_s14 + $0x47c] sm:$0xf0]  ;;  %v3268_v39 = vld [vmem:[%s4087_s14 + $0x480] sm:$0xf0]  ;;  %v3926_v41 = vld [vmem:[%s4087_s14 + $0x484] sm:$0xf0] }
  0x1a   : > { %1731 = vmatpush.bf16.msra.mxu3 %v3535_v25  ;;  %v3910_v42 = vld [vmem:[%s4087_s14 + $0x40c] sm:$0xf]  ;;  %v3267_v44 = vor.u32 %v3925_v36, %v3266_v35  ;;  %v3271_v45 = vor.u32 %v3909_v37, %v3268_v39  ;;  %v3275_v46 = vor.u32 %v3926_v41, %v3274_v40  ;;  %v3138_v47 = vld [vmem:[%s4087_s14 + $0x300] sm:$0xf]  ;;  %v3877_v49 = vld [vmem:[%s4087_s14 + $0x304] sm:$0xf] }
  0x1b   : > { %v3276_v43 = vld [vmem:[%s4087_s14 + $0x488] sm:$0xf0]  ;;  %v3893_v48 = vld [vmem:[%s4087_s14 + $0x37c] sm:$0xf0]  ;;  %v3140_v51 = vld [vmem:[%s4087_s14 + $0x380] sm:$0xf0] }
  0x1c   : > { %1690 = vmatpush.bf16.msra.mxu0 %v3395_v29  ;;  %1704 = vmatpush.bf16.msra.mxu1 %v3399_v33  ;;  %v3279_v50 = vor.u32 %v3910_v42, %v3276_v43  ;;  %v3146_v52 = vld [vmem:[%s4087_s14 + $0x308] sm:$0xf]  ;;  %v3878_v54 = vld [vmem:[%s4087_s14 + $0x30c] sm:$0xf]  ;;  %v3139_v56 = vor.u32 %v3893_v48, %v3138_v47  ;;  %v3143_v57 = vor.u32 %v3877_v49, %v3140_v51  ;;  %v3010_v59 = vld [vmem:[%s4087_s14 + $0x200] sm:$0xf] }
  0x1d   : > { %1718 = vmatpush.bf16.msra.mxu2 %v3403_v34  ;;  %v3894_v53 = vld [vmem:[%s4087_s14 + $0x384] sm:$0xf0]  ;;  %v3148_v55 = vld [vmem:[%s4087_s14 + $0x388] sm:$0xf0]  ;;  %v3861_v60 = vld [vmem:[%s4087_s14 + $0x27c] sm:$0xf0] }
  0x1e   : > { %1732 = vmatpush.bf16.msra.mxu3 %v3407_v38  ;;  %v3147_v58 = vor.u32 %v3894_v53, %v3146_v52  ;;  %v3845_v61 = vld [vmem:[%s4087_s14 + $0x204] sm:$0xf]  ;;  %v3151_v62 = vor.u32 %v3878_v54, %v3148_v55  ;;  %v3018_v0 = vld [vmem:[%s4087_s14 + $0x208] sm:$0xf]  ;;  %v3846_v2 = vld [vmem:[%s4087_s14 + $0x20c] sm:$0xf]  ;;  %v3011_v4 = vor.u32 %v3861_v60, %v3010_v59 }
  0x1f   : > { %v3012_v63 = vld [vmem:[%s4087_s14 + $0x280] sm:$0xf0]  ;;  %v3862_v1 = vld [vmem:[%s4087_s14 + $0x284] sm:$0xf0]  ;;  %v3020_v3 = vld [vmem:[%s4087_s14 + $0x288] sm:$0xf0] }
  0x20   : > { %1691 = vmatpush.bf16.msra.mxu0 %v3267_v44  ;;  %1705 = vmatpush.bf16.msra.mxu1 %v3271_v45  ;;  %v3015_v5 = vor.u32 %v3845_v61, %v3012_v63  ;;  %v3019_v6 = vor.u32 %v3862_v1, %v3018_v0  ;;  %v2882_v7 = vld [vmem:[%s4087_s14 + $0x100] sm:$0xf]  ;;  %v3813_v9 = vld [vmem:[%s4087_s14 + $0x104] sm:$0xf]  ;;  %v3023_v10 = vor.u32 %v3846_v2, %v3020_v3  ;;  %v2890_v12 = vld [vmem:[%s4087_s14 + $0x108] sm:$0xf] }
  0x21   : > { %1719 = vmatpush.bf16.msra.mxu2 %v3275_v46  ;;  %v3829_v8 = vld [vmem:[%s4087_s14 + $0x17c] sm:$0xf0]  ;;  %v2884_v11 = vld [vmem:[%s4087_s14 + $0x180] sm:$0xf0]  ;;  %v3830_v13 = vld [vmem:[%s4087_s14 + $0x184] sm:$0xf0] }
  0x22   : > { %1733 = vmatpush.bf16.msra.mxu3 %v3279_v50  ;;  %v3814_v14 = vld [vmem:[%s4087_s14 + $0x10c] sm:$0xf]  ;;  %v2883_v16 = vor.u32 %v3829_v8, %v2882_v7  ;;  %v2754_v17 = vld [vmem:[%s4087_s14] sm:$0xf]  ;;  %v2887_v19 = vor.u32 %v3813_v9, %v2884_v11  ;;  %v2891_v20 = vor.u32 %v3830_v13, %v2890_v12  ;;  %v3781_v21 = vld [vmem:[%s4087_s14 + $0x4] sm:$0xf] }
  0x23   : > { %v2892_v15 = vld [vmem:[%s4087_s14 + $0x188] sm:$0xf0]  ;;  %v3797_v18 = vld [vmem:[%s4087_s14 + $0x7c] sm:$0xf0]  ;;  %v2756_v22 = vld [vmem:[%s4087_s14 + $0x80] sm:$0xf0] }
  0x24   : > { %1692 = vmatpush.bf16.msra.mxu0 %v3139_v56  ;;  %1706 = vmatpush.bf16.msra.mxu1 %v3143_v57  ;;  %v2762_v23 = vld [vmem:[%s4087_s14 + $0x8] sm:$0xf]  ;;  %v2895_v24 = vor.u32 %v3814_v14, %v2892_v15  ;;  %v3782_v26 = vld [vmem:[%s4087_s14 + $0xc] sm:$0xf]  ;;  %v3666_v28 = vld [vmem:[%s4087_s14 + $0x710] sm:$0xf]  ;;  %v2755_v31 = vor.u32 %v3797_v18, %v2754_v17  ;;  %v2759_v35 = vor.u32 %v3781_v21, %v2756_v22 }
  0x25   : > { %1720 = vmatpush.bf16.msra.mxu2 %v3147_v58  ;;  %v3798_v25 = vld [vmem:[%s4087_s14 + $0x84] sm:$0xf0]  ;;  %v2764_v27 = vld [vmem:[%s4087_s14 + $0x88] sm:$0xf0]  ;;  %v4023_v29 = vld [vmem:[%s4087_s14 + $0x78c] sm:$0xf0] }
  0x26   : > { %1734 = vmatpush.bf16.msra.mxu3 %v3151_v62  ;;  %v4007_v30 = vld [vmem:[%s4087_s14 + $0x714] sm:$0xf]  ;;  %v3674_v33 = vld [vmem:[%s4087_s14 + $0x718] sm:$0xf]  ;;  %v2763_v36 = vor.u32 %v3798_v25, %v2762_v23  ;;  %v4008_v37 = vld [vmem:[%s4087_s14 + $0x71c] sm:$0xf]  ;;  %v2767_v39 = vor.u32 %v3782_v26, %v2764_v27  ;;  %v3667_v40 = vor.u32 %v4023_v29, %v3666_v28 }
  0x27   : > { %v3668_v32 = vld [vmem:[%s4087_s14 + $0x790] sm:$0xf0]  ;;  %v4024_v34 = vld [vmem:[%s4087_s14 + $0x794] sm:$0xf0]  ;;  %v3676_v38 = vld [vmem:[%s4087_s14 + $0x798] sm:$0xf0] }
  0x28   : > { %1693 = vmatpush.bf16.msra.mxu0 %v3011_v4  ;;  %1707 = vmatpush.bf16.msra.mxu1 %v3015_v5  ;;  %v3671_v41 = vor.u32 %v4007_v30, %v3668_v32  ;;  %v3675_v42 = vor.u32 %v4024_v34, %v3674_v33  ;;  %v3538_v43 = vld [vmem:[%s4087_s14 + $0x610] sm:$0xf]  ;;  %v3975_v45 = vld [vmem:[%s4087_s14 + $0x614] sm:$0xf]  ;;  %v3679_v46 = vor.u32 %v4008_v37, %v3676_v38  ;;  %v3546_v48 = vld [vmem:[%s4087_s14 + $0x618] sm:$0xf] }
  0x29   : > { %1721 = vmatpush.bf16.msra.mxu2 %v3019_v6  ;;  %v3991_v44 = vld [vmem:[%s4087_s14 + $0x68c] sm:$0xf0]  ;;  %v3540_v47 = vld [vmem:[%s4087_s14 + $0x690] sm:$0xf0]  ;;  %v3992_v49 = vld [vmem:[%s4087_s14 + $0x694] sm:$0xf0] }
  0x2a   : > { %1735 = vmatpush.bf16.msra.mxu3 %v3023_v10  ;;  %v3976_v50 = vld [vmem:[%s4087_s14 + $0x61c] sm:$0xf]  ;;  %v4172_v52 = vld [vmem:[%s5419_s1] sm:$0xff]  ;;  %v3539_v53 = vor.u32 %v3991_v44, %v3538_v43  ;;  %v3543_v54 = vor.u32 %v3975_v45, %v3540_v47  ;;  %v3547_v55 = vor.u32 %v3992_v49, %v3546_v48  ;;  %v3410_v56 = vld [vmem:[%s4087_s14 + $0x510] sm:$0xf] }
  0x2b   : > { %v3548_v51 = vld [vmem:[%s4087_s14 + $0x698] sm:$0xf0]  ;;  %v3959_v57 = vld [vmem:[%s4087_s14 + $0x58c] sm:$0xf0]  ;;  %v3943_v58 = vld [vmem:[%s4087_s14 + $0x514] sm:$0xf] }
  0x2c   : > { %1694 = vmatpush.bf16.msra.mxu0 %v2883_v16  ;;  %1708 = vmatpush.bf16.msra.mxu1 %v2887_v19  ;;  %v3551_v59 = vor.u32 %v3976_v50, %v3548_v51  ;;  %v3412_v60 = vld [vmem:[%s4087_s14 + $0x590] sm:$0xf0]  ;;  %v3418_v61 = vld [vmem:[%s4087_s14 + $0x518] sm:$0xf]  ;;  %v3944_v63 = vld [vmem:[%s4087_s14 + $0x51c] sm:$0xf]  ;;  %v3411_v1 = vor.u32 %v3959_v57, %v3410_v56 }
  0x2d   : > { %1722 = vmatpush.bf16.msra.mxu2 %v2891_v20  ;;  %v3960_v62 = vld [vmem:[%s4087_s14 + $0x594] sm:$0xf0]  ;;  %v3420_v0 = vld [vmem:[%s4087_s14 + $0x598] sm:$0xf0]  ;;  %v3415_v2 = vor.u32 %v3943_v58, %v3412_v60  ;;  %v3282_v4 = vld [vmem:[%s4087_s14 + $0x410] sm:$0xf] }
  0x2e   : > { %1736 = vmatpush.bf16.msra.mxu3 %v2895_v24  ;;  %v3419_v3 = vor.u32 %v3960_v62, %v3418_v61  ;;  %v3927_v5 = vld [vmem:[%s4087_s14 + $0x48c] sm:$0xf0]  ;;  %v3911_v6 = vld [vmem:[%s4087_s14 + $0x414] sm:$0xf]  ;;  %v3423_v7 = vor.u32 %v3944_v63, %v3420_v0  ;;  %v3290_v9 = vld [vmem:[%s4087_s14 + $0x418] sm:$0xf] }
  0x2f   : > { %v3284_v8 = vld [vmem:[%s4087_s14 + $0x490] sm:$0xf0]  ;;  %v3928_v10 = vld [vmem:[%s4087_s14 + $0x494] sm:$0xf0]  ;;  %v3912_v11 = vld [vmem:[%s4087_s14 + $0x41c] sm:$0xf]  ;;  %v3283_v13 = vor.u32 %v3927_v5, %v3282_v4 }
  0x30   : > { %1695 = vmatpush.bf16.msra.mxu0 %v2755_v31  ;;  %1709 = vmatpush.bf16.msra.mxu1 %v2759_v35  ;;  %v3292_v12 = vld [vmem:[%s4087_s14 + $0x498] sm:$0xf0]  ;;  %v3287_v14 = vor.u32 %v3911_v6, %v3284_v8  ;;  %v3291_v15 = vor.u32 %v3928_v10, %v3290_v9  ;;  %v3154_v16 = vld [vmem:[%s4087_s14 + $0x310] sm:$0xf]  ;;  %v3879_v18 = vld [vmem:[%s4087_s14 + $0x314] sm:$0xf] }
  0x31   : > { %1723 = vmatpush.bf16.msra.mxu2 %v2763_v36  ;;  %v3895_v17 = vld [vmem:[%s4087_s14 + $0x38c] sm:$0xf0]  ;;  %v3295_v19 = vor.u32 %v3912_v11, %v3292_v12  ;;  %v3156_v20 = vld [vmem:[%s4087_s14 + $0x390] sm:$0xf0]  ;;  %v3162_v21 = vld [vmem:[%s4087_s14 + $0x318] sm:$0xf] }
  0x32   : > { %1737 = vmatpush.bf16.msra.mxu3 %v2767_v39  ;;  %v3896_v22 = vld [vmem:[%s4087_s14 + $0x394] sm:$0xf0]  ;;  %v3880_v23 = vld [vmem:[%s4087_s14 + $0x31c] sm:$0xf]  ;;  %v3155_v25 = vor.u32 %v3895_v17, %v3154_v16  ;;  %v3159_v26 = vor.u32 %v3879_v18, %v3156_v20  ;;  %v3026_v28 = vld [vmem:[%s4087_s14 + $0x210] sm:$0xf] }
  0x33   : > { %1696 = vmatmul.bf16.vlgmr.msra.gmra.mxu0 %v4172_v52  ;;  %1710 = vmatmul.bf16.vlgmr.msra.gmra.mxu1 %v4172_v52  ;;  %v3164_v24 = vld [vmem:[%s4087_s14 + $0x398] sm:$0xf0]  ;;  %v3163_v27 = vor.u32 %v3896_v22, %v3162_v21  ;;  %v3863_v29 = vld [vmem:[%s4087_s14 + $0x28c] sm:$0xf0]  ;;  %v3847_v30 = vld [vmem:[%s4087_s14 + $0x214] sm:$0xf] }
  0x34   : > { %1744 = vmatpush.bf16.msrb.mxu0 %v3667_v40  ;;  %1758 = vmatpush.bf16.msrb.mxu1 %v3671_v41  ;;  %v3167_v31 = vor.u32 %v3880_v23, %v3164_v24  ;;  %v3028_v32 = vld [vmem:[%s4087_s14 + $0x290] sm:$0xf0]  ;;  %v3034_v33 = vld [vmem:[%s4087_s14 + $0x218] sm:$0xf]  ;;  %v3848_v35 = vld [vmem:[%s4087_s14 + $0x21c] sm:$0xf]  ;;  %v3027_v37 = vor.u32 %v3863_v29, %v3026_v28 }
  0x35   : > { %1772 = vmatpush.bf16.msrb.mxu2 %v3675_v42  ;;  %1738 = vmatmul.bf16.vlgmr.msra.gmra.mxu3 %v4172_v52  ;;  %v3864_v34 = vld [vmem:[%s4087_s14 + $0x294] sm:$0xf0]  ;;  %v3036_v36 = vld [vmem:[%s4087_s14 + $0x298] sm:$0xf0]  ;;  %v3031_v38 = vor.u32 %v3847_v30, %v3028_v32  ;;  %v2898_v40 = vld [vmem:[%s4087_s14 + $0x110] sm:$0xf] }
  0x36   : > { %1786 = vmatpush.bf16.msrb.mxu3 %v3679_v46  ;;  %1724 = vmatmul.bf16.vlgmr.msra.gmra.mxu2 %v4172_v52  ;;  %v3035_v39 = vor.u32 %v3864_v34, %v3034_v33  ;;  %v3831_v41 = vld [vmem:[%s4087_s14 + $0x18c] sm:$0xf0]  ;;  %v3815_v42 = vld [vmem:[%s4087_s14 + $0x114] sm:$0xf]  ;;  %v3039_v43 = vor.u32 %v3848_v35, %v3036_v36  ;;  %v2906_v45 = vld [vmem:[%s4087_s14 + $0x118] sm:$0xf] }
  0x37   : > { %v2900_v44 = vld [vmem:[%s4087_s14 + $0x190] sm:$0xf0]  ;;  %v3832_v46 = vld [vmem:[%s4087_s14 + $0x194] sm:$0xf0]  ;;  %v3816_v47 = vld [vmem:[%s4087_s14 + $0x11c] sm:$0xf]  ;;  %v2899_v49 = vor.u32 %v3831_v41, %v2898_v40 }
  0x38   : > { %1745 = vmatpush.bf16.msrb.mxu0 %v3539_v53  ;;  %1759 = vmatpush.bf16.msrb.mxu1 %v3543_v54  ;;  %v2908_v48 = vld [vmem:[%s4087_s14 + $0x198] sm:$0xf0]  ;;  %v2770_v50 = vld [vmem:[%s4087_s14 + $0x10] sm:$0xf]  ;;  %v2903_v53 = vor.u32 %v3815_v42, %v2900_v44  ;;  %v2907_v54 = vor.u32 %v3832_v46, %v2906_v45  ;;  %v2772_v56 = vld [vmem:[%s4087_s14 + $0x90] sm:$0xf0] }
  0x39   : > { %1773 = vmatpush.bf16.msrb.mxu2 %v3547_v55  ;;  %v3799_v51 = vld [vmem:[%s4087_s14 + $0x8c] sm:$0xf0]  ;;  %v3783_v55 = vld [vmem:[%s4087_s14 + $0x14] sm:$0xf]  ;;  %v2778_v57 = vld [vmem:[%s4087_s14 + $0x18] sm:$0xf]  ;;  %v2911_v58 = vor.u32 %v3816_v47, %v2908_v48 }
  0x3a   : > { %1787 = vmatpush.bf16.msrb.mxu3 %v3551_v59  ;;  %v3800_v59 = vld [vmem:[%s4087_s14 + $0x94] sm:$0xf0]  ;;  %v3784_v60 = vld [vmem:[%s4087_s14 + $0x1c] sm:$0xf]  ;;  %v3682_v62 = vld [vmem:[%s4087_s14 + $0x720] sm:$0xf]  ;;  %v2775_v5 = vor.u32 %v3783_v55, %v2772_v56 }
  0x3b   : > { %v2780_v61 = vld [vmem:[%s4087_s14 + $0x98] sm:$0xf0]  ;;  %v4025_v63 = vld [vmem:[%s4087_s14 + $0x79c] sm:$0xf0]  ;;  %v4009_v0 = vld [vmem:[%s4087_s14 + $0x724] sm:$0xf]  ;;  %v2779_v6 = vor.u32 %v3800_v59, %v2778_v57 }
  0x3c   : > { %1746 = vmatpush.bf16.msrb.mxu0 %v3411_v1  ;;  %1760 = vmatpush.bf16.msrb.mxu1 %v3415_v2  ;;  %v2771_v1 = vor.u32 %v3799_v51, %v2770_v50  ;;  %v3684_v2 = vld [vmem:[%s4087_s14 + $0x7a0] sm:$0xf0]  ;;  %v4026_v4 = vld [vmem:[%s4087_s14 + $0x7a4] sm:$0xf0]  ;;  %v3692_v8 = vld [vmem:[%s4087_s14 + $0x7a8] sm:$0xf0]  ;;  %v2783_v9 = vor.u32 %v3784_v60, %v2780_v61  ;;  %v3683_v10 = vor.u32 %v4025_v63, %v3682_v62 }
  0x3d   : > { %1774 = vmatpush.bf16.msrb.mxu2 %v3419_v3  ;;  %v3690_v3 = vld [vmem:[%s4087_s14 + $0x728] sm:$0xf]  ;;  %v3687_v11 = vor.u32 %v4009_v0, %v3684_v2  ;;  %v3556_v17 = vld [vmem:[%s4087_s14 + $0x6a0] sm:$0xf0]  ;;  %v3978_v20 = vld [vmem:[%s4087_s14 + $0x62c] sm:$0xf] }
  0x3e   : > { %1788 = vmatpush.bf16.msrb.mxu3 %v3423_v7  ;;  %v4010_v7 = vld [vmem:[%s4087_s14 + $0x72c] sm:$0xf]  ;;  %v3691_v12 = vor.u32 %v4026_v4, %v3690_v3  ;;  %v3562_v18 = vld [vmem:[%s4087_s14 + $0x628] sm:$0xf]  ;;  %v3428_v29 = vld [vmem:[%s4087_s14 + $0x5a0] sm:$0xf0] }
  0x3f   : > { %v3695_v16 = vor.u32 %v4010_v7, %v3692_v8  ;;  %v3564_v21 = vld [vmem:[%s4087_s14 + $0x6a8] sm:$0xf0]  ;;  %v3434_v30 = vld [vmem:[%s4087_s14 + $0x528] sm:$0xf]  ;;  %v3300_v41 = vld [vmem:[%s4087_s14 + $0x4a0] sm:$0xf0] }
  0x40   : > { %1747 = vmatpush.bf16.msrb.mxu0 %v3283_v13  ;;  %1761 = vmatpush.bf16.msrb.mxu1 %v3287_v14  ;;  %v3554_v13 = vld [vmem:[%s4087_s14 + $0x620] sm:$0xf]  ;;  %v3567_v28 = vor.u32 %v3978_v20, %v3564_v21  ;;  %v3946_v32 = vld [vmem:[%s4087_s14 + $0x52c] sm:$0xf]  ;;  %v3306_v42 = vld [vmem:[%s4087_s14 + $0x428] sm:$0xf] }
  0x41   : > { %1775 = vmatpush.bf16.msrb.mxu2 %v3291_v15  ;;  %v3993_v14 = vld [vmem:[%s4087_s14 + $0x69c] sm:$0xf0]  ;;  %v3977_v15 = vld [vmem:[%s4087_s14 + $0x624] sm:$0xf]  ;;  %v3436_v33 = vld [vmem:[%s4087_s14 + $0x5a8] sm:$0xf0] }
  0x42   : > { %1789 = vmatpush.bf16.msrb.mxu3 %v3295_v19  ;;  %v3994_v19 = vld [vmem:[%s4087_s14 + $0x6a4] sm:$0xf0]  ;;  %v3555_v22 = vor.u32 %v3993_v14, %v3554_v13  ;;  %v3559_v23 = vor.u32 %v3977_v15, %v3556_v17  ;;  %v3439_v40 = vor.u32 %v3946_v32, %v3436_v33  ;;  %v3914_v44 = vld [vmem:[%s4087_s14 + $0x42c] sm:$0xf]  ;;  %v3897_v50 = vld [vmem:[%s4087_s14 + $0x39c] sm:$0xf0] }
  0x43   : > { %v3563_v24 = vor.u32 %v3994_v19, %v3562_v18  ;;  %v3308_v45 = vld [vmem:[%s4087_s14 + $0x4a8] sm:$0xf0]  ;;  %v3881_v51 = vld [vmem:[%s4087_s14 + $0x324] sm:$0xf]  ;;  %v3178_v55 = vld [vmem:[%s4087_s14 + $0x328] sm:$0xf] }
  0x44   : > { %1748 = vmatpush.bf16.msrb.mxu0 %v3155_v25  ;;  %1762 = vmatpush.bf16.msrb.mxu1 %v3159_v26  ;;  %v3426_v25 = vld [vmem:[%s4087_s14 + $0x520] sm:$0xf]  ;;  %v3898_v56 = vld [vmem:[%s4087_s14 + $0x3a4] sm:$0xf0]  ;;  %v3882_v57 = vld [vmem:[%s4087_s14 + $0x32c] sm:$0xf] }
  0x45   : > { %1776 = vmatpush.bf16.msrb.mxu2 %v3163_v27  ;;  %v3961_v26 = vld [vmem:[%s4087_s14 + $0x59c] sm:$0xf0]  ;;  %v3945_v27 = vld [vmem:[%s4087_s14 + $0x524] sm:$0xf]  ;;  %v3179_v61 = vor.u32 %v3898_v56, %v3178_v55  ;;  %v3050_v3 = vld [vmem:[%s4087_s14 + $0x228] sm:$0xf] }
  0x46   : > { %1790 = vmatpush.bf16.msrb.mxu3 %v3167_v31  ;;  %v3962_v31 = vld [vmem:[%s4087_s14 + $0x5a4] sm:$0xf0]  ;;  %v3427_v34 = vor.u32 %v3961_v26, %v3426_v25  ;;  %v3431_v35 = vor.u32 %v3945_v27, %v3428_v29  ;;  %v3042_v62 = vld [vmem:[%s4087_s14 + $0x220] sm:$0xf]  ;;  %v3849_v0 = vld [vmem:[%s4087_s14 + $0x224] sm:$0xf] }
  0x47   : > { %v3435_v36 = vor.u32 %v3962_v31, %v3434_v30  ;;  %v3865_v63 = vld [vmem:[%s4087_s14 + $0x29c] sm:$0xf0]  ;;  %v3044_v2 = vld [vmem:[%s4087_s14 + $0x2a0] sm:$0xf0]  ;;  %v3866_v4 = vld [vmem:[%s4087_s14 + $0x2a4] sm:$0xf0] }
  0x48   : > { %1749 = vmatpush.bf16.msrb.mxu0 %v3027_v37  ;;  %1763 = vmatpush.bf16.msrb.mxu1 %v3031_v38  ;;  %v3298_v37 = vld [vmem:[%s4087_s14 + $0x420] sm:$0xf]  ;;  %v3043_v7 = vor.u32 %v3865_v63, %v3042_v62  ;;  %v3047_v8 = vor.u32 %v3849_v0, %v3044_v2  ;;  %v2916_v14 = vld [vmem:[%s4087_s14 + $0x1a0] sm:$0xf0]  ;;  %v2922_v15 = vld [vmem:[%s4087_s14 + $0x128] sm:$0xf] }
  0x49   : > { %1777 = vmatpush.bf16.msrb.mxu2 %v3035_v39  ;;  %v3929_v38 = vld [vmem:[%s4087_s14 + $0x49c] sm:$0xf0]  ;;  %v3913_v39 = vld [vmem:[%s4087_s14 + $0x424] sm:$0xf]  ;;  %v3818_v17 = vld [vmem:[%s4087_s14 + $0x12c] sm:$0xf] }
  0x4a   : > { %1791 = vmatpush.bf16.msrb.mxu3 %v3039_v43  ;;  %v3930_v43 = vld [vmem:[%s4087_s14 + $0x4a4] sm:$0xf0]  ;;  %v3299_v46 = vor.u32 %v3929_v38, %v3298_v37  ;;  %v3303_v47 = vor.u32 %v3913_v39, %v3300_v41  ;;  %v2924_v18 = vld [vmem:[%s4087_s14 + $0x1a8] sm:$0xf0]  ;;  %v2786_v20 = vld [vmem:[%s4087_s14 + $0x20] sm:$0xf] }
  0x4b   : > { %v3307_v48 = vor.u32 %v3930_v43, %v3306_v42  ;;  %v3801_v21 = vld [vmem:[%s4087_s14 + $0x9c] sm:$0xf0]  ;;  %v2788_v25 = vld [vmem:[%s4087_s14 + $0xa0] sm:$0xf0]  ;;  %v2794_v26 = vld [vmem:[%s4087_s14 + $0x28] sm:$0xf]  ;;  %v2927_v27 = vor.u32 %v3818_v17, %v2924_v18 }
  0x4c   : > { %1750 = vmatpush.bf16.msrb.mxu0 %v2899_v49  ;;  %1764 = vmatpush.bf16.msrb.mxu1 %v2903_v53  ;;  %v3170_v49 = vld [vmem:[%s4087_s14 + $0x320] sm:$0xf]  ;;  %v3311_v53 = vor.u32 %v3914_v44, %v3308_v45  ;;  %v3786_v29 = vld [vmem:[%s4087_s14 + $0x2c] sm:$0xf]  ;;  %v3698_v31 = vld [vmem:[%s4087_s14 + $0x730] sm:$0xf] }
  0x4d   : > { %1778 = vmatpush.bf16.msrb.mxu2 %v2907_v54  ;;  %v3172_v54 = vld [vmem:[%s4087_s14 + $0x3a0] sm:$0xf0]  ;;  %v3171_v59 = vor.u32 %v3897_v50, %v3170_v49  ;;  %v2796_v30 = vld [vmem:[%s4087_s14 + $0xa8] sm:$0xf0]  ;;  %v4027_v32 = vld [vmem:[%s4087_s14 + $0x7ac] sm:$0xf0] }
  0x4e   : > { %1792 = vmatpush.bf16.msrb.mxu3 %v2911_v58  ;;  %v3180_v58 = vld [vmem:[%s4087_s14 + $0x3a8] sm:$0xf0]  ;;  %v3175_v60 = vor.u32 %v3881_v51, %v3172_v54  ;;  %v4011_v33 = vld [vmem:[%s4087_s14 + $0x734] sm:$0xf]  ;;  %v4028_v37 = vld [vmem:[%s4087_s14 + $0x7b4] sm:$0xf0]  ;;  %v2799_v42 = vor.u32 %v3786_v29, %v2796_v30  ;;  %v3699_v43 = vor.u32 %v4027_v32, %v3698_v31 }
  0x4f   : > { %v3708_v41 = vld [vmem:[%s4087_s14 + $0x7b8] sm:$0xf0]  ;;  %v3572_v50 = vld [vmem:[%s4087_s14 + $0x6b0] sm:$0xf0]  ;;  %v3578_v51 = vld [vmem:[%s4087_s14 + $0x638] sm:$0xf] }
  0x50   : > { %1751 = vmatpush.bf16.msrb.mxu0 %v2771_v1  ;;  %1765 = vmatpush.bf16.msrb.mxu1 %v2775_v5  ;;  %v3183_v1 = vor.u32 %v3882_v57, %v3180_v58  ;;  %v3850_v5 = vld [vmem:[%s4087_s14 + $0x22c] sm:$0xf]  ;;  %v3980_v54 = vld [vmem:[%s4087_s14 + $0x63c] sm:$0xf]  ;;  %v3444_v63 = vld [vmem:[%s4087_s14 + $0x5b0] sm:$0xf0] }
  0x51   : > { %1779 = vmatpush.bf16.msrb.mxu2 %v2779_v6  ;;  %v3052_v6 = vld [vmem:[%s4087_s14 + $0x2a8] sm:$0xf0]  ;;  %v3580_v55 = vld [vmem:[%s4087_s14 + $0x6b8] sm:$0xf0]  ;;  %v3450_v0 = vld [vmem:[%s4087_s14 + $0x538] sm:$0xf] }
  0x52   : > { %1793 = vmatpush.bf16.msrb.mxu3 %v2783_v9  ;;  %v3051_v9 = vor.u32 %v3866_v4, %v3050_v3  ;;  %v3055_v13 = vor.u32 %v3850_v5, %v3052_v6  ;;  %v3583_v62 = vor.u32 %v3980_v54, %v3580_v55  ;;  %v3948_v2 = vld [vmem:[%s4087_s14 + $0x53c] sm:$0xf]  ;;  %v3058_v31 = vld [vmem:[%s4087_s14 + $0x230] sm:$0xf] }
  0x53   : > { %1752 = vmatmul.bf16.vlgmr.msrb.gmra.mxu0 %v4172_v52  ;;  %1766 = vmatmul.bf16.vlgmr.msrb.gmra.mxu1 %v4172_v52  ;;  %v3452_v3 = vld [vmem:[%s4087_s14 + $0x5b8] sm:$0xf0]  ;;  %v3867_v32 = vld [vmem:[%s4087_s14 + $0x2ac] sm:$0xf0] }
  0x54   : > { %1800 = vmatpush.bf16.msra.mxu0 %v3683_v10  ;;  %1814 = vmatpush.bf16.msra.mxu1 %v3687_v11  ;;  %v2914_v10 = vld [vmem:[%s4087_s14 + $0x120] sm:$0xf]  ;;  %v2802_v54 = vld [vmem:[%s4087_s14 + $0x30] sm:$0xf] }
  0x55   : > { %1828 = vmatpush.bf16.msra.mxu2 %v3691_v12  ;;  %1794 = vmatmul.bf16.vlgmr.msrb.gmra.mxu3 %v4172_v52  ;;  %v3833_v11 = vld [vmem:[%s4087_s14 + $0x19c] sm:$0xf0]  ;;  %v3817_v12 = vld [vmem:[%s4087_s14 + $0x124] sm:$0xf]  ;;  %v3803_v55 = vld [vmem:[%s4087_s14 + $0xac] sm:$0xf0] }
  0x56   : > { %1842 = vmatpush.bf16.msra.mxu3 %v3695_v16  ;;  %1780 = vmatmul.bf16.vlgmr.msrb.gmra.mxu2 %v4172_v52  ;;  %v3834_v16 = vld [vmem:[%s4087_s14 + $0x1a4] sm:$0xf0]  ;;  %v2915_v19 = vor.u32 %v3833_v11, %v2914_v10  ;;  %v3455_v10 = vor.u32 %v3948_v2, %v3452_v3  ;;  %v3316_v11 = vld [vmem:[%s4087_s14 + $0x4b0] sm:$0xf0]  ;;  %v4029_v2 = vld [vmem:[%s4087_s14 + $0x7bc] sm:$0xf0] }
  0x57   : > { %v4013_v3 = vld [vmem:[%s4087_s14 + $0x744] sm:$0xf] }
  0x58   : > { %1801 = vmatpush.bf16.msra.mxu0 %v3555_v22  ;;  %1815 = vmatpush.bf16.msra.mxu1 %v3559_v23  ;;  %v2919_v22 = vor.u32 %v3817_v12, %v2916_v14  ;;  %v2923_v23 = vor.u32 %v3834_v16, %v2922_v15  ;;  %v3322_v12 = vld [vmem:[%s4087_s14 + $0x438] sm:$0xf]  ;;  %v3916_v14 = vld [vmem:[%s4087_s14 + $0x43c] sm:$0xf] }
  0x59   : > { %1829 = vmatpush.bf16.msra.mxu2 %v3563_v24  ;;  %v3785_v24 = vld [vmem:[%s4087_s14 + $0x24] sm:$0xf]  ;;  %v3324_v15 = vld [vmem:[%s4087_s14 + $0x4b8] sm:$0xf0] }
  0x5a   : > { %1843 = vmatpush.bf16.msra.mxu3 %v3567_v28  ;;  %v3802_v28 = vld [vmem:[%s4087_s14 + $0xa4] sm:$0xf0]  ;;  %v2791_v38 = vor.u32 %v3785_v24, %v2788_v25  ;;  %v3194_v24 = vld [vmem:[%s4087_s14 + $0x338] sm:$0xf] }
  0x5b   : > { %v2795_v39 = vor.u32 %v3802_v28, %v2794_v26  ;;  %v3900_v25 = vld [vmem:[%s4087_s14 + $0x3b4] sm:$0xf0]  ;;  %v3884_v26 = vld [vmem:[%s4087_s14 + $0x33c] sm:$0xf] }
  0x5c   : > { %1802 = vmatpush.bf16.msra.mxu0 %v3427_v34  ;;  %1816 = vmatpush.bf16.msra.mxu1 %v3431_v35  ;;  %v2787_v34 = vor.u32 %v3801_v21, %v2786_v20  ;;  %v3700_v35 = vld [vmem:[%s4087_s14 + $0x7b0] sm:$0xf0]  ;;  %v3899_v20 = vld [vmem:[%s4087_s14 + $0x3ac] sm:$0xf0]  ;;  %v3195_v30 = vor.u32 %v3900_v25, %v3194_v24  ;;  %v3596_v24 = vld [vmem:[%s4087_s14 + $0x6c8] sm:$0xf0] }
  0x5d   : > { %1830 = vmatpush.bf16.msra.mxu2 %v3435_v36  ;;  %v3706_v36 = vld [vmem:[%s4087_s14 + $0x738] sm:$0xf]  ;;  %v3703_v44 = vor.u32 %v4011_v33, %v3700_v35  ;;  %v3883_v21 = vld [vmem:[%s4087_s14 + $0x334] sm:$0xf] }
  0x5e   : > { %1844 = vmatpush.bf16.msra.mxu3 %v3439_v40  ;;  %v4012_v40 = vld [vmem:[%s4087_s14 + $0x73c] sm:$0xf]  ;;  %v3707_v45 = vor.u32 %v4028_v37, %v3706_v36  ;;  %v3851_v33 = vld [vmem:[%s4087_s14 + $0x234] sm:$0xf]  ;;  %v3066_v36 = vld [vmem:[%s4087_s14 + $0x238] sm:$0xf] }
  0x5f   : > { %v3711_v49 = vor.u32 %v4012_v40, %v3708_v41  ;;  %v3060_v35 = vld [vmem:[%s4087_s14 + $0x2b0] sm:$0xf0]  ;;  %v3868_v37 = vld [vmem:[%s4087_s14 + $0x2b4] sm:$0xf0]  ;;  %v3059_v40 = vor.u32 %v3867_v32, %v3058_v31  ;;  %v3460_v32 = vld [vmem:[%s4087_s14 + $0x5c0] sm:$0xf0] }
  0x60   : > { %1803 = vmatpush.bf16.msra.mxu0 %v3299_v46  ;;  %1817 = vmatpush.bf16.msra.mxu1 %v3303_v47  ;;  %v3570_v46 = vld [vmem:[%s4087_s14 + $0x630] sm:$0xf]  ;;  %v3063_v41 = vor.u32 %v3851_v33, %v3060_v35  ;;  %v3466_v33 = vld [vmem:[%s4087_s14 + $0x548] sm:$0xf]  ;;  %v3950_v35 = vld [vmem:[%s4087_s14 + $0x54c] sm:$0xf] }
  0x61   : > { %1831 = vmatpush.bf16.msra.mxu2 %v3307_v48  ;;  %v3995_v47 = vld [vmem:[%s4087_s14 + $0x6ac] sm:$0xf0]  ;;  %v3979_v48 = vld [vmem:[%s4087_s14 + $0x634] sm:$0xf] }
  0x62   : > { %1845 = vmatpush.bf16.msra.mxu3 %v3311_v53  ;;  %v3996_v53 = vld [vmem:[%s4087_s14 + $0x6b4] sm:$0xf0]  ;;  %v3571_v56 = vor.u32 %v3995_v47, %v3570_v46  ;;  %v3575_v57 = vor.u32 %v3979_v48, %v3572_v50  ;;  %v2932_v47 = vld [vmem:[%s4087_s14 + $0x1b0] sm:$0xf0]  ;;  %v3820_v50 = vld [vmem:[%s4087_s14 + $0x13c] sm:$0xf] }
  0x63   : > { %v3579_v58 = vor.u32 %v3996_v53, %v3578_v51  ;;  %v2938_v48 = vld [vmem:[%s4087_s14 + $0x138] sm:$0xf]  ;;  %v2940_v51 = vld [vmem:[%s4087_s14 + $0x1b8] sm:$0xf0] }
  0x64   : > { %1804 = vmatpush.bf16.msra.mxu0 %v3171_v59  ;;  %1818 = vmatpush.bf16.msra.mxu1 %v3175_v60  ;;  %v3442_v59 = vld [vmem:[%s4087_s14 + $0x530] sm:$0xf] }
  0x65   : > { %1832 = vmatpush.bf16.msra.mxu2 %v3179_v61  ;;  %v3963_v60 = vld [vmem:[%s4087_s14 + $0x5ac] sm:$0xf0]  ;;  %v3947_v61 = vld [vmem:[%s4087_s14 + $0x534] sm:$0xf] }
  0x66   : > { %1846 = vmatpush.bf16.msra.mxu3 %v3183_v1  ;;  %v3964_v1 = vld [vmem:[%s4087_s14 + $0x5b4] sm:$0xf0]  ;;  %v3443_v4 = vor.u32 %v3963_v60, %v3442_v59  ;;  %v3447_v5 = vor.u32 %v3947_v61, %v3444_v63  ;;  %v2804_v59 = vld [vmem:[%s4087_s14 + $0xb0] sm:$0xf0]  ;;  %v2943_v61 = vor.u32 %v3820_v50, %v2940_v51  ;;  %v3788_v63 = vld [vmem:[%s4087_s14 + $0x3c] sm:$0xf] }
  0x67   : > { %v3451_v6 = vor.u32 %v3964_v1, %v3450_v0  ;;  %v2810_v60 = vld [vmem:[%s4087_s14 + $0x38] sm:$0xf]  ;;  %v2812_v0 = vld [vmem:[%s4087_s14 + $0xb8] sm:$0xf0]  ;;  %v3714_v1 = vld [vmem:[%s4087_s14 + $0x740] sm:$0xf] }
  0x68   : > { %1805 = vmatpush.bf16.msra.mxu0 %v3043_v7  ;;  %1819 = vmatpush.bf16.msra.mxu1 %v3047_v8  ;;  %v3314_v7 = vld [vmem:[%s4087_s14 + $0x430] sm:$0xf]  ;;  %v3202_v51 = vld [vmem:[%s4087_s14 + $0x340] sm:$0xf] }
  0x69   : > { %1833 = vmatpush.bf16.msra.mxu2 %v3051_v9  ;;  %v3931_v8 = vld [vmem:[%s4087_s14 + $0x4ac] sm:$0xf0]  ;;  %v3915_v9 = vld [vmem:[%s4087_s14 + $0x434] sm:$0xf] }
  0x6a   : > { %1847 = vmatpush.bf16.msra.mxu3 %v3055_v13  ;;  %v3932_v13 = vld [vmem:[%s4087_s14 + $0x4b4] sm:$0xf0]  ;;  %v3315_v16 = vor.u32 %v3931_v8, %v3314_v7  ;;  %v3319_v17 = vor.u32 %v3915_v9, %v3316_v11  ;;  %v4030_v7 = vld [vmem:[%s4087_s14 + $0x7c4] sm:$0xf0]  ;;  %v3724_v11 = vld [vmem:[%s4087_s14 + $0x7c8] sm:$0xf0] }
  0x6b   : > { %v3323_v18 = vor.u32 %v3932_v13, %v3322_v12  ;;  %v2815_v12 = vor.u32 %v3788_v63, %v2812_v0  ;;  %v3715_v13 = vor.u32 %v4029_v2, %v3714_v1  ;;  %v3074_v0 = vld [vmem:[%s4087_s14 + $0x240] sm:$0xf]  ;;  %v3853_v2 = vld [vmem:[%s4087_s14 + $0x244] sm:$0xf] }
  0x6c   : > { %1806 = vmatpush.bf16.msra.mxu0 %v2915_v19  ;;  %1820 = vmatpush.bf16.msra.mxu1 %v2919_v22  ;;  %v3186_v19 = vld [vmem:[%s4087_s14 + $0x330] sm:$0xf]  ;;  %v3327_v22 = vor.u32 %v3916_v14, %v3324_v15  ;;  %v3869_v1 = vld [vmem:[%s4087_s14 + $0x2bc] sm:$0xf0] }
  0x6d   : > { %1834 = vmatpush.bf16.msra.mxu2 %v2923_v23  ;;  %v3188_v23 = vld [vmem:[%s4087_s14 + $0x3b0] sm:$0xf0]  ;;  %v3187_v28 = vor.u32 %v3899_v20, %v3186_v19  ;;  %v3588_v20 = vld [vmem:[%s4087_s14 + $0x6c0] sm:$0xf0] }
  0x6e   : > { %1848 = vmatpush.bf16.msra.mxu3 %v2927_v27  ;;  %v3196_v27 = vld [vmem:[%s4087_s14 + $0x3b8] sm:$0xf0]  ;;  %v3191_v29 = vor.u32 %v3883_v21, %v3188_v23  ;;  %v3594_v21 = vld [vmem:[%s4087_s14 + $0x648] sm:$0xf]  ;;  %v3982_v23 = vld [vmem:[%s4087_s14 + $0x64c] sm:$0xf] }
  0x6f   : > { %v3599_v31 = vor.u32 %v3982_v23, %v3596_v24  ;;  %v3805_v23 = vld [vmem:[%s4087_s14 + $0xbc] sm:$0xf0] }
  0x70   : > { %1807 = vmatpush.bf16.msra.mxu0 %v2787_v34  ;;  %1821 = vmatpush.bf16.msra.mxu1 %v2791_v38  ;;  %v3199_v34 = vor.u32 %v3884_v26, %v3196_v27  ;;  %v3852_v38 = vld [vmem:[%s4087_s14 + $0x23c] sm:$0xf] }
  0x71   : > { %1835 = vmatpush.bf16.msra.mxu2 %v2795_v39  ;;  %v3068_v39 = vld [vmem:[%s4087_s14 + $0x2b8] sm:$0xf0] }
  0x72   : > { %1849 = vmatpush.bf16.msra.mxu3 %v2799_v42  ;;  %v3067_v42 = vor.u32 %v3868_v37, %v3066_v36  ;;  %v3071_v46 = vor.u32 %v3852_v38, %v3068_v39  ;;  %v3468_v36 = vld [vmem:[%s4087_s14 + $0x5c8] sm:$0xf0] }
  0x73   : > { %1808 = vmatmul.bf16.vlgmr.msra.gmra.mxu0 %v4172_v52  ;;  %1822 = vmatmul.bf16.vlgmr.msra.gmra.mxu1 %v4172_v52 }
  0x74   : > { %1856 = vmatpush.bf16.msrb.mxu0 %v3699_v43  ;;  %1870 = vmatpush.bf16.msrb.mxu1 %v3703_v44  ;;  %v2930_v43 = vld [vmem:[%s4087_s14 + $0x130] sm:$0xf] }
  0x75   : > { %1884 = vmatpush.bf16.msrb.mxu2 %v3707_v45  ;;  %1850 = vmatmul.bf16.vlgmr.msra.gmra.mxu3 %v4172_v52  ;;  %v3835_v44 = vld [vmem:[%s4087_s14 + $0x1ac] sm:$0xf0]  ;;  %v3819_v45 = vld [vmem:[%s4087_s14 + $0x134] sm:$0xf] }
  0x76   : > { %1898 = vmatpush.bf16.msrb.mxu3 %v3711_v49  ;;  %1836 = vmatmul.bf16.vlgmr.msra.gmra.mxu2 %v4172_v52  ;;  %v3836_v49 = vld [vmem:[%s4087_s14 + $0x1b4] sm:$0xf0]  ;;  %v2931_v53 = vor.u32 %v3835_v44, %v2930_v43  ;;  %v3471_v43 = vor.u32 %v3950_v35, %v3468_v36  ;;  %v3332_v44 = vld [vmem:[%s4087_s14 + $0x4c0] sm:$0xf0]  ;;  %v4015_v35 = vld [vmem:[%s4087_s14 + $0x754] sm:$0xf] }
  0x78   : > { %1857 = vmatpush.bf16.msrb.mxu0 %v3571_v56  ;;  %1871 = vmatpush.bf16.msrb.mxu1 %v3575_v57  ;;  %v2935_v56 = vor.u32 %v3819_v45, %v2932_v47  ;;  %v2939_v57 = vor.u32 %v3836_v49, %v2938_v48  ;;  %v3338_v45 = vld [vmem:[%s4087_s14 + $0x448] sm:$0xf]  ;;  %v3340_v47 = vld [vmem:[%s4087_s14 + $0x4c8] sm:$0xf0] }
  0x79   : > { %1885 = vmatpush.bf16.msrb.mxu2 %v3579_v58  ;;  %v3787_v58 = vld [vmem:[%s4087_s14 + $0x34] sm:$0xf] }
  0x7a   : > { %1899 = vmatpush.bf16.msrb.mxu3 %v3583_v62  ;;  %v3804_v62 = vld [vmem:[%s4087_s14 + $0xb4] sm:$0xf0]  ;;  %v2807_v8 = vor.u32 %v3787_v58, %v2804_v59  ;;  %v3902_v58 = vld [vmem:[%s4087_s14 + $0x3c4] sm:$0xf0]  ;;  %v3886_v59 = vld [vmem:[%s4087_s14 + $0x34c] sm:$0xf] }
  0x7b   : > { %v2811_v9 = vor.u32 %v3804_v62, %v2810_v60  ;;  %v3212_v60 = vld [vmem:[%s4087_s14 + $0x3c8] sm:$0xf0] }
  0x7c   : > { %1858 = vmatpush.bf16.msrb.mxu0 %v3443_v4  ;;  %1872 = vmatpush.bf16.msrb.mxu1 %v3447_v5  ;;  %v2803_v4 = vor.u32 %v3803_v55, %v2802_v54  ;;  %v3716_v5 = vld [vmem:[%s4087_s14 + $0x7c0] sm:$0xf0] }
  0x7d   : > { %1886 = vmatpush.bf16.msrb.mxu2 %v3451_v6  ;;  %v3722_v6 = vld [vmem:[%s4087_s14 + $0x748] sm:$0xf]  ;;  %v3719_v14 = vor.u32 %v4013_v3, %v3716_v5  ;;  %v3885_v54 = vld [vmem:[%s4087_s14 + $0x344] sm:$0xf]  ;;  %v3215_v3 = vor.u32 %v3886_v59, %v3212_v60  ;;  %v3474_v60 = vld [vmem:[%s4087_s14 + $0x550] sm:$0xf] }
  0x7e   : > { %1900 = vmatpush.bf16.msrb.mxu3 %v3455_v10  ;;  %v4014_v10 = vld [vmem:[%s4087_s14 + $0x74c] sm:$0xf]  ;;  %v3723_v15 = vor.u32 %v4030_v7, %v3722_v6  ;;  %v3082_v5 = vld [vmem:[%s4087_s14 + $0x248] sm:$0xf] }
  0x7f   : > { %v3727_v19 = vor.u32 %v4014_v10, %v3724_v11  ;;  %v3870_v6 = vld [vmem:[%s4087_s14 + $0x2c4] sm:$0xf0]  ;;  %v3854_v7 = vld [vmem:[%s4087_s14 + $0x24c] sm:$0xf] }
  0x80   : > { %1859 = vmatpush.bf16.msrb.mxu0 %v3315_v16  ;;  %1873 = vmatpush.bf16.msrb.mxu1 %v3319_v17  ;;  %v3586_v16 = vld [vmem:[%s4087_s14 + $0x640] sm:$0xf]  ;;  %v3083_v11 = vor.u32 %v3870_v6, %v3082_v5  ;;  %v3484_v5 = vld [vmem:[%s4087_s14 + $0x5d8] sm:$0xf0] }
  0x81   : > { %1887 = vmatpush.bf16.msrb.mxu2 %v3323_v18  ;;  %v3997_v17 = vld [vmem:[%s4087_s14 + $0x6bc] sm:$0xf0]  ;;  %v3981_v18 = vld [vmem:[%s4087_s14 + $0x644] sm:$0xf] }
  0x82   : > { %1901 = vmatpush.bf16.msrb.mxu3 %v3327_v22  ;;  %v3998_v22 = vld [vmem:[%s4087_s14 + $0x6c4] sm:$0xf0]  ;;  %v3587_v25 = vor.u32 %v3997_v17, %v3586_v16  ;;  %v3591_v26 = vor.u32 %v3981_v18, %v3588_v20  ;;  %v2948_v16 = vld [vmem:[%s4087_s14 + $0x1c0] sm:$0xf0]  ;;  %v2956_v20 = vld [vmem:[%s4087_s14 + $0x1c8] sm:$0xf0] }
  0x83   : > { %v3595_v27 = vor.u32 %v3998_v22, %v3594_v21  ;;  %v2954_v17 = vld [vmem:[%s4087_s14 + $0x148] sm:$0xf]  ;;  %v2818_v22 = vld [vmem:[%s4087_s14 + $0x40] sm:$0xf] }
  0x84   : > { %1860 = vmatpush.bf16.msrb.mxu0 %v3187_v28  ;;  %1874 = vmatpush.bf16.msrb.mxu1 %v3191_v29  ;;  %v3458_v28 = vld [vmem:[%s4087_s14 + $0x540] sm:$0xf]  ;;  %v3838_v18 = vld [vmem:[%s4087_s14 + $0x1c4] sm:$0xf0]  ;;  %v2819_v36 = vor.u32 %v3805_v23, %v2818_v22  ;;  %v3903_v22 = vld [vmem:[%s4087_s14 + $0x3cc] sm:$0xf0] }
  0x85   : > { %1888 = vmatpush.bf16.msrb.mxu2 %v3195_v30  ;;  %v3965_v29 = vld [vmem:[%s4087_s14 + $0x5bc] sm:$0xf0]  ;;  %v3949_v30 = vld [vmem:[%s4087_s14 + $0x544] sm:$0xf]  ;;  %v3887_v23 = vld [vmem:[%s4087_s14 + $0x354] sm:$0xf] }
  0x86   : > { %1902 = vmatpush.bf16.msrb.mxu3 %v3199_v34  ;;  %v3966_v34 = vld [vmem:[%s4087_s14 + $0x5c4] sm:$0xf0]  ;;  %v3459_v37 = vor.u32 %v3965_v29, %v3458_v28  ;;  %v3463_v38 = vor.u32 %v3949_v30, %v3460_v32  ;;  %v2828_v32 = vld [vmem:[%s4087_s14 + $0xc8] sm:$0xf0] }
  0x87   : > { %v3467_v39 = vor.u32 %v3966_v34, %v3466_v33  ;;  %v2826_v28 = vld [vmem:[%s4087_s14 + $0x48] sm:$0xf]  ;;  %v3730_v33 = vld [vmem:[%s4087_s14 + $0x750] sm:$0xf] }
  0x88   : > { %1861 = vmatpush.bf16.msrb.mxu0 %v3059_v40  ;;  %1875 = vmatpush.bf16.msrb.mxu1 %v3063_v41  ;;  %v3330_v40 = vld [vmem:[%s4087_s14 + $0x440] sm:$0xf]  ;;  %v3806_v30 = vld [vmem:[%s4087_s14 + $0xc4] sm:$0xf0]  ;;  %v4031_v34 = vld [vmem:[%s4087_s14 + $0x7cc] sm:$0xf0] }
  0x89   : > { %1889 = vmatpush.bf16.msrb.mxu2 %v3067_v42  ;;  %v3933_v41 = vld [vmem:[%s4087_s14 + $0x4bc] sm:$0xf0]  ;;  %v3917_v42 = vld [vmem:[%s4087_s14 + $0x444] sm:$0xf] }
  0x8a   : > { %1903 = vmatpush.bf16.msrb.mxu3 %v3071_v46  ;;  %v3918_v46 = vld [vmem:[%s4087_s14 + $0x44c] sm:$0xf]  ;;  %v3331_v48 = vor.u32 %v3933_v41, %v3330_v40  ;;  %v3335_v49 = vor.u32 %v3917_v42, %v3332_v44  ;;  %v2827_v41 = vor.u32 %v3806_v30, %v2826_v28  ;;  %v4016_v42 = vld [vmem:[%s4087_s14 + $0x75c] sm:$0xf] }
  0x8b   : > { %v3343_v55 = vor.u32 %v3918_v46, %v3340_v47  ;;  %v3602_v47 = vld [vmem:[%s4087_s14 + $0x650] sm:$0xf]  ;;  %v3888_v28 = vld [vmem:[%s4087_s14 + $0x35c] sm:$0xf] }
  0x8c   : > { %1862 = vmatpush.bf16.msrb.mxu0 %v2931_v53  ;;  %1876 = vmatpush.bf16.msrb.mxu1 %v2935_v56  ;;  %v3901_v53 = vld [vmem:[%s4087_s14 + $0x3bc] sm:$0xf0]  ;;  %v3204_v56 = vld [vmem:[%s4087_s14 + $0x3c0] sm:$0xf0] }
  0x8d   : > { %1890 = vmatpush.bf16.msrb.mxu2 %v2939_v57  ;;  %v3210_v57 = vld [vmem:[%s4087_s14 + $0x348] sm:$0xf]  ;;  %v3207_v62 = vor.u32 %v3885_v54, %v3204_v56  ;;  %v4000_v54 = vld [vmem:[%s4087_s14 + $0x6d4] sm:$0xf0]  ;;  %v3612_v56 = vld [vmem:[%s4087_s14 + $0x6d8] sm:$0xf0] }
  0x8e   : > { %1904 = vmatpush.bf16.msrb.mxu3 %v2943_v61  ;;  %v3203_v61 = vor.u32 %v3901_v53, %v3202_v51  ;;  %v3211_v63 = vor.u32 %v3902_v58, %v3210_v57  ;;  %v3604_v51 = vld [vmem:[%s4087_s14 + $0x6d0] sm:$0xf0]  ;;  %v3610_v53 = vld [vmem:[%s4087_s14 + $0x658] sm:$0xf] }
  0x8f   : > { %v3611_v59 = vor.u32 %v4000_v54, %v3610_v53  ;;  %v2972_v53 = vld [vmem:[%s4087_s14 + $0x1d8] sm:$0xf0] }
  0x90   : > { %1863 = vmatpush.bf16.msrb.mxu0 %v2803_v4  ;;  %1877 = vmatpush.bf16.msrb.mxu1 %v2807_v8  ;;  %v3076_v4 = vld [vmem:[%s4087_s14 + $0x2c0] sm:$0xf0]  ;;  %v3084_v8 = vld [vmem:[%s4087_s14 + $0x2c8] sm:$0xf0] }
  0x91   : > { %1891 = vmatpush.bf16.msrb.mxu2 %v2811_v9  ;;  %v3075_v9 = vor.u32 %v3869_v1, %v3074_v0  ;;  %v3079_v10 = vor.u32 %v3853_v2, %v3076_v4  ;;  %v3476_v1 = vld [vmem:[%s4087_s14 + $0x5d0] sm:$0xf0]  ;;  %v3482_v2 = vld [vmem:[%s4087_s14 + $0x558] sm:$0xf]  ;;  %v3952_v4 = vld [vmem:[%s4087_s14 + $0x55c] sm:$0xf] }
  0x92   : > { %1905 = vmatpush.bf16.msrb.mxu3 %v2815_v12  ;;  %v2946_v12 = vld [vmem:[%s4087_s14 + $0x140] sm:$0xf] }
  0x93   : > { %1864 = vmatmul.bf16.vlgmr.msrb.gmra.mxu0 %v4172_v52  ;;  %1878 = vmatmul.bf16.vlgmr.msrb.gmra.mxu1 %v4172_v52 }
  0x94   : > { %1912 = vmatpush.bf16.msra.mxu0 %v3715_v13  ;;  %1926 = vmatpush.bf16.msra.mxu1 %v3719_v14  ;;  %v3837_v13 = vld [vmem:[%s4087_s14 + $0x1bc] sm:$0xf0]  ;;  %v3821_v14 = vld [vmem:[%s4087_s14 + $0x144] sm:$0xf] }
  0x95   : > { %1940 = vmatpush.bf16.msra.mxu2 %v3723_v15  ;;  %1906 = vmatmul.bf16.vlgmr.msrb.gmra.mxu3 %v4172_v52  ;;  %v3087_v15 = vor.u32 %v3854_v7, %v3084_v8  ;;  %v2947_v21 = vor.u32 %v3837_v13, %v2946_v12  ;;  %v2951_v24 = vor.u32 %v3821_v14, %v2948_v16  ;;  %v3348_v13 = vld [vmem:[%s4087_s14 + $0x4d0] sm:$0xf0]  ;;  %v3354_v14 = vld [vmem:[%s4087_s14 + $0x458] sm:$0xf]  ;;  %v3920_v16 = vld [vmem:[%s4087_s14 + $0x45c] sm:$0xf] }
  0x96   : > { %1954 = vmatpush.bf16.msra.mxu3 %v3727_v19  ;;  %1892 = vmatmul.bf16.vlgmr.msrb.gmra.mxu2 %v4172_v52  ;;  %v3934_v52 = vld [vmem:[%s4087_s14 + $0x4c4] sm:$0xf0]  ;;  %v3822_v19 = vld [vmem:[%s4087_s14 + $0x14c] sm:$0xf]  ;;  %v3487_v12 = vor.u32 %v3952_v4, %v3484_v5  ;;  %v4033_v4 = vld [vmem:[%s4087_s14 + $0x7dc] sm:$0xf0] }
  0x97   : > { %v3339_v50 = vor.u32 %v3934_v52, %v3338_v45  ;;  %v2959_v29 = vor.u32 %v3822_v19, %v2956_v20  ;;  %v3731_v45 = vor.u32 %v4031_v34, %v3730_v33  ;;  %v3090_v33 = vld [vmem:[%s4087_s14 + $0x250] sm:$0xf]  ;;  %v4017_v5 = vld [vmem:[%s4087_s14 + $0x764] sm:$0xf] }
  0x98   : > { %1913 = vmatpush.bf16.msra.mxu0 %v3587_v25  ;;  %1927 = vmatpush.bf16.msra.mxu1 %v3591_v26  ;;  %v2955_v25 = vor.u32 %v3838_v18, %v2954_v17  ;;  %v3789_v26 = vld [vmem:[%s4087_s14 + $0x44] sm:$0xf]  ;;  %v3356_v17 = vld [vmem:[%s4087_s14 + $0x4d8] sm:$0xf0]  ;;  %v3871_v34 = vld [vmem:[%s4087_s14 + $0x2cc] sm:$0xf0] }
  0x99   : > { %1941 = vmatpush.bf16.msra.mxu2 %v3595_v27  ;;  %v2820_v27 = vld [vmem:[%s4087_s14 + $0xc0] sm:$0xf0] }
  0x9a   : > { %1955 = vmatpush.bf16.msra.mxu3 %v3599_v31  ;;  %v3790_v31 = vld [vmem:[%s4087_s14 + $0x4c] sm:$0xf]  ;;  %v2823_v40 = vor.u32 %v3789_v26, %v2820_v27  ;;  %v3226_v26 = vld [vmem:[%s4087_s14 + $0x358] sm:$0xf] }
  0x9b   : > { %v2831_v44 = vor.u32 %v3790_v31, %v2828_v32  ;;  %v3904_v27 = vld [vmem:[%s4087_s14 + $0x3d4] sm:$0xf0] }
  0x9c   : > { %1914 = vmatpush.bf16.msra.mxu0 %v3459_v37  ;;  %1928 = vmatpush.bf16.msra.mxu1 %v3463_v38  ;;  %v3732_v37 = vld [vmem:[%s4087_s14 + $0x7d0] sm:$0xf0]  ;;  %v3738_v38 = vld [vmem:[%s4087_s14 + $0x758] sm:$0xf]  ;;  %v3227_v32 = vor.u32 %v3904_v27, %v3226_v26  ;;  %v3628_v26 = vld [vmem:[%s4087_s14 + $0x6e8] sm:$0xf0] }
  0x9d   : > { %1942 = vmatpush.bf16.msra.mxu2 %v3467_v39  ;;  %v4032_v39 = vld [vmem:[%s4087_s14 + $0x7d4] sm:$0xf0]  ;;  %v3735_v52 = vor.u32 %v4015_v35, %v3732_v37  ;;  %v3855_v35 = vld [vmem:[%s4087_s14 + $0x254] sm:$0xf] }
  0x9e   : > { %1956 = vmatpush.bf16.msra.mxu3 %v3471_v43  ;;  %v3740_v43 = vld [vmem:[%s4087_s14 + $0x7d8] sm:$0xf0]  ;;  %v3739_v46 = vor.u32 %v4032_v39, %v3738_v38  ;;  %v3092_v37 = vld [vmem:[%s4087_s14 + $0x2d0] sm:$0xf0]  ;;  %v3098_v38 = vld [vmem:[%s4087_s14 + $0x258] sm:$0xf] }
  0x9f   : > { %v3872_v39 = vld [vmem:[%s4087_s14 + $0x2d4] sm:$0xf0] }
  0xa0   : > { %1915 = vmatpush.bf16.msra.mxu0 %v3331_v48  ;;  %1929 = vmatpush.bf16.msra.mxu1 %v3335_v49  ;;  %v3999_v48 = vld [vmem:[%s4087_s14 + $0x6cc] sm:$0xf0]  ;;  %v3983_v49 = vld [vmem:[%s4087_s14 + $0x654] sm:$0xf] }
  0xa1   : > { %1943 = vmatpush.bf16.msra.mxu2 %v3339_v50  ;;  %v3743_v50 = vor.u32 %v4016_v42, %v3740_v43  ;;  %v3603_v57 = vor.u32 %v3999_v48, %v3602_v47  ;;  %v3607_v58 = vor.u32 %v3983_v49, %v3604_v51  ;;  %v3091_v42 = vor.u32 %v3871_v34, %v3090_v33  ;;  %v2964_v48 = vld [vmem:[%s4087_s14 + $0x1d0] sm:$0xf0]  ;;  %v2970_v49 = vld [vmem:[%s4087_s14 + $0x158] sm:$0xf]  ;;  %v3824_v51 = vld [vmem:[%s4087_s14 + $0x15c] sm:$0xf] }
  0xa2   : > { %1957 = vmatpush.bf16.msra.mxu3 %v3343_v55  ;;  %v3984_v55 = vld [vmem:[%s4087_s14 + $0x65c] sm:$0xf]  ;;  %v3095_v43 = vor.u32 %v3855_v35, %v3092_v37  ;;  %v3492_v34 = vld [vmem:[%s4087_s14 + $0x5e0] sm:$0xf0]  ;;  %v3498_v35 = vld [vmem:[%s4087_s14 + $0x568] sm:$0xf] }
  0xa3   : > { %v3615_v0 = vor.u32 %v3984_v55, %v3612_v56  ;;  %v2834_v55 = vld [vmem:[%s4087_s14 + $0x50] sm:$0xf]  ;;  %v3954_v37 = vld [vmem:[%s4087_s14 + $0x56c] sm:$0xf] }
  0xa4   : > { %1916 = vmatpush.bf16.msra.mxu0 %v3203_v61  ;;  %1930 = vmatpush.bf16.msra.mxu1 %v3207_v62  ;;  %v3967_v61 = vld [vmem:[%s4087_s14 + $0x5cc] sm:$0xf0]  ;;  %v3951_v62 = vld [vmem:[%s4087_s14 + $0x554] sm:$0xf] }
  0xa5   : > { %1944 = vmatpush.bf16.msra.mxu2 %v3211_v63  ;;  %v4452_v63 = vld [vmem:[%s5419_s1] sm:$0xff]  ;;  %v3475_v6 = vor.u32 %v3967_v61, %v3474_v60  ;;  %v3479_v7 = vor.u32 %v3951_v62, %v3476_v1  ;;  %v3807_v56 = vld [vmem:[%s4087_s14 + $0xcc] sm:$0xf0]  ;;  %v2836_v60 = vld [vmem:[%s4087_s14 + $0xd0] sm:$0xf0]  ;;  %v2975_v62 = vor.u32 %v3824_v51, %v2972_v53 }
  0xa6   : > { %1958 = vmatpush.bf16.msra.mxu3 %v3215_v3  ;;  %v3968_v3 = vld [vmem:[%s4087_s14 + $0x5d4] sm:$0xf0]  ;;  %v3792_v1 = vld [vmem:[%s4087_s14 + $0x5c] sm:$0xf] }
  0xa7   : > { %v3483_v8 = vor.u32 %v3968_v3, %v3482_v2  ;;  %v2842_v61 = vld [vmem:[%s4087_s14 + $0x58] sm:$0xf]  ;;  %v2844_v2 = vld [vmem:[%s4087_s14 + $0xd8] sm:$0xf0]  ;;  %v3746_v3 = vld [vmem:[%s4087_s14 + $0x760] sm:$0xf] }
  0xa8   : > { %1917 = vmatpush.bf16.msra.mxu0 %v3075_v9  ;;  %1931 = vmatpush.bf16.msra.mxu1 %v3079_v10  ;;  %v3346_v9 = vld [vmem:[%s4087_s14 + $0x450] sm:$0xf] }
  0xa9   : > { %1945 = vmatpush.bf16.msra.mxu2 %v3083_v11  ;;  %v3935_v10 = vld [vmem:[%s4087_s14 + $0x4cc] sm:$0xf0]  ;;  %v3919_v11 = vld [vmem:[%s4087_s14 + $0x454] sm:$0xf] }
  0xaa   : > { %1959 = vmatpush.bf16.msra.mxu3 %v3087_v15  ;;  %v3936_v15 = vld [vmem:[%s4087_s14 + $0x4d4] sm:$0xf0]  ;;  %v3347_v18 = vor.u32 %v3935_v10, %v3346_v9  ;;  %v3351_v19 = vor.u32 %v3919_v11, %v3348_v13  ;;  %v4034_v9 = vld [vmem:[%s4087_s14 + $0x7e4] sm:$0xf0]  ;;  %v3756_v13 = vld [vmem:[%s4087_s14 + $0x7e8] sm:$0xf0] }
  0xab   : > { %v3355_v20 = vor.u32 %v3936_v15, %v3354_v14  ;;  %v2847_v14 = vor.u32 %v3792_v1, %v2844_v2  ;;  %v3747_v15 = vor.u32 %v4033_v4, %v3746_v3  ;;  %v3106_v3 = vld [vmem:[%s4087_s14 + $0x260] sm:$0xf] }
  0xac   : > { %1918 = vmatpush.bf16.msra.mxu0 %v2947_v21  ;;  %1932 = vmatpush.bf16.msra.mxu1 %v2951_v24  ;;  %v3218_v21 = vld [vmem:[%s4087_s14 + $0x350] sm:$0xf]  ;;  %v3359_v24 = vor.u32 %v3920_v16, %v3356_v17  ;;  %v3873_v4 = vld [vmem:[%s4087_s14 + $0x2dc] sm:$0xf0] }
  0xad   : > { %1946 = vmatpush.bf16.msra.mxu2 %v2955_v25  ;;  %v3220_v25 = vld [vmem:[%s4087_s14 + $0x3d0] sm:$0xf0]  ;;  %v3219_v30 = vor.u32 %v3903_v22, %v3218_v21  ;;  %v3620_v22 = vld [vmem:[%s4087_s14 + $0x6e0] sm:$0xf0] }
  0xae   : > { %1960 = vmatpush.bf16.msra.mxu3 %v2959_v29  ;;  %v3228_v29 = vld [vmem:[%s4087_s14 + $0x3d8] sm:$0xf0]  ;;  %v3223_v31 = vor.u32 %v3887_v23, %v3220_v25  ;;  %v3626_v23 = vld [vmem:[%s4087_s14 + $0x668] sm:$0xf]  ;;  %v3986_v25 = vld [vmem:[%s4087_s14 + $0x66c] sm:$0xf] }
  0xaf   : > { %v3631_v33 = vor.u32 %v3986_v25, %v3628_v26  ;;  %v2850_v25 = vld [vmem:[%s4087_s14 + $0x60] sm:$0xf] }
  0xb0   : > { %1919 = vmatpush.bf16.msra.mxu0 %v2819_v36  ;;  %1933 = vmatpush.bf16.msra.mxu1 %v2823_v40  ;;  %v3231_v36 = vor.u32 %v3888_v28, %v3228_v29  ;;  %v3856_v40 = vld [vmem:[%s4087_s14 + $0x25c] sm:$0xf]  ;;  %v3809_v26 = vld [vmem:[%s4087_s14 + $0xdc] sm:$0xf0] }
  0xb1   : > { %1947 = vmatpush.bf16.msra.mxu2 %v2827_v41  ;;  %v3100_v41 = vld [vmem:[%s4087_s14 + $0x2d8] sm:$0xf0] }
  0xb2   : > { %1961 = vmatpush.bf16.msra.mxu3 %v2831_v44  ;;  %v3099_v44 = vor.u32 %v3872_v39, %v3098_v38  ;;  %v3103_v47 = vor.u32 %v3856_v40, %v3100_v41  ;;  %v3500_v38 = vld [vmem:[%s4087_s14 + $0x5e8] sm:$0xf0] }
  0xb3   : > { %1920 = vmatmul.bf16.vlgmr.msra.gmra.mxu0 %v4452_v63  ;;  %1934 = vmatmul.bf16.vlgmr.msra.gmra.mxu1 %v4452_v63 }
  0xb4   : > { %1968 = vmatpush.bf16.msrb.mxu0 %v3731_v45  ;;  %1982 = vmatpush.bf16.msrb.mxu1 %v3735_v52  ;;  %v2962_v45 = vld [vmem:[%s4087_s14 + $0x150] sm:$0xf] }
  0xb5   : > { %1996 = vmatpush.bf16.msrb.mxu2 %v3739_v46  ;;  %1962 = vmatmul.bf16.vlgmr.msra.gmra.mxu3 %v4452_v63  ;;  %v3839_v52 = vld [vmem:[%s4087_s14 + $0x1cc] sm:$0xf0]  ;;  %v3823_v46 = vld [vmem:[%s4087_s14 + $0x154] sm:$0xf] }
  0xb6   : > { %2010 = vmatpush.bf16.msrb.mxu3 %v3743_v50  ;;  %1948 = vmatmul.bf16.vlgmr.msra.gmra.mxu2 %v4452_v63  ;;  %v3840_v50 = vld [vmem:[%s4087_s14 + $0x1d4] sm:$0xf0]  ;;  %v2963_v54 = vor.u32 %v3839_v52, %v2962_v45  ;;  %v3503_v45 = vor.u32 %v3954_v37, %v3500_v38  ;;  %v3364_v52 = vld [vmem:[%s4087_s14 + $0x4e0] sm:$0xf0]  ;;  %v4035_v37 = vld [vmem:[%s4087_s14 + $0x7ec] sm:$0xf0] }
  0xb7   : > { %v4019_v38 = vld [vmem:[%s4087_s14 + $0x774] sm:$0xf] }
  0xb8   : > { %1969 = vmatpush.bf16.msrb.mxu0 %v3603_v57  ;;  %1983 = vmatpush.bf16.msrb.mxu1 %v3607_v58  ;;  %v2967_v57 = vor.u32 %v3823_v46, %v2964_v48  ;;  %v2971_v58 = vor.u32 %v3840_v50, %v2970_v49  ;;  %v3370_v46 = vld [vmem:[%s4087_s14 + $0x468] sm:$0xf]  ;;  %v3922_v48 = vld [vmem:[%s4087_s14 + $0x46c] sm:$0xf] }
  0xb9   : > { %1997 = vmatpush.bf16.msrb.mxu2 %v3611_v59  ;;  %v3791_v59 = vld [vmem:[%s4087_s14 + $0x54] sm:$0xf]  ;;  %v3372_v49 = vld [vmem:[%s4087_s14 + $0x4e8] sm:$0xf0] }
  0xba   : > { %2011 = vmatpush.bf16.msrb.mxu3 %v3615_v0  ;;  %v3808_v0 = vld [vmem:[%s4087_s14 + $0xd4] sm:$0xf0]  ;;  %v2839_v10 = vor.u32 %v3791_v59, %v2836_v60  ;;  %v3242_v59 = vld [vmem:[%s4087_s14 + $0x368] sm:$0xf] }
  0xbb   : > { %v2843_v11 = vor.u32 %v3808_v0, %v2842_v61  ;;  %v3906_v60 = vld [vmem:[%s4087_s14 + $0x3e4] sm:$0xf0]  ;;  %v3890_v61 = vld [vmem:[%s4087_s14 + $0x36c] sm:$0xf] }
  0xbc   : > { %1970 = vmatpush.bf16.msrb.mxu0 %v3475_v6  ;;  %1984 = vmatpush.bf16.msrb.mxu1 %v3479_v7  ;;  %v2835_v6 = vor.u32 %v3807_v56, %v2834_v55  ;;  %v3748_v7 = vld [vmem:[%s4087_s14 + $0x7e0] sm:$0xf0]  ;;  %v3905_v55 = vld [vmem:[%s4087_s14 + $0x3dc] sm:$0xf0]  ;;  %v3243_v2 = vor.u32 %v3906_v60, %v3242_v59  ;;  %v3644_v59 = vld [vmem:[%s4087_s14 + $0x6f8] sm:$0xf0] }
  0xbd   : > { %1998 = vmatpush.bf16.msrb.mxu2 %v3483_v8  ;;  %v3754_v8 = vld [vmem:[%s4087_s14 + $0x768] sm:$0xf]  ;;  %v3751_v16 = vor.u32 %v4017_v5, %v3748_v7  ;;  %v3889_v56 = vld [vmem:[%s4087_s14 + $0x364] sm:$0xf] }
  0xbe   : > { %2012 = vmatpush.bf16.msrb.mxu3 %v3487_v12  ;;  %v4018_v12 = vld [vmem:[%s4087_s14 + $0x76c] sm:$0xf]  ;;  %v3755_v17 = vor.u32 %v4034_v9, %v3754_v8  ;;  %v3857_v5 = vld [vmem:[%s4087_s14 + $0x264] sm:$0xf]  ;;  %v3114_v8 = vld [vmem:[%s4087_s14 + $0x268] sm:$0xf] }
  0xbf   : > { %v3759_v21 = vor.u32 %v4018_v12, %v3756_v13  ;;  %v3108_v7 = vld [vmem:[%s4087_s14 + $0x2e0] sm:$0xf0]  ;;  %v3874_v9 = vld [vmem:[%s4087_s14 + $0x2e4] sm:$0xf0]  ;;  %v3107_v12 = vor.u32 %v3873_v4, %v3106_v3  ;;  %v3508_v4 = vld [vmem:[%s4087_s14 + $0x5f0] sm:$0xf0] }
  0xc0   : > { %1971 = vmatpush.bf16.msrb.mxu0 %v3347_v18  ;;  %1985 = vmatpush.bf16.msrb.mxu1 %v3351_v19  ;;  %v3618_v18 = vld [vmem:[%s4087_s14 + $0x660] sm:$0xf]  ;;  %v3111_v13 = vor.u32 %v3857_v5, %v3108_v7  ;;  %v3514_v5 = vld [vmem:[%s4087_s14 + $0x578] sm:$0xf]  ;;  %v3956_v7 = vld [vmem:[%s4087_s14 + $0x57c] sm:$0xf] }
  0xc1   : > { %1999 = vmatpush.bf16.msrb.mxu2 %v3355_v20  ;;  %v4001_v19 = vld [vmem:[%s4087_s14 + $0x6dc] sm:$0xf0]  ;;  %v3985_v20 = vld [vmem:[%s4087_s14 + $0x664] sm:$0xf] }
  0xc2   : > { %2013 = vmatpush.bf16.msrb.mxu3 %v3359_v24  ;;  %v4002_v24 = vld [vmem:[%s4087_s14 + $0x6e4] sm:$0xf0]  ;;  %v3619_v27 = vor.u32 %v4001_v19, %v3618_v18  ;;  %v3623_v28 = vor.u32 %v3985_v20, %v3620_v22  ;;  %v2980_v19 = vld [vmem:[%s4087_s14 + $0x1e0] sm:$0xf0]  ;;  %v3826_v22 = vld [vmem:[%s4087_s14 + $0x16c] sm:$0xf] }
  0xc3   : > { %v3627_v29 = vor.u32 %v4002_v24, %v3626_v23  ;;  %v2986_v20 = vld [vmem:[%s4087_s14 + $0x168] sm:$0xf]  ;;  %v2988_v23 = vld [vmem:[%s4087_s14 + $0x1e8] sm:$0xf0] }
  0xc4   : > { %1972 = vmatpush.bf16.msrb.mxu0 %v3219_v30  ;;  %1986 = vmatpush.bf16.msrb.mxu1 %v3223_v31  ;;  %v3490_v30 = vld [vmem:[%s4087_s14 + $0x560] sm:$0xf] }
  0xc5   : > { %2000 = vmatpush.bf16.msrb.mxu2 %v3227_v32  ;;  %v3969_v31 = vld [vmem:[%s4087_s14 + $0x5dc] sm:$0xf0]  ;;  %v3953_v32 = vld [vmem:[%s4087_s14 + $0x564] sm:$0xf] }
  0xc6   : > { %2014 = vmatpush.bf16.msrb.mxu3 %v3231_v36  ;;  %v3970_v36 = vld [vmem:[%s4087_s14 + $0x5e4] sm:$0xf0]  ;;  %v3491_v39 = vor.u32 %v3969_v31, %v3490_v30  ;;  %v3495_v40 = vor.u32 %v3953_v32, %v3492_v34  ;;  %v2852_v30 = vld [vmem:[%s4087_s14 + $0xe0] sm:$0xf0]  ;;  %v2991_v32 = vor.u32 %v3826_v22, %v2988_v23  ;;  %v3794_v34 = vld [vmem:[%s4087_s14 + $0x6c] sm:$0xf] }
  0xc7   : > { %v3499_v41 = vor.u32 %v3970_v36, %v3498_v35  ;;  %v2858_v31 = vld [vmem:[%s4087_s14 + $0x68] sm:$0xf]  ;;  %v2860_v35 = vld [vmem:[%s4087_s14 + $0xe8] sm:$0xf0]  ;;  %v3762_v36 = vld [vmem:[%s4087_s14 + $0x770] sm:$0xf] }
  0xc8   : > { %1973 = vmatpush.bf16.msrb.mxu0 %v3091_v42  ;;  %1987 = vmatpush.bf16.msrb.mxu1 %v3095_v43  ;;  %v3362_v42 = vld [vmem:[%s4087_s14 + $0x460] sm:$0xf] }
  0xc9   : > { %2001 = vmatpush.bf16.msrb.mxu2 %v3099_v44  ;;  %v3937_v43 = vld [vmem:[%s4087_s14 + $0x4dc] sm:$0xf0]  ;;  %v3921_v44 = vld [vmem:[%s4087_s14 + $0x464] sm:$0xf] }
  0xca   : > { %2015 = vmatpush.bf16.msrb.mxu3 %v3103_v47  ;;  %v3938_v47 = vld [vmem:[%s4087_s14 + $0x4e4] sm:$0xf0]  ;;  %v3363_v50 = vor.u32 %v3937_v43, %v3362_v42  ;;  %v3367_v51 = vor.u32 %v3921_v44, %v3364_v52  ;;  %v4036_v42 = vld [vmem:[%s4087_s14 + $0x7f4] sm:$0xf0]  ;;  %v3772_v52 = vld [vmem:[%s4087_s14 + $0x7f8] sm:$0xf0] }
  0xcb   : > { %v3371_v53 = vor.u32 %v3938_v47, %v3370_v46  ;;  %v2863_v46 = vor.u32 %v3794_v34, %v2860_v35  ;;  %v3763_v47 = vor.u32 %v4035_v37, %v3762_v36  ;;  %v3122_v36 = vld [vmem:[%s4087_s14 + $0x270] sm:$0xf] }
  0xcc   : > { %1974 = vmatpush.bf16.msrb.mxu0 %v2963_v54  ;;  %1988 = vmatpush.bf16.msrb.mxu1 %v2967_v57  ;;  %v3234_v54 = vld [vmem:[%s4087_s14 + $0x360] sm:$0xf]  ;;  %v3375_v57 = vor.u32 %v3922_v48, %v3372_v49  ;;  %v3875_v37 = vld [vmem:[%s4087_s14 + $0x2ec] sm:$0xf0] }
  0xcd   : > { %2002 = vmatpush.bf16.msrb.mxu2 %v2971_v58  ;;  %v3236_v58 = vld [vmem:[%s4087_s14 + $0x3e0] sm:$0xf0]  ;;  %v3235_v0 = vor.u32 %v3905_v55, %v3234_v54  ;;  %v3636_v55 = vld [vmem:[%s4087_s14 + $0x6f0] sm:$0xf0] }
  0xce   : > { %2016 = vmatpush.bf16.msrb.mxu3 %v2975_v62  ;;  %v3244_v62 = vld [vmem:[%s4087_s14 + $0x3e8] sm:$0xf0]  ;;  %v3239_v1 = vor.u32 %v3889_v56, %v3236_v58  ;;  %v3642_v56 = vld [vmem:[%s4087_s14 + $0x678] sm:$0xf]  ;;  %v3988_v58 = vld [vmem:[%s4087_s14 + $0x67c] sm:$0xf] }
  0xcf   : > { %v3647_v3 = vor.u32 %v3988_v58, %v3644_v59 }
  0xd0   : > { %1975 = vmatpush.bf16.msrb.mxu0 %v2835_v6  ;;  %1989 = vmatpush.bf16.msrb.mxu1 %v2839_v10  ;;  %v3247_v6 = vor.u32 %v3890_v61, %v3244_v62  ;;  %v3858_v10 = vld [vmem:[%s4087_s14 + $0x26c] sm:$0xf] }
  0xd1   : > { %2003 = vmatpush.bf16.msrb.mxu2 %v2843_v11  ;;  %v3116_v11 = vld [vmem:[%s4087_s14 + $0x2e8] sm:$0xf0] }
  0xd2   : > { %2017 = vmatpush.bf16.msrb.mxu3 %v2847_v14  ;;  %v3115_v14 = vor.u32 %v3874_v9, %v3114_v8  ;;  %v3119_v18 = vor.u32 %v3858_v10, %v3116_v11  ;;  %v3516_v8 = vld [vmem:[%s4087_s14 + $0x5f8] sm:$0xf0] }
  0xd3   : > { %1976 = vmatmul.bf16.vlgmr.msrb.gmra.mxu0 %v4452_v63  ;;  %1990 = vmatmul.bf16.vlgmr.msrb.gmra.mxu1 %v4452_v63 }
  0xd4   : > { %2024 = vmatpush.bf16.msra.mxu0 %v3747_v15  ;;  %2038 = vmatpush.bf16.msra.mxu1 %v3751_v16  ;;  %v2978_v15 = vld [vmem:[%s4087_s14 + $0x160] sm:$0xf] }
  0xd5   : > { %2052 = vmatpush.bf16.msra.mxu2 %v3755_v17  ;;  %2018 = vmatmul.bf16.vlgmr.msrb.gmra.mxu3 %v4452_v63  ;;  %v3841_v16 = vld [vmem:[%s4087_s14 + $0x1dc] sm:$0xf0]  ;;  %v3825_v17 = vld [vmem:[%s4087_s14 + $0x164] sm:$0xf] }
  0xd6   : > { %2066 = vmatpush.bf16.msra.mxu3 %v3759_v21  ;;  %2004 = vmatmul.bf16.vlgmr.msrb.gmra.mxu2 %v4452_v63  ;;  %v3842_v21 = vld [vmem:[%s4087_s14 + $0x1e4] sm:$0xf0]  ;;  %v2979_v24 = vor.u32 %v3841_v16, %v2978_v15  ;;  %v3519_v15 = vor.u32 %v3956_v7, %v3516_v8  ;;  %v3380_v16 = vld [vmem:[%s4087_s14 + $0x4f0] sm:$0xf0] }
  0xd8   : > { %2025 = vmatpush.bf16.msra.mxu0 %v3619_v27  ;;  %2039 = vmatpush.bf16.msra.mxu1 %v3623_v28  ;;  %v2983_v27 = vor.u32 %v3825_v17, %v2980_v19  ;;  %v2987_v28 = vor.u32 %v3842_v21, %v2986_v20  ;;  %v3386_v17 = vld [vmem:[%s4087_s14 + $0x478] sm:$0xf]  ;;  %v3924_v19 = vld [vmem:[%s4087_s14 + $0x47c] sm:$0xf] }
  0xd9   : > { %2053 = vmatpush.bf16.msra.mxu2 %v3627_v29  ;;  %v3793_v29 = vld [vmem:[%s4087_s14 + $0x64] sm:$0xf]  ;;  %v3388_v20 = vld [vmem:[%s4087_s14 + $0x4f8] sm:$0xf0] }
  0xda   : > { %2067 = vmatpush.bf16.msra.mxu3 %v3631_v33  ;;  %v3810_v33 = vld [vmem:[%s4087_s14 + $0xe4] sm:$0xf0]  ;;  %v2855_v43 = vor.u32 %v3793_v29, %v2852_v30  ;;  %v3258_v29 = vld [vmem:[%s4087_s14 + $0x378] sm:$0xf] }
  0xdb   : > { %v2859_v44 = vor.u32 %v3810_v33, %v2858_v31  ;;  %v3908_v30 = vld [vmem:[%s4087_s14 + $0x3f4] sm:$0xf0]  ;;  %v3892_v31 = vld [vmem:[%s4087_s14 + $0x37c] sm:$0xf] }
  0xdc   : > { %2026 = vmatpush.bf16.msra.mxu0 %v3491_v39  ;;  %2040 = vmatpush.bf16.msra.mxu1 %v3495_v40  ;;  %v2851_v39 = vor.u32 %v3809_v26, %v2850_v25  ;;  %v3764_v40 = vld [vmem:[%s4087_s14 + $0x7f0] sm:$0xf0]  ;;  %v3907_v25 = vld [vmem:[%s4087_s14 + $0x3ec] sm:$0xf0]  ;;  %v3259_v35 = vor.u32 %v3908_v30, %v3258_v29 }
  0xdd   : > { %2054 = vmatpush.bf16.msra.mxu2 %v3499_v41  ;;  %v3770_v41 = vld [vmem:[%s4087_s14 + $0x778] sm:$0xf]  ;;  %v3767_v48 = vor.u32 %v4019_v38, %v3764_v40  ;;  %v3891_v26 = vld [vmem:[%s4087_s14 + $0x374] sm:$0xf] }
  0xde   : > { %2068 = vmatpush.bf16.msra.mxu3 %v3503_v45  ;;  %v4020_v45 = vld [vmem:[%s4087_s14 + $0x77c] sm:$0xf]  ;;  %v3771_v49 = vor.u32 %v4036_v42, %v3770_v41  ;;  %v3859_v38 = vld [vmem:[%s4087_s14 + $0x274] sm:$0xf]  ;;  %v3130_v41 = vld [vmem:[%s4087_s14 + $0x278] sm:$0xf] }
  0xdf   : > { %v3775_v54 = vor.u32 %v4020_v45, %v3772_v52  ;;  %v3124_v40 = vld [vmem:[%s4087_s14 + $0x2f0] sm:$0xf0]  ;;  %v3876_v42 = vld [vmem:[%s4087_s14 + $0x2f4] sm:$0xf0]  ;;  %v3123_v45 = vor.u32 %v3875_v37, %v3122_v36 }
  0xe0   : > { %2027 = vmatpush.bf16.msra.mxu0 %v3363_v50  ;;  %2041 = vmatpush.bf16.msra.mxu1 %v3367_v51  ;;  %v3634_v50 = vld [vmem:[%s4087_s14 + $0x670] sm:$0xf]  ;;  %v3127_v52 = vor.u32 %v3859_v38, %v3124_v40 }
  0xe1   : > { %2055 = vmatpush.bf16.msra.mxu2 %v3371_v53  ;;  %v4003_v51 = vld [vmem:[%s4087_s14 + $0x6ec] sm:$0xf0]  ;;  %v3987_v53 = vld [vmem:[%s4087_s14 + $0x674] sm:$0xf] }
  0xe2   : > { %2069 = vmatpush.bf16.msra.mxu3 %v3375_v57  ;;  %v4004_v57 = vld [vmem:[%s4087_s14 + $0x6f4] sm:$0xf0]  ;;  %v3635_v60 = vor.u32 %v4003_v51, %v3634_v50  ;;  %v3639_v61 = vor.u32 %v3987_v53, %v3636_v55  ;;  %v2996_v51 = vld [vmem:[%s4087_s14 + $0x1f0] sm:$0xf0]  ;;  %v3828_v55 = vld [vmem:[%s4087_s14 + $0x17c] sm:$0xf] }
  0xe3   : > { %v3643_v62 = vor.u32 %v4004_v57, %v3642_v56  ;;  %v3002_v53 = vld [vmem:[%s4087_s14 + $0x178] sm:$0xf]  ;;  %v3004_v56 = vld [vmem:[%s4087_s14 + $0x1f8] sm:$0xf0] }
  0xe4   : > { %2028 = vmatpush.bf16.msra.mxu0 %v3235_v0  ;;  %2042 = vmatpush.bf16.msra.mxu1 %v3239_v1  ;;  %v3506_v0 = vld [vmem:[%s4087_s14 + $0x570] sm:$0xf] }
  0xe5   : > { %2056 = vmatpush.bf16.msra.mxu2 %v3243_v2  ;;  %v3971_v1 = vld [vmem:[%s4087_s14 + $0x5ec] sm:$0xf0]  ;;  %v3955_v2 = vld [vmem:[%s4087_s14 + $0x574] sm:$0xf] }
  0xe6   : > { %2070 = vmatpush.bf16.msra.mxu3 %v3247_v6  ;;  %v3972_v6 = vld [vmem:[%s4087_s14 + $0x5f4] sm:$0xf0]  ;;  %v3507_v9 = vor.u32 %v3971_v1, %v3506_v0  ;;  %v3511_v10 = vor.u32 %v3955_v2, %v3508_v4  ;;  %v3007_v0 = vor.u32 %v3828_v55, %v3004_v56  ;;  %v2868_v1 = vld [vmem:[%s4087_s14 + $0xf0] sm:$0xf0]  ;;  %v3796_v4 = vld [vmem:[%s4087_s14 + $0x7c] sm:$0xf] }
  0xe7   : > { %v3515_v11 = vor.u32 %v3972_v6, %v3514_v5  ;;  %v2874_v2 = vld [vmem:[%s4087_s14 + $0x78] sm:$0xf]  ;;  %v2876_v5 = vld [vmem:[%s4087_s14 + $0xf8] sm:$0xf0] }
  0xe8   : > { %2029 = vmatpush.bf16.msra.mxu0 %v3107_v12  ;;  %2043 = vmatpush.bf16.msra.mxu1 %v3111_v13  ;;  %v3378_v12 = vld [vmem:[%s4087_s14 + $0x470] sm:$0xf] }
  0xe9   : > { %2057 = vmatpush.bf16.msra.mxu2 %v3115_v14  ;;  %v3939_v13 = vld [vmem:[%s4087_s14 + $0x4ec] sm:$0xf0]  ;;  %v3923_v14 = vld [vmem:[%s4087_s14 + $0x474] sm:$0xf] }
  0xea   : > { %2071 = vmatpush.bf16.msra.mxu3 %v3119_v18  ;;  %v3940_v18 = vld [vmem:[%s4087_s14 + $0x4f4] sm:$0xf0]  ;;  %v3379_v21 = vor.u32 %v3939_v13, %v3378_v12  ;;  %v3383_v22 = vor.u32 %v3923_v14, %v3380_v16  ;;  %v4647_v12 = vpop.f32.mrf.mxu2  ;;  %v4649_v13 = vpop.f32.mrf.mxu3 }
  0xeb   : > { %v3387_v23 = vor.u32 %v3940_v18, %v3386_v17  ;;  %v2205_v38 = vmul.f32 %v4649_v13, %v4649_v13 }
  0xec   : > { %2030 = vmatpush.bf16.msra.mxu0 %v2979_v24  ;;  %2044 = vmatpush.bf16.msra.mxu1 %v2983_v27  ;;  %v3250_v24 = vld [vmem:[%s4087_s14 + $0x370] sm:$0xf]  ;;  %v3391_v27 = vor.u32 %v3924_v19, %v3388_v20 }
  0xed   : > { %2058 = vmatpush.bf16.msra.mxu2 %v2987_v28  ;;  %v3252_v28 = vld [vmem:[%s4087_s14 + $0x3f0] sm:$0xf0]  ;;  %v3251_v33 = vor.u32 %v3907_v25, %v3250_v24 }
  0xee   : > { %2072 = vmatpush.bf16.msra.mxu3 %v2991_v32  ;;  %v3260_v32 = vld [vmem:[%s4087_s14 + $0x3f8] sm:$0xf0]  ;;  %v3255_v34 = vor.u32 %v3891_v26, %v3252_v28 }
  0xf0   : > { %2031 = vmatpush.bf16.msra.mxu0 %v2851_v39  ;;  %2045 = vmatpush.bf16.msra.mxu1 %v2855_v43  ;;  %v3263_v39 = vor.u32 %v3892_v31, %v3260_v32  ;;  %v3860_v43 = vld [vmem:[%s4087_s14 + $0x27c] sm:$0xf]  ;;  %v2204_v32 = vmul.f32 %v4647_v12, %v4647_v12 }
  0xf1   : > { %2059 = vmatpush.bf16.msra.mxu2 %v2859_v44  ;;  %v3132_v44 = vld [vmem:[%s4087_s14 + $0x2f8] sm:$0xf0] }
  0xf2   : > { %2073 = vmatpush.bf16.msra.mxu3 %v2863_v46  ;;  %v3131_v46 = vor.u32 %v3876_v42, %v3130_v41  ;;  %v3135_v50 = vor.u32 %v3860_v43, %v3132_v44  ;;  %v4655_v16 = vpop.f32.mrf.mxu2  ;;  %v4657_v17 = vpop.f32.mrf.mxu3 }
  0xf3   : > { %2032 = vmatmul.bf16.vlgmr.msra.gmra.mxu0 %v4452_v63  ;;  %2046 = vmatmul.bf16.vlgmr.msra.gmra.mxu1 %v4452_v63  ;;  %5457 = vst [vmem:[#allocation4_spill] sm:$0xff] %v4655_v16 }
  0xf4   : > { %2080 = vmatpush.bf16.msrb.mxu0 %v3763_v47  ;;  %2094 = vmatpush.bf16.msrb.mxu1 %v3767_v48  ;;  %v2994_v47 = vld [vmem:[%s4087_s14 + $0x170] sm:$0xf]  ;;  %5458 = vst [vmem:[#allocation5_spill] sm:$0xff] %v4657_v17 }
  0xf5   : > { %2108 = vmatpush.bf16.msrb.mxu2 %v3771_v49  ;;  %2074 = vmatmul.bf16.vlgmr.msra.gmra.mxu3 %v4452_v63  ;;  %v3843_v48 = vld [vmem:[%s4087_s14 + $0x1ec] sm:$0xf0]  ;;  %v3827_v49 = vld [vmem:[%s4087_s14 + $0x174] sm:$0xf] }
  0xf6   : > { %2122 = vmatpush.bf16.msrb.mxu3 %v3775_v54  ;;  %2060 = vmatmul.bf16.vlgmr.msra.gmra.mxu2 %v4452_v63  ;;  %v3844_v54 = vld [vmem:[%s4087_s14 + $0x1f4] sm:$0xf0]  ;;  %v2995_v57 = vor.u32 %v3843_v48, %v2994_v47  ;;  %v2999_v58 = vor.u32 %v3827_v49, %v2996_v51 }
  0xf7   : > { %v3003_v59 = vor.u32 %v3844_v54, %v3002_v53 }
  0xf8   : > { %2081 = vmatpush.bf16.msrb.mxu0 %v3635_v60  ;;  %2095 = vmatpush.bf16.msrb.mxu1 %v3639_v61  ;;  %v2866_v60 = vld [vmem:[%s4087_s14 + $0x70] sm:$0xf] }
  0xf9   : > { %2109 = vmatpush.bf16.msrb.mxu2 %v3643_v62  ;;  %v3811_v61 = vld [vmem:[%s4087_s14 + $0xec] sm:$0xf0]  ;;  %v3795_v62 = vld [vmem:[%s4087_s14 + $0x74] sm:$0xf] }
  0xfa   : > { %2123 = vmatpush.bf16.msrb.mxu3 %v3647_v3  ;;  %v3812_v3 = vld [vmem:[%s4087_s14 + $0xf4] sm:$0xf0]  ;;  %v2867_v6 = vor.u32 %v3811_v61, %v2866_v60  ;;  %v2871_v7 = vor.u32 %v3795_v62, %v2868_v1  ;;  %v4663_v20 = vpop.f32.mrf.mxu2 }
  0xfb   : > { %v2875_v8 = vor.u32 %v3812_v3, %v2874_v2 }
  0xfc   : > { %2082 = vmatpush.bf16.msrb.mxu0 %v3507_v9  ;;  %2096 = vmatpush.bf16.msrb.mxu1 %v3511_v10  ;;  %v2879_v9 = vor.u32 %v3796_v4, %v2876_v5  ;;  %v4639_v10 = vpop.f32.mrf.mxu0 }
  0xfd   : > { %2110 = vmatpush.bf16.msrb.mxu2 %v3515_v11  ;;  %v4641_v11 = vpop.f32.mrf.mxu1 }
  0xfe   : > { %2124 = vmatpush.bf16.msrb.mxu3 %v3519_v15  ;;  %v2203_v28 = vmul.f32 %v4641_v11, %v4641_v11  ;;  %v2136_v29 = vadd.f32 %v4641_v11, %v4639_v10 }
 0x100   : > { %2083 = vmatpush.bf16.msrb.mxu0 %v3379_v21  ;;  %2097 = vmatpush.bf16.msrb.mxu1 %v3383_v22  ;;  %v4665_v21 = vpop.f32.mrf.mxu3 }
 0x101   : > { %2111 = vmatpush.bf16.msrb.mxu2 %v3387_v23  ;;  %v2209_v5 = vmul.f32 %v4665_v21, %v4665_v21 }
 0x102   : > { %2125 = vmatpush.bf16.msrb.mxu3 %v3391_v27  ;;  %v4671_v23 = vpop.f32.mrf.mxu2  ;;  %v2202_v27 = vmul.f32 %v4639_v10, %v4639_v10 }
 0x103   : > { %5461 = vst [vmem:[#allocation8_spill] sm:$0xff] %v4671_v23 }
 0x104   : > { %2084 = vmatpush.bf16.msrb.mxu0 %v3251_v33  ;;  %2098 = vmatpush.bf16.msrb.mxu1 %v3255_v34  ;;  %v4651_v14 = vpop.f32.mrf.mxu0  ;;  %v2266_v31 = vadd.f32 %v2203_v28, %v2202_v27  ;;  %v2137_v34 = vadd.f32 %v2136_v29, %v4647_v12 }
 0x105   : > { %2112 = vmatpush.bf16.msrb.mxu2 %v3259_v35  ;;  %5455 = vst [vmem:[#allocation2_spill] sm:$0xff] %v4651_v14  ;;  %v4653_v15 = vpop.f32.mrf.mxu1  ;;  %v2234_v40 = vmul.f32 %v4651_v14, %v4651_v14 }
 0x106   : > { %2126 = vmatpush.bf16.msrb.mxu3 %v3263_v39  ;;  %5456 = vst [vmem:[#allocation3_spill] sm:$0xff] %v4653_v15  ;;  %v2267_v37 = vadd.f32 %v2266_v31, %v2204_v32  ;;  %v2138_v39 = vadd.f32 %v2137_v34, %v4649_v13  ;;  %v2235_v42 = vmul.f32 %v4653_v15, %v4653_v15 }
 0x107   : > { %v2240_v32 = vmul.f32 %v4671_v23, %v4671_v23 }
 0x108   : > { %2085 = vmatpush.bf16.msrb.mxu0 %v3123_v45  ;;  %2099 = vmatpush.bf16.msrb.mxu1 %v3127_v52  ;;  %v4673_v24 = vpop.f32.mrf.mxu3  ;;  %v2268_v41 = vadd.f32 %v2267_v37, %v2205_v38  ;;  %v2169_v45 = vadd.f32 %v4653_v15, %v4651_v14  ;;  %v2299_v49 = vadd.f32 %v2235_v42, %v2234_v40 }
 0x109   : > { %2113 = vmatpush.bf16.msrb.mxu2 %v3131_v46  ;;  %5462 = vst [vmem:[#allocation9_spill] sm:$0xff] %v4673_v24 }
 0x10a   : > { %2127 = vmatpush.bf16.msrb.mxu3 %v3135_v50  ;;  %v4685_v30 = vpop.f32.mrf.mxu2  ;;  %v2236_v50 = vmul.f32 %v4655_v16, %v4655_v16  ;;  %v2170_v54 = vadd.f32 %v2169_v45, %v4655_v16 }
 0x10c   : > { %2086 = vmatpush.bf16.msrb.mxu0 %v2995_v57  ;;  %2100 = vmatpush.bf16.msrb.mxu1 %v2999_v58  ;;  %v4659_v18 = vpop.f32.mrf.mxu0  ;;  %v2300_v56 = vadd.f32 %v2299_v49, %v2236_v50  ;;  %v2237_v57 = vmul.f32 %v4657_v17, %v4657_v17  ;;  %v2171_v61 = vadd.f32 %v2170_v54, %v4657_v17 }
 0x10d   : > { %2114 = vmatpush.bf16.msrb.mxu2 %v3003_v59  ;;  %v4661_v19 = vpop.f32.mrf.mxu1  ;;  %v2206_v43 = vmul.f32 %v4659_v18, %v4659_v18  ;;  %v2139_v52 = vadd.f32 %v2138_v39, %v4659_v18  ;;  %v2208_v59 = vmul.f32 %v4663_v20, %v4663_v20 }
 0x10e   : > { %2128 = vmatpush.bf16.msrb.mxu3 %v3007_v0  ;;  %v2207_v53 = vmul.f32 %v4661_v19, %v4661_v19  ;;  %v2301_v2 = vadd.f32 %v2300_v56, %v2237_v57 }
 0x10f   : > { %v2269_v51 = vadd.f32 %v2268_v41, %v2206_v43  ;;  %v2140_v55 = vadd.f32 %v2139_v52, %v4661_v19  ;;  %v2241_v43 = vmul.f32 %v4673_v24, %v4673_v24  ;;  %v2212_v52 = vmul.f32 %v4685_v30, %v4685_v30 }
 0x110   : > { %2087 = vmatpush.bf16.msrb.mxu0 %v2867_v6  ;;  %2101 = vmatpush.bf16.msrb.mxu1 %v2871_v7  ;;  %v4689_v33 = vpop.f32.mrf.mxu3 }
 0x111   : > { %2115 = vmatpush.bf16.msrb.mxu2 %v2875_v8  ;;  %v2270_v58 = vadd.f32 %v2269_v51, %v2207_v53  ;;  %v2141_v62 = vadd.f32 %v2140_v55, %v4663_v20 }
 0x112   : > { %2129 = vmatpush.bf16.msrb.mxu3 %v2879_v9  ;;  %v4705_v44 = vpop.f32.mrf.mxu2 }
 0x113   : > { %2088 = vmatmul.bf16.vlgmr.msrb.gmra.mxu0 %v4452_v63  ;;  %2102 = vmatmul.bf16.vlgmr.msrb.gmra.mxu1 %v4452_v63  ;;  %5465 = vst [vmem:[#allocation12_spill] sm:$0xff] %v4705_v44  ;;  %v2271_v3 = vadd.f32 %v2270_v58, %v2208_v59  ;;  %v2142_v9 = vadd.f32 %v2141_v62, %v4665_v21 }
 0x114   : > { %2116 = vmatmul.bf16.vlgmr.msrb.gmra.mxu2 %v4452_v63 }
 0x115   : > { %2130 = vmatmul.bf16.vlgmr.msrb.gmra.mxu3 %v4452_v63  ;;  %v4667_v63 = vpop.f32.mrf.mxu0  ;;  %v4669_v22 = vpop.f32.mrf.mxu1  ;;  %v2272_v29 = vadd.f32 %v2271_v3, %v2209_v5 }
 0x116   : > { %5459 = vst [vmem:[#allocation6_spill] sm:$0xff] %v4667_v63  ;;  %v2238_v0 = vmul.f32 %v4667_v63, %v4667_v63  ;;  %v2172_v4 = vadd.f32 %v2171_v61, %v4667_v63  ;;  %v2239_v27 = vmul.f32 %v4669_v22, %v4669_v22  ;;  %v2213_v61 = vmul.f32 %v4689_v33, %v4689_v33 }
 0x117   : > { %5460 = vst [vmem:[#allocation7_spill] sm:$0xff] %v4669_v22 }
 0x118   : > { %v4710_v46 = vpop.f32.mrf.mxu3  ;;  %v2302_v8 = vadd.f32 %v2301_v2, %v2238_v0  ;;  %v2173_v31 = vadd.f32 %v2172_v4, %v4669_v22 }
 0x119   : > { %5466 = vst [vmem:[#allocation13_spill] sm:$0xff] %v4710_v46 }
 0x11a   : > { %v4726_v60 = vpop.f32.mrf.mxu2  ;;  %v2303_v37 = vadd.f32 %v2302_v8, %v2239_v27  ;;  %v2174_v38 = vadd.f32 %v2173_v31, %v4671_v23 }
 0x11c   : > { %v2304_v42 = vadd.f32 %v2303_v37, %v2240_v32  ;;  %v2175_v53 = vadd.f32 %v2174_v38, %v4673_v24 }
 0x11d   : > { %v4675_v25 = vpop.f32.mrf.mxu0  ;;  %v4677_v26 = vpop.f32.mrf.mxu1 }
 0x11e   : > { %v2210_v28 = vmul.f32 %v4675_v25, %v4675_v25  ;;  %v2143_v34 = vadd.f32 %v2142_v9, %v4675_v25  ;;  %v2211_v40 = vmul.f32 %v4677_v26, %v4677_v26  ;;  %v2305_v57 = vadd.f32 %v2304_v42, %v2241_v43 }
 0x11f   : > { %v2244_v9 = vmul.f32 %v4705_v44, %v4705_v44  ;;  %v2216_v43 = vmul.f32 %v4726_v60, %v4726_v60 }
 0x120   : > { %v4732_v1 = vpop.f32.mrf.mxu3  ;;  %v2273_v39 = vadd.f32 %v2272_v29, %v2210_v28  ;;  %v2144_v45 = vadd.f32 %v2143_v34, %v4677_v26 }
 0x122   : > { %v4753_v41 = vpop.f32.mrf.mxu2  ;;  %v2274_v54 = vadd.f32 %v2273_v39, %v2211_v40  ;;  %v2145_v55 = vadd.f32 %v2144_v45, %v4685_v30  ;;  %v2245_v40 = vmul.f32 %v4710_v46, %v4710_v46 }
 0x123   : > { %5469 = vst [vmem:[#allocation16_spill] sm:$0xff] %v4753_v41 }
 0x124   : > { %v2275_v58 = vadd.f32 %v2274_v54, %v2212_v52  ;;  %v2146_v0 = vadd.f32 %v2145_v55, %v4689_v33 }
 0x125   : > { %v4692_v35 = vpop.f32.mrf.mxu0  ;;  %v4694_v36 = vpop.f32.mrf.mxu1 }
 0x126   : > { %5463 = vst [vmem:[#allocation10_spill] sm:$0xff] %v4692_v35  ;;  %v2242_v56 = vmul.f32 %v4692_v35, %v4692_v35  ;;  %v2176_v59 = vadd.f32 %v2175_v53, %v4692_v35  ;;  %v2243_v2 = vmul.f32 %v4694_v36, %v4694_v36  ;;  %v2276_v5 = vadd.f32 %v2275_v58, %v2213_v61 }
 0x127   : > { %5464 = vst [vmem:[#allocation11_spill] sm:$0xff] %v4694_v36  ;;  %v2217_v58 = vmul.f32 %v4732_v1, %v4732_v1 }
 0x128   : > { %v4760_v49 = vpop.f32.mrf.mxu3  ;;  %v2306_v62 = vadd.f32 %v2305_v57, %v2242_v56  ;;  %v2177_v8 = vadd.f32 %v2176_v59, %v4694_v36 }
 0x129   : > { %5470 = vst [vmem:[#allocation17_spill] sm:$0xff] %v4760_v49 }
 0x12a   : > { %v2307_v29 = vadd.f32 %v2306_v62, %v2243_v2  ;;  %v2178_v31 = vadd.f32 %v2177_v8, %v4705_v44 }
 0x12c   : > { %v2308_v39 = vadd.f32 %v2307_v29, %v2244_v9  ;;  %v2179_v45 = vadd.f32 %v2178_v31, %v4710_v46  ;;  %v2248_v29 = vmul.f32 %v4753_v41, %v4753_v41 }
 0x12d   : > { %v4712_v47 = vpop.f32.mrf.mxu0  ;;  %v4714_v48 = vpop.f32.mrf.mxu1 }
 0x12e   : > { %v2214_v3 = vmul.f32 %v4712_v47, %v4712_v47  ;;  %v2147_v27 = vadd.f32 %v2146_v0, %v4712_v47  ;;  %v2215_v34 = vmul.f32 %v4714_v48, %v4714_v48  ;;  %v2309_v55 = vadd.f32 %v2308_v39, %v2245_v40 }
 0x130   : > { %v2277_v32 = vadd.f32 %v2276_v5, %v2214_v3  ;;  %v2148_v42 = vadd.f32 %v2147_v27, %v4714_v48 }
 0x132   : > { %v2278_v52 = vadd.f32 %v2277_v32, %v2215_v34  ;;  %v2149_v53 = vadd.f32 %v2148_v42, %v4726_v60 }
 0x134   : > { %v2279_v56 = vadd.f32 %v2278_v52, %v2216_v43  ;;  %v2150_v62 = vadd.f32 %v2149_v53, %v4732_v1  ;;  %v2249_v43 = vmul.f32 %v4760_v49, %v4760_v49 }
 0x135   : > { %v4737_v6 = vpop.f32.mrf.mxu0  ;;  %v4739_v7 = vpop.f32.mrf.mxu1 }
 0x136   : > { %5467 = vst [vmem:[#allocation14_spill] sm:$0xff] %v4737_v6  ;;  %v2246_v54 = vmul.f32 %v4737_v6, %v4737_v6  ;;  %v2180_v57 = vadd.f32 %v2179_v45, %v4737_v6  ;;  %v2247_v0 = vmul.f32 %v4739_v7, %v4739_v7  ;;  %v2280_v9 = vadd.f32 %v2279_v56, %v2217_v58 }
 0x137   : > { %5468 = vst [vmem:[#allocation15_spill] sm:$0xff] %v4739_v7 }
 0x138   : > { %v4784_v28 = vpop.f32.mrf.mxu3  ;;  %v2310_v61 = vadd.f32 %v2309_v55, %v2246_v54  ;;  %v2181_v27 = vadd.f32 %v2180_v57, %v4739_v7 }
 0x139   : > { %v4778_v4 = vpop.f32.mrf.mxu2 }
 0x13a   : > { %v2311_v32 = vadd.f32 %v2310_v61, %v2247_v0  ;;  %v2182_v34 = vadd.f32 %v2181_v27, %v4753_v41  ;;  %v2220_v52 = vmul.f32 %v4778_v4, %v4778_v4 }
 0x13c   : > { %v2312_v42 = vadd.f32 %v2311_v32, %v2248_v29  ;;  %v2183_v54 = vadd.f32 %v2182_v34, %v4760_v49 }
 0x13d   : > { %v4762_v50 = vpop.f32.mrf.mxu0  ;;  %v4764_v51 = vpop.f32.mrf.mxu1 }
 0x13e   : > { %v2218_v2 = vmul.f32 %v4762_v50, %v4762_v50  ;;  %v2151_v31 = vadd.f32 %v2150_v62, %v4762_v50  ;;  %v2219_v40 = vmul.f32 %v4764_v51, %v4764_v51  ;;  %v2313_v61 = vadd.f32 %v2312_v42, %v2249_v43 }
 0x140   : > { %v4812_v3 = vpop.f32.mrf.mxu3  ;;  %v2281_v39 = vadd.f32 %v2280_v9, %v2218_v2  ;;  %v2152_v45 = vadd.f32 %v2151_v31, %v4764_v51  ;;  %v2221_v2 = vmul.f32 %v4784_v28, %v4784_v28 }
 0x141   : > { %v4805_v59 = vpop.f32.mrf.mxu2  ;;  %5474 = vst [vmem:[#allocation21_spill] sm:$0xff] %v4812_v3 }
 0x142   : > { %5473 = vst [vmem:[#allocation20_spill] sm:$0xff] %v4805_v59  ;;  %v2282_v55 = vadd.f32 %v2281_v39, %v2219_v40  ;;  %v2153_v56 = vadd.f32 %v2152_v45, %v4778_v4  ;;  %v2252_v42 = vmul.f32 %v4805_v59, %v4805_v59 }
 0x144   : > { %v2283_v62 = vadd.f32 %v2282_v55, %v2220_v52  ;;  %v2154_v31 = vadd.f32 %v2153_v56, %v4784_v28 }
 0x145   : > { %v4789_v37 = vpop.f32.mrf.mxu0  ;;  %v4791_v38 = vpop.f32.mrf.mxu1 }
 0x146   : > { %5471 = vst [vmem:[#allocation18_spill] sm:$0xff] %v4789_v37  ;;  %v2250_v57 = vmul.f32 %v4789_v37, %v4789_v37  ;;  %v2184_v0 = vadd.f32 %v2183_v54, %v4789_v37  ;;  %v2251_v32 = vmul.f32 %v4791_v38, %v4791_v38  ;;  %v2284_v39 = vadd.f32 %v2283_v62, %v2221_v2 }
 0x147   : > { %5472 = vst [vmem:[#allocation19_spill] sm:$0xff] %v4791_v38 }
 0x148   : > { %v2314_v29 = vadd.f32 %v2313_v61, %v2250_v57  ;;  %v2185_v40 = vadd.f32 %v2184_v0, %v4791_v38  ;;  %v2253_v61 = vmul.f32 %v4812_v3, %v4812_v3 }
 0x14a   : > { %v2315_v45 = vadd.f32 %v2314_v29, %v2251_v32  ;;  %v2186_v52 = vadd.f32 %v2185_v40, %v4805_v59 }
 0x14c   : > { %v2316_v57 = vadd.f32 %v2315_v45, %v2252_v42  ;;  %v2187_v32 = vadd.f32 %v2186_v52, %v4812_v3 }
 0x14e   : > { %v2317_v42 = vadd.f32 %v2316_v57, %v2253_v61 }
 0x150   : > { %v4814_v5 = vpop.f32.mrf.mxu0  ;;  %v4816_v8 = vpop.f32.mrf.mxu1 }
 0x151   : > { %v2222_v34 = vmul.f32 %v4814_v5, %v4814_v5  ;;  %v2155_v43 = vadd.f32 %v2154_v31, %v4814_v5  ;;  %v2223_v55 = vmul.f32 %v4816_v8, %v4816_v8 }
 0x153   : > { %v2285_v54 = vadd.f32 %v2284_v39, %v2222_v34  ;;  %v2156_v62 = vadd.f32 %v2155_v43, %v4816_v8 }
 0x155   : > { %v2286_v34 = vadd.f32 %v2285_v54, %v2223_v55 }
 0x158   : > { %v4836_v58 = vpop.f32.mrf.mxu3  ;;  %v4841_v9 = vpop.f32.mrf.mxu0 }
 0x159   : > { %v4830_v53 = vpop.f32.mrf.mxu2  ;;  %5475 = vst [vmem:[#allocation22_spill] sm:$0xff] %v4841_v9  ;;  %v4843_v27 = vpop.f32.mrf.mxu1  ;;  %v2254_v40 = vmul.f32 %v4841_v9, %v4841_v9  ;;  %v2188_v43 = vadd.f32 %v2187_v32, %v4841_v9  ;;  %v2225_v59 = vmul.f32 %v4836_v58, %v4836_v58 }
 0x15a   : > { %5476 = vst [vmem:[#allocation23_spill] sm:$0xff] %v4843_v27  ;;  %v2224_v0 = vmul.f32 %v4830_v53, %v4830_v53  ;;  %v2157_v39 = vadd.f32 %v2156_v62, %v4830_v53  ;;  %v2255_v49 = vmul.f32 %v4843_v27, %v4843_v27 }
 0x15b   : > { %v2318_v38 = vadd.f32 %v2317_v42, %v2254_v40  ;;  %v2189_v57 = vadd.f32 %v2188_v43, %v4843_v27 }
 0x15c   : > { %v2287_v45 = vadd.f32 %v2286_v34, %v2224_v0  ;;  %v2158_v37 = vadd.f32 %v2157_v39, %v4836_v58 }
 0x15d   : > { %v2319_v32 = vadd.f32 %v2318_v38, %v2255_v49 }
 0x15e   : > { %v2288_v55 = vadd.f32 %v2287_v45, %v2225_v59 }
 0x160   : > { %v4864_v2 = vpop.f32.mrf.mxu3 }
 0x161   : > { %v4857_v56 = vpop.f32.mrf.mxu2  ;;  %5478 = vst [vmem:[#allocation25_spill] sm:$0xff] %v4864_v2  ;;  %v2257_v45 = vmul.f32 %v4864_v2, %v4864_v2 }
 0x162   : > { %5477 = vst [vmem:[#allocation24_spill] sm:$0xff] %v4857_v56  ;;  %v2256_v61 = vmul.f32 %v4857_v56, %v4857_v56  ;;  %v2190_v34 = vadd.f32 %v2189_v57, %v4857_v56 }
 0x164   : > { %v2320_v59 = vadd.f32 %v2319_v32, %v2256_v61  ;;  %v2191_v49 = vadd.f32 %v2190_v34, %v4864_v2 }
 0x166   : > { %v2321_v57 = vadd.f32 %v2320_v59, %v2257_v45 }
 0x170   : > { %v4866_v29 = vpop.f32.mrf.mxu0  ;;  %v4868_v31 = vpop.f32.mrf.mxu1 }
 0x171   : > { %v2226_v52 = vmul.f32 %v4866_v29, %v4866_v29  ;;  %v2159_v62 = vadd.f32 %v2158_v37, %v4866_v29  ;;  %v2227_v40 = vmul.f32 %v4868_v31, %v4868_v31 }
 0x173   : > { %v2289_v39 = vadd.f32 %v2288_v55, %v2226_v52  ;;  %v2160_v43 = vadd.f32 %v2159_v62, %v4868_v31 }
 0x175   : > { %v2290_v38 = vadd.f32 %v2289_v39, %v2227_v40 }
 0x178   : > { %v4888_v0 = vpop.f32.mrf.mxu3  ;;  %v4893_v42 = vpop.f32.mrf.mxu0 }
 0x179   : > { %v4882_v54 = vpop.f32.mrf.mxu2  ;;  %5479 = vst [vmem:[#allocation26_spill] sm:$0xff] %v4893_v42  ;;  %v4895_v9 = vpop.f32.mrf.mxu1  ;;  %v2258_v55 = vmul.f32 %v4893_v42, %v4893_v42  ;;  %v2192_v61 = vadd.f32 %v2191_v49, %v4893_v42  ;;  %v2229_v32 = vmul.f32 %v4888_v0, %v4888_v0 }
 0x17a   : > { %5480 = vst [vmem:[#allocation27_spill] sm:$0xff] %v4895_v9  ;;  %v2228_v37 = vmul.f32 %v4882_v54, %v4882_v54  ;;  %v2161_v52 = vadd.f32 %v2160_v43, %v4882_v54  ;;  %v2259_v34 = vmul.f32 %v4895_v9, %v4895_v9 }
 0x17b   : > { %v2322_v62 = vadd.f32 %v2321_v57, %v2258_v55 }
 0x17c   : > { %v2291_v56 = vadd.f32 %v2290_v38, %v2228_v37  ;;  %v2162_v3 = vadd.f32 %v2161_v52, %v4888_v0  ;;  %v2193_v37 = vadd.f32 %v2192_v61, %v4895_v9 }
 0x17d   : > { %v2323_v52 = vadd.f32 %v2322_v62, %v2259_v34 }
 0x17e   : > { %v2292_v43 = vadd.f32 %v2291_v56, %v2229_v32 }
 0x180   : > { %v4914_v39 = vpop.f32.mrf.mxu3 }
 0x181   : > { %v4909_v27 = vpop.f32.mrf.mxu2  ;;  %5482 = vst [vmem:[#allocation29_spill] sm:$0xff] %v4914_v39  ;;  %v2261_v41 = vmul.f32 %v4914_v39, %v4914_v39 }
 0x182   : > { %5481 = vst [vmem:[#allocation28_spill] sm:$0xff] %v4909_v27  ;;  %v2260_v49 = vmul.f32 %v4909_v27, %v4909_v27  ;;  %v2194_v55 = vadd.f32 %v2193_v37, %v4909_v27 }
 0x184   : > { %v2324_v2 = vadd.f32 %v2323_v52, %v2260_v49  ;;  %v2195_v61 = vadd.f32 %v2194_v55, %v4914_v39 }
 0x190   : > { %v4916_v40 = vpop.f32.mrf.mxu0  ;;  %v4920_v45 = vpop.f32.mrf.mxu1 }
 0x191   : > { %v2230_v59 = vmul.f32 %v4916_v40, %v4916_v40  ;;  %v2163_v38 = vadd.f32 %v2162_v3, %v4916_v40  ;;  %v2231_v42 = vmul.f32 %v4920_v45, %v4920_v45 }
 0x193   : > { %v2293_v57 = vadd.f32 %v2292_v43, %v2230_v59  ;;  %v2164_v56 = vadd.f32 %v2163_v38, %v4920_v45  ;;  %v2325_v38 = vadd.f32 %v2324_v2, %v2261_v41 }
 0x195   : > { %v2294_v43 = vadd.f32 %v2293_v57, %v2231_v42 }
 0x197   : > { %v4932_v32 = vpop.f32.mrf.mxu2 }
 0x198   : > { %v2232_v3 = vmul.f32 %v4932_v32, %v4932_v32  ;;  %v4937_v62 = vpop.f32.mrf.mxu3  ;;  %v4939_v34 = vpop.f32.mrf.mxu0  ;;  %v2165_v59 = vadd.f32 %v2164_v56, %v4932_v32 }
 0x199   : > { %5483 = vst [vmem:[#allocation30_spill] sm:$0xff] %v4939_v34  ;;  %v2262_v37 = vmul.f32 %v4939_v34, %v4939_v34  ;;  %v2233_v49 = vmul.f32 %v4937_v62, %v4937_v62  ;;  %v2196_v52 = vadd.f32 %v2195_v61, %v4939_v34  ;;  %v4948_v27 = vpop.f32.mrf.mxu1 }
 0x19a   : > { %v2166_v55 = vadd.f32 %v2165_v59, %v4937_v62  ;;  %v2295_v39 = vadd.f32 %v2294_v43, %v2232_v3  ;;  %5484 = vst [vmem:[#allocation31_spill] sm:$0xff] %v4948_v27  ;;  %v2263_v42 = vmul.f32 %v4948_v27, %v4948_v27 }
 0x19b   : > { %v2326_v9 = vadd.f32 %v2325_v38, %v2262_v37  ;;  %v2197_v56 = vadd.f32 %v2196_v52, %v4948_v27 }
 0x19c   : > { %2167 = vadd.xlane.f32.xlu0 %v2166_v55  ;;  %v2296_v7 = vadd.f32 %v2295_v39, %v2233_v49 }
 0x19d   : > { %v2327_v6 = vadd.f32 %v2326_v9, %v2263_v42 }
 0x19e   : > { %2297 = vadd.xlane.f32.xlu1 %v2296_v7 }
 0x19f   : > { %v4953_v57 = vpop.f32.mrf.mxu2 }
 0x1a0   : > { %5485 = vst [vmem:[#allocation32_spill] sm:$0xff] %v4953_v57  ;;  %v2198_v41 = vadd.f32 %v2197_v56, %v4953_v57  ;;  %v2264_v2 = vmul.f32 %v4953_v57, %v4953_v57  ;;  %v4958_v61 = vpop.f32.mrf.mxu3 }
 0x1a1   : > { %5486 = vst [vmem:[#allocation33_spill] sm:$0xff] %v4958_v61  ;;  %v2265_v3 = vmul.f32 %v4958_v61, %v4958_v61 }
 0x1a2   : > { %v2199_v39 = vadd.f32 %v2198_v41, %v4958_v61  ;;  %v2328_v59 = vadd.f32 %v2327_v6, %v2264_v2 }
 0x1a4   : > { %2200 = vadd.xlane.f32.xlu0 %v2199_v39  ;;  %v2329_v43 = vadd.f32 %v2328_v59, %v2265_v3 }
 0x1a6   : > { %2330 = vadd.xlane.f32.xlu1 %v2329_v43 }
 0x20f   : > { %v2168_v7 = vpop.xlane.xlu0 %2167 }
 0x210   : > { %v4963_v37 = vmul.f32 0.00024414063, %v2168_v7 }
 0x211   : > { %v2298_v9 = vpop.xlane.xlu1 %2297 }
 0x212   : > { %v2334_v49 = vmul.f32 0.00024414063, %v2298_v9  ;;  %v2336_v38 = vmul.f32 %v4963_v37, %v4963_v37  ;;  %v2342_v9 = vsub.f32 %v4639_v10, %v4963_v37  ;;  %v2349_v10 = vsub.f32 %v4665_v21, %v4963_v37 }
 0x213   : > { %v2355_v21 = vsub.f32 %v4714_v48, %v4963_v37  ;;  %v2362_v48 = vsub.f32 %v4814_v5, %v4963_v37  ;;  %v2368_v5 = vsub.f32 %v4882_v54, %v4963_v37 }
 0x214   : > { %v2338_v52 = vsub.f32 %v2334_v49, %v2336_v38  ;;  %v2343_v49 = vsub.f32 %v4641_v11, %v4963_v37  ;;  %v2344_v38 = vsub.f32 %v4647_v12, %v4963_v37  ;;  %v2350_v11 = vsub.f32 %v4675_v25, %v4963_v37 }
 0x215   : > { %v2351_v12 = vsub.f32 %v4677_v26, %v4963_v37  ;;  %v2356_v25 = vsub.f32 %v4726_v60, %v4963_v37  ;;  %v2357_v26 = vsub.f32 %v4732_v1, %v4963_v37  ;;  %v2363_v60 = vsub.f32 %v4816_v8, %v4963_v37 }
 0x216   : > { %v2340_v55 = vmax.f32 %v2338_v52, 0.0  ;;  %v2369_v8 = vsub.f32 %v4888_v0, %v4963_v37 }
 0x217   : > { %v2201_v42 = vpop.xlane.xlu0 %2200 }
 0x218   : > { %v2406_v56 = vadd.f32 1e-05, %v2340_v55  ;;  %v4967_v57 = vmul.f32 0.00024414063, %v2201_v42  ;;  %v2345_v55 = vsub.f32 %v4649_v13, %v4963_v37  ;;  %v2346_v42 = vsub.f32 %v4659_v18, %v4963_v37 }
 0x219   : > { %v2331_v41 = vpop.xlane.xlu1 %2330  ;;  %v2352_v13 = vsub.f32 %v4685_v30, %v4963_v37  ;;  %v2353_v18 = vsub.f32 %v4689_v33, %v4963_v37  ;;  %v2358_v30 = vsub.f32 %v4762_v50, %v4963_v37  ;;  %v2359_v33 = vsub.f32 %v4764_v51, %v4963_v37 }
 0x21a   : > { %4045 = vrsqrt.f32 %v2406_v56  ;;  %v2335_v3 = vmul.f32 0.00024414063, %v2331_v41  ;;  %v2337_v39 = vmul.f32 %v4967_v57, %v4967_v57  ;;  %v2347_v41 = vsub.f32 %v4661_v19, %v4963_v37 }
 0x21b   : > { %vm2414_vm1 = vweird.f32 %v2406_v56  ;;  %v2364_v50 = vsub.f32 %v4830_v53, %v4963_v37  ;;  %v2365_v51 = vsub.f32 %v4836_v58, %v4963_v37  ;;  %v2371_v53 = vsub.f32 %v4920_v45, %v4963_v37 }
 0x21c   : > { %v2339_v7 = vsub.f32 %v2335_v3, %v2337_v39  ;;  %v2360_v39 = vsub.f32 %v4778_v4, %v4963_v37  ;;  %v2366_v4 = vsub.f32 %v4866_v29, %v4963_v37  ;;  %v2372_v58 = vsub.f32 %v4932_v32, %v4963_v37 }
 0x21d   : > { %v2373_v29 = vsub.f32 %v4937_v62, %v4963_v37 }
 0x21e   : > { %v2341_v3 = vmax.f32 %v2339_v7, 0.0 }
 0x220   : > { %v4046_v6 = vpop.eup %4045  ;;  %v5015_v1 = vadd.f32 1e-05, %v2341_v3 }
 0x221   : > { %v2409_v2 = vmul.f32 %v4046_v6, %v2406_v56  ;;  %vm2415_vm0 = vweird.f32 %v4046_v6 }
 0x222   : > { %vm2416_vm2 = vmor %vm2414_vm1, %vm2415_vm0  ;;  %5487 = vst [vmem:[#allocation34_spill] sm:$0xff] %v5015_v1  ;;  %4047 = vrsqrt.f32 %v5015_v1 }
 0x223   : > { %v2410_v59 = vmul.f32 %v4046_v6, %v2409_v2  ;;  %v2348_v2 = vsub.f32 %v4663_v20, %v4963_v37  ;;  %v2354_v20 = vsub.f32 %v4712_v47, %v4963_v37  ;;  %v2361_v47 = vsub.f32 %v4784_v28, %v4963_v37 }
 0x224   : > { %v2367_v28 = vsub.f32 %v4868_v31, %v4963_v37 }
 0x225   : > { %v2411_v43 = vmul.f32 0.5, %v2410_v59  ;;  %v2370_v59 = vsub.f32 %v4916_v40, %v4963_v37 }
 0x227   : > { %v2412_v52 = vsub.f32 1.5, %v2411_v43 }
 0x229   : > { %v2413_v19 = vmul.f32 %v4046_v6, %v2412_v52 }
 0x22b   : > { %v2417_v56 = vsel %vm2416_vm2, %v4046_v6, %v2413_v19 }
 0x22c   : > { %v5039_v6 = vmul.f32 %v2417_v56, %v2342_v9  ;;  %v5041_v54 = vmul.f32 %v2417_v56, %v2343_v49  ;;  %v5046_v40 = vmul.f32 %v2417_v56, %v2344_v38  ;;  %v5048_v45 = vmul.f32 %v2417_v56, %v2345_v55 }
 0x22d   : > { %v5050_v32 = vmul.f32 %v2417_v56, %v2346_v42  ;;  %v5052_v43 = vmul.f32 %v2417_v56, %v2347_v41  ;;  %v5054_v62 = vmul.f32 %v2417_v56, %v2348_v2  ;;  %v5056_v37 = vmul.f32 %v2417_v56, %v2349_v10 }
 0x22e   : > { %v5058_v7 = vmul.f32 %v2417_v56, %v2350_v11  ;;  %v5060_v9 = vmul.f32 %v2417_v56, %v2351_v12  ;;  %v5062_v49 = vmul.f32 %v2417_v56, %v2352_v13  ;;  %v5064_v52 = vmul.f32 %v2417_v56, %v2353_v18  ;;  %v5086_v18 = vpop.eup %4047 }
 0x22f   : > { %v5066_v38 = vmul.f32 %v2417_v56, %v2354_v20  ;;  %v5068_v55 = vmul.f32 %v2417_v56, %v2355_v21  ;;  %v5070_v42 = vmul.f32 %v2417_v56, %v2356_v25  ;;  %v5072_v41 = vmul.f32 %v2417_v56, %v2357_v26 }
 0x230   : > { %v5074_v2 = vmul.f32 %v2417_v56, %v2358_v30  ;;  %v5076_v10 = vmul.f32 %v2417_v56, %v2359_v33  ;;  %v5078_v11 = vmul.f32 %v2417_v56, %v2360_v39  ;;  %v5080_v12 = vmul.f32 %v2417_v56, %v2361_v47 }
 0x231   : > { %v5082_v3 = vmul.f32 %v2417_v56, %v2362_v48  ;;  %v5084_v13 = vmul.f32 %v2417_v56, %v2363_v60  ;;  %v5088_v19 = vmul.f32 %v2417_v56, %v2364_v50  ;;  %v5090_v20 = vmul.f32 %v2417_v56, %v2365_v51 }
 0x232   : > { %v5092_v21 = vmul.f32 %v2417_v56, %v2366_v4  ;;  %v5094_v25 = vmul.f32 %v2417_v56, %v2367_v28  ;;  %v5096_v26 = vmul.f32 %v2417_v56, %v2368_v5  ;;  %v5098_v30 = vmul.f32 %v2417_v56, %v2369_v8 }
 0x233   : > { %v5100_v33 = vmul.f32 %v2417_v56, %v2370_v59  ;;  %v2492_v39 = vmul.f32 0.2, %v5039_v6  ;;  %v5104_v47 = vmul.f32 %v2417_v56, %v2371_v53  ;;  %v5106_v48 = vmul.f32 %v2417_v56, %v2372_v58 }
 0x234   : > { %v2493_v60 = vmul.f32 0.2, %v5041_v54  ;;  %v2494_v50 = vmul.f32 0.2, %v5046_v40  ;;  %v5110_v51 = vmul.f32 %v2417_v56, %v2373_v29  ;;  %v2495_v4 = vmul.f32 0.2, %v5048_v45 }
 0x235   : > { %5488 = vst [vmem:[#allocation35_spill] sm:$0xff] %v5100_v33  ;;  %v2496_v28 = vmul.f32 0.2, %v5050_v32  ;;  %v2497_v5 = vmul.f32 0.2, %v5052_v43  ;;  %v2419_v58 = vmul.f32 %v5086_v18, %v5015_v1  ;;  %v2556_v31 = vmax.f32 %v5039_v6, %v2492_v39 }
 0x236   : > { %v2498_v8 = vmul.f32 0.2, %v5054_v62  ;;  %v2499_v59 = vmul.f32 0.2, %v5056_v37  ;;  %v2500_v53 = vmul.f32 0.2, %v5058_v7  ;;  %v2557_v27 = vmax.f32 %v5041_v54, %v2493_v60 }
 0x237   : > { %v2501_v0 = vmul.f32 0.2, %v5060_v9  ;;  %v2502_v56 = vmul.f32 0.2, %v5062_v49  ;;  %v2503_v29 = vmul.f32 0.2, %v5064_v52  ;;  %v2558_v44 = vmax.f32 %v5046_v40, %v2494_v50 }
 0x238   : > { %v2504_v15 = vmul.f32 0.2, %v5066_v38  ;;  %v2505_v14 = vmul.f32 0.2, %v5068_v55  ;;  %v2506_v61 = vmul.f32 0.2, %v5070_v42  ;;  %v2559_v35 = vmax.f32 %v5048_v45, %v2495_v4 }
 0x239   : > { %v2507_v34 = vmul.f32 0.2, %v5072_v41  ;;  %v2508_v1 = vmul.f32 0.2, %v5074_v2  ;;  %v2509_v46 = vmul.f32 0.2, %v5076_v10  ;;  %v2560_v23 = vmax.f32 %v5050_v32, %v2496_v28 }
 0x23a   : > { %v2510_v36 = vmul.f32 0.2, %v5078_v11  ;;  %v2511_v6 = vmul.f32 0.2, %v5080_v12  ;;  %v2512_v39 = vmul.f32 0.2, %v5082_v3  ;;  %v2561_v40 = vmax.f32 %v5052_v43, %v2497_v5 }
 0x23b   : > { %v2513_v24 = vmul.f32 0.2, %v5084_v13  ;;  %v2514_v54 = vmul.f32 0.2, %v5088_v19  ;;  %v2515_v60 = vmul.f32 0.2, %v5090_v20  ;;  %v2562_v50 = vmax.f32 %v5054_v62, %v2498_v8 }
 0x23c   : > { %v2516_v22 = vmul.f32 0.2, %v5092_v21  ;;  %v2563_v63 = vmax.f32 %v5056_v37, %v2499_v59  ;;  %v2517_v17 = vmul.f32 0.2, %v5094_v25  ;;  %v2518_v45 = vmul.f32 0.2, %v5096_v26 }
 0x23d   : > { %v2564_v4 = vmax.f32 %v5058_v7, %v2500_v53  ;;  %v2565_v16 = vmax.f32 %v5060_v9, %v2501_v0  ;;  %v2519_v32 = vmul.f32 0.2, %v5098_v30  ;;  %v2520_v43 = vmul.f32 0.2, %v5100_v33 }
 0x23e   : > { %v2566_v62 = vmax.f32 %v5062_v49, %v2502_v56  ;;  %v2567_v37 = vmax.f32 %v5064_v52, %v2503_v29  ;;  %v2568_v28 = vmax.f32 %v5066_v38, %v2504_v15  ;;  %v2569_v7 = vmax.f32 %v5068_v55, %v2505_v14  ;;  %v5494_v29 = vld [vmem:[#allocation8_spill] sm:$0xff] }
 0x23f   : > { %v2620_v0 = vpack.c.bf16 %v2557_v27, %v2556_v31  ;;  %v2621_v9 = vpack.c.bf16 %v2559_v35, %v2558_v44  ;;  %v2570_v5 = vmax.f32 %v5070_v42, %v2506_v61  ;;  %v2571_v8 = vmax.f32 %v5072_v41, %v2507_v34 }
 0x240   : > { %v2622_v59 = vpack.c.bf16 %v2561_v40, %v2560_v23  ;;  %v2623_v53 = vpack.c.bf16 %v2563_v63, %v2562_v50  ;;  %v2521_v33 = vmul.f32 0.2, %v5104_v47  ;;  %v2572_v49 = vmax.f32 %v5074_v2, %v2508_v1  ;;  %v5489_v2 = vld [vmem:[#allocation4_spill] sm:$0xff]  ;;  %v5497_v40 = vld [vmem:[#allocation11_spill] sm:$0xff] }
 0x241   : > { %v2573_v52 = vmax.f32 %v5076_v10, %v2509_v46  ;;  %v2624_v56 = vpack.c.bf16 %v2565_v16, %v2564_v4  ;;  %2652 = vst [vmem:[%s5153_s22] sm:$0xff] %v2620_v0  ;;  %v2522_v14 = vmul.f32 0.2, %v5106_v48  ;;  %v2574_v15 = vmax.f32 %v5078_v11, %v2510_v36  ;;  %v5490_v11 = vld [vmem:[#allocation35_spill] sm:$0xff]  ;;  %v5498_v4 = vld [vmem:[#allocation12_spill] sm:$0xff] }
 0x242   : > { %v2575_v35 = vmax.f32 %v5080_v12, %v2511_v6  ;;  %v2625_v44 = vpack.c.bf16 %v2567_v37, %v2566_v62  ;;  %2653 = vst [vmem:[%s5153_s22 + $0x8] sm:$0xff] %v2621_v9  ;;  %v2576_v63 = vmax.f32 %v5082_v3, %v2512_v39  ;;  %v2577_v23 = vmax.f32 %v5084_v13, %v2513_v24  ;;  %v5499_v37 = vld [vmem:[#allocation13_spill] sm:$0xff]  ;;  %v5501_v9 = vld [vmem:[#allocation15_spill] sm:$0xff] }
 0x243   : > { %v2626_v27 = vpack.c.bf16 %v2569_v7, %v2568_v28  ;;  %2654 = vst [vmem:[%s5153_s22 + $0x10] sm:$0xff] %v2622_v59  ;;  %v2420_v16 = vmul.f32 %v5086_v18, %v2419_v58  ;;  %v2523_v46 = vmul.f32 0.2, %v5110_v51  ;;  %v2578_v34 = vmax.f32 %v5088_v19, %v2514_v54  ;;  %v5496_v54 = vld [vmem:[#allocation10_spill] sm:$0xff] }
 0x244   : > { %v2579_v36 = vmax.f32 %v5090_v20, %v2515_v60  ;;  %v2627_v61 = vpack.c.bf16 %v2571_v8, %v2570_v5  ;;  %2655 = vst [vmem:[%s5153_s22 + $0x18] sm:$0xff] %v2623_v53  ;;  %v2580_v1 = vmax.f32 %v5092_v21, %v2516_v22  ;;  %v2581_v31 = vmax.f32 %v5094_v25, %v2517_v17  ;;  %v5491_v21 = vld [vmem:[#allocation5_spill] sm:$0xff]  ;;  %v5500_v7 = vld [vmem:[#allocation14_spill] sm:$0xff]  ;;  %v5502_v8 = vld [vmem:[#allocation16_spill] sm:$0xff] }
 0x245   : > { %v2628_v38 = vpack.c.bf16 %v2573_v52, %v2572_v49  ;;  %2656 = vst [vmem:[%s5153_s22 + $0x20] sm:$0xff] %v2624_v56  ;;  %v2421_v24 = vmul.f32 0.5, %v2420_v16  ;;  %v2582_v55 = vmax.f32 %v5096_v26, %v2518_v45  ;;  %v2583_v42 = vmax.f32 %v5098_v30, %v2519_v32  ;;  %v5492_v30 = vld [vmem:[#allocation6_spill] sm:$0xff]  ;;  %v5503_v53 = vld [vmem:[#allocation17_spill] sm:$0xff] }
 0x246   : > { %v2629_v41 = vpack.c.bf16 %v2575_v35, %v2574_v15  ;;  %2657 = vst [vmem:[%s5153_s22 + $0x28] sm:$0xff] %v2625_v44  ;;  %v2376_v10 = vsub.f32 %v5489_v2, %v4967_v57  ;;  %v2584_v12 = vmax.f32 %v5490_v11, %v2520_v43  ;;  %v2585_v22 = vmax.f32 %v5104_v47, %v2521_v33  ;;  %v5493_v33 = vld [vmem:[#allocation7_spill] sm:$0xff]  ;;  %v5504_v52 = vld [vmem:[#allocation18_spill] sm:$0xff]  ;;  %v5507_v44 = vld [vmem:[#allocation20_spill] sm:$0xff] }
 0x247   : > { %v2630_v17 = vpack.c.bf16 %v2577_v23, %v2576_v63  ;;  %2658 = vst [vmem:[%s5153_s22 + $0x30] sm:$0xff] %v2626_v27  ;;  %v2422_v3 = vsub.f32 1.5, %v2421_v24  ;;  %v2586_v13 = vmax.f32 %v5106_v48, %v2522_v14  ;;  %v2587_v19 = vmax.f32 %v5110_v51, %v2523_v46  ;;  %v5495_v51 = vld [vmem:[#allocation9_spill] sm:$0xff]  ;;  %v5505_v14 = vld [vmem:[#allocation34_spill] sm:$0xff]  ;;  %v5506_v15 = vld [vmem:[#allocation19_spill] sm:$0xff] }
 0x248   : > { %v2631_v20 = vpack.c.bf16 %v2579_v36, %v2578_v34  ;;  %2659 = vst [vmem:[%s5153_s22 + $0x38] sm:$0xff] %v2627_v61  ;;  %v2377_v25 = vsub.f32 %v5491_v21, %v4967_v57  ;;  %v2632_v26 = vpack.c.bf16 %v2581_v31, %v2580_v1  ;;  %v2378_v58 = vsub.f32 %v5492_v30, %v4967_v57  ;;  %v5508_v23 = vld [vmem:[#allocation21_spill] sm:$0xff]  ;;  %v5509_v16 = vld [vmem:[#allocation22_spill] sm:$0xff]  ;;  %v5510_v34 = vld [vmem:[#allocation23_spill] sm:$0xff] }
 0x249   : > { %2660 = vst [vmem:[%s5153_s22 + $0x40] sm:$0xff] %v2628_v38  ;;  %v2379_v47 = vsub.f32 %v5493_v33, %v4967_v57  ;;  %v2380_v48 = vsub.f32 %v5494_v29, %v4967_v57  ;;  %v2633_v6 = vpack.c.bf16 %v2583_v42, %v2582_v55  ;;  %v2381_v39 = vsub.f32 %v5495_v51, %v4967_v57  ;;  %v5511_v61 = vld [vmem:[#allocation24_spill] sm:$0xff]  ;;  %v5512_v31 = vld [vmem:[#allocation25_spill] sm:$0xff]  ;;  %v5513_v55 = vld [vmem:[#allocation26_spill] sm:$0xff] }
 0x24a   : > { %2661 = vst [vmem:[%s5153_s22 + $0x48] sm:$0xff] %v2629_v41  ;;  %v2382_v60 = vsub.f32 %v5496_v54, %v4967_v57  ;;  %v2383_v50 = vsub.f32 %v5497_v40, %v4967_v57  ;;  %v2634_v45 = vpack.c.bf16 %v2585_v22, %v2584_v12  ;;  %v2384_v32 = vsub.f32 %v5498_v4, %v4967_v57  ;;  %v5514_v41 = vld [vmem:[#allocation27_spill] sm:$0xff]  ;;  %v5515_v11 = vld [vmem:[#allocation28_spill] sm:$0xff]  ;;  %v5516_v22 = vld [vmem:[#allocation29_spill] sm:$0xff] }
 0x24b   : > { %2662 = vst [vmem:[%s5153_s22 + $0x50] sm:$0xff] %v2630_v17  ;;  %v2423_v43 = vmul.f32 %v5086_v18, %v2422_v3  ;;  %vm2425_vm3 = vweird.f32 %v5086_v18  ;;  %v2635_v62 = vpack.c.bf16 %v2587_v19, %v2586_v13  ;;  %v2385_v28 = vsub.f32 %v5499_v37, %v4967_v57  ;;  %v5517_v3 = vld [vmem:[#allocation30_spill] sm:$0xff]  ;;  %v5518_v19 = vld [vmem:[#allocation31_spill] sm:$0xff] }
 0x24c   : > { %2663 = vst [vmem:[%s5153_s22 + $0x58] sm:$0xff] %v2631_v20  ;;  %v2386_v0 = vsub.f32 %v5500_v7, %v4967_v57  ;;  %v2387_v5 = vsub.f32 %v5501_v9, %v4967_v57  ;;  %v2388_v59 = vsub.f32 %v5502_v8, %v4967_v57  ;;  %v2389_v49 = vsub.f32 %v5503_v53, %v4967_v57  ;;  %v5521_v33 = vld [vmem:[#allocation2_spill] sm:$0xff]  ;;  %v5523_v51 = vld [vmem:[#allocation3_spill] sm:$0xff] }
 0x24d   : > { %2664 = vst [vmem:[%s5153_s22 + $0x60] sm:$0xff] %v2632_v26  ;;  %v2390_v56 = vsub.f32 %v5504_v52, %v4967_v57  ;;  %vm2424_vm4 = vweird.f32 %v5505_v14  ;;  %v2391_v35 = vsub.f32 %v5506_v15, %v4967_v57  ;;  %v2392_v63 = vsub.f32 %v5507_v44, %v4967_v57  ;;  %v5520_v26 = vld [vmem:[#allocation33_spill] sm:$0xff] }
 0x24e   : > { %2665 = vst [vmem:[%s5153_s22 + $0x68] sm:$0xff] %v2633_v6  ;;  %v2393_v27 = vsub.f32 %v5508_v23, %v4967_v57  ;;  %v2394_v46 = vsub.f32 %v5509_v16, %v4967_v57  ;;  %vm2426_vm5 = vmor %vm2424_vm4, %vm2425_vm3  ;;  %v2395_v36 = vsub.f32 %v5510_v34, %v4967_v57  ;;  %v2396_v1 = vsub.f32 %v5511_v61, %v4967_v57 }
 0x24f   : > { %2666 = vst [vmem:[%s5153_s22 + $0x70] sm:$0xff] %v2634_v45  ;;  %v2397_v38 = vsub.f32 %v5512_v31, %v4967_v57  ;;  %v2427_v24 = vsel %vm2426_vm5, %v5086_v18, %v2423_v43  ;;  %v2398_v42 = vsub.f32 %v5513_v55, %v4967_v57  ;;  %v2399_v2 = vsub.f32 %v5514_v41, %v4967_v57  ;;  %v5519_v18 = vld [vmem:[#allocation32_spill] sm:$0xff] }
 0x250   : > { %2667 = vst [vmem:[%s5153_s22 + $0x78] sm:$0xff] %v2635_v62  ;;  %v2400_v12 = vsub.f32 %v5515_v11, %v4967_v57  ;;  %v2401_v17 = vsub.f32 %v5516_v22, %v4967_v57  ;;  %v2402_v13 = vsub.f32 %v5517_v3, %v4967_v57  ;;  %v2403_v20 = vsub.f32 %v5518_v19, %v4967_v57 }
 0x251   : > { %v2404_v21 = vsub.f32 %v5519_v18, %v4967_v57  ;;  %v2405_v30 = vsub.f32 %v5520_v26, %v4967_v57  ;;  %v5522_v29 = vsub.f32 %v5521_v33, %v4967_v57  ;;  %v5524_v54 = vsub.f32 %v5523_v51, %v4967_v57 }
 0x252   : > { %v5275_v45 = vmul.f32 %v2427_v24, %v2376_v10  ;;  %v5277_v4 = vmul.f32 %v2427_v24, %v2377_v25  ;;  %v5279_v43 = vmul.f32 %v2427_v24, %v2378_v58  ;;  %v5281_v62 = vmul.f32 %v2427_v24, %v2379_v47 }
 0x253   : > { %v5268_v6 = vmul.f32 %v2427_v24, %v5522_v29  ;;  %v5273_v40 = vmul.f32 %v2427_v24, %v5524_v54  ;;  %v5283_v37 = vmul.f32 %v2427_v24, %v2380_v48  ;;  %v5285_v7 = vmul.f32 %v2427_v24, %v2381_v39 }
 0x254   : > { %v5287_v9 = vmul.f32 %v2427_v24, %v2382_v60  ;;  %v5289_v8 = vmul.f32 %v2427_v24, %v2383_v50  ;;  %v5291_v53 = vmul.f32 %v2427_v24, %v2384_v32  ;;  %v5293_v57 = vmul.f32 %v2427_v24, %v2385_v28 }
 0x255   : > { %v5295_v10 = vmul.f32 %v2427_v24, %v2386_v0  ;;  %v5297_v25 = vmul.f32 %v2427_v24, %v2387_v5  ;;  %v5299_v58 = vmul.f32 %v2427_v24, %v2388_v59  ;;  %v5301_v47 = vmul.f32 %v2427_v24, %v2389_v49 }
 0x256   : > { %v5303_v48 = vmul.f32 %v2427_v24, %v2390_v56  ;;  %v5305_v39 = vmul.f32 %v2427_v24, %v2391_v35  ;;  %v5307_v60 = vmul.f32 %v2427_v24, %v2392_v63  ;;  %v5309_v50 = vmul.f32 %v2427_v24, %v2393_v27 }
 0x257   : > { %v5311_v32 = vmul.f32 %v2427_v24, %v2394_v46  ;;  %v5313_v28 = vmul.f32 %v2427_v24, %v2395_v36  ;;  %v5315_v0 = vmul.f32 %v2427_v24, %v2396_v1  ;;  %v5317_v5 = vmul.f32 %v2427_v24, %v2397_v38 }
 0x258   : > { %v5319_v59 = vmul.f32 %v2427_v24, %v2398_v42  ;;  %v5321_v49 = vmul.f32 %v2427_v24, %v2399_v2  ;;  %v5323_v52 = vmul.f32 %v2427_v24, %v2400_v12  ;;  %v2524_v56 = vmul.f32 0.2, %v5268_v6 }
 0x259   : > { %v5326_v14 = vmul.f32 %v2427_v24, %v2401_v17  ;;  %v5328_v15 = vmul.f32 %v2427_v24, %v2402_v13  ;;  %v5330_v35 = vmul.f32 %v2427_v24, %v2403_v20  ;;  %v2525_v44 = vmul.f32 0.2, %v5273_v40 }
 0x25a   : > { %v5333_v63 = vmul.f32 %v2427_v24, %v2404_v21  ;;  %v2526_v23 = vmul.f32 0.2, %v5275_v45  ;;  %v2527_v27 = vmul.f32 0.2, %v5277_v4  ;;  %v2528_v16 = vmul.f32 0.2, %v5279_v43 }
 0x25b   : > { %v5338_v46 = vmul.f32 %v2427_v24, %v2405_v30  ;;  %v2529_v34 = vmul.f32 0.2, %v5281_v62  ;;  %v2530_v36 = vmul.f32 0.2, %v5283_v37  ;;  %v2531_v61 = vmul.f32 0.2, %v5285_v7 }
 0x25c   : > { %v2532_v1 = vmul.f32 0.2, %v5287_v9  ;;  %v2533_v31 = vmul.f32 0.2, %v5289_v8  ;;  %v2534_v38 = vmul.f32 0.2, %v5291_v53  ;;  %v2588_v55 = vmax.f32 %v5268_v6, %v2524_v56 }
 0x25d   : > { %v2535_v42 = vmul.f32 0.2, %v5293_v57  ;;  %v2536_v41 = vmul.f32 0.2, %v5295_v10  ;;  %v2537_v24 = vmul.f32 0.2, %v5297_v25  ;;  %v2589_v2 = vmax.f32 %v5273_v40, %v2525_v44 }
 0x25e   : > { %v2538_v11 = vmul.f32 0.2, %v5299_v58  ;;  %v2539_v12 = vmul.f32 0.2, %v5301_v47  ;;  %v2540_v22 = vmul.f32 0.2, %v5303_v48  ;;  %v2590_v17 = vmax.f32 %v5275_v45, %v2526_v23 }
 0x25f   : > { %v2541_v3 = vmul.f32 0.2, %v5305_v39  ;;  %v2542_v13 = vmul.f32 0.2, %v5307_v60  ;;  %v2543_v19 = vmul.f32 0.2, %v5309_v50  ;;  %v2591_v20 = vmax.f32 %v5277_v4, %v2527_v27 }
 0x260   : > { %v2544_v18 = vmul.f32 0.2, %v5311_v32  ;;  %v2545_v21 = vmul.f32 0.2, %v5313_v28  ;;  %v2546_v26 = vmul.f32 0.2, %v5315_v0  ;;  %v2592_v30 = vmax.f32 %v5279_v43, %v2528_v16 }
 0x261   : > { %v2547_v33 = vmul.f32 0.2, %v5317_v5  ;;  %v2593_v29 = vmax.f32 %v5281_v62, %v2529_v34  ;;  %v2594_v6 = vmax.f32 %v5283_v37, %v2530_v36  ;;  %v2595_v51 = vmax.f32 %v5285_v7, %v2531_v61 }
 0x262   : > { %v2548_v54 = vmul.f32 0.2, %v5319_v59  ;;  %v2549_v40 = vmul.f32 0.2, %v5321_v49  ;;  %v2596_v45 = vmax.f32 %v5287_v9, %v2532_v1  ;;  %v2597_v4 = vmax.f32 %v5289_v8, %v2533_v31 }
 0x263   : > { %v2550_v56 = vmul.f32 0.2, %v5323_v52  ;;  %v2551_v43 = vmul.f32 0.2, %v5326_v14  ;;  %v2598_v44 = vmax.f32 %v5291_v53, %v2534_v38  ;;  %v2599_v62 = vmax.f32 %v5293_v57, %v2535_v42 }
 0x264   : > { %v2600_v37 = vmax.f32 %v5295_v10, %v2536_v41  ;;  %v2601_v7 = vmax.f32 %v5297_v25, %v2537_v24  ;;  %v2636_v23 = vpack.c.bf16 %v2589_v2, %v2588_v55  ;;  %v2637_v27 = vpack.c.bf16 %v2591_v20, %v2590_v17 }
 0x265   : > { %v2602_v9 = vmax.f32 %v5299_v58, %v2538_v11  ;;  %v2603_v8 = vmax.f32 %v5301_v47, %v2539_v12  ;;  %v2638_v16 = vpack.c.bf16 %v2593_v29, %v2592_v30  ;;  %v2639_v34 = vpack.c.bf16 %v2595_v51, %v2594_v6 }
 0x266   : > { %v2552_v36 = vmul.f32 0.2, %v5328_v15  ;;  %v2604_v53 = vmax.f32 %v5303_v48, %v2540_v22  ;;  %v2605_v57 = vmax.f32 %v5305_v39, %v2541_v3  ;;  %v2640_v61 = vpack.c.bf16 %v2597_v4, %v2596_v45  ;;  %2668 = vst [vmem:[%s5153_s22 + $0x80] sm:$0xff] %v2636_v23 }
 0x267   : > { %v2553_v10 = vmul.f32 0.2, %v5330_v35  ;;  %v2606_v25 = vmax.f32 %v5307_v60, %v2542_v13  ;;  %v2607_v58 = vmax.f32 %v5309_v50, %v2543_v19  ;;  %v2641_v47 = vpack.c.bf16 %v2599_v62, %v2598_v44  ;;  %2669 = vst [vmem:[%s5153_s22 + $0x88] sm:$0xff] %v2637_v27 }
 0x268   : > { %v2554_v1 = vmul.f32 0.2, %v5333_v63  ;;  %v2608_v31 = vmax.f32 %v5311_v32, %v2544_v18  ;;  %v2609_v48 = vmax.f32 %v5313_v28, %v2545_v21  ;;  %v2642_v39 = vpack.c.bf16 %v2601_v7, %v2600_v37  ;;  %2670 = vst [vmem:[%s5153_s22 + $0x90] sm:$0xff] %v2638_v16 }
 0x269   : > { %v2555_v38 = vmul.f32 0.2, %v5338_v46  ;;  %v2610_v55 = vmax.f32 %v5315_v0, %v2546_v26  ;;  %v2611_v60 = vmax.f32 %v5317_v5, %v2547_v33  ;;  %v2643_v50 = vpack.c.bf16 %v2603_v8, %v2602_v9  ;;  %2671 = vst [vmem:[%s5153_s22 + $0x98] sm:$0xff] %v2639_v34 }
 0x26a   : > { %v2612_v42 = vmax.f32 %v5319_v59, %v2548_v54  ;;  %v2613_v41 = vmax.f32 %v5321_v49, %v2549_v40  ;;  %v2644_v32 = vpack.c.bf16 %v2605_v57, %v2604_v53  ;;  %2672 = vst [vmem:[%s5153_s22 + $0xa0] sm:$0xff] %v2640_v61  ;;  %v2614_v28 = vmax.f32 %v5323_v52, %v2550_v56 }
 0x26b   : > { %v2615_v24 = vmax.f32 %v5326_v14, %v2551_v43  ;;  %v2645_v2 = vpack.c.bf16 %v2607_v58, %v2606_v25  ;;  %2673 = vst [vmem:[%s5153_s22 + $0xa8] sm:$0xff] %v2641_v47  ;;  %v2616_v0 = vmax.f32 %v5328_v15, %v2552_v36  ;;  %v2617_v5 = vmax.f32 %v5330_v35, %v2553_v10 }
 0x26c   : > { %v2646_v59 = vpack.c.bf16 %v2609_v48, %v2608_v31  ;;  %2674 = vst [vmem:[%s5153_s22 + $0xb0] sm:$0xff] %v2642_v39  ;;  %v2618_v49 = vmax.f32 %v5333_v63, %v2554_v1  ;;  %v2619_v52 = vmax.f32 %v5338_v46, %v2555_v38  ;;  %v2647_v11 = vpack.c.bf16 %v2611_v60, %v2610_v55 }
 0x26d   : > { %2675 = vst [vmem:[%s5153_s22 + $0xb8] sm:$0xff] %v2643_v50  ;;  %v2648_v14 = vpack.c.bf16 %v2613_v41, %v2612_v42  ;;  %v2649_v12 = vpack.c.bf16 %v2615_v24, %v2614_v28  ;;  %v2650_v22 = vpack.c.bf16 %v2617_v5, %v2616_v0 }
 0x26e   : > { %2676 = vst [vmem:[%s5153_s22 + $0xc0] sm:$0xff] %v2644_v32  ;;  %v2651_v15 = vpack.c.bf16 %v2619_v52, %v2618_v49 }
 0x26f   : > { %2677 = vst [vmem:[%s5153_s22 + $0xc8] sm:$0xff] %v2645_v2 }
 0x270   : > { %2678 = vst [vmem:[%s5153_s22 + $0xd0] sm:$0xff] %v2646_v59 }
 0x271   : > { %2679 = vst [vmem:[%s5153_s22 + $0xd8] sm:$0xff] %v2647_v11 }
 0x272   : > { %2680 = vst [vmem:[%s5153_s22 + $0xe0] sm:$0xff] %v2648_v14 }
 0x273   : > { %2681 = vst [vmem:[%s5153_s22 + $0xe8] sm:$0xff] %v2649_v12 }
 0x274   : > { %2682 = vst [vmem:[%s5153_s22 + $0xf0] sm:$0xff] %v2650_v22 }
 0x275   : > { %2683 = vst [vmem:[%s5153_s22 + $0xf8] sm:$0xff] %v2651_v15 }
 0x276 PF: > { %s12_s9 = sadd.s32 1, %s4056_s9  }
 0x277   : > { %p9_p4 = scmp.ge.s32.totalorder %s12_s9, 4  }
 0x279   :  { %11 = sbr.rel (!%p9_p4) target bundleno = 1 (0x1), region = 58 }

// kernel: _lambda_.6
= control target key start
LH: loop header
LB: loop body
LE: loop exit
PB: predicated region body
PF: predicated region fallthrough
CT: control target
= control target key end

     0   :  { %s1849_s12 = smov 0   ;;  %s2549_s0 = inlined_call_operand.vmem [shape: bf16[2,64,896], index: 0, kind: input, shape index: {}]   ;;  %s2550_s1 = inlined_call_operand.vmem [shape: bf16[128,64], index: 1, kind: input, shape index: {}]   ;;  %s2551_s2 = inlined_call_operand.vmem [shape: f32[1,768], index: 2, kind: input, shape index: {}]   ;;  %s2552_s3 = inlined_call_operand.vmem [shape: bf16[2,16,768], index: 3, kind: output, shape index: {}]  }
   0x1 LB: > { %s1536_s13 = sadd.s32 4294967295, %s1820_s12   ;;  %p1540_p0 = scmp.ge.s32.totalorder %s1820_s12, 1  ;;  %s1820_s12 = sphi %s1849_s12, %s13_s12  }
   0x2   : > { %p137_p1 = scmp.lt.s32.totalorder %s1820_s12, 3 }
   0x4   : > { %p138_p2 = pnand %p1540_p0, %p137_p1 }
   0x5   : > { %p161_p3 = scmp.lt.s32.totalorder (!%p138_p2), %s1536_s13, 1  ;;  %s1822_s7 = smov (!%p138_p2), 38  }
   0x6   : > { %141 = sbr.rel (%p138_p2) target bundleno = 718 (0x2ce), region = 32  ;;  %s1823_s8 = smov (!%p138_p2), 127  }
   0x7   : > { %s1824_s9 = smov (!%p138_p2), 37   ;;  %s1825_s10 = smov (!%p138_p2), 119  }
   0x8   : > { %s1826_s11 = smov (!%p138_p2), 118   ;;  %s1828_s15 = smov (!%p138_p2), 46  }
   0xb   : > { %s2554_s13 = smov (!%p161_p3, %s1536_s13), 1  ;;  %v1904_v43 = vld [vmem:[%s2550_s1] sm:$0xff]  ;;  %v1909_v44 = vld [vmem:[%s2550_s1 + $0x30] sm:$0xff]  ;;  %vm404_vm0 = vcmask 523264   ;;  %v1924_v50 = vld [vmem:[%s2550_s1 + $0x8] sm:$0xff]  ;;  %vm812_vm1 = vcmask 1039360  }
   0xc   : > { %s1793_s14 = smul.u32 224, %s2554_s13  ;;  %v1929_v51 = vld [vmem:[%s2550_s1 + $0x38] sm:$0xff]  ;;  %v1948_v58 = vld [vmem:[%s2550_s1 + $0x10] sm:$0xff]  ;;  %vm891_vm2 = vcmask 973824   ;;  %vm1207_vm3 = vcmask 310272   ;;  %vm970_vm4 = vcmask 965632  }
   0xd   : > { %vm1049_vm5 = vcmask 384000   ;;  %vm1128_vm6 = vcmask 375808   ;;  %vm1286_vm7 = vcmask 302080   ;;  %s1794_s18 = smul.u32 48, %s2554_s13 }
   0xe   : > { %s1863_s17 = scalar_lea.vmem %s2549_s0, %s1793_s14  ;;  %s1827_s14 = smov 47  }
   0xf   : > { %v1661_v0 = vld [vmem:[%s1863_s17 + $0xa8] sm:$0xf]  ;;  %v1777_v1 = vld [vmem:[%s1863_s17 + $0xc0] sm:$0xf0]  ;;  %v1774_v2 = vld [vmem:[%s1863_s17 + $0xac] sm:$0xf]  ;;  %s2526_s21 = scalar_lea.vmem %s2552_s3, %s1794_s18 }
  0x10   : > { %v1662_v3 = vor.u32 %v1777_v1, %v1661_v0  ;;  %v1663_v4 = vld [vmem:[%s1863_s17 + $0xc4] sm:$0xf0]  ;;  %v1669_v5 = vld [vmem:[%s1863_s17 + $0xb0] sm:$0xf]  ;;  %v1778_v6 = vld [vmem:[%s1863_s17 + $0xc8] sm:$0xf0] }
  0x11   : > { %v1666_v7 = vor.u32 %v1774_v2, %v1663_v4  ;;  %v1871_v8 = vor.u32 %v1778_v6, %v1669_v5  ;;  %v1633_v9 = vld [vmem:[%s1863_s17 + $0x70] sm:$0xf]  ;;  %v1770_v10 = vld [vmem:[%s1863_s17 + $0x88] sm:$0xf0]  ;;  %v1767_v11 = vld [vmem:[%s1863_s17 + $0x74] sm:$0xf] }
  0x12   : > { %433 = vmatpush.bf16.msra.mxu0 %v1662_v3  ;;  %1781 = vmatpush.bf16.msra.mxu3 %v1662_v3  ;;  %v1634_v12 = vor.u32 %v1770_v10, %v1633_v9  ;;  %v1635_v13 = vld [vmem:[%s1863_s17 + $0x8c] sm:$0xf0]  ;;  %v1641_v14 = vld [vmem:[%s1863_s17 + $0x78] sm:$0xf]  ;;  %v1771_v15 = vld [vmem:[%s1863_s17 + $0x90] sm:$0xf0] }
  0x13   : > { %482 = vmatpush.bf16.msra.mxu1 %v1666_v7  ;;  %531 = vmatpush.bf16.msra.mxu2 %v1871_v8  ;;  %v1638_v16 = vor.u32 %v1767_v11, %v1635_v13  ;;  %v1880_v17 = vor.u32 %v1771_v15, %v1641_v14  ;;  %v1605_v18 = vld [vmem:[%s1863_s17 + $0x38] sm:$0xf]  ;;  %v1763_v19 = vld [vmem:[%s1863_s17 + $0x50] sm:$0xf0]  ;;  %v1760_v20 = vld [vmem:[%s1863_s17 + $0x3c] sm:$0xf] }
  0x14   : > { %v1607_v21 = vld [vmem:[%s1863_s17 + $0x54] sm:$0xf0]  ;;  %v1613_v22 = vld [vmem:[%s1863_s17 + $0x40] sm:$0xf]  ;;  %v1764_v23 = vld [vmem:[%s1863_s17 + $0x58] sm:$0xf0]  ;;  %v1606_v24 = vor.u32 %v1763_v19, %v1605_v18 }
  0x15   : > { %v1610_v25 = vor.u32 %v1760_v20, %v1607_v21  ;;  %v1614_v26 = vor.u32 %v1764_v23, %v1613_v22  ;;  %v1577_v27 = vld [vmem:[%s1863_s17] sm:$0xf]  ;;  %v1756_v28 = vld [vmem:[%s1863_s17 + $0x18] sm:$0xf0]  ;;  %v1753_v29 = vld [vmem:[%s1863_s17 + $0x4] sm:$0xf] }
  0x16   : > { %434 = vmatpush.bf16.msra.mxu0 %v1634_v12  ;;  %1782 = vmatpush.bf16.msra.mxu3 %v1634_v12  ;;  %v1579_v30 = vld [vmem:[%s1863_s17 + $0x1c] sm:$0xf0]  ;;  %v1585_v31 = vld [vmem:[%s1863_s17 + $0x8] sm:$0xf]  ;;  %v1757_v32 = vld [vmem:[%s1863_s17 + $0x20] sm:$0xf0]  ;;  %v1578_v35 = vor.u32 %v1756_v28, %v1577_v27 }
  0x17   : > { %483 = vmatpush.bf16.msra.mxu1 %v1638_v16  ;;  %532 = vmatpush.bf16.msra.mxu2 %v1880_v17  ;;  %v1685_v33 = vld [vmem:[%s1863_s17 + $0xc0] sm:$0xf]  ;;  %v1780_v34 = vld [vmem:[%s1863_s17 + $0xd8] sm:$0xf0]  ;;  %v1582_v36 = vor.u32 %v1753_v29, %v1579_v30  ;;  %v1586_v37 = vor.u32 %v1757_v32, %v1585_v31  ;;  %v1677_v38 = vld [vmem:[%s1863_s17 + $0xb8] sm:$0xf] }
  0x18   : > { %v1686_v39 = vor.u32 %v1780_v34, %v1685_v33  ;;  %v1779_v40 = vld [vmem:[%s1863_s17 + $0xd0] sm:$0xf0]  ;;  %v1776_v41 = vld [vmem:[%s1863_s17 + $0xbc] sm:$0xf]  ;;  %v1679_v42 = vld [vmem:[%s1863_s17 + $0xd4] sm:$0xf0] }
  0x19   : > { %v1678_v45 = vor.u32 %v1779_v40, %v1677_v38  ;;  %v1682_v46 = vor.u32 %v1776_v41, %v1679_v42  ;;  %v1657_v47 = vld [vmem:[%s1863_s17 + $0x88] sm:$0xf]  ;;  %v1773_v48 = vld [vmem:[%s1863_s17 + $0xa0] sm:$0xf0]  ;;  %v1649_v52 = vld [vmem:[%s1863_s17 + $0x80] sm:$0xf] }
  0x1a   : > { %435 = vmatpush.bf16.msra.mxu0 %v1606_v24  ;;  %1783 = vmatpush.bf16.msra.mxu3 %v1606_v24  ;;  %v1658_v49 = vor.u32 %v1773_v48, %v1657_v47  ;;  %v1772_v53 = vld [vmem:[%s1863_s17 + $0x98] sm:$0xf0]  ;;  %v1769_v54 = vld [vmem:[%s1863_s17 + $0x84] sm:$0xf]  ;;  %v1651_v56 = vld [vmem:[%s1863_s17 + $0x9c] sm:$0xf0] }
  0x1b   : > { %484 = vmatpush.bf16.msra.mxu1 %v1610_v25  ;;  %533 = vmatpush.bf16.msra.mxu2 %v1614_v26  ;;  %v1650_v55 = vor.u32 %v1772_v53, %v1649_v52  ;;  %v1654_v57 = vor.u32 %v1769_v54, %v1651_v56  ;;  %v1629_v59 = vld [vmem:[%s1863_s17 + $0x50] sm:$0xf]  ;;  %v1766_v60 = vld [vmem:[%s1863_s17 + $0x68] sm:$0xf0]  ;;  %v1621_v61 = vld [vmem:[%s1863_s17 + $0x48] sm:$0xf] }
  0x1c   : > { %v1630_v62 = vor.u32 %v1766_v60, %v1629_v59  ;;  %v1765_v63 = vld [vmem:[%s1863_s17 + $0x60] sm:$0xf0]  ;;  %v1762_v0 = vld [vmem:[%s1863_s17 + $0x4c] sm:$0xf]  ;;  %v1623_v1 = vld [vmem:[%s1863_s17 + $0x64] sm:$0xf0] }
  0x1d   : > { %v1622_v2 = vor.u32 %v1765_v63, %v1621_v61  ;;  %v1626_v3 = vor.u32 %v1762_v0, %v1623_v1  ;;  %v1967_v4 = vld [vmem:[%s2550_s1 + $0x18] sm:$0xff]  ;;  %v1775_v5 = vld [vmem:[%s1863_s17 + $0xb4] sm:$0xf]  ;;  %v1671_v6 = vld [vmem:[%s1863_s17 + $0xcc] sm:$0xf0] }
  0x1e   : > { %436 = vmatpush.bf16.msra.mxu0 %v1578_v35  ;;  %1784 = vmatpush.bf16.msra.mxu3 %v1578_v35  ;;  %v1643_v9 = vld [vmem:[%s1863_s17 + $0x94] sm:$0xf0]  ;;  %v1759_v11 = vld [vmem:[%s1863_s17 + $0x30] sm:$0xf0]  ;;  %v1593_v13 = vld [vmem:[%s1863_s17 + $0x10] sm:$0xf] }
  0x1f   : > { %485 = vmatpush.bf16.msra.mxu1 %v1582_v36  ;;  %534 = vmatpush.bf16.msra.mxu2 %v1586_v37  ;;  %v1601_v10 = vld [vmem:[%s1863_s17 + $0x18] sm:$0xf]  ;;  %v1758_v15 = vld [vmem:[%s1863_s17 + $0x28] sm:$0xf0]  ;;  %v1587_v21 = vld [vmem:[%s1863_s17 + $0x24] sm:$0xf0] }
  0x20   : > { %v1602_v12 = vor.u32 %v1759_v11, %v1601_v10  ;;  %v1594_v18 = vor.u32 %v1758_v15, %v1593_v13  ;;  %v1754_v20 = vld [vmem:[%s1863_s17 + $0xc] sm:$0xf]  ;;  %v1992_v23 = vld [vmem:[%s2550_s1 + $0x20] sm:$0xff]  ;;  %v1755_v24 = vld [vmem:[%s1863_s17 + $0x14] sm:$0xf] }
  0x21   : > { %1687 = vmatmul.msk.bf16.vlgmr.msra.gmra.mxu0 %vm404_vm0, %v1904_v43  ;;  %1693 = vmatmul.msk.bf16.vlgmr.msra.gmra.mxu3 %vm404_vm0, %v1909_v44  ;;  %v1590_v22 = vor.u32 %v1754_v20, %v1587_v21  ;;  %v2007_v27 = vld [vmem:[%s2550_s1 + $0x28] sm:$0xff] }
  0x22   : > { %1785 = vmatpush.bf16.msrb.mxu3 %v1666_v7  ;;  %1695 = vmatmul.msk.bf16.vlgmr.msra.gmra.mxu1 %vm404_vm0, %v1904_v43  ;;  %v1768_v7 = vld [vmem:[%s1863_s17 + $0x7c] sm:$0xf] }
  0x23   : > { %727 = vmatpush.bf16.msrb.mxu2 %v1686_v39  ;;  %629 = vmatpush.bf16.msrb.mxu0 %v1678_v45  ;;  %v1646_v14 = vor.u32 %v1768_v7, %v1643_v9 }
  0x24   : > { %1703 = vmatmul.msk.bf16.vlgmr.msra.gmra.mxu2 %vm404_vm0, %v1904_v43  ;;  %678 = vmatpush.bf16.msrb.mxu1 %v1682_v46 }
  0x26   : > { %1786 = vmatpush.bf16.msrb.mxu3 %v1638_v16  ;;  %v1761_v16 = vld [vmem:[%s1863_s17 + $0x44] sm:$0xf] }
  0x27   : > { %728 = vmatpush.bf16.msrb.mxu2 %v1658_v49  ;;  %630 = vmatpush.bf16.msrb.mxu0 %v1650_v55 }
  0x28   : > { %679 = vmatpush.bf16.msrb.mxu1 %v1654_v57 }
  0x2a   : > { %1787 = vmatpush.bf16.msrb.mxu3 %v1610_v25  ;;  %v1595_v25 = vld [vmem:[%s1863_s17 + $0x2c] sm:$0xf0] }
  0x2b   : > { %729 = vmatpush.bf16.msrb.mxu2 %v1630_v62  ;;  %631 = vmatpush.bf16.msrb.mxu0 %v1622_v2 }
  0x2c   : > { %680 = vmatpush.bf16.msrb.mxu1 %v1626_v3 }
  0x2e   : > { %1788 = vmatpush.bf16.msrb.mxu3 %v1582_v36 }
  0x2f   : > { %730 = vmatpush.bf16.msrb.mxu2 %v1602_v12  ;;  %632 = vmatpush.bf16.msrb.mxu0 %v1594_v18 }
  0x31   : > { %1688 = vmatmul.msk.bf16.gmra.mxu0 %vm404_vm0, %v1924_v50  ;;  %1694 = vmatmul.msk.bf16.gmra.mxu3 %vm404_vm0, %v1929_v51 }
  0x32   : > { %1789 = vmatpush.bf16.msra.mxu3 %v1871_v8  ;;  %1696 = vmatmul.msk.bf16.gmra.mxu1 %vm404_vm0, %v1924_v50  ;;  %v1674_v8 = vor.u32 %v1775_v5, %v1671_v6 }
  0x34   : > { %1704 = vmatmul.msk.bf16.gmra.mxu2 %vm404_vm0, %v1924_v50 }
  0x36   : > { %1790 = vmatpush.bf16.msra.mxu3 %v1880_v17  ;;  %v1615_v17 = vld [vmem:[%s1863_s17 + $0x5c] sm:$0xf0] }
  0x37   : > { %v1618_v19 = vor.u32 %v1761_v16, %v1615_v17 }
  0x3a   : > { %1791 = vmatpush.bf16.msra.mxu3 %v1614_v26  ;;  %v1598_v26 = vor.u32 %v1755_v24, %v1595_v25 }
  0x3c   : > { %681 = vmatpush.bf16.msrb.mxu1 %v1598_v26 }
  0x3e   : > { %1792 = vmatpush.bf16.msra.mxu3 %v1586_v37 }
  0x41   : > { %1689 = vmatmul.msk.bf16.gmra.mxu0 %vm404_vm0, %v1948_v58  ;;  %1701 = vmatmul.msk.bf16.vlgmr.msrb.gmra.mxu3 %vm404_vm0, %v1909_v44 }
  0x42   : > { %1697 = vmatmul.msk.bf16.gmra.mxu1 %vm404_vm0, %v1948_v58  ;;  %580 = vmatpush.bf16.msrb.mxu3 %v1674_v8 }
  0x44   : > { %1705 = vmatmul.msk.bf16.gmra.mxu2 %vm404_vm0, %v1948_v58 }
  0x46   : > { %581 = vmatpush.bf16.msrb.mxu3 %v1646_v14 }
  0x4a   : > { %582 = vmatpush.bf16.msrb.mxu3 %v1618_v19 }
  0x4e   : > { %583 = vmatpush.bf16.msrb.mxu3 %v1590_v22 }
  0x51   : > { %1690 = vmatmul.msk.bf16.gmra.mxu0 %vm404_vm0, %v1967_v4  ;;  %1702 = vmatmul.msk.bf16.gmra.mxu3 %vm404_vm0, %v1929_v51 }
  0x52   : > { %1698 = vmatmul.msk.bf16.gmra.mxu1 %vm404_vm0, %v1967_v4 }
  0x54   : > { %1706 = vmatmul.msk.bf16.gmra.mxu2 %vm404_vm0, %v1967_v4 }
  0x61   : > { %1691 = vmatmul.msk.bf16.gmra.mxu0 %vm404_vm0, %v1992_v23  ;;  %1709 = vmatmul.msk.bf16.vlgmr.msra.gmra.mxu3 %vm404_vm0, %v1909_v44 }
  0x62   : > { %1699 = vmatmul.msk.bf16.gmra.mxu1 %vm404_vm0, %v1992_v23 }
  0x64   : > { %1707 = vmatmul.msk.bf16.gmra.mxu2 %vm404_vm0, %v1992_v23 }
  0x71   : > { %1692 = vmatmul.msk.bf16.gmra.mxu0 %vm404_vm0, %v2007_v27  ;;  %1710 = vmatmul.msk.bf16.gmra.mxu3 %vm404_vm0, %v1929_v51 }
  0x72   : > { %1700 = vmatmul.msk.bf16.gmra.mxu1 %vm404_vm0, %v2007_v27 }
  0x74   : > { %1708 = vmatmul.msk.bf16.gmra.mxu2 %vm404_vm0, %v2007_v27 }
  0x81   : > { %1719 = vmatmul.msk.bf16.vlgmr.msrb.gmra.mxu0 %vm404_vm0, %v1904_v43  ;;  %1711 = vmatmul.msk.bf16.vlgmr.msrb.gmra.mxu3 %vm404_vm0, %v1904_v43 }
  0x82   : > { %1727 = vmatmul.msk.bf16.vlgmr.msrb.gmra.mxu1 %vm404_vm0, %v1904_v43 }
  0x84   : > { %1735 = vmatmul.msk.bf16.vlgmr.msrb.gmra.mxu2 %vm404_vm0, %v1904_v43 }
  0x91   : > { %1720 = vmatmul.msk.bf16.gmra.mxu0 %vm404_vm0, %v1924_v50  ;;  %1712 = vmatmul.msk.bf16.gmra.mxu3 %vm404_vm0, %v1924_v50 }
  0x92   : > { %1728 = vmatmul.msk.bf16.gmra.mxu1 %vm404_vm0, %v1924_v50 }
  0x94   : > { %1736 = vmatmul.msk.bf16.gmra.mxu2 %vm404_vm0, %v1924_v50 }
  0x9e   : > { %v2033_v28 = vpop.f32.mrf.mxu0 }
  0x9f   : > { %v2035_v29 = vpop.f32.mrf.mxu1 }
  0xa1   : > { %1713 = vmatmul.msk.bf16.gmra.mxu3 %vm404_vm0, %v1948_v58  ;;  %1721 = vmatmul.msk.bf16.gmra.mxu0 %vm404_vm0, %v1948_v58 }
  0xa2   : > { %1729 = vmatmul.msk.bf16.gmra.mxu1 %vm404_vm0, %v1948_v58 }
  0xa4   : > { %1737 = vmatmul.msk.bf16.gmra.mxu2 %vm404_vm0, %v1948_v58  ;;  %v468_v30 = vpop.f32.mrf.mxu3 }
  0xa5   : > { %1179 = vrot.lane.b32.xlu2 %v468_v30, %s1822_s7 }
  0xa6   : > { %v2048_v32 = vpop.f32.mrf.mxu0 }
  0xa7   : > { %v2045_v31 = vpop.f32.mrf.mxu2  ;;  %v2050_v33 = vpop.f32.mrf.mxu1 }
  0xac   : > { %v470_v34 = vpop.f32.mrf.mxu3 }
  0xad   : > { %1193 = vrot.lane.b32.xlu2 %v470_v34, %s1822_s7 }
  0xae   : > { %v443_v36 = vpop.f32.mrf.mxu0 }
  0xaf   : > { %v2052_v35 = vpop.f32.mrf.mxu2  ;;  %v492_v37 = vpop.f32.mrf.mxu1  ;;  %784 = vrot.lane.b32.xlu0 %v443_v36, %s1823_s8 }
  0xb1   : > { %1714 = vmatmul.msk.bf16.gmra.mxu3 %vm404_vm0, %v1967_v4  ;;  %1722 = vmatmul.msk.bf16.gmra.mxu0 %vm404_vm0, %v1967_v4 }
  0xb2   : > { %1730 = vmatmul.msk.bf16.gmra.mxu1 %vm404_vm0, %v1967_v4 }
  0xb4   : > { %1738 = vmatmul.msk.bf16.gmra.mxu2 %vm404_vm0, %v1967_v4  ;;  %v473_v38 = vpop.f32.mrf.mxu3 }
  0xb5   : > { %1258 = vrot.lane.b32.xlu2 %v473_v38, %s1824_s9 }
  0xb6   : > { %v445_v40 = vpop.f32.mrf.mxu0 }
  0xb7   : > { %v541_v39 = vpop.f32.mrf.mxu2  ;;  %v494_v41 = vpop.f32.mrf.mxu1  ;;  %786 = vrot.lane.b32.xlu0 %v492_v37, %s1823_s8 }
  0xb8   : > { %788 = vrot.lane.b32.xlu1 %v541_v39, %s1823_s8 }
  0xbc   : > { %v475_v42 = vpop.f32.mrf.mxu3 }
  0xbd   : > { %800 = vrot.lane.b32.xlu2 %v494_v41, %s1823_s8 }
  0xbe   : > { %v448_v45 = vpop.f32.mrf.mxu0 }
  0xbf   : > { %v543_v43 = vpop.f32.mrf.mxu2  ;;  %v497_v46 = vpop.f32.mrf.mxu1 }
  0xc0   : > { %798 = vrot.lane.b32.xlu1 %v445_v40, %s1823_s8  ;;  %802 = vrot.lane.b32.xlu0 %v543_v43, %s1823_s8 }
  0xc1   : > { %1715 = vmatmul.msk.bf16.gmra.mxu3 %vm404_vm0, %v1992_v23  ;;  %1723 = vmatmul.msk.bf16.gmra.mxu0 %vm404_vm0, %v1992_v23 }
  0xc2   : > { %1731 = vmatmul.msk.bf16.gmra.mxu1 %vm404_vm0, %v1992_v23 }
  0xc4   : > { %1739 = vmatmul.msk.bf16.gmra.mxu2 %vm404_vm0, %v1992_v23  ;;  %v517_v47 = vpop.f32.mrf.mxu3 }
  0xc5   : > { %1272 = vrot.lane.b32.xlu2 %v475_v42, %s1824_s9 }
  0xc6   : > { %v450_v49 = vpop.f32.mrf.mxu0 }
  0xc7   : > { %v546_v48 = vpop.f32.mrf.mxu2  ;;  %v499_v50 = vpop.f32.mrf.mxu1 }
  0xc8   : > { %867 = vrot.lane.b32.xlu1 %v546_v48, %s1825_s10  ;;  %865 = vrot.lane.b32.xlu0 %v497_v46, %s1825_s10 }
  0xcc   : > { %v519_v52 = vpop.f32.mrf.mxu3 }
  0xcd   : > { %863 = vrot.lane.b32.xlu2 %v448_v45, %s1825_s10 }
  0xce   : > { %v453_v54 = vpop.f32.mrf.mxu0 }
  0xcf   : > { %v548_v53 = vpop.f32.mrf.mxu2  ;;  %v502_v55 = vpop.f32.mrf.mxu1 }
  0xd0   : > { %879 = vrot.lane.b32.xlu1 %v499_v50, %s1825_s10  ;;  %1181 = vrot.lane.b32.xlu0 %v517_v47, %s1822_s7 }
  0xd1   : > { %1716 = vmatmul.msk.bf16.gmra.mxu3 %vm404_vm0, %v2007_v27  ;;  %1724 = vmatmul.msk.bf16.gmra.mxu0 %vm404_vm0, %v2007_v27 }
  0xd2   : > { %1732 = vmatmul.msk.bf16.gmra.mxu1 %vm404_vm0, %v2007_v27 }
  0xd4   : > { %1740 = vmatmul.msk.bf16.gmra.mxu2 %vm404_vm0, %v2007_v27  ;;  %v522_v56 = vpop.f32.mrf.mxu3 }
  0xd5   : > { %881 = vrot.lane.b32.xlu2 %v548_v53, %s1825_s10 }
  0xd6   : > { %v455_v58 = vpop.f32.mrf.mxu0 }
  0xd7   : > { %v551_v57 = vpop.f32.mrf.mxu2  ;;  %v504_v59 = vpop.f32.mrf.mxu1 }
  0xd8   : > { %942 = vrot.lane.b32.xlu1 %v453_v54, %s1826_s11  ;;  %877 = vrot.lane.b32.xlu0 %v450_v49, %s1825_s10 }
  0xdc   : > { %v524_v60 = vpop.f32.mrf.mxu3 }
  0xdd   : > { %944 = vrot.lane.b32.xlu2 %v502_v55, %s1826_s11 }
  0xde   : > { %v458_v62 = vpop.f32.mrf.mxu0 }
  0xdf   : > { %v553_v61 = vpop.f32.mrf.mxu2  ;;  %v507_v63 = vpop.f32.mrf.mxu1 }
  0xe0   : > { %960 = vrot.lane.b32.xlu1 %v553_v61, %s1826_s11  ;;  %1195 = vrot.lane.b32.xlu0 %v519_v52, %s1822_s7 }
  0xe1   : > { %1725 = vmatmul.msk.bf16.gmra.mxu0 %vm404_vm0, %v1909_v44  ;;  %1717 = vmatmul.msk.bf16.gmra.mxu3 %vm404_vm0, %v1909_v44 }
  0xe2   : > { %1733 = vmatmul.msk.bf16.gmra.mxu1 %vm404_vm0, %v1909_v44 }
  0xe4   : > { %1741 = vmatmul.msk.bf16.gmra.mxu2 %vm404_vm0, %v1909_v44  ;;  %v566_v0 = vpop.f32.mrf.mxu3 }
  0xe5   : > { %956 = vrot.lane.b32.xlu2 %v455_v58, %s1826_s11 }
  0xe6   : > { %v460_v2 = vpop.f32.mrf.mxu0 }
  0xe7   : > { %v556_v1 = vpop.f32.mrf.mxu2  ;;  %v509_v3 = vpop.f32.mrf.mxu1 }
  0xe8   : > { %1023 = vrot.lane.b32.xlu1 %v507_v63, %s1827_s14  ;;  %946 = vrot.lane.b32.xlu0 %v551_v57, %s1826_s11 }
  0xec   : > { %v568_v4 = vpop.f32.mrf.mxu3 }
  0xed   : > { %1025 = vrot.lane.b32.xlu2 %v556_v1, %s1827_s14 }
  0xee   : > { %v463_v6 = vpop.f32.mrf.mxu0 }
  0xef   : > { %v558_v5 = vpop.f32.mrf.mxu2  ;;  %v512_v44 = vpop.f32.mrf.mxu1 }
  0xf0   : > { %1183 = vrot.lane.b32.xlu1 %v566_v0, %s1822_s7  ;;  %1260 = vrot.lane.b32.xlu0 %v522_v56, %s1824_s9 }
  0xf1   : > { %1726 = vmatmul.msk.bf16.gmra.mxu0 %vm404_vm0, %v1929_v51  ;;  %1718 = vmatmul.msk.bf16.gmra.mxu3 %vm404_vm0, %v1929_v51 }
  0xf2   : > { %1734 = vmatmul.msk.bf16.gmra.mxu1 %vm404_vm0, %v1929_v51 }
  0xf4   : > { %1742 = vmatmul.msk.bf16.gmra.mxu2 %vm404_vm0, %v1929_v51  ;;  %v571_v7 = vpop.f32.mrf.mxu3 }
  0xf5   : > { %1037 = vrot.lane.b32.xlu2 %v509_v3, %s1827_s14 }
  0xf6   : > { %v465_v9 = vpop.f32.mrf.mxu0 }
  0xf7   : > { %v561_v8 = vpop.f32.mrf.mxu2  ;;  %v514_v10 = vpop.f32.mrf.mxu1 }
  0xf8   : > { %1035 = vrot.lane.b32.xlu1 %v460_v2, %s1827_s14  ;;  %958 = vrot.lane.b32.xlu0 %v504_v59, %s1826_s11 }
  0xfc   : > { %v573_v11 = vpop.f32.mrf.mxu3 }
  0xfd   : > { %1100 = vrot.lane.b32.xlu2 %v463_v6, %s1828_s15 }
  0xfe   : > { %v2125_v13 = vpop.f32.mrf.mxu0 }
  0xff   : > { %v563_v12 = vpop.f32.mrf.mxu2  ;;  %v2127_v51 = vpop.permute.xlu2 %1179 }
 0x100   : > { %1197 = vrot.lane.b32.xlu1 %v568_v4, %s1822_s7  ;;  %1274 = vrot.lane.b32.xlu0 %v524_v60, %s1824_s9  ;;  %v2130_v14 = vpop.f32.mrf.mxu1 }
 0x104   : > { %v2132_v15 = vpop.f32.mrf.mxu3 }
 0x105   : > { %1116 = vrot.lane.b32.xlu2 %v514_v10, %s1828_s15 }
 0x106   : > { %v2136_v17 = vpop.f32.mrf.mxu0 }
 0x107   : > { %v732_v16 = vpop.f32.mrf.mxu2  ;;  %v2138_v18 = vpop.permute.xlu2 %1193 }
 0x108   : > { %1104 = vrot.lane.b32.xlu1 %v561_v8, %s1828_s15  ;;  %1021 = vrot.lane.b32.xlu0 %v458_v62, %s1827_s14  ;;  %v2141_v19 = vpop.f32.mrf.mxu1 }
 0x10c   : > { %v2143_v20 = vpop.f32.mrf.mxu3 }
 0x10e   : > { %v639_v22 = vpop.f32.mrf.mxu0 }
 0x10f   : > { %v733_v21 = vpop.f32.mrf.mxu2  ;;  %v2146_v23 = vpop.permute.xlu2 %1258  ;;  %792 = vrot.lane.b32.xlu2 %v639_v22, %s1823_s8 }
 0x110   : > { %1262 = vrot.lane.b32.xlu1 %v571_v7, %s1824_s9  ;;  %1039 = vrot.lane.b32.xlu0 %v558_v5, %s1827_s14  ;;  %v688_v25 = vpop.f32.mrf.mxu1 }
 0x114   : > { %v590_v24 = vpop.f32.mrf.mxu3 }
 0x116   : > { %v641_v34 = vpop.f32.mrf.mxu0 }
 0x117   : > { %v801_v26 = vpop.permute.xlu2 %800  ;;  %794 = vrot.lane.b32.xlu2 %v688_v25, %s1823_s8  ;;  %v735_v27 = vpop.f32.mrf.mxu2 }
 0x118   : > { %1114 = vrot.lane.b32.xlu1 %v465_v9, %s1828_s15  ;;  %1102 = vrot.lane.b32.xlu0 %v512_v44, %s1828_s15  ;;  %v690_v37 = vpop.f32.mrf.mxu1 }
 0x11c   : > { %v592_v30 = vpop.f32.mrf.mxu3 }
 0x11e   : > { %v644_v43 = vpop.f32.mrf.mxu0 }
 0x11f   : > { %v2154_v36 = vpop.permute.xlu2 %1272  ;;  %806 = vrot.lane.b32.xlu2 %v641_v34, %s1823_s8  ;;  %v737_v39 = vpop.f32.mrf.mxu2 }
 0x120   : > { %1276 = vrot.lane.b32.xlu1 %v573_v11, %s1824_s9  ;;  %1118 = vrot.lane.b32.xlu0 %v563_v12, %s1828_s15  ;;  %v693_v47 = vpop.f32.mrf.mxu1 }
 0x121   : > { %v785_v38 = vpop.permute.xlu0 %784 }
 0x124   : > { %v595_v40 = vpop.f32.mrf.mxu3 }
 0x126   : > { %v646_v55 = vpop.f32.mrf.mxu0 }
 0x127   : > { %v864_v41 = vpop.permute.xlu2 %863  ;;  %869 = vrot.lane.b32.xlu2 %v595_v40, %s1825_s10  ;;  %v740_v48 = vpop.f32.mrf.mxu2 }
 0x128   : > { %790 = vrot.lane.b32.xlu1 %v590_v24, %s1823_s8  ;;  %796 = vrot.lane.b32.xlu0 %v735_v27, %s1823_s8  ;;  %v695_v56 = vpop.f32.mrf.mxu1 }
 0x129   : > { %v787_v45 = vpop.permute.xlu0 %786 }
 0x12a   : > { %v2161_v42 = vpop.permute.xlu1 %788  ;;  %v813_v46 = vsel %vm812_vm1, %v785_v38, %v787_v45 }
 0x12b   : > { %v814_v57 = vsel %vm812_vm1, %v787_v45, %v2161_v42  ;;  %v837_v61 = vadd.f32 %v813_v46, %v2033_v28 }
 0x12c   : > { %v597_v52 = vpop.f32.mrf.mxu3  ;;  %v838_v62 = vadd.f32 %v814_v57, %v2035_v29 }
 0x12e   : > { %v649_v5 = vpop.f32.mrf.mxu0 }
 0x12f   : > { %v2165_v49 = vpop.permute.xlu2 %881  ;;  %875 = vrot.lane.b32.xlu2 %v740_v48, %s1825_s10  ;;  %v742_v60 = vpop.f32.mrf.mxu2 }
 0x130   : > { %804 = vrot.lane.b32.xlu1 %v592_v30, %s1823_s8  ;;  %808 = vrot.lane.b32.xlu0 %v690_v37, %s1823_s8  ;;  %v698_v6 = vpop.f32.mrf.mxu1 }
 0x132   : > { %v799_v50 = vpop.permute.xlu1 %798  ;;  %v2170_v54 = vpop.permute.xlu0 %802 }
 0x133   : > { %v819_v53 = vsel %vm812_vm1, %v799_v50, %v801_v26  ;;  %v820_v44 = vsel %vm812_vm1, %v801_v26, %v2170_v54 }
 0x134   : > { %v600_v2 = vpop.f32.mrf.mxu3  ;;  %v844_v28 = vadd.f32 %v820_v44, %v2050_v33  ;;  %v843_v25 = vadd.f32 %v819_v53, %v2048_v32 }
 0x136   : > { %v651_v24 = vpop.f32.mrf.mxu0 }
 0x137   : > { %v945_v58 = vpop.permute.xlu2 %944  ;;  %887 = vrot.lane.b32.xlu2 %v695_v56, %s1825_s10  ;;  %v745_v12 = vpop.f32.mrf.mxu2 }
 0x138   : > { %810 = vrot.lane.b32.xlu1 %v737_v39, %s1823_s8  ;;  %871 = vrot.lane.b32.xlu0 %v644_v43, %s1825_s10  ;;  %v700_v21 = vpop.f32.mrf.mxu1 }
 0x13a   : > { %v2177_v59 = vpop.permute.xlu1 %867  ;;  %v866_v63 = vpop.permute.xlu0 %865 }
 0x13b   : > { %v892_v0 = vsel %vm891_vm2, %v864_v41, %v866_v63  ;;  %v893_v1 = vsel %vm891_vm2, %v866_v63, %v2177_v59 }
 0x13c   : > { %v916_v3 = vadd.f32 %v892_v0, %v837_v61  ;;  %v917_v4 = vadd.f32 %v893_v1, %v838_v62  ;;  %v602_v16 = vpop.f32.mrf.mxu3 }
 0x13e   : > { %v654_v41 = vpop.f32.mrf.mxu0 }
 0x13f   : > { %v2187_v7 = vpop.permute.xlu2 %956  ;;  %950 = vrot.lane.b32.xlu2 %v649_v5, %s1826_s11  ;;  %v747_v37 = vpop.f32.mrf.mxu2 }
 0x140   : > { %873 = vrot.lane.b32.xlu1 %v693_v47, %s1825_s10  ;;  %883 = vrot.lane.b32.xlu0 %v597_v52, %s1825_s10  ;;  %v703_v32 = vpop.f32.mrf.mxu1 }
 0x142   : > { %v880_v29 = vpop.permute.xlu1 %879  ;;  %v2194_v9 = vpop.permute.xlu0 %1181 }
 0x143   : > { %v899_v8 = vsel %vm891_vm2, %v880_v29, %v2165_v49  ;;  %v2199_v11 = vsel %vm1207_vm3, %v2127_v51, %v2194_v9 }
 0x144   : > { %v923_v10 = vadd.f32 %v899_v8, %v844_v28  ;;  %v605_v52 = vpop.f32.mrf.mxu3 }
 0x147   : > { %v2202_v22 = vpop.permute.xlu2 %1025  ;;  %962 = vrot.lane.b32.xlu2 %v602_v16, %s1826_s11  ;;  %v750_v57 = vpop.f32.mrf.mxu2 }
 0x148   : > { %885 = vrot.lane.b32.xlu1 %v646_v55, %s1825_s10  ;;  %889 = vrot.lane.b32.xlu0 %v742_v60, %s1825_s10  ;;  %v705_v48 = vpop.f32.mrf.mxu1  ;;  %v656_v55 = vpop.f32.mrf.mxu0 }
 0x14a   : > { %v943_v33 = vpop.permute.xlu1 %942  ;;  %v878_v51 = vpop.permute.xlu0 %877 }
 0x14b   : > { %v971_v26 = vsel %vm970_vm4, %v943_v33, %v945_v58  ;;  %v898_v30 = vsel %vm891_vm2, %v878_v51, %v880_v29 }
 0x14c   : > { %v2208_v27 = vadd.f32 %v971_v26, %v916_v3  ;;  %v922_v34 = vadd.f32 %v898_v30, %v843_v25  ;;  %v607_v63 = vpop.f32.mrf.mxu3 }
 0x14f   : > { %v2212_v38 = vpop.permute.xlu2 %1037  ;;  %968 = vrot.lane.b32.xlu2 %v747_v37, %s1826_s11  ;;  %v752_v0 = vpop.f32.mrf.mxu2 }
 0x150   : > { %948 = vrot.lane.b32.xlu1 %v600_v2, %s1826_s11  ;;  %952 = vrot.lane.b32.xlu0 %v698_v6, %s1826_s11  ;;  %v708_v62 = vpop.f32.mrf.mxu1 }
 0x152   : > { %v2216_v39 = vpop.permute.xlu1 %960  ;;  %v2218_v40 = vpop.permute.xlu0 %1195 }
 0x154   : > { %v610_v8 = vpop.f32.mrf.mxu3 }
 0x157   : > { %1031 = vrot.lane.b32.xlu2 %v703_v32, %s1827_s14  ;;  %v2223_v43 = vpop.permute.xlu2 %1100 }
 0x158   : > { %954 = vrot.lane.b32.xlu1 %v745_v12, %s1826_s11  ;;  %964 = vrot.lane.b32.xlu0 %v651_v24, %s1826_s11  ;;  %v659_v12 = vpop.f32.mrf.mxu0  ;;  %v710_v24 = vpop.f32.mrf.mxu1 }
 0x15a   : > { %v1024_v45 = vpop.permute.xlu1 %1023  ;;  %v2225_v46 = vpop.permute.xlu0 %946 }
 0x15b   : > { %v972_v47 = vsel %vm970_vm4, %v945_v58, %v2225_v46  ;;  %v1051_v53 = vsel %vm1049_vm5, %v1024_v45, %v2202_v22 }
 0x15c   : > { %v996_v50 = vadd.f32 %v972_v47, %v917_v4  ;;  %v612_v32 = vpop.f32.mrf.mxu3 }
 0x15e   : > { %v2231_v56 = vadd.f32 %v1051_v53, %v996_v50 }
 0x15f   : > { %1043 = vrot.lane.b32.xlu2 %v656_v55, %s1827_s14  ;;  %v2236_v60 = vpop.permute.xlu2 %1116 }
 0x160   : > { %966 = vrot.lane.b32.xlu1 %v700_v21, %s1826_s11  ;;  %1027 = vrot.lane.b32.xlu0 %v605_v52, %s1827_s14  ;;  %v755_v21 = vpop.f32.mrf.mxu2  ;;  %v661_v51 = vpop.f32.mrf.mxu0 }
 0x162   : > { %v2238_v61 = vpop.permute.xlu1 %1183  ;;  %v2240_v58 = vpop.permute.xlu0 %1260 }
 0x167   : > { %1110 = vrot.lane.b32.xlu2 %v708_v62, %s1828_s15 }
 0x168   : > { %1029 = vrot.lane.b32.xlu1 %v654_v41, %s1827_s14  ;;  %1033 = vrot.lane.b32.xlu0 %v750_v57, %s1827_s14 }
 0x169   : > { %v2247_v4 = vpop.permute.xlu2 %792 }
 0x16a   : > { %v1036_v1 = vpop.permute.xlu1 %1035  ;;  %v959_v3 = vpop.permute.xlu0 %958 }
 0x16b   : > { %v1056_v2 = vsel %vm1049_vm5, %v1036_v1, %v2212_v38  ;;  %v977_v5 = vsel %vm970_vm4, %v2187_v7, %v959_v3  ;;  %v978_v6 = vsel %vm970_vm4, %v959_v3, %v2216_v39  ;;  %v1214_v3 = vsel %vm1207_vm3, %v2138_v18, %v2218_v40 }
 0x16c   : > { %v1001_v44 = vadd.f32 %v977_v5, %v922_v34  ;;  %v1002_v28 = vadd.f32 %v978_v6, %v923_v10  ;;  %v757_v34 = vpop.f32.mrf.mxu2  ;;  %v615_v5 = vpop.f32.mrf.mxu3  ;;  %v1287_v18 = vsel %vm1286_vm7, %v2146_v23, %v2240_v58 }
 0x16e   : > { %v1080_v29 = vadd.f32 %v1056_v2, %v1001_v44 }
 0x16f   : > { %1106 = vrot.lane.b32.xlu2 %v610_v8, %s1828_s15 }
 0x170   : > { %1041 = vrot.lane.b32.xlu1 %v607_v63, %s1827_s14  ;;  %1045 = vrot.lane.b32.xlu0 %v705_v48, %s1827_s14  ;;  %v713_v48 = vpop.f32.mrf.mxu1 }
 0x171   : > { %v2260_v7 = vpop.permute.xlu2 %794 }
 0x172   : > { %v2256_v16 = vpop.permute.xlu1 %1197  ;;  %v2258_v33 = vpop.permute.xlu0 %1274  ;;  %v2265_v10 = vsel %vm812_vm1, %v2247_v4, %v2260_v7 }
 0x174   : > { %v760_v53 = vpop.f32.mrf.mxu2 }
 0x177   : > { %1112 = vrot.lane.b32.xlu2 %v755_v21, %s1828_s15 }
 0x178   : > { %1047 = vrot.lane.b32.xlu1 %v752_v0, %s1827_s14  ;;  %1108 = vrot.lane.b32.xlu0 %v659_v12, %s1828_s15  ;;  %v715_v2 = vpop.f32.mrf.mxu1 }
 0x179   : > { %v2275_v41 = vpop.permute.xlu2 %806 }
 0x17a   : > { %v2270_v25 = vpop.permute.xlu1 %1104  ;;  %v1022_v26 = vpop.permute.xlu0 %1021 }
 0x17b   : > { %v1050_v30 = vsel %vm1049_vm5, %v1022_v26, %v1024_v45 }
 0x17c   : > { %v1074_v37 = vadd.f32 %v1050_v30, %v2208_v27  ;;  %v664_v27 = vpop.f32.mrf.mxu0  ;;  %v1215_v30 = vsel %vm1207_vm3, %v2218_v40, %v2256_v16 }
 0x17f   : > { %1122 = vrot.lane.b32.xlu2 %v661_v51, %s1828_s15 }
 0x180   : > { %1120 = vrot.lane.b32.xlu1 %v612_v32, %s1828_s15  ;;  %1124 = vrot.lane.b32.xlu0 %v710_v24, %s1828_s15 }
 0x181   : > { %v2289_v57 = vpop.permute.xlu2 %869 }
 0x182   : > { %v2279_v47 = vpop.permute.xlu1 %1262  ;;  %v2281_v50 = vpop.permute.xlu0 %1039 }
 0x183   : > { %v1057_v45 = vsel %vm1049_vm5, %v2212_v38, %v2281_v50 }
 0x184   : > { %v1081_v52 = vadd.f32 %v1057_v45, %v1002_v28  ;;  %v1209_v28 = vsel %vm1207_vm3, %v2194_v9, %v2238_v61  ;;  %v666_v21 = vpop.f32.mrf.mxu0 }
 0x187   : > { %1191 = vrot.lane.b32.xlu2 %v760_v53, %s1822_s7 }
 0x188   : > { %1187 = vrot.lane.b32.xlu1 %v664_v27, %s1822_s7  ;;  %1126 = vrot.lane.b32.xlu0 %v757_v34, %s1828_s15  ;;  %v718_v34 = vpop.f32.mrf.mxu1 }
 0x18a   : > { %v1115_v55 = vpop.permute.xlu1 %1114  ;;  %v1103_v63 = vpop.permute.xlu0 %1102 }
 0x18b   : > { %v1135_v62 = vsel %vm1128_vm6, %v1115_v55, %v2236_v60  ;;  %v1129_v38 = vsel %vm1128_vm6, %v2223_v43, %v1103_v63  ;;  %v1130_v1 = vsel %vm1128_vm6, %v1103_v63, %v2270_v25  ;;  %v1293_v43 = vsel %vm1286_vm7, %v2154_v36, %v2258_v33 }
 0x18c   : > { %v1159_v0 = vadd.f32 %v1135_v62, %v1080_v29  ;;  %v1153_v6 = vadd.f32 %v1129_v38, %v1074_v37  ;;  %v1154_v44 = vadd.f32 %v1130_v1, %v2231_v56  ;;  %v1288_v56 = vsel %vm1286_vm7, %v2240_v58, %v2279_v47  ;;  %v876_v58 = vpop.permute.xlu2 %875  ;;  %v617_v37 = vpop.f32.mrf.mxu3 }
 0x18d   : > { %v894_v62 = vsel %vm891_vm2, %v2177_v59, %v2289_v57  ;;  %v669_v63 = vpop.f32.mrf.mxu0 }
 0x18e   : > { %v1238_v29 = vadd.f32 %v1214_v3, %v1159_v0  ;;  %v1232_v8 = vadd.f32 %v2199_v11, %v1153_v6  ;;  %v1233_v12 = vadd.f32 %v1209_v28, %v1154_v44 }
 0x18f   : > { %1201 = vrot.lane.b32.xlu2 %v666_v21, %s1822_s7 }
 0x190   : > { %v2314_v24 = vadd.f32 %v1293_v43, %v1238_v29  ;;  %1189 = vrot.lane.b32.xlu1 %v713_v48, %s1822_s7  ;;  %v2317_v9 = vadd.f32 %v1287_v18, %v1232_v8  ;;  %v2319_v26 = vadd.f32 %v1288_v56, %v1233_v12  ;;  %1185 = vrot.lane.b32.xlu0 %v615_v5, %s1822_s7  ;;  %v762_v48 = vpop.f32.mrf.mxu2  ;;  %v720_v1 = vpop.f32.mrf.mxu1 }
 0x191   : > { %v841_v18 = vadd.f32 %v2265_v10, %v2125_v13 }
 0x192   : > { %v2323_v36 = vpop.permute.xlu1 %1276  ;;  %v2325_v23 = vpop.permute.xlu0 %1118 }
 0x193   : > { %v1136_v11 = vsel %vm1128_vm6, %v2236_v60, %v2325_v23  ;;  %v1294_v45 = vsel %vm1286_vm7, %v2258_v33, %v2323_v36 }
 0x194   : > { %v1160_v51 = vadd.f32 %v1136_v11, %v1081_v52  ;;  %v888_v38 = vpop.permute.xlu2 %887 }
 0x195   : > { %v671_v59 = vpop.f32.mrf.mxu0 }
 0x196   : > { %v1239_v32 = vadd.f32 %v1215_v30, %v1160_v51 }
 0x197   : > { %1203 = vrot.lane.b32.xlu2 %v715_v2, %s1822_s7  ;;  %v620_v2 = vpop.f32.mrf.mxu3 }
 0x198   : > { %1199 = vrot.lane.b32.xlu1 %v617_v37, %s1822_s7  ;;  %v2337_v27 = vadd.f32 %v1294_v45, %v1239_v32  ;;  %1205 = vrot.lane.b32.xlu0 %v762_v48, %s1822_s7  ;;  %v765_v43 = vpop.f32.mrf.mxu2 }
 0x19a   : > { %v791_v60 = vpop.permute.xlu1 %790  ;;  %v797_v53 = vpop.permute.xlu0 %796 }
 0x19b   : > { %v815_v40 = vsel %vm812_vm1, %v2161_v42, %v791_v60  ;;  %v816_v52 = vsel %vm812_vm1, %v791_v60, %v2247_v4  ;;  %v818_v33 = vsel %vm812_vm1, %v2260_v7, %v797_v53 }
 0x19c   : > { %v839_v55 = vadd.f32 %v815_v40, %v2045_v31  ;;  %v951_v3 = vpop.permute.xlu2 %950  ;;  %v840_v6 = vadd.f32 %v816_v52, %v2132_v15  ;;  %v842_v15 = vadd.f32 %v818_v33, %v2130_v14 }
 0x19e   : > { %v918_v0 = vadd.f32 %v894_v62, %v839_v55 }
 0x19f   : > { %1282 = vrot.lane.b32.xlu2 %v720_v1, %s1824_s9  ;;  %v622_v12 = vpop.f32.mrf.mxu3 }
 0x1a0   : > { %1268 = vrot.lane.b32.xlu1 %v718_v34, %s1824_s9  ;;  %1266 = vrot.lane.b32.xlu0 %v669_v63, %s1824_s9  ;;  %v767_v10 = vpop.f32.mrf.mxu2 }
 0x1a2   : > { %v805_v42 = vpop.permute.xlu1 %804  ;;  %v809_v4 = vpop.permute.xlu0 %808 }
 0x1a3   : > { %v822_v31 = vsel %vm812_vm1, %v805_v42, %v2275_v41  ;;  %v823_v7 = vsel %vm812_vm1, %v2275_v41, %v809_v4  ;;  %v821_v41 = vsel %vm812_vm1, %v2170_v54, %v805_v42 }
 0x1a4   : > { %v845_v21 = vadd.f32 %v821_v41, %v2052_v35  ;;  %v963_v11 = vpop.permute.xlu2 %962  ;;  %v846_v35 = vadd.f32 %v822_v31, %v2143_v20  ;;  %v847_v48 = vadd.f32 %v823_v7, %v2136_v17 }
 0x1a5   : > { %v979_v13 = vsel %vm970_vm4, %v2216_v39, %v963_v11 }
 0x1a8   : > { %1280 = vrot.lane.b32.xlu1 %v671_v59, %s1824_s9  ;;  %1264 = vrot.lane.b32.xlu0 %v620_v2, %s1824_s9 }
 0x1aa   : > { %v811_v5 = vpop.permute.xlu1 %810  ;;  %v872_v28 = vpop.permute.xlu0 %871 }
 0x1ab   : > { %v824_v44 = vsel %vm812_vm1, %v809_v4, %v811_v5  ;;  %v895_v29 = vsel %vm891_vm2, %v2289_v57, %v872_v28 }
 0x1ac   : > { %v919_v8 = vadd.f32 %v895_v29, %v840_v6  ;;  %v848_v45 = vadd.f32 %v824_v44, %v2141_v19  ;;  %v969_v55 = vpop.permute.xlu2 %968 }
 0x1b0   : > { %1278 = vrot.lane.b32.xlu1 %v622_v12, %s1824_s9  ;;  %1270 = vrot.lane.b32.xlu0 %v765_v43, %s1824_s9 }
 0x1b2   : > { %v874_v56 = vpop.permute.xlu1 %873  ;;  %v884_v30 = vpop.permute.xlu0 %883 }
 0x1b3   : > { %v896_v57 = vsel %vm891_vm2, %v872_v28, %v874_v56  ;;  %v897_v51 = vsel %vm891_vm2, %v874_v56, %v876_v58  ;;  %v900_v37 = vsel %vm891_vm2, %v2165_v49, %v884_v30 }
 0x1b4   : > { %v920_v34 = vadd.f32 %v896_v57, %v841_v18  ;;  %v921_v54 = vadd.f32 %v897_v51, %v842_v15  ;;  %v924_v32 = vadd.f32 %v900_v37, %v845_v21  ;;  %v1032_v4 = vpop.permute.xlu2 %1031 }
 0x1b6   : > { %v2378_v14 = vadd.f32 %v979_v13, %v924_v32 }
 0x1b8   : > { %1284 = vrot.lane.b32.xlu1 %v767_v10, %s1824_s9 }
 0x1ba   : > { %v886_v58 = vpop.permute.xlu1 %885  ;;  %v890_v40 = vpop.permute.xlu0 %889 }
 0x1bb   : > { %v901_v60 = vsel %vm891_vm2, %v884_v30, %v886_v58  ;;  %v902_v49 = vsel %vm891_vm2, %v886_v58, %v888_v38  ;;  %v903_v39 = vsel %vm891_vm2, %v888_v38, %v890_v40 }
 0x1bc   : > { %v925_v52 = vadd.f32 %v901_v60, %v846_v35  ;;  %v926_v53 = vadd.f32 %v902_v49, %v847_v48  ;;  %v927_v33 = vadd.f32 %v903_v39, %v848_v45  ;;  %v1044_v44 = vpop.permute.xlu2 %1043  ;;  %v2414_v39 = vld [vmem:[%s2551_s2] sm:$0x3f] }
 0x1c2   : > { %v949_v62 = vpop.permute.xlu1 %948  ;;  %v953_v63 = vpop.permute.xlu0 %952 }
 0x1c3   : > { %v973_v20 = vsel %vm970_vm4, %v2225_v46, %v949_v62  ;;  %v974_v17 = vsel %vm970_vm4, %v949_v62, %v951_v3  ;;  %v975_v42 = vsel %vm970_vm4, %v951_v3, %v953_v63  ;;  %v1325_v62 = vperm.slane %v2414_v39, 0 }
 0x1c4   : > { %v997_v1 = vadd.f32 %v973_v20, %v918_v0  ;;  %v998_v19 = vadd.f32 %v974_v17, %v919_v8  ;;  %v999_v31 = vadd.f32 %v975_v42, %v920_v34  ;;  %v1111_v18 = vpop.permute.xlu2 %1110 }
 0x1c5   : > { %v1337_v17 = vmul.f32 %v1325_v62, %v2317_v9 }
 0x1ca   : > { %v955_v7 = vpop.permute.xlu1 %954  ;;  %v965_v59 = vpop.permute.xlu0 %964 }
 0x1cb   : > { %v976_v2 = vsel %vm970_vm4, %v953_v63, %v955_v7  ;;  %v980_v5 = vsel %vm970_vm4, %v963_v11, %v965_v59  ;;  %v2425_v7 = vmul.f32 %v1325_v62, %v2314_v24 }
 0x1cc   : > { %v1000_v38 = vadd.f32 %v976_v2, %v921_v54  ;;  %v2393_v6 = vadd.f32 %v980_v5, %v925_v52  ;;  %v1107_v37 = vpop.permute.xlu2 %1106 }
 0x1d2   : > { %v967_v46 = vpop.permute.xlu1 %966  ;;  %v1028_v29 = vpop.permute.xlu0 %1027 }
 0x1d3   : > { %v981_v28 = vsel %vm970_vm4, %v965_v59, %v967_v46  ;;  %v982_v0 = vsel %vm970_vm4, %v967_v46, %v969_v55  ;;  %v1052_v8 = vsel %vm1049_vm5, %v2202_v22, %v1028_v29  ;;  %v1326_v55 = vperm.slane %v2414_v39, 1 }
 0x1d4   : > { %v2397_v43 = vadd.f32 %v981_v28, %v926_v53  ;;  %v1006_v3 = vadd.f32 %v982_v0, %v927_v33  ;;  %v1076_v12 = vadd.f32 %v1052_v8, %v997_v1  ;;  %v1113_v35 = vpop.permute.xlu2 %1112  ;;  %v1131_v46 = vsel %vm1128_vm6, %v2270_v25, %v1107_v37 }
 0x1d5   : > { %v1338_v63 = vmul.f32 %v1326_v55, %v2319_v26  ;;  %v2430_v5 = vmul.f32 %v1326_v55, %v2337_v27 }
 0x1d7   : > { %v1364_v42 = vmul.f32 %v1338_v63, %v1338_v63  ;;  %v1349_v59 = vadd.f32 %v1338_v63, %v1337_v17  ;;  %v1329_v63 = vperm.slane %v2414_v39, 4 }
 0x1da   : > { %v1030_v41 = vpop.permute.xlu1 %1029  ;;  %v1034_v21 = vpop.permute.xlu0 %1033 }
 0x1db   : > { %v1053_v15 = vsel %vm1049_vm5, %v1028_v29, %v1030_v41  ;;  %v1054_v56 = vsel %vm1049_vm5, %v1030_v41, %v1032_v4  ;;  %v1055_v51 = vsel %vm1049_vm5, %v1032_v4, %v1034_v21  ;;  %v1134_v29 = vsel %vm1128_vm6, %v1111_v18, %v1113_v35 }
 0x1dc   : > { %v1077_v11 = vadd.f32 %v1053_v15, %v998_v19  ;;  %v1078_v57 = vadd.f32 %v1054_v56, %v999_v31  ;;  %v1079_v30 = vadd.f32 %v1055_v51, %v1000_v38  ;;  %v1123_v45 = vpop.permute.xlu2 %1122  ;;  %v1363_v19 = vmul.f32 %v1337_v17, %v1337_v17 }
 0x1de   : > { %v1375_v38 = vadd.f32 %v1364_v42, %v1363_v19  ;;  %v1158_v56 = vadd.f32 %v1134_v29, %v1079_v30  ;;  %v1327_v30 = vperm.slane %v2414_v39, 2  ;;  %v1330_v29 = vperm.slane %v2414_v39, 5 }
 0x1e2   : > { %v1042_v34 = vpop.permute.xlu1 %1041  ;;  %v1046_v54 = vpop.permute.xlu0 %1045 }
 0x1e3   : > { %v1058_v2 = vsel %vm1049_vm5, %v2281_v50, %v1042_v34  ;;  %v1059_v28 = vsel %vm1049_vm5, %v1042_v34, %v1044_v44  ;;  %v1155_v50 = vadd.f32 %v1131_v46, %v1076_v12 }
 0x1e4   : > { %v1192_v52 = vpop.permute.xlu2 %1191  ;;  %v1082_v15 = vadd.f32 %v1058_v2, %v2378_v14  ;;  %v1083_v51 = vadd.f32 %v1059_v28, %v2393_v6 }
 0x1ea   : > { %v1048_v32 = vpop.permute.xlu1 %1047  ;;  %v1109_v22 = vpop.permute.xlu0 %1108 }
 0x1eb   : > { %v1061_v13 = vsel %vm1049_vm5, %v1046_v54, %v1048_v32  ;;  %v1132_v0 = vsel %vm1128_vm6, %v1107_v37, %v1109_v22  ;;  %v1133_v8 = vsel %vm1128_vm6, %v1109_v22, %v1111_v18 }
 0x1ec   : > { %v2405_v10 = vadd.f32 %v1061_v13, %v1006_v3  ;;  %v1202_v1 = vpop.permute.xlu2 %1201  ;;  %v1060_v3 = vsel %vm1049_vm5, %v1044_v44, %v1046_v54  ;;  %v1156_v34 = vadd.f32 %v1132_v0, %v1077_v11  ;;  %v1157_v54 = vadd.f32 %v1133_v8, %v1078_v57 }
 0x1ed   : > { %v1084_v18 = vadd.f32 %v1060_v3, %v2397_v43  ;;  %v1328_v11 = vperm.slane %v2414_v39, 3 }
 0x1f2   : > { %v1121_v48 = vpop.permute.xlu1 %1120  ;;  %v2407_v58 = vpop.permute.xlu0 %1124 }
 0x1f3   : > { %v1139_v37 = vsel %vm1128_vm6, %v1123_v45, %v2407_v58  ;;  %v1137_v14 = vsel %vm1128_vm6, %v2325_v23, %v1121_v48  ;;  %v1138_v23 = vsel %vm1128_vm6, %v1121_v48, %v1123_v45 }
 0x1f4   : > { %v2439_v41 = vpop.permute.xlu2 %1203  ;;  %v1163_v22 = vadd.f32 %v1139_v37, %v1084_v18  ;;  %v1161_v62 = vadd.f32 %v1137_v14, %v1082_v15 }
 0x1fa   : > { %v1188_v60 = vpop.permute.xlu1 %1187  ;;  %v2409_v49 = vpop.permute.xlu0 %1126 }
 0x202   : > { %v1190_v40 = vpop.permute.xlu1 %1189  ;;  %v1186_v53 = vpop.permute.xlu0 %1185 }
 0x203   : > { %v1210_v21 = vsel %vm1207_vm3, %v2238_v61, %v1186_v53  ;;  %v1211_v25 = vsel %vm1207_vm3, %v1186_v53, %v1188_v60  ;;  %v1212_v44 = vsel %vm1207_vm3, %v1188_v60, %v1190_v40  ;;  %v1213_v60 = vsel %vm1207_vm3, %v1190_v40, %v1192_v52 }
 0x204   : > { %v1234_v61 = vadd.f32 %v1210_v21, %v1155_v50  ;;  %v1235_v32 = vadd.f32 %v1211_v25, %v1156_v34  ;;  %v1236_v35 = vadd.f32 %v1212_v44, %v1157_v54  ;;  %v1370_v40 = vmul.f32 %v2430_v5, %v2430_v5 }
 0x205   : > { %v1162_v52 = vadd.f32 %v1138_v23, %v1083_v51  ;;  %v1237_v2 = vadd.f32 %v1213_v60, %v1158_v56  ;;  %v1369_v44 = vmul.f32 %v2425_v7, %v2425_v7 }
 0x20a   : > { %v1200_v33 = vpop.permute.xlu1 %1199  ;;  %v2418_v20 = vpop.permute.xlu0 %1205 }
 0x20b   : > { %v1216_v17 = vsel %vm1207_vm3, %v2256_v16, %v1200_v33  ;;  %v1217_v42 = vsel %vm1207_vm3, %v1200_v33, %v1202_v1  ;;  %v1283_v16 = vpop.permute.xlu2 %1282 }
 0x20c   : > { %v1240_v46 = vadd.f32 %v1216_v17, %v1161_v62  ;;  %v1241_v3 = vadd.f32 %v1217_v42, %v1162_v52 }
 0x212   : > { %v2422_v31 = vpop.permute.xlu1 %1268  ;;  %v1267_v4 = vpop.permute.xlu0 %1266 }
 0x213   : > { %v1291_v6 = vsel %vm1286_vm7, %v1267_v4, %v2422_v31 }
 0x214   : > { %v2468_v19 = vadd.f32 %v1291_v6, %v1236_v35  ;;  %v1382_v6 = vadd.f32 %v1370_v40, %v1369_v44 }
 0x216   : > { %v1341_v8 = vmul.f32 %v1329_v63, %v2468_v19 }
 0x21a   : > { %v1281_v12 = vpop.permute.xlu1 %1280  ;;  %v1265_v13 = vpop.permute.xlu0 %1264 }
 0x21b   : > { %v1289_v43 = vsel %vm1286_vm7, %v2279_v47, %v1265_v13  ;;  %v1290_v57 = vsel %vm1286_vm7, %v1265_v13, %v1267_v4  ;;  %v1218_v47 = vsel %vm1207_vm3, %v1202_v1, %v2439_v41  ;;  %v1297_v33 = vsel %vm1286_vm7, %v1281_v12, %v1283_v16 }
 0x21c   : > { %v2461_v53 = vadd.f32 %v1289_v43, %v1234_v61  ;;  %v2463_v55 = vadd.f32 %v1290_v57, %v1235_v32  ;;  %v1242_v4 = vadd.f32 %v1218_v47, %v1163_v22  ;;  %v1367_v32 = vmul.f32 %v1341_v8, %v1341_v8 }
 0x21e   : > { %v1339_v48 = vmul.f32 %v1327_v30, %v2461_v53  ;;  %v1340_v45 = vmul.f32 %v1328_v11, %v2463_v55 }
 0x220   : > { %v1350_v28 = vadd.f32 %v1349_v59, %v1339_v48  ;;  %v1365_v0 = vmul.f32 %v1339_v48, %v1339_v48  ;;  %v1366_v1 = vmul.f32 %v1340_v45, %v1340_v45  ;;  %v1140_v59 = vsel %vm1128_vm6, %v2407_v58, %v2409_v49 }
 0x221   : > { %v1219_v58 = vsel %vm1207_vm3, %v2439_v41, %v2418_v20  ;;  %v2501_v49 = vadd.f32 %v1297_v33, %v1242_v4 }
 0x222   : > { %v1279_v50 = vpop.permute.xlu1 %1278  ;;  %v1271_v25 = vpop.permute.xlu0 %1270  ;;  %v1351_v56 = vadd.f32 %v1350_v28, %v1340_v45  ;;  %v1376_v51 = vadd.f32 %v1375_v38, %v1365_v0 }
 0x223   : > { %v1295_v15 = vsel %vm1286_vm7, %v2323_v36, %v1279_v50  ;;  %v1296_v21 = vsel %vm1286_vm7, %v1279_v50, %v1281_v12  ;;  %v1292_v37 = vsel %vm1286_vm7, %v2422_v31, %v1271_v25  ;;  %v1356_v36 = vadd.f32 %v2430_v5, %v2425_v7 }
 0x224   : > { %v2486_v39 = vadd.f32 %v1295_v15, %v1240_v46  ;;  %v2488_v34 = vadd.f32 %v1296_v21, %v1241_v3  ;;  %v2496_v18 = vadd.f32 %v1292_v37, %v1237_v2  ;;  %v1377_v38 = vadd.f32 %v1376_v51, %v1366_v1 }
 0x225   : > { %v1164_v31 = vadd.f32 %v1140_v59, %v2405_v10  ;;  %v1352_v61 = vadd.f32 %v1351_v56, %v1341_v8  ;;  %v1347_v20 = vmul.f32 %v1329_v63, %v2501_v49 }
 0x226   : > { %v1345_v54 = vmul.f32 %v1327_v30, %v2486_v39  ;;  %v1346_v14 = vmul.f32 %v1328_v11, %v2488_v34  ;;  %v1342_v12 = vmul.f32 %v1330_v29, %v2496_v18  ;;  %v1378_v43 = vadd.f32 %v1377_v38, %v1367_v32 }
 0x227   : > { %v1243_v13 = vadd.f32 %v1219_v58, %v1164_v31  ;;  %v1373_v42 = vmul.f32 %v1347_v20, %v1347_v20 }
 0x228   : > { %v1357_v7 = vadd.f32 %v1356_v36, %v1345_v54  ;;  %v1371_v5 = vmul.f32 %v1345_v54, %v1345_v54  ;;  %v1353_v22 = vadd.f32 %v1352_v61, %v1342_v12  ;;  %v1368_v35 = vmul.f32 %v1342_v12, %v1342_v12 }
 0x229   : > { %v1372_v41 = vmul.f32 %v1346_v14, %v1346_v14 }
 0x22a   : > { %v1285_v57 = vpop.permute.xlu1 %1284  ;;  %v1358_v30 = vadd.f32 %v1357_v7, %v1346_v14  ;;  %v1383_v23 = vadd.f32 %v1382_v6, %v1371_v5  ;;  %1354 = vadd.xlane.f32.xlu2 %v1353_v22  ;;  %v1379_v10 = vadd.f32 %v1378_v43, %v1368_v35 }
 0x22b   : > { %v1298_v11 = vsel %vm1286_vm7, %v1283_v16, %v1285_v57 }
 0x22c   : > { %v2509_v60 = vadd.f32 %v1298_v11, %v1243_v13  ;;  %v1384_v62 = vadd.f32 %v1383_v23, %v1372_v41  ;;  %1380 = vadd.xlane.f32.xlu1 %v1379_v10  ;;  %v1359_v47 = vadd.f32 %v1358_v30, %v1347_v20 }
 0x22e   : > { %v1348_v17 = vmul.f32 %v1330_v29, %v2509_v60  ;;  %v1385_v40 = vadd.f32 %v1384_v62, %v1373_v42 }
 0x230   : > { %v1360_v48 = vadd.f32 %v1359_v47, %v1348_v17  ;;  %v1374_v45 = vmul.f32 %v1348_v17, %v1348_v17 }
 0x232   : > { %1361 = vadd.xlane.f32.xlu0 %v1360_v48  ;;  %v1386_v63 = vadd.f32 %v1385_v40, %v1374_v45 }
 0x234   : > { %1387 = vadd.xlane.f32.xlu2 %v1386_v63 }
 0x29d   : > { %v1355_v52 = vpop.xlane.xlu2 %1354 }
 0x29e   : > { %v1389_v4 = vmul.f32 0.001953125, %v1355_v52 }
 0x29f   : > { %v1381_v2 = vpop.xlane.xlu1 %1380 }
 0x2a0   : > { %v1391_v16 = vmul.f32 0.001953125, %v1381_v2  ;;  %v1393_v46 = vmul.f32 %v1389_v4, %v1389_v4  ;;  %v1399_v38 = vsub.f32 %v2317_v9, %v1389_v4  ;;  %v1400_v54 = vsub.f32 %v2319_v26, %v1389_v4 }
 0x2a1   : > { %v1401_v14 = vsub.f32 %v2461_v53, %v1389_v4  ;;  %v1402_v31 = vsub.f32 %v2463_v55, %v1389_v4  ;;  %v1403_v61 = vsub.f32 %v2468_v19, %v1389_v4  ;;  %v1404_v32 = vsub.f32 %v2496_v18, %v1389_v4 }
 0x2a2   : > { %v1395_v28 = vsub.f32 %v1391_v16, %v1393_v46 }
 0x2a4   : > { %v1397_v0 = vmax.f32 %v1395_v28, 0.0 }
 0x2a5   : > { %v1362_v3 = vpop.xlane.xlu0 %1361 }
 0x2a6   : > { %v2512_v8 = vmul.f32 0.001953125, %v1362_v3  ;;  %v1411_v33 = vadd.f32 1e-05, %v1397_v0 }
 0x2a7   : > { %v1388_v29 = vpop.xlane.xlu2 %1387 }
 0x2a8   : > { %v1394_v1 = vmul.f32 %v2512_v8, %v2512_v8  ;;  %1810 = vrsqrt.f32 %v1411_v33  ;;  %v1392_v50 = vmul.f32 0.001953125, %v1388_v29  ;;  %vm1419_vm9 = vweird.f32 %v1411_v33 }
 0x2a9   : > { %v1405_v40 = vsub.f32 %v2314_v24, %v2512_v8  ;;  %v1406_v63 = vsub.f32 %v2337_v27, %v2512_v8  ;;  %v1407_v52 = vsub.f32 %v2486_v39, %v2512_v8  ;;  %v1408_v4 = vsub.f32 %v2488_v34, %v2512_v8 }
 0x2aa   : > { %v1396_v15 = vsub.f32 %v1392_v50, %v1394_v1  ;;  %v1409_v2 = vsub.f32 %v2501_v49, %v2512_v8  ;;  %v1410_v16 = vsub.f32 %v2509_v60, %v2512_v8 }
 0x2ac   : > { %v1398_v21 = vmax.f32 %v1396_v15, 0.0 }
 0x2ae   : > { %v1811_v25 = vpop.eup %1810  ;;  %v1412_v51 = vadd.f32 1e-05, %v1398_v21 }
 0x2af   : > { %v1414_v56 = vmul.f32 %v1811_v25, %v1411_v33  ;;  %vm1420_vm8 = vweird.f32 %v1811_v25 }
 0x2b0   : > { %1812 = vrsqrt.f32 %v1412_v51  ;;  %vm1421_vm10 = vmor %vm1419_vm9, %vm1420_vm8  ;;  %vm1429_vm12 = vweird.f32 %v1412_v51 }
 0x2b1   : > { %v1415_v59 = vmul.f32 %v1811_v25, %v1414_v56 }
 0x2b3   : > { %v1416_v37 = vmul.f32 0.5, %v1415_v59 }
 0x2b5   : > { %v1417_v44 = vsub.f32 1.5, %v1416_v37 }
 0x2b6   : > { %v1813_v36 = vpop.eup %1812 }
 0x2b7   : > { %v1418_v58 = vmul.f32 %v1811_v25, %v1417_v44  ;;  %v1424_v12 = vmul.f32 %v1813_v36, %v1412_v51  ;;  %vm1430_vm11 = vweird.f32 %v1813_v36 }
 0x2b8   : > { %vm1431_vm13 = vmor %vm1429_vm12, %vm1430_vm11 }
 0x2b9   : > { %v1422_v7 = vsel %vm1421_vm10, %v1811_v25, %v1418_v58  ;;  %v1425_v43 = vmul.f32 %v1813_v36, %v1424_v12 }
 0x2ba   : > { %v1433_v5 = vmul.f32 %v1422_v7, %v1399_v38  ;;  %v1434_v6 = vmul.f32 %v1422_v7, %v1400_v54  ;;  %v1435_v13 = vmul.f32 %v1422_v7, %v1401_v14  ;;  %v1436_v22 = vmul.f32 %v1422_v7, %v1402_v31 }
 0x2bb   : > { %v1437_v9 = vmul.f32 %v1422_v7, %v1403_v61  ;;  %v1438_v35 = vmul.f32 %v1422_v7, %v1404_v32  ;;  %v1426_v11 = vmul.f32 0.5, %v1425_v43 }
 0x2bc   : > { %v1445_v26 = vmul.f32 0.2, %v1433_v5  ;;  %v1446_v20 = vmul.f32 0.2, %v1434_v6  ;;  %v1447_v53 = vmul.f32 0.2, %v1435_v13 }
 0x2bd   : > { %v1448_v41 = vmul.f32 0.2, %v1436_v22  ;;  %v1449_v55 = vmul.f32 0.2, %v1437_v9  ;;  %v1450_v57 = vmul.f32 0.2, %v1438_v35 }
 0x2be   : > { %v1457_v30 = vmax.f32 %v1433_v5, %v1445_v26  ;;  %v1458_v23 = vmax.f32 %v1434_v6, %v1446_v20  ;;  %v1459_v19 = vmax.f32 %v1435_v13, %v1447_v53  ;;  %v1427_v47 = vsub.f32 1.5, %v1426_v11 }
 0x2bf   : > { %v1460_v18 = vmax.f32 %v1436_v22, %v1448_v41  ;;  %v1461_v10 = vmax.f32 %v1437_v9, %v1449_v55  ;;  %v1462_v62 = vmax.f32 %v1438_v35, %v1450_v57 }
 0x2c0   : > { %v1469_v17 = vpack.c.bf16 %v1458_v23, %v1457_v30  ;;  %v1428_v45 = vmul.f32 %v1813_v36, %v1427_v47 }
 0x2c1   : > { %v1470_v42 = vpack.c.bf16 %v1460_v18, %v1459_v19  ;;  %v1471_v48 = vpack.c.bf16 %v1462_v62, %v1461_v10 }
 0x2c2   : > { %1475 = vst [vmem:[%s2526_s21] sm:$0xff] %v1469_v17  ;;  %v1432_v46 = vsel %vm1431_vm13, %v1813_v36, %v1428_v45 }
 0x2c3   : > { %1476 = vst [vmem:[%s2526_s21 + $0x8] sm:$0xff] %v1470_v42  ;;  %v1439_v28 = vmul.f32 %v1432_v46, %v1405_v40  ;;  %v1440_v24 = vmul.f32 %v1432_v46, %v1406_v63  ;;  %v1441_v0 = vmul.f32 %v1432_v46, %v1407_v52  ;;  %v1442_v3 = vmul.f32 %v1432_v46, %v1408_v4 }
 0x2c4   : > { %1477 = vst [vmem:[%s2526_s21 + $0x10] sm:$0xff] %v1471_v48  ;;  %v1443_v27 = vmul.f32 %v1432_v46, %v1409_v2  ;;  %v1444_v33 = vmul.f32 %v1432_v46, %v1410_v16 }
 0x2c5   : > { %v1451_v39 = vmul.f32 0.2, %v1439_v28  ;;  %v1452_v29 = vmul.f32 0.2, %v1440_v24  ;;  %v1453_v34 = vmul.f32 0.2, %v1441_v0 }
 0x2c6   : > { %v1454_v1 = vmul.f32 0.2, %v1442_v3  ;;  %v1455_v50 = vmul.f32 0.2, %v1443_v27  ;;  %v1456_v15 = vmul.f32 0.2, %v1444_v33 }
 0x2c7   : > { %v1463_v49 = vmax.f32 %v1439_v28, %v1451_v39  ;;  %v1464_v21 = vmax.f32 %v1440_v24, %v1452_v29  ;;  %v1465_v25 = vmax.f32 %v1441_v0, %v1453_v34 }
 0x2c8   : > { %v1466_v60 = vmax.f32 %v1442_v3, %v1454_v1  ;;  %v1467_v8 = vmax.f32 %v1443_v27, %v1455_v50  ;;  %v1468_v56 = vmax.f32 %v1444_v33, %v1456_v15 }
 0x2c9   : > { %v1472_v51 = vpack.c.bf16 %v1464_v21, %v1463_v49 }
 0x2ca   : > { %v1473_v59 = vpack.c.bf16 %v1466_v60, %v1465_v25  ;;  %v1474_v37 = vpack.c.bf16 %v1468_v56, %v1467_v8 }
 0x2cb   : > { %1478 = vst [vmem:[%s2526_s21 + $0x18] sm:$0xff] %v1472_v51 }
 0x2cc   : > { %1479 = vst [vmem:[%s2526_s21 + $0x20] sm:$0xff] %v1473_v59 }
 0x2cd   : > { %1480 = vst [vmem:[%s2526_s21 + $0x28] sm:$0xff] %v1474_v37 }
 0x2ce PF: > { %s13_s12 = sadd.s32 1, %s1820_s12  }
 0x2cf   : > { %p10_p4 = scmp.ge.s32.totalorder %s13_s12, 4  }
 0x2d1   :  { %12 = sbr.rel (!%p10_p4) target bundleno = 1 (0x1), region = 62 }

// kernel: _lambda_.7
= control target key start
LH: loop header
LB: loop body
LE: loop exit
PB: predicated region body
PF: predicated region fallthrough
CT: control target
= control target key end

     0   :  { %s1258_s12 = smov 0   ;;  %s1494_s0 = inlined_call_operand.vmem [shape: bf16[2,128,256], index: 0, kind: input, shape index: {}]   ;;  %s1495_s1 = inlined_call_operand.vmem [shape: bf16[256,128], index: 1, kind: input, shape index: {}]   ;;  %s1496_s2 = inlined_call_operand.vmem [shape: f32[1,128], index: 2, kind: input, shape index: {}]   ;;  %s1497_s3 = inlined_call_operand.vmem [shape: bf16[2,32,128], index: 3, kind: output, shape index: {}]  }
   0x1 LB: > { %s999_s13 = sadd.s32 4294967295, %s1229_s12   ;;  %p1003_p0 = scmp.ge.s32.totalorder %s1229_s12, 1  ;;  %s1229_s12 = sphi %s1258_s12, %s13_s12  }
   0x2   : > { %p137_p1 = scmp.lt.s32.totalorder %s1229_s12, 3 }
   0x4   : > { %p138_p2 = pnand %p1003_p0, %p137_p1 }
   0x5   : > { %p161_p3 = scmp.lt.s32.totalorder (!%p138_p2), %s999_s13, 1  ;;  %s1231_s25 = smov (!%p138_p2), 103  }
   0x6   : > { %141 = sbr.rel (%p138_p2) target bundleno = 613 (0x265), region = 32  ;;  %s1232_s26 = smov (!%p138_p2), 127  }
   0x7   : > { %s1233_s27 = smov (!%p138_p2), 102   ;;  %s1234_s28 = smov (!%p138_p2), 123  }
   0x8   : > { %s1235_s29 = smov (!%p138_p2), 98   ;;  %s1236_s30 = smov (!%p138_p2), 122  }
   0x9   : > { %s1237_s4 = smov (!%p138_p2), 97  }
   0xb   : > { %s1499_s13 = smov (!%p161_p3, %s999_s13), 1  ;;  %v1140_v48 = vld [vmem:[%s1495_s1] sm:$0xff]  ;;  %v1141_v50 = vld [vmem:[%s1495_s1 + $0x8] sm:$0xff]  ;;  %v1142_v52 = vld [vmem:[%s1495_s1 + $0x10] sm:$0xff]  ;;  %vm704_vm0 = vcmask 842752   ;;  %vm593_vm1 = vcmask 1039360  }
   0xc   : > { %s1138_s14 = sshll.u32 %s1499_s13, 7  ;;  %v1148_v49 = vld [vmem:[%s1495_s1 + $0x40] sm:$0xff]  ;;  %v1149_v51 = vld [vmem:[%s1495_s1 + $0x48] sm:$0xff]  ;;  %v1150_v53 = vld [vmem:[%s1495_s1 + $0x50] sm:$0xff]  ;;  %vm741_vm2 = vcmask 834560   ;;  %vm630_vm3 = vcmask 1006592  }
   0xd   : > { %s1272_s17 = scalar_lea.vmem %s1494_s0, %s1138_s14  ;;  %v1151_v54 = vld [vmem:[%s1495_s1 + $0x58] sm:$0xff]  ;;  %v1152_v56 = vld [vmem:[%s1495_s1 + $0x60] sm:$0xff]  ;;  %v1153_v58 = vld [vmem:[%s1495_s1 + $0x68] sm:$0xff]  ;;  %vm667_vm4 = vcmask 998400   ;;  %vm778_vm5 = vcmask 801792   ;;  %vm815_vm6 = vcmask 793600  }
   0xe   : > { %v1130_v0 = vld [vmem:[%s1272_s17 + $0x70] sm:$0xf]  ;;  %v1171_v1 = vld [vmem:[%s1272_s17 + $0x74] sm:$0xf0]  ;;  %v1170_v2 = vld [vmem:[%s1272_s17 + $0x74] sm:$0xf] }
   0xf   : > { %v1131_v3 = vor.u32 %v1171_v1, %v1130_v0  ;;  %v1132_v4 = vld [vmem:[%s1272_s17 + $0x78] sm:$0xf0]  ;;  %v1122_v5 = vld [vmem:[%s1272_s17 + $0x60] sm:$0xf]  ;;  %v1169_v6 = vld [vmem:[%s1272_s17 + $0x64] sm:$0xf0] }
  0x10   : > { %v1135_v7 = vor.u32 %v1170_v2, %v1132_v4  ;;  %v1168_v8 = vld [vmem:[%s1272_s17 + $0x64] sm:$0xf]  ;;  %v1124_v9 = vld [vmem:[%s1272_s17 + $0x68] sm:$0xf0]  ;;  %v1123_v10 = vor.u32 %v1169_v6, %v1122_v5  ;;  %v1114_v12 = vld [vmem:[%s1272_s17 + $0x50] sm:$0xf] }
  0x11   : > { %395 = vmatpush.bf16.msra.mxu0 %v1131_v3  ;;  %1183 = vmatpush.bf16.msra.mxu2 %v1131_v3  ;;  %v1127_v11 = vor.u32 %v1168_v8, %v1124_v9  ;;  %v1167_v13 = vld [vmem:[%s1272_s17 + $0x54] sm:$0xf0]  ;;  %v1166_v14 = vld [vmem:[%s1272_s17 + $0x54] sm:$0xf]  ;;  %v1116_v15 = vld [vmem:[%s1272_s17 + $0x58] sm:$0xf0] }
  0x12   : > { %484 = vmatpush.bf16.msra.mxu1 %v1135_v7  ;;  %1191 = vmatpush.bf16.msra.mxu3 %v1135_v7  ;;  %v1115_v16 = vor.u32 %v1167_v13, %v1114_v12  ;;  %v1119_v17 = vor.u32 %v1166_v14, %v1116_v15  ;;  %v1106_v18 = vld [vmem:[%s1272_s17 + $0x40] sm:$0xf]  ;;  %v1165_v19 = vld [vmem:[%s1272_s17 + $0x44] sm:$0xf0]  ;;  %v1164_v20 = vld [vmem:[%s1272_s17 + $0x44] sm:$0xf] }
  0x13   : > { %v1108_v21 = vld [vmem:[%s1272_s17 + $0x48] sm:$0xf0]  ;;  %v1107_v22 = vor.u32 %v1165_v19, %v1106_v18  ;;  %v1098_v24 = vld [vmem:[%s1272_s17 + $0x30] sm:$0xf]  ;;  %v1163_v25 = vld [vmem:[%s1272_s17 + $0x34] sm:$0xf0] }
  0x14   : > { %v1111_v23 = vor.u32 %v1164_v20, %v1108_v21  ;;  %v1162_v26 = vld [vmem:[%s1272_s17 + $0x34] sm:$0xf]  ;;  %v1100_v27 = vld [vmem:[%s1272_s17 + $0x38] sm:$0xf0]  ;;  %v1099_v28 = vor.u32 %v1163_v25, %v1098_v24  ;;  %v1090_v30 = vld [vmem:[%s1272_s17 + $0x20] sm:$0xf] }
  0x15   : > { %396 = vmatpush.bf16.msra.mxu0 %v1123_v10  ;;  %1184 = vmatpush.bf16.msra.mxu2 %v1123_v10  ;;  %v1103_v29 = vor.u32 %v1162_v26, %v1100_v27  ;;  %v1161_v31 = vld [vmem:[%s1272_s17 + $0x24] sm:$0xf0]  ;;  %v1160_v32 = vld [vmem:[%s1272_s17 + $0x24] sm:$0xf]  ;;  %v1092_v33 = vld [vmem:[%s1272_s17 + $0x28] sm:$0xf0] }
  0x16   : > { %485 = vmatpush.bf16.msra.mxu1 %v1127_v11  ;;  %1192 = vmatpush.bf16.msra.mxu3 %v1127_v11  ;;  %v1091_v34 = vor.u32 %v1161_v31, %v1090_v30  ;;  %v1095_v35 = vor.u32 %v1160_v32, %v1092_v33  ;;  %v1082_v36 = vld [vmem:[%s1272_s17 + $0x10] sm:$0xf]  ;;  %v1159_v37 = vld [vmem:[%s1272_s17 + $0x14] sm:$0xf0]  ;;  %v1158_v38 = vld [vmem:[%s1272_s17 + $0x14] sm:$0xf] }
  0x17   : > { %v1084_v39 = vld [vmem:[%s1272_s17 + $0x18] sm:$0xf0]  ;;  %v1083_v40 = vor.u32 %v1159_v37, %v1082_v36  ;;  %v1074_v42 = vld [vmem:[%s1272_s17] sm:$0xf]  ;;  %v1157_v43 = vld [vmem:[%s1272_s17 + $0x4] sm:$0xf0] }
  0x18   : > { %v1087_v41 = vor.u32 %v1158_v38, %v1084_v39  ;;  %v1156_v44 = vld [vmem:[%s1272_s17 + $0x4] sm:$0xf]  ;;  %v1076_v45 = vld [vmem:[%s1272_s17 + $0x8] sm:$0xf0]  ;;  %v1075_v46 = vor.u32 %v1157_v43, %v1074_v42  ;;  %v1143_v55 = vld [vmem:[%s1495_s1 + $0x18] sm:$0xff]  ;;  %s1139_s7 = sshll.u32 %s1499_s13, 4 }
  0x19   : > { %397 = vmatpush.bf16.msra.mxu0 %v1115_v16  ;;  %1185 = vmatpush.bf16.msra.mxu2 %v1115_v16  ;;  %v1079_v47 = vor.u32 %v1156_v44, %v1076_v45  ;;  %v1144_v57 = vld [vmem:[%s1495_s1 + $0x20] sm:$0xff]  ;;  %v1145_v59 = vld [vmem:[%s1495_s1 + $0x28] sm:$0xff]  ;;  %v1146_v60 = vld [vmem:[%s1495_s1 + $0x30] sm:$0xff]  ;;  %s170_s10 = scalar_lea.vmem %s1497_s3, %s1139_s7 }
  0x1a   : > { %486 = vmatpush.bf16.msra.mxu1 %v1119_v17  ;;  %1193 = vmatpush.bf16.msra.mxu3 %v1119_v17  ;;  %v1154_v61 = vld [vmem:[%s1495_s1 + $0x70] sm:$0xff]  ;;  %v1155_v62 = vld [vmem:[%s1495_s1 + $0x78] sm:$0xff] }
  0x1b   : > { %v1147_v63 = vld [vmem:[%s1495_s1 + $0x38] sm:$0xff] }
  0x1d   : > { %398 = vmatpush.bf16.msra.mxu0 %v1107_v22  ;;  %1186 = vmatpush.bf16.msra.mxu2 %v1107_v22 }
  0x1e   : > { %487 = vmatpush.bf16.msra.mxu1 %v1111_v23  ;;  %1194 = vmatpush.bf16.msra.mxu3 %v1111_v23 }
  0x21   : > { %399 = vmatpush.bf16.msra.mxu0 %v1099_v28  ;;  %1187 = vmatpush.bf16.msra.mxu2 %v1099_v28 }
  0x22   : > { %488 = vmatpush.bf16.msra.mxu1 %v1103_v29  ;;  %1195 = vmatpush.bf16.msra.mxu3 %v1103_v29 }
  0x25   : > { %400 = vmatpush.bf16.msra.mxu0 %v1091_v34  ;;  %1188 = vmatpush.bf16.msra.mxu2 %v1091_v34 }
  0x26   : > { %489 = vmatpush.bf16.msra.mxu1 %v1095_v35  ;;  %1196 = vmatpush.bf16.msra.mxu3 %v1095_v35 }
  0x29   : > { %401 = vmatpush.bf16.msra.mxu0 %v1083_v40  ;;  %1189 = vmatpush.bf16.msra.mxu2 %v1083_v40 }
  0x2a   : > { %490 = vmatpush.bf16.msra.mxu1 %v1087_v41  ;;  %1197 = vmatpush.bf16.msra.mxu3 %v1087_v41 }
  0x2d   : > { %402 = vmatpush.bf16.msra.mxu0 %v1075_v46  ;;  %1190 = vmatpush.bf16.msra.mxu2 %v1075_v46 }
  0x2e   : > { %491 = vmatpush.bf16.msra.mxu1 %v1079_v47  ;;  %1198 = vmatpush.bf16.msra.mxu3 %v1079_v47 }
  0x30   : > { %403 = vmatmul.bf16.vlgmr.msra.gmra.mxu0 %v1140_v48  ;;  %443 = vmatmul.bf16.vlgmr.msra.gmra.mxu2 %v1148_v49 }
  0x31   : > { %492 = vmatmul.bf16.vlgmr.msra.gmra.mxu1 %v1140_v48  ;;  %528 = vmatmul.bf16.vlgmr.msra.gmra.mxu3 %v1148_v49 }
  0x40   : > { %408 = vmatmul.bf16.gmra.mxu0 %v1141_v50  ;;  %448 = vmatmul.bf16.gmra.mxu2 %v1149_v51 }
  0x41   : > { %495 = vmatmul.bf16.gmra.mxu1 %v1141_v50  ;;  %533 = vmatmul.bf16.gmra.mxu3 %v1149_v51 }
  0x50   : > { %413 = vmatmul.bf16.gmra.mxu0 %v1142_v52  ;;  %453 = vmatmul.bf16.gmra.mxu2 %v1150_v53 }
  0x51   : > { %498 = vmatmul.bf16.gmra.mxu1 %v1142_v52  ;;  %538 = vmatmul.bf16.gmra.mxu3 %v1150_v53 }
  0x60   : > { %458 = vmatmul.bf16.gmra.mxu2 %v1151_v54  ;;  %418 = vmatmul.bf16.gmra.mxu0 %v1143_v55 }
  0x61   : > { %543 = vmatmul.bf16.gmra.mxu3 %v1151_v54  ;;  %503 = vmatmul.bf16.gmra.mxu1 %v1143_v55 }
  0x70   : > { %463 = vmatmul.bf16.gmra.mxu2 %v1152_v56  ;;  %423 = vmatmul.bf16.gmra.mxu0 %v1144_v57 }
  0x71   : > { %548 = vmatmul.bf16.gmra.mxu3 %v1152_v56  ;;  %508 = vmatmul.bf16.gmra.mxu1 %v1144_v57 }
  0x80   : > { %468 = vmatmul.bf16.gmra.mxu2 %v1153_v58  ;;  %428 = vmatmul.bf16.gmra.mxu0 %v1145_v59 }
  0x81   : > { %513 = vmatmul.bf16.gmra.mxu1 %v1145_v59  ;;  %553 = vmatmul.bf16.gmra.mxu3 %v1153_v58 }
  0x90   : > { %433 = vmatmul.bf16.gmra.mxu0 %v1146_v60  ;;  %473 = vmatmul.bf16.gmra.mxu2 %v1154_v61 }
  0x91   : > { %558 = vmatmul.bf16.gmra.mxu3 %v1154_v61  ;;  %518 = vmatmul.bf16.gmra.mxu1 %v1146_v60 }
  0xa0   : > { %478 = vmatmul.bf16.gmra.mxu2 %v1155_v62  ;;  %438 = vmatmul.bf16.gmra.mxu0 %v1147_v63 }
  0xa1   : > { %563 = vmatmul.bf16.gmra.mxu3 %v1155_v62  ;;  %523 = vmatmul.bf16.gmra.mxu1 %v1147_v63 }
  0xad   : > { %v1354_v0 = vpop.f32.mrf.mxu0 }
  0xae   : > { %v493_v1 = vpop.f32.mrf.mxu1 }
  0xb3   : > { %v444_v2 = vpop.f32.mrf.mxu2 }
  0xb4   : > { %v529_v3 = vpop.f32.mrf.mxu3  ;;  %688 = vrot.lane.b32.xlu0 %v444_v2, %s1231_s25 }
  0xb5   : > { %v1356_v4 = vpop.f32.mrf.mxu0  ;;  %690 = vrot.lane.b32.xlu1 %v529_v3, %s1231_s25 }
  0xb6   : > { %v494_v5 = vpop.f32.mrf.mxu1 }
  0xbb   : > { %v446_v6 = vpop.f32.mrf.mxu2 }
  0xbc   : > { %v531_v7 = vpop.f32.mrf.mxu3  ;;  %692 = vrot.lane.b32.xlu2 %v446_v6, %s1231_s25 }
  0xbd   : > { %694 = vrot.lane.b32.xlu0 %v531_v7, %s1231_s25  ;;  %v1358_v8 = vpop.f32.mrf.mxu0 }
  0xbe   : > { %v496_v9 = vpop.f32.mrf.mxu1 }
  0xc3   : > { %v449_v10 = vpop.f32.mrf.mxu2 }
  0xc4   : > { %v534_v11 = vpop.f32.mrf.mxu3  ;;  %696 = vrot.lane.b32.xlu1 %v449_v10, %s1231_s25 }
  0xc5   : > { %v1360_v12 = vpop.f32.mrf.mxu0  ;;  %698 = vrot.lane.b32.xlu2 %v534_v11, %s1231_s25 }
  0xc6   : > { %v497_v13 = vpop.f32.mrf.mxu1 }
  0xcb   : > { %v451_v14 = vpop.f32.mrf.mxu2 }
  0xcc   : > { %v536_v15 = vpop.f32.mrf.mxu3  ;;  %700 = vrot.lane.b32.xlu0 %v451_v14, %s1231_s25 }
  0xcd   : > { %702 = vrot.lane.b32.xlu1 %v536_v15, %s1231_s25  ;;  %v414_v16 = vpop.f32.mrf.mxu0 }
  0xce   : > { %v499_v17 = vpop.f32.mrf.mxu1 }
  0xd3   : > { %v454_v18 = vpop.f32.mrf.mxu2 }
  0xd4   : > { %v539_v19 = vpop.f32.mrf.mxu3  ;;  %577 = vrot.lane.b32.xlu0 %v414_v16, %s1232_s26  ;;  %725 = vrot.lane.b32.xlu2 %v454_v18, %s1233_s27 }
  0xd5   : > { %v416_v20 = vpop.f32.mrf.mxu0 }
  0xd6   : > { %581 = vrot.lane.b32.xlu1 %v416_v20, %s1232_s26  ;;  %v501_v22 = vpop.f32.mrf.mxu1 }
  0xdb   : > { %v456_v23 = vpop.f32.mrf.mxu2 }
  0xdc   : > { %v541_v21 = vpop.f32.mrf.mxu3  ;;  %579 = vrot.lane.b32.xlu0 %v499_v17, %s1232_s26 }
  0xdd   : > { %731 = vrot.lane.b32.xlu2 %v541_v21, %s1233_s27  ;;  %v419_v24 = vpop.f32.mrf.mxu0 }
  0xde   : > { %583 = vrot.lane.b32.xlu1 %v501_v22, %s1232_s26  ;;  %v504_v26 = vpop.f32.mrf.mxu1 }
  0xe3   : > { %v459_v25 = vpop.f32.mrf.mxu2 }
  0xe4   : > { %727 = vrot.lane.b32.xlu0 %v539_v19, %s1233_s27  ;;  %v544_v27 = vpop.f32.mrf.mxu3 }
  0xe5   : > { %585 = vrot.lane.b32.xlu2 %v419_v24, %s1232_s26  ;;  %v421_v28 = vpop.f32.mrf.mxu0 }
  0xe6   : > { %729 = vrot.lane.b32.xlu1 %v456_v23, %s1233_s27  ;;  %v506_v30 = vpop.f32.mrf.mxu1 }
  0xeb   : > { %v461_v29 = vpop.f32.mrf.mxu2 }
  0xec   : > { %733 = vrot.lane.b32.xlu0 %v459_v25, %s1233_s27  ;;  %v546_v31 = vpop.f32.mrf.mxu3 }
  0xed   : > { %587 = vrot.lane.b32.xlu2 %v504_v26, %s1232_s26  ;;  %v424_v32 = vpop.f32.mrf.mxu0 }
  0xee   : > { %735 = vrot.lane.b32.xlu1 %v544_v27, %s1233_s27  ;;  %v509_v34 = vpop.f32.mrf.mxu1 }
  0xf3   : > { %v464_v33 = vpop.f32.mrf.mxu2 }
  0xf4   : > { %589 = vrot.lane.b32.xlu0 %v421_v28, %s1232_s26  ;;  %v549_v35 = vpop.f32.mrf.mxu3 }
  0xf5   : > { %737 = vrot.lane.b32.xlu2 %v461_v29, %s1233_s27  ;;  %v426_v36 = vpop.f32.mrf.mxu0 }
  0xf6   : > { %591 = vrot.lane.b32.xlu1 %v506_v30, %s1232_s26  ;;  %v511_v37 = vpop.f32.mrf.mxu1 }
  0xfb   : > { %v466_v38 = vpop.f32.mrf.mxu2 }
  0xfc   : > { %739 = vrot.lane.b32.xlu0 %v546_v31, %s1233_s27  ;;  %v551_v39 = vpop.f32.mrf.mxu3 }
  0xfd   : > { %614 = vrot.lane.b32.xlu2 %v424_v32, %s1234_s28  ;;  %v429_v40 = vpop.f32.mrf.mxu0 }
  0xfe   : > { %762 = vrot.lane.b32.xlu1 %v464_v33, %s1235_s29  ;;  %v514_v42 = vpop.f32.mrf.mxu1 }
 0x103   : > { %v469_v41 = vpop.f32.mrf.mxu2 }
 0x104   : > { %616 = vrot.lane.b32.xlu0 %v509_v34, %s1234_s28  ;;  %v554_v43 = vpop.f32.mrf.mxu3 }
 0x105   : > { %764 = vrot.lane.b32.xlu2 %v549_v35, %s1235_s29  ;;  %v431_v44 = vpop.f32.mrf.mxu0 }
 0x106   : > { %618 = vrot.lane.b32.xlu1 %v426_v36, %s1234_s28  ;;  %v516_v46 = vpop.f32.mrf.mxu1 }
 0x10b   : > { %v471_v45 = vpop.f32.mrf.mxu2 }
 0x10c   : > { %766 = vrot.lane.b32.xlu0 %v466_v38, %s1235_s29  ;;  %v556_v48 = vpop.f32.mrf.mxu3 }
 0x10d   : > { %620 = vrot.lane.b32.xlu2 %v511_v37, %s1234_s28  ;;  %v434_v49 = vpop.f32.mrf.mxu0 }
 0x10e   : > { %768 = vrot.lane.b32.xlu1 %v551_v39, %s1235_s29  ;;  %v519_v50 = vpop.f32.mrf.mxu1 }
 0x113   : > { %v474_v55 = vpop.f32.mrf.mxu2 }
 0x114   : > { %622 = vrot.lane.b32.xlu0 %v429_v40, %s1234_s28  ;;  %v559_v56 = vpop.f32.mrf.mxu3 }
 0x115   : > { %770 = vrot.lane.b32.xlu2 %v469_v41, %s1235_s29  ;;  %v436_v61 = vpop.f32.mrf.mxu0 }
 0x116   : > { %624 = vrot.lane.b32.xlu1 %v514_v42, %s1234_s28  ;;  %v693_v47 = vpop.permute.xlu2 %692  ;;  %v521_v59 = vpop.f32.mrf.mxu1 }
 0x11b   : > { %v476_v62 = vpop.f32.mrf.mxu2 }
 0x11c   : > { %772 = vrot.lane.b32.xlu0 %v554_v43, %s1235_s29  ;;  %v561_v5 = vpop.f32.mrf.mxu3 }
 0x11d   : > { %626 = vrot.lane.b32.xlu2 %v431_v44, %s1234_s28  ;;  %v439_v6 = vpop.f32.mrf.mxu0 }
 0x11e   : > { %774 = vrot.lane.b32.xlu1 %v471_v45, %s1235_s29  ;;  %v524_v3 = vpop.f32.mrf.mxu1 }
 0x11f   : > { %v699_v51 = vpop.permute.xlu2 %698 }
 0x123   : > { %v479_v7 = vpop.f32.mrf.mxu2 }
 0x124   : > { %628 = vrot.lane.b32.xlu0 %v516_v46, %s1234_s28  ;;  %v564_v15 = vpop.f32.mrf.mxu3 }
 0x125   : > { %776 = vrot.lane.b32.xlu2 %v556_v48, %s1235_s29  ;;  %v441_v16 = vpop.f32.mrf.mxu0 }
 0x126   : > { %v689_v52 = vpop.permute.xlu0 %688  ;;  %651 = vrot.lane.b32.xlu1 %v434_v49, %s1236_s30  ;;  %v526_v14 = vpop.f32.mrf.mxu1 }
 0x127   : > { %v691_v53 = vpop.permute.xlu1 %690 }
 0x128   : > { %v1380_v54 = vsel %vm704_vm0, %v689_v52, %v691_v53 }
 0x12b   : > { %v481_v21 = vpop.f32.mrf.mxu2 }
 0x12c   : > { %799 = vrot.lane.b32.xlu0 %v474_v55, %s1237_s4  ;;  %v566_v22 = vpop.f32.mrf.mxu3 }
 0x12d   : > { %653 = vrot.lane.b32.xlu2 %v519_v50, %s1236_s30 }
 0x12e   : > { %v726_v57 = vpop.permute.xlu2 %725  ;;  %801 = vrot.lane.b32.xlu1 %v559_v56, %s1237_s4 }
 0x12f   : > { %v695_v58 = vpop.permute.xlu0 %694 }
 0x130   : > { %v1386_v60 = vsel %vm704_vm0, %v693_v47, %v695_v58 }
 0x134   : > { %655 = vrot.lane.b32.xlu0 %v436_v61, %s1236_s30 }
 0x135   : > { %803 = vrot.lane.b32.xlu2 %v476_v62, %s1237_s4 }
 0x136   : > { %v697_v63 = vpop.permute.xlu1 %696  ;;  %657 = vrot.lane.b32.xlu1 %v521_v59, %s1236_s30 }
 0x137   : > { %v1392_v1 = vsel %vm704_vm0, %v697_v63, %v699_v51  ;;  %v732_v2 = vpop.permute.xlu2 %731 }
 0x13c   : > { %805 = vrot.lane.b32.xlu0 %v561_v5, %s1237_s4 }
 0x13d   : > { %659 = vrot.lane.b32.xlu2 %v439_v6, %s1236_s30 }
 0x13e   : > { %v701_v9 = vpop.permute.xlu0 %700  ;;  %807 = vrot.lane.b32.xlu1 %v479_v7, %s1237_s4 }
 0x13f   : > { %v703_v10 = vpop.permute.xlu1 %702  ;;  %v586_v11 = vpop.permute.xlu2 %585 }
 0x140   : > { %v1398_v13 = vsel %vm704_vm0, %v701_v9, %v703_v10 }
 0x144   : > { %661 = vrot.lane.b32.xlu0 %v524_v3, %s1236_s30 }
 0x145   : > { %665 = vrot.lane.b32.xlu2 %v526_v14, %s1236_s30 }
 0x146   : > { %v578_v17 = vpop.permute.xlu0 %577  ;;  %663 = vrot.lane.b32.xlu1 %v441_v16, %s1236_s30 }
 0x147   : > { %v588_v18 = vpop.permute.xlu2 %587 }
 0x148   : > { %v1404_v19 = vsel %vm593_vm1, %v586_v11, %v588_v18  ;;  %v582_v20 = vpop.permute.xlu1 %581 }
 0x14c   : > { %811 = vrot.lane.b32.xlu0 %v481_v21, %s1237_s4 }
 0x14d   : > { %809 = vrot.lane.b32.xlu2 %v564_v15, %s1237_s4 }
 0x14e   : > { %v580_v23 = vpop.permute.xlu0 %579  ;;  %813 = vrot.lane.b32.xlu1 %v566_v22, %s1237_s4 }
 0x14f   : > { %v594_v24 = vsel %vm593_vm1, %v578_v17, %v580_v23  ;;  %v738_v25 = vpop.permute.xlu2 %737 }
 0x150   : > { %v584_v26 = vpop.permute.xlu1 %583 }
 0x151   : > { %v595_v27 = vsel %vm593_vm1, %v582_v20, %v584_v26 }
 0x152   : > { %v603_v17 = vadd.f32 %v595_v27, %v1356_v4 }
 0x156   : > { %v728_v28 = vpop.permute.xlu0 %727 }
 0x157   : > { %v742_v29 = vsel %vm741_vm2, %v726_v57, %v728_v28  ;;  %v615_v32 = vpop.permute.xlu2 %614  ;;  %v602_v57 = vadd.f32 %v594_v24, %v1354_v0  ;;  %v1214_v0 = vld [vmem:[%s1496_s2] ss:$0 sm:$0xff] }
 0x158   : > { %v730_v30 = vpop.permute.xlu1 %729 }
 0x159   : > { %v743_v31 = vsel %vm741_vm2, %v730_v30, %v732_v2 }
 0x15e   : > { %v734_v33 = vpop.permute.xlu0 %733 }
 0x15f   : > { %v765_v36 = vpop.permute.xlu2 %764 }
 0x160   : > { %v736_v34 = vpop.permute.xlu1 %735 }
 0x161   : > { %v1411_v35 = vsel %vm741_vm2, %v734_v33, %v736_v34 }
 0x166   : > { %v590_v37 = vpop.permute.xlu0 %589 }
 0x167   : > { %v621_v40 = vpop.permute.xlu2 %620 }
 0x168   : > { %v592_v38 = vpop.permute.xlu1 %591 }
 0x169   : > { %v1414_v39 = vsel %vm593_vm1, %v590_v37, %v592_v38 }
 0x16e   : > { %v740_v41 = vpop.permute.xlu0 %739 }
 0x16f   : > { %v1416_v42 = vsel %vm741_vm2, %v738_v25, %v740_v41  ;;  %v1418_v45 = vpop.permute.xlu2 %770 }
 0x170   : > { %v763_v43 = vpop.permute.xlu1 %762 }
 0x171   : > { %v779_v7 = vsel %vm778_vm5, %v763_v43, %v765_v36  ;;  %v604_v36 = vadd.f32 %v1404_v19, %v1358_v8 }
 0x176   : > { %v617_v44 = vpop.permute.xlu0 %616 }
 0x177   : > { %v627_v49 = vpop.permute.xlu2 %626  ;;  %v631_v56 = vsel %vm630_vm3, %v615_v32, %v617_v44 }
 0x178   : > { %v619_v46 = vpop.permute.xlu1 %618  ;;  %v639_v61 = vadd.f32 %v631_v56, %v602_v57 }
 0x17e   : > { %v767_v47 = vpop.permute.xlu0 %766 }
 0x17f   : > { %v1420_v52 = vpop.permute.xlu2 %776 }
 0x180   : > { %v769_v48 = vpop.permute.xlu1 %768 }
 0x181   : > { %v780_v30 = vsel %vm778_vm5, %v767_v47, %v769_v48 }
 0x186   : > { %v623_v50 = vpop.permute.xlu0 %622 }
 0x187   : > { %v654_v58 = vpop.permute.xlu2 %653 }
 0x188   : > { %v625_v51 = vpop.permute.xlu1 %624 }
 0x189   : > { %v633_v34 = vsel %vm630_vm3, %v623_v50, %v625_v51 }
 0x18e   : > { %v1422_v53 = vpop.permute.xlu0 %772 }
 0x18f   : > { %v804_v9 = vpop.permute.xlu2 %803 }
 0x190   : > { %v1424_v55 = vpop.permute.xlu1 %774 }
 0x196   : > { %v629_v59 = vpop.permute.xlu0 %628 }
 0x197   : > { %v660_v23 = vpop.permute.xlu2 %659  ;;  %v634_v38 = vsel %vm630_vm3, %v627_v49, %v629_v59 }
 0x198   : > { %v652_v62 = vpop.permute.xlu1 %651 }
 0x199   : > { %v668_v63 = vsel %vm667_vm4, %v652_v62, %v654_v58  ;;  %v782_v58 = vsel %vm778_vm5, %v1424_v55, %v1420_v52 }
 0x19a   : > { %v676_v2 = vadd.f32 %v668_v63, %v639_v61 }
 0x19c   : > { %v713_v3 = vadd.f32 %v1380_v54, %v676_v2  ;;  %v632_v54 = vsel %vm630_vm3, %v619_v46, %v621_v40  ;;  %v641_v40 = vadd.f32 %v633_v34, %v604_v36 }
 0x19d   : > { %v640_v20 = vadd.f32 %v632_v54, %v603_v17 }
 0x19e   : > { %v800_v5 = vpop.permute.xlu0 %799  ;;  %v750_v6 = vadd.f32 %v742_v29, %v713_v3 }
 0x19f   : > { %v666_v37 = vpop.permute.xlu2 %665 }
 0x1a0   : > { %v802_v10 = vpop.permute.xlu1 %801  ;;  %v787_v11 = vadd.f32 %v779_v7, %v750_v6 }
 0x1a1   : > { %v816_v14 = vsel %vm815_vm6, %v800_v5, %v802_v10 }
 0x1a2   : > { %v1435_v15 = vadd.f32 %v816_v14, %v787_v11 }
 0x1a4   : > { %v832_v16 = vmul.f32 %v1214_v0, %v1435_v15 }
 0x1a6   : > { %v656_v18 = vpop.permute.xlu0 %655  ;;  %836 = vadd.xlane.f32.xlu2 %v832_v16  ;;  %v844_v26 = vmul.f32 %v832_v16, %v832_v16 }
 0x1a8   : > { %v658_v21 = vpop.permute.xlu1 %657 }
 0x1a9   : > { %v669_v22 = vsel %vm667_vm4, %v656_v18, %v658_v21 }
 0x1aa   : > { %v677_v24 = vadd.f32 %v669_v22, %v640_v20 }
 0x1ac   : > { %v714_v25 = vadd.f32 %v1386_v60, %v677_v24 }
 0x1ae   : > { %v806_v28 = vpop.permute.xlu0 %805  ;;  %v751_v29 = vadd.f32 %v743_v31, %v714_v25  ;;  %848 = vadd.xlane.f32.xlu2 %v844_v26  ;;  %v605_v31 = vadd.f32 %v1414_v39, %v1360_v12  ;;  %v781_v12 = vsel %vm778_vm5, %v1418_v45, %v1422_v53  ;;  %v810_v39 = vpop.permute.xlu2 %809 }
 0x1af   : > { %v817_v4 = vsel %vm815_vm6, %v804_v9, %v806_v28 }
 0x1b0   : > { %v788_v32 = vadd.f32 %v780_v30, %v751_v29  ;;  %v808_v33 = vpop.permute.xlu1 %807  ;;  %v642_v44 = vadd.f32 %v634_v38, %v605_v31 }
 0x1b2   : > { %v1444_v27 = vadd.f32 %v817_v4, %v788_v32 }
 0x1b4   : > { %v833_v60 = vmul.f32 %v1214_v0, %v1444_v27 }
 0x1b6   : > { %838 = vadd.xlane.f32.xlu0 %v833_v60  ;;  %v662_v41 = vpop.permute.xlu0 %661  ;;  %v845_v51 = vmul.f32 %v833_v60, %v833_v60 }
 0x1b7   : > { %v670_v43 = vsel %vm667_vm4, %v660_v23, %v662_v41 }
 0x1b8   : > { %v678_v46 = vadd.f32 %v670_v43, %v641_v40  ;;  %v664_v47 = vpop.permute.xlu1 %663 }
 0x1b9   : > { %v671_v48 = vsel %vm667_vm4, %v664_v47, %v666_v37 }
 0x1ba   : > { %v715_v8 = vadd.f32 %v1392_v1, %v678_v46  ;;  %v679_v19 = vadd.f32 %v671_v48, %v642_v44  ;;  %v818_v1 = vsel %vm815_vm6, %v808_v33, %v810_v39 }
 0x1bc   : > { %v752_v50 = vadd.f32 %v1411_v35, %v715_v8  ;;  %v716_v49 = vadd.f32 %v1398_v13, %v679_v19 }
 0x1be   : > { %850 = vadd.xlane.f32.xlu0 %v845_v51  ;;  %v753_v56 = vadd.f32 %v1416_v42, %v716_v49  ;;  %v789_v57 = vadd.f32 %v781_v12, %v752_v50  ;;  %v812_v59 = vpop.permute.xlu0 %811 }
 0x1c0   : > { %v814_v35 = vpop.permute.xlu1 %813  ;;  %v790_v61 = vadd.f32 %v782_v58, %v753_v56  ;;  %v1466_v13 = vadd.f32 %v818_v1, %v789_v57 }
 0x1c1   : > { %v819_v62 = vsel %vm815_vm6, %v812_v59, %v814_v35 }
 0x1c2   : > { %v1469_v63 = vadd.f32 %v819_v62, %v790_v61  ;;  %v834_v45 = vmul.f32 %v1214_v0, %v1466_v13 }
 0x1c4   : > { %840 = vadd.xlane.f32.xlu1 %v834_v45  ;;  %v835_v42 = vmul.f32 %v1214_v0, %v1469_v63  ;;  %v846_v53 = vmul.f32 %v834_v45, %v834_v45 }
 0x1c6   : > { %842 = vadd.xlane.f32.xlu2 %v835_v42  ;;  %v847_v52 = vmul.f32 %v835_v42, %v835_v42 }
 0x1cc   : > { %852 = vadd.xlane.f32.xlu1 %v846_v53 }
 0x1ce   : > { %854 = vadd.xlane.f32.xlu2 %v847_v52 }
 0x219   : > { %v837_v55 = vpop.xlane.xlu2 %836 }
 0x21a   : > { %v856_v2 = vmul.f32 0.015625, %v837_v55 }
 0x21c   : > { %v864_v5 = vmul.f32 %v856_v2, %v856_v2  ;;  %v876_v48 = vsub.f32 %v1435_v15, %v856_v2 }
 0x221   : > { %v849_v3 = vpop.xlane.xlu2 %848 }
 0x222   : > { %v860_v6 = vmul.f32 0.015625, %v849_v3 }
 0x224   : > { %v868_v7 = vsub.f32 %v860_v6, %v864_v5 }
 0x226   : > { %v872_v9 = vmax.f32 %v868_v7, 0.0 }
 0x228   : > { %v880_v10 = vadd.f32 1e-05, %v872_v9 }
 0x229   : > { %v839_v11 = vpop.xlane.xlu0 %838 }
 0x22a   : > { %1215 = vrsqrt.f32 %v880_v10  ;;  %v857_v14 = vmul.f32 0.015625, %v839_v11  ;;  %vm890_vm8 = vweird.f32 %v880_v10 }
 0x22c   : > { %v865_v0 = vmul.f32 %v857_v14, %v857_v14  ;;  %v877_v39 = vsub.f32 %v1444_v27, %v857_v14 }
 0x230   : > { %v1216_v16 = vpop.eup %1215 }
 0x231   : > { %v885_v54 = vmul.f32 %v1216_v16, %v880_v10  ;;  %v851_v17 = vpop.xlane.xlu0 %850  ;;  %vm891_vm7 = vweird.f32 %v1216_v16 }
 0x232   : > { %v861_v18 = vmul.f32 0.015625, %v851_v17  ;;  %vm892_vm9 = vmor %vm890_vm8, %vm891_vm7 }
 0x233   : > { %v886_v21 = vmul.f32 %v1216_v16, %v885_v54 }
 0x234   : > { %v869_v20 = vsub.f32 %v861_v18, %v865_v0 }
 0x235   : > { %v887_v25 = vmul.f32 0.5, %v886_v21 }
 0x236   : > { %v873_v22 = vmax.f32 %v869_v20, 0.0 }
 0x237   : > { %v841_v23 = vpop.xlane.xlu1 %840  ;;  %v888_v29 = vsub.f32 1.5, %v887_v25 }
 0x238   : > { %v881_v24 = vadd.f32 1e-05, %v873_v22  ;;  %v1473_v28 = vmul.f32 0.015625, %v841_v23 }
 0x239   : > { %v843_v26 = vpop.xlane.xlu2 %842  ;;  %v889_v36 = vmul.f32 %v1216_v16, %v888_v29 }
 0x23a   : > { %1217 = vrsqrt.f32 %v881_v24  ;;  %v1475_v30 = vmul.f32 0.015625, %v843_v26  ;;  %v866_v4 = vmul.f32 %v1473_v28, %v1473_v28  ;;  %vm900_vm11 = vweird.f32 %v881_v24 }
 0x23b   : > { %v893_v46 = vsel %vm892_vm9, %v1216_v16, %v889_v36  ;;  %v878_v6 = vsub.f32 %v1466_v13, %v1473_v28 }
 0x23c   : > { %v867_v38 = vmul.f32 %v1475_v30, %v1475_v30  ;;  %v924_v49 = vmul.f32 %v893_v46, %v876_v48  ;;  %v879_v10 = vsub.f32 %v1469_v63, %v1475_v30 }
 0x23e   : > { %v928_v57 = vmul.f32 0.2, %v924_v49 }
 0x23f   : > { %v853_v32 = vpop.xlane.xlu1 %852 }
 0x240   : > { %v1218_v33 = vpop.eup %1217  ;;  %v862_v34 = vmul.f32 0.015625, %v853_v32  ;;  %v932_v61 = vmax.f32 %v924_v49, %v928_v57 }
 0x241   : > { %v895_v37 = vmul.f32 %v1218_v33, %v881_v24  ;;  %v855_v60 = vpop.xlane.xlu2 %854  ;;  %vm901_vm10 = vweird.f32 %v1218_v33 }
 0x242   : > { %v870_v31 = vsub.f32 %v862_v34, %v866_v4  ;;  %v863_v40 = vmul.f32 0.015625, %v855_v60  ;;  %vm902_vm12 = vmor %vm900_vm11, %vm901_vm10 }
 0x243   : > { %v896_v41 = vmul.f32 %v1218_v33, %v895_v37 }
 0x244   : > { %v874_v43 = vmax.f32 %v870_v31, 0.0  ;;  %v871_v44 = vsub.f32 %v863_v40, %v867_v38 }
 0x245   : > { %v897_v47 = vmul.f32 0.5, %v896_v41 }
 0x246   : > { %v882_v8 = vadd.f32 1e-05, %v874_v43  ;;  %v875_v19 = vmax.f32 %v871_v44, 0.0 }
 0x247   : > { %v898_v50 = vsub.f32 1.5, %v897_v47 }
 0x248   : > { %1219 = vrsqrt.f32 %v882_v8  ;;  %v883_v51 = vadd.f32 1e-05, %v875_v19  ;;  %vm910_vm14 = vweird.f32 %v882_v8 }
 0x249   : > { %v899_v12 = vmul.f32 %v1218_v33, %v898_v50 }
 0x24a   : > { %1221 = vrsqrt.f32 %v883_v51  ;;  %vm920_vm1 = vweird.f32 %v883_v51 }
 0x24b   : > { %v903_v56 = vsel %vm902_vm12, %v1218_v33, %v899_v12 }
 0x24c   : > { %v925_v58 = vmul.f32 %v903_v56, %v877_v39 }
 0x24e   : > { %v1220_v1 = vpop.eup %1219  ;;  %v929_v15 = vmul.f32 0.2, %v925_v58 }
 0x24f   : > { %v905_v59 = vmul.f32 %v1220_v1, %v882_v8  ;;  %vm911_vm13 = vweird.f32 %v1220_v1 }
 0x250   : > { %v1222_v35 = vpop.eup %1221  ;;  %v933_v62 = vmax.f32 %v925_v58, %v929_v15  ;;  %vm912_vm0 = vmor %vm910_vm14, %vm911_vm13 }
 0x251   : > { %v906_v45 = vmul.f32 %v1220_v1, %v905_v59  ;;  %v915_v42 = vmul.f32 %v1222_v35, %v883_v51  ;;  %vm921_vm15 = vweird.f32 %v1222_v35 }
 0x252   : > { %v1175_v53 = vpack.c.bf16 %v933_v62, %v932_v61  ;;  %vm922_vm2 = vmor %vm920_vm1, %vm921_vm15 }
 0x253   : > { %v907_v27 = vmul.f32 0.5, %v906_v45  ;;  %v916_v52 = vmul.f32 %v1222_v35, %v915_v42 }
 0x254   : > { %1176 = vst [vmem:[%s170_s10] sm:$0xff] %v1175_v53  }
 0x255   : > { %v908_v55 = vsub.f32 1.5, %v907_v27  ;;  %v917_v2 = vmul.f32 0.5, %v916_v52 }
 0x257   : > { %v909_v3 = vmul.f32 %v1220_v1, %v908_v55  ;;  %v918_v5 = vsub.f32 1.5, %v917_v2 }
 0x259   : > { %v913_v7 = vsel %vm912_vm0, %v1220_v1, %v909_v3  ;;  %v919_v9 = vmul.f32 %v1222_v35, %v918_v5 }
 0x25a   : > { %v926_v11 = vmul.f32 %v913_v7, %v878_v6 }
 0x25b   : > { %v923_v14 = vsel %vm922_vm2, %v1222_v35, %v919_v9 }
 0x25c   : > { %v930_v16 = vmul.f32 0.2, %v926_v11  ;;  %v927_v54 = vmul.f32 %v923_v14, %v879_v10 }
 0x25e   : > { %v931_v17 = vmul.f32 0.2, %v927_v54  ;;  %v934_v0 = vmax.f32 %v926_v11, %v930_v16 }
 0x260   : > { %v935_v18 = vmax.f32 %v927_v54, %v931_v17 }
 0x262   : > { %v1180_v20 = vpack.c.bf16 %v935_v18, %v934_v0 }
 0x264   : > { %1182 = vst [vmem:[%s170_s10 + $0x8] sm:$0xff] %v1180_v20  }
 0x265 PF: > { %s13_s12 = sadd.s32 1, %s1229_s12  }
 0x266   : > { %p10_p4 = scmp.ge.s32.totalorder %s13_s12, 4  }
 0x268   :  { %12 = sbr.rel (!%p10_p4) target bundleno = 1 (0x1), region = 62 }

// kernel: _lambda_.8
= control target key start
LH: loop header
LB: loop body
LE: loop exit
PB: predicated region body
PF: predicated region fallthrough
CT: control target
= control target key end

     0   :  { %s2784_s12 = smov 0   ;;  %s3665_s0 = inlined_call_operand.vmem [shape: bf16[2,256,256], index: 0, kind: input, shape index: {}]   ;;  %s3666_s1 = inlined_call_operand.vmem [shape: bf16[512,256], index: 1, kind: input, shape index: {}]   ;;  %s3667_s2 = inlined_call_operand.vmem [shape: f32[1,128], index: 2, kind: input, shape index: {}]   ;;  %s3668_s3 = inlined_call_operand.vmem [shape: bf16[2,64,128], index: 3, kind: output, shape index: {}]  }
   0x1 LB: > { %s2201_s13 = sadd.s32 4294967295, %s2755_s12   ;;  %p2205_p0 = scmp.ge.s32.totalorder %s2755_s12, 1  ;;  %s2755_s12 = sphi %s2784_s12, %s13_s12  }
   0x2   : > { %p137_p1 = scmp.lt.s32.totalorder %s2755_s12, 3 }
   0x4   : > { %p138_p2 = pnand %p2205_p0, %p137_p1 }
   0x5   : > { %p161_p3 = scmp.lt.s32.totalorder (!%p138_p2), %s2201_s13, 1  ;;  %s2757_s22 = smov (!%p138_p2), 127  }
   0x6   : > { %141 = sbr.rel (%p138_p2) target bundleno = 968 (0x3c8), region = 32  ;;  %s2758_s4 = smov (!%p138_p2), 125  }
   0x7   : > { %s2760_s23 = smov (!%p138_p2), 119   ;;  %s2761_s5 = smov (!%p138_p2), 118  }
   0x8   : > { %s2762_s6 = smov (!%p138_p2), 116  }
   0xb   : > { %s3670_s13 = smov (!%p161_p3, %s2201_s13), 1  ;;  %vm1455_vm0 = vcmask 1039360   ;;  %vm1528_vm1 = vcmask 1022976   ;;  %vm1601_vm2 = vcmask 1014784   ;;  %vm1674_vm3 = vcmask 973824  }
   0xc   : > { %s2596_s14 = sshll.u32 %s3670_s13, 8  ;;  %vm1747_vm4 = vcmask 965632   ;;  %vm1820_vm5 = vcmask 949248   ;;  %vm1893_vm6 = vcmask 941056   ;;  %s2597_s7 = sshll.u32 %s3670_s13, 5 }
   0xd   : > { %s2798_s17 = scalar_lea.vmem %s3665_s0, %s2596_s14  ;;  %s2759_s14 = smov 124  }
   0xe   : > { %v2524_v0 = vld [vmem:[%s2798_s17 + $0x70] sm:$0xf]  ;;  %v2677_v1 = vld [vmem:[%s2798_s17 + $0x74] sm:$0xf0]  ;;  %v2676_v5 = vld [vmem:[%s2798_s17 + $0x74] sm:$0xf]  ;;  %s3627_s10 = scalar_lea.vmem %s3668_s3, %s2597_s7 }
   0xf   : > { %v2588_v2 = vld [vmem:[%s2798_s17 + $0xf0] sm:$0xf]  ;;  %v2525_v3 = vor.u32 %v2677_v1, %v2524_v0  ;;  %v2693_v4 = vld [vmem:[%s2798_s17 + $0xf4] sm:$0xf0]  ;;  %v2526_v6 = vld [vmem:[%s2798_s17 + $0x78] sm:$0xf0] }
  0x10   : > { %v2589_v7 = vor.u32 %v2693_v4, %v2588_v2  ;;  %v2529_v8 = vor.u32 %v2676_v5, %v2526_v6  ;;  %v2692_v9 = vld [vmem:[%s2798_s17 + $0xf4] sm:$0xf]  ;;  %v2590_v10 = vld [vmem:[%s2798_s17 + $0xf8] sm:$0xf0]  ;;  %v2516_v11 = vld [vmem:[%s2798_s17 + $0x60] sm:$0xf] }
  0x11   : > { %747 = vmatpush.bf16.msra.mxu0 %v2525_v3  ;;  %v2593_v12 = vor.u32 %v2692_v9, %v2590_v10  ;;  %v2675_v13 = vld [vmem:[%s2798_s17 + $0x64] sm:$0xf0]  ;;  %v2580_v14 = vld [vmem:[%s2798_s17 + $0xe0] sm:$0xf]  ;;  %v2674_v18 = vld [vmem:[%s2798_s17 + $0x64] sm:$0xf] }
  0x12   : > { %v2691_v15 = vld [vmem:[%s2798_s17 + $0xe4] sm:$0xf0]  ;;  %916 = vmatpush.bf16.msra.mxu1 %v2589_v7  ;;  %1085 = vmatpush.bf16.msra.mxu2 %v2529_v8  ;;  %v2517_v16 = vor.u32 %v2675_v13, %v2516_v11  ;;  %v2518_v19 = vld [vmem:[%s2798_s17 + $0x68] sm:$0xf0]  ;;  %v2690_v20 = vld [vmem:[%s2798_s17 + $0xe4] sm:$0xf] }
  0x13   : > { %v2581_v17 = vor.u32 %v2691_v15, %v2580_v14  ;;  %1246 = vmatpush.bf16.msra.mxu3 %v2593_v12  ;;  %v2521_v21 = vor.u32 %v2674_v18, %v2518_v19  ;;  %v2582_v22 = vld [vmem:[%s2798_s17 + $0xe8] sm:$0xf0]  ;;  %v2508_v23 = vld [vmem:[%s2798_s17 + $0x50] sm:$0xf]  ;;  %v2673_v24 = vld [vmem:[%s2798_s17 + $0x54] sm:$0xf0] }
  0x14   : > { %v2585_v25 = vor.u32 %v2690_v20, %v2582_v22  ;;  %v2572_v26 = vld [vmem:[%s2798_s17 + $0xd0] sm:$0xf]  ;;  %v2689_v27 = vld [vmem:[%s2798_s17 + $0xd4] sm:$0xf0]  ;;  %v2672_v28 = vld [vmem:[%s2798_s17 + $0x54] sm:$0xf]  ;;  %v2509_v29 = vor.u32 %v2673_v24, %v2508_v23 }
  0x15   : > { %748 = vmatpush.bf16.msra.mxu0 %v2517_v16  ;;  %v2510_v30 = vld [vmem:[%s2798_s17 + $0x58] sm:$0xf0]  ;;  %v2688_v31 = vld [vmem:[%s2798_s17 + $0xd4] sm:$0xf]  ;;  %v2573_v33 = vor.u32 %v2689_v27, %v2572_v26  ;;  %v2500_v35 = vld [vmem:[%s2798_s17 + $0x40] sm:$0xf] }
  0x16   : > { %v2574_v32 = vld [vmem:[%s2798_s17 + $0xd8] sm:$0xf0]  ;;  %917 = vmatpush.bf16.msra.mxu1 %v2581_v17  ;;  %1086 = vmatpush.bf16.msra.mxu2 %v2521_v21  ;;  %v2513_v34 = vor.u32 %v2672_v28, %v2510_v30  ;;  %v2671_v36 = vld [vmem:[%s2798_s17 + $0x44] sm:$0xf0]  ;;  %v2564_v37 = vld [vmem:[%s2798_s17 + $0xc0] sm:$0xf] }
  0x17   : > { %1247 = vmatpush.bf16.msra.mxu3 %v2585_v25  ;;  %v2577_v38 = vor.u32 %v2688_v31, %v2574_v32  ;;  %v2687_v39 = vld [vmem:[%s2798_s17 + $0xc4] sm:$0xf0]  ;;  %v2670_v40 = vld [vmem:[%s2798_s17 + $0x44] sm:$0xf]  ;;  %v2502_v41 = vld [vmem:[%s2798_s17 + $0x48] sm:$0xf0]  ;;  %v2501_v44 = vor.u32 %v2671_v36, %v2500_v35 }
  0x18   : > { %v2686_v42 = vld [vmem:[%s2798_s17 + $0xc4] sm:$0xf]  ;;  %v2566_v43 = vld [vmem:[%s2798_s17 + $0xc8] sm:$0xf0]  ;;  %v2565_v45 = vor.u32 %v2687_v39, %v2564_v37  ;;  %v2505_v46 = vor.u32 %v2670_v40, %v2502_v41  ;;  %v2492_v47 = vld [vmem:[%s2798_s17 + $0x30] sm:$0xf] }
  0x19   : > { %749 = vmatpush.bf16.msra.mxu0 %v2509_v29  ;;  %v2669_v48 = vld [vmem:[%s2798_s17 + $0x34] sm:$0xf0]  ;;  %v2556_v49 = vld [vmem:[%s2798_s17 + $0xb0] sm:$0xf]  ;;  %v2569_v50 = vor.u32 %v2686_v42, %v2566_v43  ;;  %v2668_v52 = vld [vmem:[%s2798_s17 + $0x34] sm:$0xf] }
  0x1a   : > { %918 = vmatpush.bf16.msra.mxu1 %v2573_v33  ;;  %1087 = vmatpush.bf16.msra.mxu2 %v2513_v34  ;;  %v2685_v51 = vld [vmem:[%s2798_s17 + $0xb4] sm:$0xf0]  ;;  %v2494_v53 = vld [vmem:[%s2798_s17 + $0x38] sm:$0xf0]  ;;  %v2684_v54 = vld [vmem:[%s2798_s17 + $0xb4] sm:$0xf]  ;;  %v2493_v56 = vor.u32 %v2669_v48, %v2492_v47 }
  0x1b   : > { %1248 = vmatpush.bf16.msra.mxu3 %v2577_v38  ;;  %v2558_v55 = vld [vmem:[%s2798_s17 + $0xb8] sm:$0xf0]  ;;  %v2557_v57 = vor.u32 %v2685_v51, %v2556_v49  ;;  %v2497_v58 = vor.u32 %v2668_v52, %v2494_v53  ;;  %v2484_v59 = vld [vmem:[%s2798_s17 + $0x20] sm:$0xf]  ;;  %v2667_v60 = vld [vmem:[%s2798_s17 + $0x24] sm:$0xf0] }
  0x1c   : > { %v2548_v61 = vld [vmem:[%s2798_s17 + $0xa0] sm:$0xf]  ;;  %v2561_v62 = vor.u32 %v2684_v54, %v2558_v55  ;;  %v2683_v63 = vld [vmem:[%s2798_s17 + $0xa4] sm:$0xf0]  ;;  %v2666_v0 = vld [vmem:[%s2798_s17 + $0x24] sm:$0xf]  ;;  %v2485_v4 = vor.u32 %v2667_v60, %v2484_v59 }
  0x1d   : > { %750 = vmatpush.bf16.msra.mxu0 %v2501_v44  ;;  %v2486_v1 = vld [vmem:[%s2798_s17 + $0x28] sm:$0xf0]  ;;  %v2682_v2 = vld [vmem:[%s2798_s17 + $0xa4] sm:$0xf]  ;;  %v2549_v5 = vor.u32 %v2683_v63, %v2548_v61  ;;  %v2476_v7 = vld [vmem:[%s2798_s17 + $0x10] sm:$0xf] }
  0x1e   : > { %919 = vmatpush.bf16.msra.mxu1 %v2565_v45  ;;  %1088 = vmatpush.bf16.msra.mxu2 %v2505_v46  ;;  %v2550_v3 = vld [vmem:[%s2798_s17 + $0xa8] sm:$0xf0]  ;;  %v2489_v6 = vor.u32 %v2666_v0, %v2486_v1  ;;  %v2665_v8 = vld [vmem:[%s2798_s17 + $0x14] sm:$0xf0]  ;;  %v2540_v9 = vld [vmem:[%s2798_s17 + $0x90] sm:$0xf] }
  0x1f   : > { %1249 = vmatpush.bf16.msra.mxu3 %v2569_v50  ;;  %v2553_v10 = vor.u32 %v2682_v2, %v2550_v3  ;;  %v2681_v11 = vld [vmem:[%s2798_s17 + $0x94] sm:$0xf0]  ;;  %v2664_v12 = vld [vmem:[%s2798_s17 + $0x14] sm:$0xf]  ;;  %v2478_v13 = vld [vmem:[%s2798_s17 + $0x18] sm:$0xf0]  ;;  %v2477_v16 = vor.u32 %v2665_v8, %v2476_v7 }
  0x20   : > { %v2680_v14 = vld [vmem:[%s2798_s17 + $0x94] sm:$0xf]  ;;  %v2542_v15 = vld [vmem:[%s2798_s17 + $0x98] sm:$0xf0]  ;;  %v2541_v17 = vor.u32 %v2681_v11, %v2540_v9  ;;  %v2481_v18 = vor.u32 %v2664_v12, %v2478_v13  ;;  %v2468_v19 = vld [vmem:[%s2798_s17] sm:$0xf] }
  0x21   : > { %751 = vmatpush.bf16.msra.mxu0 %v2493_v56  ;;  %v2663_v20 = vld [vmem:[%s2798_s17 + $0x4] sm:$0xf0]  ;;  %v2532_v21 = vld [vmem:[%s2798_s17 + $0x80] sm:$0xf]  ;;  %v2545_v22 = vor.u32 %v2680_v14, %v2542_v15  ;;  %v2662_v24 = vld [vmem:[%s2798_s17 + $0x4] sm:$0xf] }
  0x22   : > { %920 = vmatpush.bf16.msra.mxu1 %v2557_v57  ;;  %1089 = vmatpush.bf16.msra.mxu2 %v2497_v58  ;;  %v2679_v23 = vld [vmem:[%s2798_s17 + $0x84] sm:$0xf0]  ;;  %v2470_v25 = vld [vmem:[%s2798_s17 + $0x8] sm:$0xf0]  ;;  %v2678_v26 = vld [vmem:[%s2798_s17 + $0x84] sm:$0xf]  ;;  %v2469_v28 = vor.u32 %v2663_v20, %v2468_v19 }
  0x23   : > { %1250 = vmatpush.bf16.msra.mxu3 %v2561_v62  ;;  %v2534_v27 = vld [vmem:[%s2798_s17 + $0x88] sm:$0xf0]  ;;  %v2212_v29 = vld [vmem:[%s3666_s1] sm:$0xf]  ;;  %v2599_v30 = vld [vmem:[%s3666_s1 + $0x4] sm:$0xf0]  ;;  %v2533_v31 = vor.u32 %v2679_v23, %v2532_v21  ;;  %v2473_v32 = vor.u32 %v2662_v24, %v2470_v25 }
  0x24   : > { %v2598_v33 = vld [vmem:[%s3666_s1 + $0x4] sm:$0xf]  ;;  %v2214_v34 = vld [vmem:[%s3666_s1 + $0x8] sm:$0xf0]  ;;  %v2537_v35 = vor.u32 %v2678_v26, %v2534_v27  ;;  %v2213_v36 = vor.u32 %v2599_v30, %v2212_v29  ;;  %v2220_v38 = vld [vmem:[%s3666_s1 + $0x10] sm:$0xf] }
  0x25   : > { %752 = vmatpush.bf16.msra.mxu0 %v2485_v4  ;;  %v2217_v37 = vor.u32 %v2598_v33, %v2214_v34  ;;  %v2601_v39 = vld [vmem:[%s3666_s1 + $0x14] sm:$0xf0]  ;;  %v2600_v40 = vld [vmem:[%s3666_s1 + $0x14] sm:$0xf]  ;;  %v2222_v41 = vld [vmem:[%s3666_s1 + $0x18] sm:$0xf0] }
  0x26   : > { %921 = vmatpush.bf16.msra.mxu1 %v2549_v5  ;;  %1090 = vmatpush.bf16.msra.mxu2 %v2489_v6  ;;  %v2221_v42 = vor.u32 %v2601_v39, %v2220_v38  ;;  %v2225_v43 = vor.u32 %v2600_v40, %v2222_v41  ;;  %v2228_v44 = vld [vmem:[%s3666_s1 + $0x20] sm:$0xf]  ;;  %v2603_v45 = vld [vmem:[%s3666_s1 + $0x24] sm:$0xf0]  ;;  %v2602_v46 = vld [vmem:[%s3666_s1 + $0x24] sm:$0xf] }
  0x27   : > { %1251 = vmatpush.bf16.msra.mxu3 %v2553_v10  ;;  %v2230_v47 = vld [vmem:[%s3666_s1 + $0x28] sm:$0xf0]  ;;  %v2229_v48 = vor.u32 %v2603_v45, %v2228_v44  ;;  %v2236_v50 = vld [vmem:[%s3666_s1 + $0x30] sm:$0xf]  ;;  %v2605_v51 = vld [vmem:[%s3666_s1 + $0x34] sm:$0xf0] }
  0x28   : > { %v2233_v49 = vor.u32 %v2602_v46, %v2230_v47  ;;  %v2604_v52 = vld [vmem:[%s3666_s1 + $0x34] sm:$0xf]  ;;  %v2238_v53 = vld [vmem:[%s3666_s1 + $0x38] sm:$0xf0]  ;;  %v2237_v54 = vor.u32 %v2605_v51, %v2236_v50  ;;  %v2244_v56 = vld [vmem:[%s3666_s1 + $0x40] sm:$0xf] }
  0x29   : > { %753 = vmatpush.bf16.msra.mxu0 %v2477_v16  ;;  %v2241_v55 = vor.u32 %v2604_v52, %v2238_v53  ;;  %v2607_v57 = vld [vmem:[%s3666_s1 + $0x44] sm:$0xf0]  ;;  %v2606_v58 = vld [vmem:[%s3666_s1 + $0x44] sm:$0xf]  ;;  %v2246_v59 = vld [vmem:[%s3666_s1 + $0x48] sm:$0xf0] }
  0x2a   : > { %922 = vmatpush.bf16.msra.mxu1 %v2541_v17  ;;  %1091 = vmatpush.bf16.msra.mxu2 %v2481_v18  ;;  %v2245_v60 = vor.u32 %v2607_v57, %v2244_v56  ;;  %v2249_v61 = vor.u32 %v2606_v58, %v2246_v59  ;;  %v2252_v62 = vld [vmem:[%s3666_s1 + $0x50] sm:$0xf]  ;;  %v2609_v63 = vld [vmem:[%s3666_s1 + $0x54] sm:$0xf0]  ;;  %v2608_v0 = vld [vmem:[%s3666_s1 + $0x54] sm:$0xf] }
  0x2b   : > { %1252 = vmatpush.bf16.msra.mxu3 %v2545_v22  ;;  %v2254_v1 = vld [vmem:[%s3666_s1 + $0x58] sm:$0xf0]  ;;  %v2253_v2 = vor.u32 %v2609_v63, %v2252_v62  ;;  %v2260_v4 = vld [vmem:[%s3666_s1 + $0x60] sm:$0xf]  ;;  %v2611_v5 = vld [vmem:[%s3666_s1 + $0x64] sm:$0xf0] }
  0x2c   : > { %v2257_v3 = vor.u32 %v2608_v0, %v2254_v1  ;;  %v2610_v6 = vld [vmem:[%s3666_s1 + $0x64] sm:$0xf]  ;;  %v2262_v7 = vld [vmem:[%s3666_s1 + $0x68] sm:$0xf0]  ;;  %v2261_v8 = vor.u32 %v2611_v5, %v2260_v4  ;;  %v2268_v10 = vld [vmem:[%s3666_s1 + $0x70] sm:$0xf] }
  0x2d   : > { %754 = vmatpush.bf16.msra.mxu0 %v2469_v28  ;;  %v2265_v9 = vor.u32 %v2610_v6, %v2262_v7  ;;  %v2613_v11 = vld [vmem:[%s3666_s1 + $0x74] sm:$0xf0]  ;;  %v2612_v12 = vld [vmem:[%s3666_s1 + $0x74] sm:$0xf]  ;;  %v2270_v13 = vld [vmem:[%s3666_s1 + $0x78] sm:$0xf0] }
  0x2e   : > { %923 = vmatpush.bf16.msra.mxu1 %v2533_v31  ;;  %1092 = vmatpush.bf16.msra.mxu2 %v2473_v32  ;;  %v2269_v14 = vor.u32 %v2613_v11, %v2268_v10  ;;  %v2273_v15 = vor.u32 %v2612_v12, %v2270_v13  ;;  %v2276_v16 = vld [vmem:[%s3666_s1 + $0x80] sm:$0xf]  ;;  %v2615_v17 = vld [vmem:[%s3666_s1 + $0x84] sm:$0xf0]  ;;  %v2614_v18 = vld [vmem:[%s3666_s1 + $0x84] sm:$0xf] }
  0x2f   : > { %1253 = vmatpush.bf16.msra.mxu3 %v2537_v35  ;;  %v2278_v19 = vld [vmem:[%s3666_s1 + $0x88] sm:$0xf0]  ;;  %v2277_v20 = vor.u32 %v2615_v17, %v2276_v16  ;;  %v2284_v30 = vld [vmem:[%s3666_s1 + $0x90] sm:$0xf]  ;;  %v2617_v31 = vld [vmem:[%s3666_s1 + $0x94] sm:$0xf0] }
  0x30   : > { %755 = vmatmul.bf16.vlgmr.msra.gmra.mxu0 %v2213_v36  ;;  %v2281_v22 = vor.u32 %v2614_v18, %v2278_v19  ;;  %v2616_v32 = vld [vmem:[%s3666_s1 + $0x94] sm:$0xf]  ;;  %v2286_v33 = vld [vmem:[%s3666_s1 + $0x98] sm:$0xf0]  ;;  %v2285_v35 = vor.u32 %v2617_v31, %v2284_v30  ;;  %v2292_v46 = vld [vmem:[%s3666_s1 + $0xa0] sm:$0xf] }
  0x31   : > { %924 = vmatmul.bf16.vlgmr.msra.gmra.mxu1 %v2217_v37  ;;  %1093 = vmatmul.bf16.vlgmr.msra.gmra.mxu2 %v2213_v36  ;;  %v2289_v38 = vor.u32 %v2616_v32, %v2286_v33  ;;  %v2619_v47 = vld [vmem:[%s3666_s1 + $0xa4] sm:$0xf0]  ;;  %v2300_v62 = vld [vmem:[%s3666_s1 + $0xb0] sm:$0xf]  ;;  %v2621_v63 = vld [vmem:[%s3666_s1 + $0xb4] sm:$0xf0] }
  0x32   : > { %1254 = vmatmul.bf16.vlgmr.msra.gmra.mxu3 %v2217_v37  ;;  %v2293_v51 = vor.u32 %v2619_v47, %v2292_v46  ;;  %v2620_v0 = vld [vmem:[%s3666_s1 + $0xb4] sm:$0xf]  ;;  %v2302_v1 = vld [vmem:[%s3666_s1 + $0xb8] sm:$0xf0]  ;;  %v2622_v16 = vld [vmem:[%s3666_s1 + $0xc4] sm:$0xf] }
  0x33   : > { %v2305_v6 = vor.u32 %v2620_v0, %v2302_v1  ;;  %v2310_v17 = vld [vmem:[%s3666_s1 + $0xc8] sm:$0xf0]  ;;  %v2316_v33 = vld [vmem:[%s3666_s1 + $0xd0] sm:$0xf] }
  0x40   : > { %760 = vmatmul.bf16.gmra.mxu0 %v2221_v42 }
  0x41   : > { %929 = vmatmul.bf16.gmra.mxu1 %v2225_v43  ;;  %1096 = vmatmul.bf16.gmra.mxu2 %v2221_v42 }
  0x42   : > { %1257 = vmatmul.bf16.gmra.mxu3 %v2225_v43 }
  0x50   : > { %765 = vmatmul.bf16.gmra.mxu0 %v2229_v48 }
  0x51   : > { %934 = vmatmul.bf16.gmra.mxu1 %v2233_v49  ;;  %1099 = vmatmul.bf16.gmra.mxu2 %v2229_v48  ;;  %v2618_v48 = vld [vmem:[%s3666_s1 + $0xa4] sm:$0xf] }
  0x52   : > { %1260 = vmatmul.bf16.gmra.mxu3 %v2233_v49  ;;  %v2294_v49 = vld [vmem:[%s3666_s1 + $0xa8] sm:$0xf0] }
  0x60   : > { %770 = vmatmul.bf16.gmra.mxu0 %v2237_v54 }
  0x61   : > { %939 = vmatmul.bf16.gmra.mxu1 %v2241_v55  ;;  %1102 = vmatmul.bf16.gmra.mxu2 %v2237_v54  ;;  %v2297_v54 = vor.u32 %v2618_v48, %v2294_v49 }
  0x62   : > { %1263 = vmatmul.bf16.gmra.mxu3 %v2241_v55 }
  0x70   : > { %775 = vmatmul.bf16.gmra.mxu0 %v2245_v60 }
  0x71   : > { %944 = vmatmul.bf16.gmra.mxu1 %v2249_v61  ;;  %1105 = vmatmul.bf16.gmra.mxu2 %v2245_v60 }
  0x72   : > { %1266 = vmatmul.bf16.gmra.mxu3 %v2249_v61 }
  0x80   : > { %780 = vmatmul.bf16.gmra.mxu0 %v2253_v2 }
  0x81   : > { %949 = vmatmul.bf16.gmra.mxu1 %v2257_v3  ;;  %1110 = vmatmul.bf16.gmra.mxu2 %v2253_v2 }
  0x82   : > { %1271 = vmatmul.bf16.gmra.mxu3 %v2257_v3  ;;  %v2301_v3 = vor.u32 %v2621_v63, %v2300_v62 }
  0x90   : > { %785 = vmatmul.bf16.gmra.mxu0 %v2261_v8 }
  0x91   : > { %954 = vmatmul.bf16.gmra.mxu1 %v2265_v9  ;;  %1115 = vmatmul.bf16.gmra.mxu2 %v2261_v8 }
  0x92   : > { %1276 = vmatmul.bf16.gmra.mxu3 %v2265_v9 }
  0xa0   : > { %790 = vmatmul.bf16.gmra.mxu0 %v2269_v14 }
  0xa1   : > { %959 = vmatmul.bf16.gmra.mxu1 %v2273_v15  ;;  %1120 = vmatmul.bf16.gmra.mxu2 %v2269_v14  ;;  %v2308_v14 = vld [vmem:[%s3666_s1 + $0xc0] sm:$0xf] }
  0xa2   : > { %1281 = vmatmul.bf16.gmra.mxu3 %v2273_v15  ;;  %v2623_v15 = vld [vmem:[%s3666_s1 + $0xc4] sm:$0xf0] }
  0xa3   : > { %v2309_v19 = vor.u32 %v2623_v15, %v2308_v14  ;;  %v2334_v14 = vld [vmem:[%s3666_s1 + $0xf8] sm:$0xf0] }
  0xad   : > { %v756_v21 = vpop.f32.mrf.mxu0 }
  0xae   : > { %v925_v23 = vpop.f32.mrf.mxu1 }
  0xaf   : > { %v2972_v24 = vadd.f32 %v925_v23, %v756_v21 }
  0xb0   : > { %795 = vmatmul.bf16.gmra.mxu0 %v2277_v20 }
  0xb1   : > { %964 = vmatmul.bf16.gmra.mxu1 %v2281_v22  ;;  %1125 = vmatmul.bf16.gmra.mxu2 %v2277_v20 }
  0xb2   : > { %1286 = vmatmul.bf16.gmra.mxu3 %v2281_v22  ;;  %v2313_v22 = vor.u32 %v2622_v16, %v2310_v17 }
  0xb4   : > { %v1094_v25 = vpop.f32.mrf.mxu2 }
  0xb5   : > { %v1255_v26 = vpop.f32.mrf.mxu3  ;;  %v758_v27 = vpop.f32.mrf.mxu0 }
  0xb6   : > { %v927_v28 = vpop.f32.mrf.mxu1 }
  0xb7   : > { %v2974_v29 = vadd.f32 %v927_v28, %v758_v27 }
  0xbc   : > { %v1095_v34 = vpop.f32.mrf.mxu2 }
  0xbd   : > { %v1256_v36 = vpop.f32.mrf.mxu3  ;;  %v761_v37 = vpop.f32.mrf.mxu0  ;;  %v2625_v34 = vld [vmem:[%s3666_s1 + $0xd4] sm:$0xf0] }
  0xbe   : > { %v930_v39 = vpop.f32.mrf.mxu1  ;;  %v2318_v36 = vld [vmem:[%s3666_s1 + $0xd8] sm:$0xf0] }
  0xbf   : > { %v2988_v40 = vadd.f32 %v930_v39, %v761_v37 }
  0xc0   : > { %800 = vmatmul.bf16.gmra.mxu0 %v2285_v35 }
  0xc1   : > { %969 = vmatmul.bf16.gmra.mxu1 %v2289_v38  ;;  %1130 = vmatmul.bf16.gmra.mxu2 %v2285_v35  ;;  %v2624_v35 = vld [vmem:[%s3666_s1 + $0xd4] sm:$0xf] }
  0xc2   : > { %1291 = vmatmul.bf16.gmra.mxu3 %v2289_v38  ;;  %v2317_v38 = vor.u32 %v2625_v34, %v2316_v33  ;;  %v2630_v33 = vld [vmem:[%s3666_s1 + $0x104] sm:$0xf]  ;;  %v2342_v34 = vld [vmem:[%s3666_s1 + $0x108] sm:$0xf0] }
  0xc4   : > { %v1097_v41 = vpop.f32.mrf.mxu2 }
  0xc5   : > { %v1258_v42 = vpop.f32.mrf.mxu3  ;;  %v763_v43 = vpop.f32.mrf.mxu0 }
  0xc6   : > { %v932_v44 = vpop.f32.mrf.mxu1  ;;  %v2321_v42 = vor.u32 %v2624_v35, %v2318_v36 }
  0xc7   : > { %v2990_v45 = vadd.f32 %v932_v44, %v763_v43 }
  0xcc   : > { %v1098_v50 = vpop.f32.mrf.mxu2 }
  0xcd   : > { %v1259_v52 = vpop.f32.mrf.mxu3  ;;  %v766_v53 = vpop.f32.mrf.mxu0 }
  0xce   : > { %v935_v55 = vpop.f32.mrf.mxu1 }
  0xcf   : > { %v3004_v56 = vadd.f32 %v935_v55, %v766_v53  ;;  %v2324_v53 = vld [vmem:[%s3666_s1 + $0xe0] sm:$0xf]  ;;  %v2626_v55 = vld [vmem:[%s3666_s1 + $0xe4] sm:$0xf] }
  0xd0   : > { %805 = vmatmul.bf16.gmra.mxu0 %v2293_v51 }
  0xd1   : > { %974 = vmatmul.bf16.gmra.mxu1 %v2297_v54  ;;  %1135 = vmatmul.bf16.gmra.mxu2 %v2293_v51 }
  0xd2   : > { %1296 = vmatmul.bf16.gmra.mxu3 %v2297_v54  ;;  %v2627_v54 = vld [vmem:[%s3666_s1 + $0xe4] sm:$0xf0] }
  0xd4   : > { %v1100_v57 = vpop.f32.mrf.mxu2 }
  0xd5   : > { %v1261_v58 = vpop.f32.mrf.mxu3  ;;  %v768_v59 = vpop.f32.mrf.mxu0  ;;  %v2326_v57 = vld [vmem:[%s3666_s1 + $0xe8] sm:$0xf0] }
  0xd6   : > { %v937_v60 = vpop.f32.mrf.mxu1  ;;  %v2329_v63 = vor.u32 %v2626_v55, %v2326_v57 }
  0xd7   : > { %v3006_v61 = vadd.f32 %v937_v60, %v768_v59  ;;  %v2325_v59 = vor.u32 %v2627_v54, %v2324_v53  ;;  %v2632_v53 = vld [vmem:[%s3666_s1 + $0x114] sm:$0xf]  ;;  %v2350_v54 = vld [vmem:[%s3666_s1 + $0x118] sm:$0xf0] }
  0xdc   : > { %v1101_v2 = vpop.f32.mrf.mxu2 }
  0xdd   : > { %v1262_v4 = vpop.f32.mrf.mxu3  ;;  %v771_v5 = vpop.f32.mrf.mxu0 }
  0xde   : > { %v940_v7 = vpop.f32.mrf.mxu1 }
  0xdf   : > { %v3020_v8 = vadd.f32 %v940_v7, %v771_v5 }
  0xe0   : > { %810 = vmatmul.bf16.gmra.mxu0 %v2301_v3 }
  0xe1   : > { %979 = vmatmul.bf16.gmra.mxu1 %v2305_v6  ;;  %1140 = vmatmul.bf16.gmra.mxu2 %v2301_v3 }
  0xe2   : > { %1301 = vmatmul.bf16.gmra.mxu3 %v2305_v6 }
  0xe4   : > { %v1103_v9 = vpop.f32.mrf.mxu2 }
  0xe5   : > { %v1264_v10 = vpop.f32.mrf.mxu3  ;;  %v773_v11 = vpop.f32.mrf.mxu0 }
  0xe6   : > { %v942_v12 = vpop.f32.mrf.mxu1  ;;  %v2332_v10 = vld [vmem:[%s3666_s1 + $0xf0] sm:$0xf] }
  0xe7   : > { %v3022_v13 = vadd.f32 %v942_v12, %v773_v11  ;;  %v2629_v11 = vld [vmem:[%s3666_s1 + $0xf4] sm:$0xf0]  ;;  %v2628_v12 = vld [vmem:[%s3666_s1 + $0xf4] sm:$0xf] }
  0xe8   : > { %v2333_v16 = vor.u32 %v2629_v11, %v2332_v10  ;;  %v2634_v10 = vld [vmem:[%s3666_s1 + $0x124] sm:$0xf]  ;;  %v2358_v11 = vld [vmem:[%s3666_s1 + $0x128] sm:$0xf0] }
  0xec   : > { %v1104_v18 = vpop.f32.mrf.mxu2 }
  0xed   : > { %v1265_v20 = vpop.f32.mrf.mxu3  ;;  %v776_v21 = vpop.f32.mrf.mxu0 }
  0xee   : > { %v945_v23 = vpop.f32.mrf.mxu1 }
  0xef   : > { %v946_v25 = vadd.f32 %v945_v23, %v776_v21 }
  0xf0   : > { %815 = vmatmul.bf16.gmra.mxu0 %v2309_v19 }
  0xf1   : > { %984 = vmatmul.bf16.gmra.mxu1 %v2313_v22  ;;  %1423 = vrot.lane.b32.xlu0 %v946_v25, %s2757_s22 }
  0xf2   : > { %1306 = vmatmul.bf16.gmra.mxu3 %v2313_v22  ;;  %1145 = vmatmul.bf16.gmra.mxu2 %v2309_v19  ;;  %v2337_v19 = vor.u32 %v2628_v12, %v2334_v14 }
  0xf4   : > { %v1106_v26 = vpop.f32.mrf.mxu2 }
  0xf5   : > { %v1267_v27 = vpop.f32.mrf.mxu3  ;;  %v778_v28 = vpop.f32.mrf.mxu0 }
  0xf6   : > { %v947_v30 = vpop.f32.mrf.mxu1  ;;  %v1268_v31 = vadd.f32 %v1267_v27, %v1106_v26 }
  0xf7   : > { %v948_v32 = vadd.f32 %v947_v30, %v778_v28 }
  0xf9   : > { %1427 = vrot.lane.b32.xlu1 %v948_v32, %s2757_s22  ;;  %1425 = vrot.lane.b32.xlu0 %v1268_v31, %s2757_s22  ;;  %v2340_v31 = vld [vmem:[%s3666_s1 + $0x100] sm:$0xf]  ;;  %v2631_v32 = vld [vmem:[%s3666_s1 + $0x104] sm:$0xf0] }
  0xfa   : > { %v2341_v36 = vor.u32 %v2631_v32, %v2340_v31  ;;  %v2636_v31 = vld [vmem:[%s3666_s1 + $0x134] sm:$0xf]  ;;  %v2366_v32 = vld [vmem:[%s3666_s1 + $0x138] sm:$0xf0] }
  0xfc   : > { %v1108_v37 = vpop.f32.mrf.mxu2 }
  0xfd   : > { %v1269_v39 = vpop.f32.mrf.mxu3  ;;  %v781_v41 = vpop.f32.mrf.mxu0 }
  0xfe   : > { %v950_v43 = vpop.f32.mrf.mxu1  ;;  %v1270_v46 = vadd.f32 %v1269_v39, %v1108_v37  ;;  %v2345_v39 = vor.u32 %v2630_v33, %v2342_v34 }
  0xff   : > { %v951_v44 = vadd.f32 %v950_v43, %v781_v41 }
 0x100   : > { %820 = vmatmul.bf16.gmra.mxu0 %v2317_v38 }
 0x101   : > { %989 = vmatmul.bf16.gmra.mxu1 %v2321_v42  ;;  %1431 = vrot.lane.b32.xlu2 %v951_v44, %s2757_s22 }
 0x102   : > { %1311 = vmatmul.bf16.gmra.mxu3 %v2321_v42  ;;  %1150 = vmatmul.bf16.gmra.mxu2 %v2317_v38 }
 0x103   : > { %1429 = vrot.lane.b32.xlu1 %v1270_v46, %s2757_s22 }
 0x104   : > { %v1111_v47 = vpop.f32.mrf.mxu2 }
 0x105   : > { %v1272_v48 = vpop.f32.mrf.mxu3  ;;  %v783_v49 = vpop.f32.mrf.mxu0 }
 0x106   : > { %v952_v50 = vpop.f32.mrf.mxu1  ;;  %v1273_v51 = vadd.f32 %v1272_v48, %v1111_v47 }
 0x107   : > { %v953_v52 = vadd.f32 %v952_v50, %v783_v49 }
 0x109   : > { %1435 = vrot.lane.b32.xlu0 %v953_v52, %s2757_s22  ;;  %1433 = vrot.lane.b32.xlu2 %v1273_v51, %s2757_s22  ;;  %v2348_v51 = vld [vmem:[%s3666_s1 + $0x110] sm:$0xf]  ;;  %v2633_v52 = vld [vmem:[%s3666_s1 + $0x114] sm:$0xf0] }
 0x10a   : > { %v2349_v57 = vor.u32 %v2633_v52, %v2348_v51 }
 0x10c   : > { %v1113_v58 = vpop.f32.mrf.mxu2 }
 0x10d   : > { %v1274_v60 = vpop.f32.mrf.mxu3  ;;  %v786_v62 = vpop.f32.mrf.mxu0 }
 0x10e   : > { %v1275_v0 = vadd.f32 %v1274_v60, %v1113_v58  ;;  %v955_v1 = vpop.f32.mrf.mxu1  ;;  %v2353_v60 = vor.u32 %v2632_v53, %v2350_v54  ;;  %v2372_v54 = vld [vmem:[%s3666_s1 + $0x140] sm:$0xf] }
 0x10f   : > { %v956_v2 = vadd.f32 %v955_v1, %v786_v62 }
 0x110   : > { %1437 = vrot.lane.b32.xlu1 %v1275_v0, %s2757_s22  ;;  %825 = vmatmul.bf16.gmra.mxu0 %v2325_v59 }
 0x111   : > { %994 = vmatmul.bf16.gmra.mxu1 %v2329_v63  ;;  %1439 = vrot.lane.b32.xlu2 %v956_v2, %s2757_s22 }
 0x112   : > { %1155 = vmatmul.bf16.gmra.mxu2 %v2325_v59  ;;  %1316 = vmatmul.bf16.gmra.mxu3 %v2329_v63 }
 0x114   : > { %v1116_v3 = vpop.f32.mrf.mxu2 }
 0x115   : > { %v1277_v4 = vpop.f32.mrf.mxu3  ;;  %v788_v5 = vpop.f32.mrf.mxu0 }
 0x116   : > { %v1278_v6 = vadd.f32 %v1277_v4, %v1116_v3  ;;  %v957_v7 = vpop.f32.mrf.mxu1 }
 0x117   : > { %v958_v9 = vadd.f32 %v957_v7, %v788_v5  ;;  %v2356_v7 = vld [vmem:[%s3666_s1 + $0x120] sm:$0xf] }
 0x118   : > { %1441 = vrot.lane.b32.xlu0 %v1278_v6, %s2757_s22 }
 0x119   : > { %1443 = vrot.lane.b32.xlu1 %v958_v9, %s2757_s22  ;;  %v2635_v9 = vld [vmem:[%s3666_s1 + $0x124] sm:$0xf0] }
 0x11a   : > { %v2357_v14 = vor.u32 %v2635_v9, %v2356_v7 }
 0x11c   : > { %v1118_v15 = vpop.f32.mrf.mxu2 }
 0x11d   : > { %v1279_v17 = vpop.f32.mrf.mxu3  ;;  %v791_v18 = vpop.f32.mrf.mxu0 }
 0x11e   : > { %v1280_v20 = vadd.f32 %v1279_v17, %v1118_v15  ;;  %v960_v21 = vpop.f32.mrf.mxu1  ;;  %v2361_v17 = vor.u32 %v2634_v10, %v2358_v11 }
 0x11f   : > { %v961_v22 = vadd.f32 %v960_v21, %v791_v18 }
 0x120   : > { %1445 = vrot.lane.b32.xlu2 %v1280_v20, %s2757_s22  ;;  %830 = vmatmul.bf16.gmra.mxu0 %v2333_v16 }
 0x121   : > { %999 = vmatmul.bf16.gmra.mxu1 %v2337_v19  ;;  %1447 = vrot.lane.b32.xlu0 %v961_v22, %s2757_s22 }
 0x122   : > { %1160 = vmatmul.bf16.gmra.mxu2 %v2333_v16  ;;  %1321 = vmatmul.bf16.gmra.mxu3 %v2337_v19 }
 0x124   : > { %v1121_v23 = vpop.f32.mrf.mxu2 }
 0x125   : > { %v1282_v25 = vpop.f32.mrf.mxu3  ;;  %v793_v26 = vpop.f32.mrf.mxu0 }
 0x126   : > { %v1283_v27 = vadd.f32 %v1282_v25, %v1121_v23  ;;  %v962_v28 = vpop.f32.mrf.mxu1 }
 0x127   : > { %v963_v30 = vadd.f32 %v962_v28, %v793_v26  ;;  %v2364_v28 = vld [vmem:[%s3666_s1 + $0x130] sm:$0xf] }
 0x128   : > { %1449 = vrot.lane.b32.xlu1 %v1283_v27, %s2757_s22 }
 0x129   : > { %1451 = vrot.lane.b32.xlu2 %v963_v30, %s2757_s22  ;;  %v2637_v30 = vld [vmem:[%s3666_s1 + $0x134] sm:$0xf0] }
 0x12c   : > { %v1123_v35 = vpop.f32.mrf.mxu2 }
 0x12d   : > { %v1284_v37 = vpop.f32.mrf.mxu3  ;;  %v796_v38 = vpop.f32.mrf.mxu0 }
 0x12e   : > { %v1285_v41 = vadd.f32 %v1284_v37, %v1123_v35  ;;  %v965_v42 = vpop.f32.mrf.mxu1  ;;  %v2365_v35 = vor.u32 %v2637_v30, %v2364_v28 }
 0x12f   : > { %v966_v43 = vadd.f32 %v965_v42, %v796_v38  ;;  %v2369_v38 = vor.u32 %v2636_v31, %v2366_v32 }
 0x130   : > { %1453 = vrot.lane.b32.xlu0 %v1285_v41, %s2757_s22  ;;  %835 = vmatmul.bf16.gmra.mxu0 %v2341_v36 }
 0x131   : > { %1004 = vmatmul.bf16.gmra.mxu1 %v2345_v39  ;;  %1496 = vrot.lane.b32.xlu1 %v966_v43, %s2758_s4 }
 0x132   : > { %1165 = vmatmul.bf16.gmra.mxu2 %v2341_v36  ;;  %1326 = vmatmul.bf16.gmra.mxu3 %v2345_v39 }
 0x134   : > { %v1126_v44 = vpop.f32.mrf.mxu2 }
 0x135   : > { %v1287_v46 = vpop.f32.mrf.mxu3  ;;  %v798_v47 = vpop.f32.mrf.mxu0 }
 0x136   : > { %v1288_v48 = vadd.f32 %v1287_v46, %v1126_v44  ;;  %v967_v49 = vpop.f32.mrf.mxu1 }
 0x137   : > { %v968_v50 = vadd.f32 %v967_v49, %v798_v47 }
 0x138   : > { %1498 = vrot.lane.b32.xlu2 %v1288_v48, %s2758_s4 }
 0x139   : > { %1500 = vrot.lane.b32.xlu0 %v968_v50, %s2758_s4 }
 0x13c   : > { %v1128_v55 = vpop.f32.mrf.mxu2 }
 0x13d   : > { %v1289_v58 = vpop.f32.mrf.mxu3  ;;  %v801_v59 = vpop.f32.mrf.mxu0 }
 0x13e   : > { %v1290_v62 = vadd.f32 %v1289_v58, %v1128_v55  ;;  %v970_v63 = vpop.f32.mrf.mxu1  ;;  %v2639_v55 = vld [vmem:[%s3666_s1 + $0x144] sm:$0xf0] }
 0x13f   : > { %v971_v0 = vadd.f32 %v970_v63, %v801_v59  ;;  %v2373_v63 = vor.u32 %v2639_v55, %v2372_v54 }
 0x140   : > { %1502 = vrot.lane.b32.xlu1 %v1290_v62, %s2758_s4  ;;  %840 = vmatmul.bf16.gmra.mxu0 %v2349_v57 }
 0x141   : > { %1009 = vmatmul.bf16.gmra.mxu1 %v2353_v60  ;;  %1504 = vrot.lane.b32.xlu2 %v971_v0, %s2758_s4 }
 0x142   : > { %1170 = vmatmul.bf16.gmra.mxu2 %v2349_v57  ;;  %1331 = vmatmul.bf16.gmra.mxu3 %v2353_v60  ;;  %v2374_v57 = vld [vmem:[%s3666_s1 + $0x148] sm:$0xf0] }
 0x144   : > { %v1131_v1 = vpop.f32.mrf.mxu2 }
 0x145   : > { %v1292_v2 = vpop.f32.mrf.mxu3  ;;  %v803_v3 = vpop.f32.mrf.mxu0 }
 0x146   : > { %v1293_v4 = vadd.f32 %v1292_v2, %v1131_v1  ;;  %v972_v5 = vpop.f32.mrf.mxu1 }
 0x147   : > { %v973_v6 = vadd.f32 %v972_v5, %v803_v3 }
 0x148   : > { %1506 = vrot.lane.b32.xlu0 %v1293_v4, %s2758_s4 }
 0x149   : > { %1508 = vrot.lane.b32.xlu1 %v973_v6, %s2758_s4 }
 0x14c   : > { %v1133_v12 = vpop.f32.mrf.mxu2 }
 0x14d   : > { %v1294_v15 = vpop.f32.mrf.mxu3  ;;  %v806_v16 = vpop.f32.mrf.mxu0 }
 0x14e   : > { %v1295_v18 = vadd.f32 %v1294_v15, %v1133_v12  ;;  %v975_v19 = vpop.f32.mrf.mxu1 }
 0x14f   : > { %v976_v20 = vadd.f32 %v975_v19, %v806_v16  ;;  %v2382_v19 = vld [vmem:[%s3666_s1 + $0x158] sm:$0xf0] }
 0x150   : > { %1510 = vrot.lane.b32.xlu2 %v1295_v18, %s2758_s4  ;;  %845 = vmatmul.bf16.gmra.mxu0 %v2357_v14  ;;  %v2641_v18 = vld [vmem:[%s3666_s1 + $0x154] sm:$0xf0] }
 0x151   : > { %1014 = vmatmul.bf16.gmra.mxu1 %v2361_v17  ;;  %1512 = vrot.lane.b32.xlu0 %v976_v20, %s2758_s4 }
 0x152   : > { %1175 = vmatmul.bf16.gmra.mxu2 %v2357_v14  ;;  %1336 = vmatmul.bf16.gmra.mxu3 %v2361_v17  ;;  %v2380_v17 = vld [vmem:[%s3666_s1 + $0x150] sm:$0xf] }
 0x153   : > { %v2381_v20 = vor.u32 %v2641_v18, %v2380_v17 }
 0x154   : > { %v1136_v21 = vpop.f32.mrf.mxu2 }
 0x155   : > { %v1297_v22 = vpop.f32.mrf.mxu3  ;;  %v808_v23 = vpop.f32.mrf.mxu0 }
 0x156   : > { %v1298_v25 = vadd.f32 %v1297_v22, %v1136_v21  ;;  %v977_v26 = vpop.f32.mrf.mxu1 }
 0x157   : > { %v978_v27 = vadd.f32 %v977_v26, %v808_v23 }
 0x158   : > { %1514 = vrot.lane.b32.xlu1 %v1298_v25, %s2758_s4 }
 0x159   : > { %1516 = vrot.lane.b32.xlu2 %v978_v27, %s2758_s4 }
 0x15b   : > { %v1432_v33 = vpop.permute.xlu2 %1431 }
 0x15c   : > { %v1138_v34 = vpop.f32.mrf.mxu2 }
 0x15d   : > { %v1299_v36 = vpop.f32.mrf.mxu3  ;;  %v811_v37 = vpop.f32.mrf.mxu0 }
 0x15e   : > { %v1300_v39 = vadd.f32 %v1299_v36, %v1138_v34  ;;  %v980_v41 = vpop.f32.mrf.mxu1 }
 0x15f   : > { %v981_v42 = vadd.f32 %v980_v41, %v811_v37 }
 0x160   : > { %1518 = vrot.lane.b32.xlu0 %v1300_v39, %s2758_s4  ;;  %850 = vmatmul.bf16.gmra.mxu0 %v2365_v35 }
 0x161   : > { %1019 = vmatmul.bf16.gmra.mxu1 %v2369_v38  ;;  %1520 = vrot.lane.b32.xlu1 %v981_v42, %s2758_s4  ;;  %v2388_v42 = vld [vmem:[%s3666_s1 + $0x160] sm:$0xf] }
 0x162   : > { %1180 = vmatmul.bf16.gmra.mxu2 %v2365_v35  ;;  %1341 = vmatmul.bf16.gmra.mxu3 %v2369_v38 }
 0x163   : > { %v1424_v43 = vpop.permute.xlu0 %1423  ;;  %v1434_v44 = vpop.permute.xlu2 %1433 }
 0x164   : > { %v1458_v46 = vsel %vm1455_vm0, %v1432_v33, %v1434_v44  ;;  %v1141_v47 = vpop.f32.mrf.mxu2 }
 0x165   : > { %v3151_v48 = vadd.f32 %v1458_v46, %v2988_v40  ;;  %v1302_v49 = vpop.f32.mrf.mxu3  ;;  %v813_v50 = vpop.f32.mrf.mxu0  ;;  %v2638_v40 = vld [vmem:[%s3666_s1 + $0x144] sm:$0xf]  ;;  %v2390_v46 = vld [vmem:[%s3666_s1 + $0x168] sm:$0xf0] }
 0x166   : > { %v1303_v51 = vadd.f32 %v1302_v49, %v1141_v47  ;;  %v982_v52 = vpop.f32.mrf.mxu1  ;;  %v2377_v3 = vor.u32 %v2638_v40, %v2374_v57 }
 0x167   : > { %v983_v53 = vadd.f32 %v982_v52, %v813_v50 }
 0x168   : > { %1522 = vrot.lane.b32.xlu2 %v1303_v51, %s2758_s4 }
 0x169   : > { %1524 = vrot.lane.b32.xlu0 %v983_v53, %s2758_s4 }
 0x16b   : > { %v1428_v58 = vpop.permute.xlu1 %1427  ;;  %v1426_v59 = vpop.permute.xlu0 %1425 }
 0x16c   : > { %v1456_v60 = vsel %vm1455_vm0, %v1424_v43, %v1426_v59  ;;  %v1143_v62 = vpop.f32.mrf.mxu2  ;;  %v1440_v30 = vpop.permute.xlu2 %1439  ;;  %v2643_v43 = vld [vmem:[%s3666_s1 + $0x164] sm:$0xf0] }
 0x16d   : > { %v3169_v0 = vadd.f32 %v1456_v60, %v2972_v24  ;;  %v1304_v1 = vpop.f32.mrf.mxu3  ;;  %v816_v2 = vpop.f32.mrf.mxu0  ;;  %v2389_v53 = vor.u32 %v2643_v43, %v2388_v42 }
 0x16e   : > { %v1305_v4 = vadd.f32 %v1304_v1, %v1143_v62  ;;  %v985_v5 = vpop.f32.mrf.mxu1 }
 0x16f   : > { %v986_v6 = vadd.f32 %v985_v5, %v816_v2  ;;  %v2396_v5 = vld [vmem:[%s3666_s1 + $0x170] sm:$0xf] }
 0x170   : > { %1526 = vrot.lane.b32.xlu1 %v1305_v4, %s2758_s4  ;;  %855 = vmatmul.bf16.gmra.mxu0 %v2373_v63 }
 0x171   : > { %1024 = vmatmul.bf16.gmra.mxu1 %v2377_v3  ;;  %1569 = vrot.lane.b32.xlu2 %v986_v6, %s2759_s14  ;;  %v2645_v6 = vld [vmem:[%s3666_s1 + $0x174] sm:$0xf0] }
 0x172   : > { %1346 = vmatmul.bf16.gmra.mxu3 %v2377_v3  ;;  %1185 = vmatmul.bf16.gmra.mxu2 %v2373_v63 }
 0x175   : > { %v1430_v7 = vpop.permute.xlu1 %1429  ;;  %v1146_v9 = vpop.f32.mrf.mxu2 }
 0x176   : > { %v1457_v24 = vsel %vm1455_vm0, %v1428_v58, %v1430_v7  ;;  %v1307_v10 = vpop.f32.mrf.mxu3  ;;  %v818_v11 = vpop.f32.mrf.mxu0 }
 0x177   : > { %v3175_v12 = vadd.f32 %v1457_v24, %v2974_v29  ;;  %v1308_v14 = vadd.f32 %v1307_v10, %v1146_v9  ;;  %v987_v15 = vpop.f32.mrf.mxu1  ;;  %v2640_v29 = vld [vmem:[%s3666_s1 + $0x154] sm:$0xf]  ;;  %v2398_v24 = vld [vmem:[%s3666_s1 + $0x178] sm:$0xf0] }
 0x178   : > { %v988_v16 = vadd.f32 %v987_v15, %v818_v11  ;;  %v2385_v22 = vor.u32 %v2640_v29, %v2382_v19  ;;  %v2644_v9 = vld [vmem:[%s3666_s1 + $0x174] sm:$0xf]  ;;  %v2397_v15 = vor.u32 %v2645_v6, %v2396_v5 }
 0x179   : > { %1571 = vrot.lane.b32.xlu0 %v1308_v14, %s2759_s14  ;;  %v2401_v17 = vor.u32 %v2644_v9, %v2398_v24 }
 0x17a   : > { %1573 = vrot.lane.b32.xlu1 %v988_v16, %s2759_s14  ;;  %v1446_v47 = vpop.permute.xlu2 %1445 }
 0x17b   : > { %v1436_v31 = vpop.permute.xlu0 %1435 }
 0x17d   : > { %v1148_v21 = vpop.f32.mrf.mxu2 }
 0x17e   : > { %v1309_v23 = vpop.f32.mrf.mxu3  ;;  %v821_v25 = vpop.f32.mrf.mxu0 }
 0x17f   : > { %v1310_v26 = vadd.f32 %v1309_v23, %v1148_v21  ;;  %v990_v27 = vpop.f32.mrf.mxu1 }
 0x180   : > { %v991_v28 = vadd.f32 %v990_v27, %v821_v25  ;;  %860 = vmatmul.bf16.gmra.mxu0 %v2381_v20 }
 0x181   : > { %1575 = vrot.lane.b32.xlu2 %v1310_v26, %s2759_s14  ;;  %1029 = vmatmul.bf16.gmra.mxu1 %v2385_v22 }
 0x182   : > { %1351 = vmatmul.bf16.gmra.mxu3 %v2385_v22  ;;  %v1438_v32 = vpop.permute.xlu1 %1437  ;;  %1190 = vmatmul.bf16.gmra.mxu2 %v2381_v20 }
 0x183   : > { %v1459_v33 = vsel %vm1455_vm0, %v1436_v31, %v1438_v32  ;;  %1577 = vrot.lane.b32.xlu0 %v991_v28, %s2759_s14  ;;  %v1452_v10 = vpop.permute.xlu2 %1451 }
 0x184   : > { %v3195_v34 = vadd.f32 %v1459_v33, %v2990_v45  ;;  %v2642_v45 = vld [vmem:[%s3666_s1 + $0x164] sm:$0xf] }
 0x185   : > { %v1151_v35 = vpop.f32.mrf.mxu2  ;;  %v2393_v40 = vor.u32 %v2642_v45, %v2390_v46 }
 0x186   : > { %v1312_v36 = vpop.f32.mrf.mxu3  ;;  %v823_v37 = vpop.f32.mrf.mxu0 }
 0x187   : > { %v1313_v38 = vadd.f32 %v1312_v36, %v1151_v35  ;;  %v992_v39 = vpop.f32.mrf.mxu1 }
 0x188   : > { %v993_v41 = vadd.f32 %v992_v39, %v823_v37  ;;  %v2404_v37 = vld [vmem:[%s3666_s1 + $0x180] sm:$0xf] }
 0x189   : > { %1579 = vrot.lane.b32.xlu1 %v1313_v38, %s2759_s14  ;;  %v2406_v38 = vld [vmem:[%s3666_s1 + $0x188] sm:$0xf0] }
 0x18a   : > { %v1442_v44 = vpop.permute.xlu0 %1441  ;;  %1581 = vrot.lane.b32.xlu2 %v993_v41, %s2759_s14 }
 0x18b   : > { %v1460_v49 = vsel %vm1455_vm0, %v1440_v30, %v1442_v44  ;;  %v1444_v50 = vpop.permute.xlu1 %1443 }
 0x18c   : > { %v3213_v51 = vadd.f32 %v1460_v49, %v3004_v56  ;;  %v1461_v52 = vsel %vm1455_vm0, %v1444_v50, %v1446_v47 }
 0x18d   : > { %v3217_v54 = vadd.f32 %v1461_v52, %v3006_v61  ;;  %v1153_v55 = vpop.f32.mrf.mxu2 }
 0x18e   : > { %v1314_v57 = vpop.f32.mrf.mxu3  ;;  %v826_v58 = vpop.f32.mrf.mxu0 }
 0x18f   : > { %v1315_v59 = vadd.f32 %v1314_v57, %v1153_v55  ;;  %v995_v60 = vpop.f32.mrf.mxu1 }
 0x190   : > { %v996_v62 = vadd.f32 %v995_v60, %v826_v58  ;;  %865 = vmatmul.bf16.gmra.mxu0 %v2389_v53 }
 0x191   : > { %1583 = vrot.lane.b32.xlu0 %v1315_v59, %s2759_s14  ;;  %1034 = vmatmul.bf16.gmra.mxu1 %v2393_v40 }
 0x192   : > { %1356 = vmatmul.bf16.gmra.mxu3 %v2393_v40  ;;  %1195 = vmatmul.bf16.gmra.mxu2 %v2389_v53  ;;  %v1499_v23 = vpop.permute.xlu2 %1498 }
 0x193   : > { %1585 = vrot.lane.b32.xlu1 %v996_v62, %s2759_s14  ;;  %v1448_v4 = vpop.permute.xlu0 %1447 }
 0x195   : > { %v1156_v56 = vpop.f32.mrf.mxu2 }
 0x196   : > { %v1317_v63 = vpop.f32.mrf.mxu3  ;;  %v828_v1 = vpop.f32.mrf.mxu0 }
 0x197   : > { %v1318_v61 = vadd.f32 %v1317_v63, %v1156_v56  ;;  %v997_v2 = vpop.f32.mrf.mxu1  ;;  %v2412_v56 = vld [vmem:[%s3666_s1 + $0x190] sm:$0xf]  ;;  %v2649_v63 = vld [vmem:[%s3666_s1 + $0x194] sm:$0xf0] }
 0x198   : > { %v998_v3 = vadd.f32 %v997_v2, %v828_v1 }
 0x199   : > { %1587 = vrot.lane.b32.xlu2 %v1318_v61, %s2759_s14  ;;  %v2414_v61 = vld [vmem:[%s3666_s1 + $0x198] sm:$0xf0] }
 0x19a   : > { %v1450_v7 = vpop.permute.xlu1 %1449  ;;  %1589 = vrot.lane.b32.xlu0 %v998_v3, %s2759_s14 }
 0x19b   : > { %v1462_v11 = vsel %vm1455_vm0, %v1448_v4, %v1450_v7  ;;  %v1505_v49 = vpop.permute.xlu2 %1504  ;;  %v2413_v7 = vor.u32 %v2649_v63, %v2412_v56 }
 0x19c   : > { %v3237_v14 = vadd.f32 %v1462_v11, %v3020_v8 }
 0x19d   : > { %v1158_v16 = vpop.f32.mrf.mxu2 }
 0x19e   : > { %v1319_v18 = vpop.f32.mrf.mxu3  ;;  %v831_v29 = vpop.f32.mrf.mxu0 }
 0x19f   : > { %v1320_v19 = vadd.f32 %v1319_v18, %v1158_v16  ;;  %v1000_v20 = vpop.f32.mrf.mxu1 }
 0x1a0   : > { %v1001_v21 = vadd.f32 %v1000_v20, %v831_v29  ;;  %870 = vmatmul.bf16.gmra.mxu0 %v2397_v15 }
 0x1a1   : > { %1591 = vrot.lane.b32.xlu1 %v1320_v19, %s2759_s14  ;;  %1039 = vmatmul.bf16.gmra.mxu1 %v2401_v17 }
 0x1a2   : > { %1361 = vmatmul.bf16.gmra.mxu3 %v2401_v17  ;;  %v1454_v22 = vpop.permute.xlu0 %1453  ;;  %1200 = vmatmul.bf16.gmra.mxu2 %v2397_v15 }
 0x1a3   : > { %v1463_v8 = vsel %vm1455_vm0, %v1452_v10, %v1454_v22  ;;  %v1497_v25 = vpop.permute.xlu1 %1496  ;;  %1593 = vrot.lane.b32.xlu2 %v1001_v21, %s2759_s14 }
 0x1a4   : > { %v3243_v26 = vadd.f32 %v1463_v8, %v3022_v13  ;;  %v1529_v27 = vsel %vm1528_vm1, %v1497_v25, %v1499_v23  ;;  %v2647_v13 = vld [vmem:[%s3666_s1 + $0x184] sm:$0xf0]  ;;  %v2420_v23 = vld [vmem:[%s3666_s1 + $0x1a0] sm:$0xf] }
 0x1a5   : > { %v3247_v28 = vadd.f32 %v1529_v27, %v3169_v0  ;;  %v1161_v30 = vpop.f32.mrf.mxu2  ;;  %v2646_v0 = vld [vmem:[%s3666_s1 + $0x184] sm:$0xf]  ;;  %v2405_v39 = vor.u32 %v2647_v13, %v2404_v37  ;;  %v2651_v8 = vld [vmem:[%s3666_s1 + $0x1a4] sm:$0xf0] }
 0x1a6   : > { %v1322_v31 = vpop.f32.mrf.mxu3  ;;  %v833_v32 = vpop.f32.mrf.mxu0  ;;  %v2409_v42 = vor.u32 %v2646_v0, %v2406_v38  ;;  %v2650_v27 = vld [vmem:[%s3666_s1 + $0x1a4] sm:$0xf] }
 0x1a7   : > { %v1323_v33 = vadd.f32 %v1322_v31, %v1161_v30  ;;  %v1002_v35 = vpop.f32.mrf.mxu1  ;;  %v2422_v30 = vld [vmem:[%s3666_s1 + $0x1a8] sm:$0xf0] }
 0x1a8   : > { %v1003_v36 = vadd.f32 %v1002_v35, %v833_v32  ;;  %v2421_v35 = vor.u32 %v2651_v8, %v2420_v23  ;;  %v2425_v37 = vor.u32 %v2650_v27, %v2422_v30 }
 0x1a9   : > { %1595 = vrot.lane.b32.xlu0 %v1323_v33, %s2759_s14 }
 0x1aa   : > { %1597 = vrot.lane.b32.xlu1 %v1003_v36, %s2759_s14  ;;  %v1511_v2 = vpop.permute.xlu2 %1510 }
 0x1ab   : > { %v1501_v50 = vpop.permute.xlu0 %1500 }
 0x1ad   : > { %v1163_v41 = vpop.f32.mrf.mxu2 }
 0x1ae   : > { %v1324_v43 = vpop.f32.mrf.mxu3  ;;  %v836_v44 = vpop.f32.mrf.mxu0 }
 0x1af   : > { %v1325_v45 = vadd.f32 %v1324_v43, %v1163_v41  ;;  %v1005_v46 = vpop.f32.mrf.mxu1 }
 0x1b0   : > { %v1006_v47 = vadd.f32 %v1005_v46, %v836_v44  ;;  %875 = vmatmul.bf16.gmra.mxu0 %v2405_v39 }
 0x1b1   : > { %1599 = vrot.lane.b32.xlu2 %v1325_v45, %s2759_s14  ;;  %1044 = vmatmul.bf16.gmra.mxu1 %v2409_v42 }
 0x1b2   : > { %1366 = vmatmul.bf16.gmra.mxu3 %v2409_v42  ;;  %v1503_v52 = vpop.permute.xlu1 %1502  ;;  %1205 = vmatmul.bf16.gmra.mxu2 %v2405_v39 }
 0x1b3   : > { %v1530_v53 = vsel %vm1528_vm1, %v1501_v50, %v1503_v52  ;;  %1642 = vrot.lane.b32.xlu0 %v1006_v47, %s2760_s23  ;;  %v1517_v31 = vpop.permute.xlu2 %1516 }
 0x1b4   : > { %v3267_v55 = vadd.f32 %v1530_v53, %v3175_v12  ;;  %v2648_v12 = vld [vmem:[%s3666_s1 + $0x194] sm:$0xf] }
 0x1b5   : > { %v1166_v40 = vpop.f32.mrf.mxu2  ;;  %v2417_v10 = vor.u32 %v2648_v12, %v2414_v61 }
 0x1b6   : > { %v1327_v57 = vpop.f32.mrf.mxu3  ;;  %v838_v58 = vpop.f32.mrf.mxu0 }
 0x1b7   : > { %v1328_v59 = vadd.f32 %v1327_v57, %v1166_v40  ;;  %v1007_v60 = vpop.f32.mrf.mxu1 }
 0x1b8   : > { %v1008_v62 = vadd.f32 %v1007_v60, %v838_v58  ;;  %v2428_v58 = vld [vmem:[%s3666_s1 + $0x1b0] sm:$0xf] }
 0x1b9   : > { %1644 = vrot.lane.b32.xlu1 %v1328_v59, %s2760_s23  ;;  %v2430_v59 = vld [vmem:[%s3666_s1 + $0x1b8] sm:$0xf0] }
 0x1ba   : > { %v1507_v1 = vpop.permute.xlu0 %1506  ;;  %1646 = vrot.lane.b32.xlu2 %v1008_v62, %s2760_s23 }
 0x1bb   : > { %v1531_v3 = vsel %vm1528_vm1, %v1505_v49, %v1507_v1  ;;  %v1509_v4 = vpop.permute.xlu1 %1508 }
 0x1bc   : > { %v3285_v5 = vadd.f32 %v1531_v3, %v3151_v48  ;;  %v1532_v6 = vsel %vm1528_vm1, %v1509_v4, %v1511_v2 }
 0x1bd   : > { %v3289_v9 = vadd.f32 %v1532_v6, %v3195_v34  ;;  %v1168_v24 = vpop.f32.mrf.mxu2 }
 0x1be   : > { %v1329_v11 = vpop.f32.mrf.mxu3  ;;  %v841_v15 = vpop.f32.mrf.mxu0 }
 0x1bf   : > { %v1330_v16 = vadd.f32 %v1329_v11, %v1168_v24  ;;  %v1010_v17 = vpop.f32.mrf.mxu1 }
 0x1c0   : > { %v1011_v18 = vadd.f32 %v1010_v17, %v841_v15  ;;  %880 = vmatmul.bf16.gmra.mxu0 %v2413_v7 }
 0x1c1   : > { %1648 = vrot.lane.b32.xlu0 %v1330_v16, %s2760_s23  ;;  %1049 = vmatmul.bf16.gmra.mxu1 %v2417_v10 }
 0x1c2   : > { %1371 = vmatmul.bf16.gmra.mxu3 %v2417_v10  ;;  %1210 = vmatmul.bf16.gmra.mxu2 %v2413_v7  ;;  %v1523_v43 = vpop.permute.xlu2 %1522 }
 0x1c3   : > { %1650 = vrot.lane.b32.xlu1 %v1011_v18, %s2760_s23  ;;  %v1513_v22 = vpop.permute.xlu0 %1512 }
 0x1c5   : > { %v1171_v48 = vpop.f32.mrf.mxu2 }
 0x1c6   : > { %v1332_v29 = vpop.f32.mrf.mxu3  ;;  %v843_v19 = vpop.f32.mrf.mxu0 }
 0x1c7   : > { %v1333_v34 = vadd.f32 %v1332_v29, %v1171_v48  ;;  %v1012_v20 = vpop.f32.mrf.mxu1  ;;  %v2436_v48 = vld [vmem:[%s3666_s1 + $0x1c0] sm:$0xf]  ;;  %v2655_v29 = vld [vmem:[%s3666_s1 + $0x1c4] sm:$0xf0] }
 0x1c8   : > { %v1013_v21 = vadd.f32 %v1012_v20, %v843_v19  ;;  %v2438_v19 = vld [vmem:[%s3666_s1 + $0x1c8] sm:$0xf0]  ;;  %v2437_v23 = vor.u32 %v2655_v29, %v2436_v48 }
 0x1c9   : > { %1652 = vrot.lane.b32.xlu2 %v1333_v34, %s2760_s23 }
 0x1ca   : > { %v1515_v25 = vpop.permute.xlu1 %1514  ;;  %1654 = vrot.lane.b32.xlu0 %v1013_v21, %s2760_s23 }
 0x1cb   : > { %v1533_v32 = vsel %vm1528_vm1, %v1513_v22, %v1515_v25  ;;  %v1570_v3 = vpop.permute.xlu2 %1569 }
 0x1cc   : > { %v3309_v33 = vadd.f32 %v1533_v32, %v3213_v51 }
 0x1cd   : > { %v1173_v36 = vpop.f32.mrf.mxu2 }
 0x1ce   : > { %v1334_v13 = vpop.f32.mrf.mxu3  ;;  %v846_v0 = vpop.f32.mrf.mxu0 }
 0x1cf   : > { %v1335_v38 = vadd.f32 %v1334_v13, %v1173_v36  ;;  %v1015_v39 = vpop.f32.mrf.mxu1 }
 0x1d0   : > { %v1016_v41 = vadd.f32 %v1015_v39, %v846_v0  ;;  %885 = vmatmul.bf16.gmra.mxu0 %v2421_v35 }
 0x1d1   : > { %1656 = vrot.lane.b32.xlu1 %v1335_v38, %s2760_s23  ;;  %1054 = vmatmul.bf16.gmra.mxu1 %v2425_v37 }
 0x1d2   : > { %1376 = vmatmul.bf16.gmra.mxu3 %v2425_v37  ;;  %v1519_v42 = vpop.permute.xlu0 %1518  ;;  %1215 = vmatmul.bf16.gmra.mxu2 %v2421_v35 }
 0x1d3   : > { %v1534_v44 = vsel %vm1528_vm1, %v1517_v31, %v1519_v42  ;;  %v1521_v51 = vpop.permute.xlu1 %1520  ;;  %1658 = vrot.lane.b32.xlu2 %v1016_v41, %s2760_s23 }
 0x1d4   : > { %v3315_v45 = vadd.f32 %v1534_v44, %v3217_v54  ;;  %v1535_v46 = vsel %vm1528_vm1, %v1521_v51, %v1523_v43  ;;  %v2653_v54 = vld [vmem:[%s3666_s1 + $0x1b4] sm:$0xf0]  ;;  %v2444_v43 = vld [vmem:[%s3666_s1 + $0x1d0] sm:$0xf]  ;;  %v2656_v51 = vld [vmem:[%s3666_s1 + $0x1d4] sm:$0xf] }
 0x1d5   : > { %v3319_v47 = vadd.f32 %v1535_v46, %v3237_v14  ;;  %v1176_v49 = vpop.f32.mrf.mxu2  ;;  %v2652_v14 = vld [vmem:[%s3666_s1 + $0x1b4] sm:$0xf]  ;;  %v2429_v60 = vor.u32 %v2653_v54, %v2428_v58  ;;  %v2657_v44 = vld [vmem:[%s3666_s1 + $0x1d4] sm:$0xf0]  ;;  %v2446_v46 = vld [vmem:[%s3666_s1 + $0x1d8] sm:$0xf0] }
 0x1d6   : > { %v1337_v50 = vpop.f32.mrf.mxu3  ;;  %v848_v52 = vpop.f32.mrf.mxu0  ;;  %v2433_v56 = vor.u32 %v2652_v14, %v2430_v59  ;;  %v2449_v58 = vor.u32 %v2656_v51, %v2446_v46 }
 0x1d7   : > { %v1338_v53 = vadd.f32 %v1337_v50, %v1176_v49  ;;  %v1017_v40 = vpop.f32.mrf.mxu1 }
 0x1d8   : > { %v1018_v57 = vadd.f32 %v1017_v40, %v848_v52 }
 0x1d9   : > { %1660 = vrot.lane.b32.xlu0 %v1338_v53, %s2760_s23  ;;  %v2445_v53 = vor.u32 %v2657_v44, %v2444_v43 }
 0x1da   : > { %1662 = vrot.lane.b32.xlu1 %v1018_v57, %s2760_s23 }
 0x1db   : > { %v1525_v4 = vpop.permute.xlu0 %1524  ;;  %v1576_v20 = vpop.permute.xlu2 %1575 }
 0x1dd   : > { %v1178_v62 = vpop.f32.mrf.mxu2 }
 0x1de   : > { %v1339_v63 = vpop.f32.mrf.mxu3  ;;  %v851_v1 = vpop.f32.mrf.mxu0 }
 0x1df   : > { %v1340_v12 = vadd.f32 %v1339_v63, %v1178_v62  ;;  %v1020_v61 = vpop.f32.mrf.mxu1 }
 0x1e0   : > { %v1021_v2 = vadd.f32 %v1020_v61, %v851_v1  ;;  %890 = vmatmul.bf16.gmra.mxu0 %v2429_v60 }
 0x1e1   : > { %1664 = vrot.lane.b32.xlu2 %v1340_v12, %s2760_s23  ;;  %1059 = vmatmul.bf16.gmra.mxu1 %v2433_v56 }
 0x1e2   : > { %1381 = vmatmul.bf16.gmra.mxu3 %v2433_v56  ;;  %v1527_v6 = vpop.permute.xlu1 %1526  ;;  %1220 = vmatmul.bf16.gmra.mxu2 %v2429_v60 }
 0x1e3   : > { %v1536_v7 = vsel %vm1528_vm1, %v1525_v4, %v1527_v6  ;;  %1666 = vrot.lane.b32.xlu0 %v1021_v2, %s2760_s23 }
 0x1e4   : > { %v3339_v24 = vadd.f32 %v1536_v7, %v3243_v26  ;;  %v2654_v26 = vld [vmem:[%s3666_s1 + $0x1c4] sm:$0xf]  ;;  %v1582_v50 = vpop.permute.xlu2 %1581 }
 0x1e5   : > { %v1181_v10 = vpop.f32.mrf.mxu2  ;;  %v2441_v30 = vor.u32 %v2654_v26, %v2438_v19 }
 0x1e6   : > { %v1342_v11 = vpop.f32.mrf.mxu3  ;;  %v853_v15 = vpop.f32.mrf.mxu0 }
 0x1e7   : > { %v1343_v16 = vadd.f32 %v1342_v11, %v1181_v10  ;;  %v1022_v17 = vpop.f32.mrf.mxu1 }
 0x1e8   : > { %v1023_v18 = vadd.f32 %v1022_v17, %v853_v15  ;;  %v2452_v15 = vld [vmem:[%s3666_s1 + $0x1e0] sm:$0xf] }
 0x1e9   : > { %1668 = vrot.lane.b32.xlu1 %v1343_v16, %s2760_s23  ;;  %v2454_v16 = vld [vmem:[%s3666_s1 + $0x1e8] sm:$0xf0] }
 0x1ea   : > { %1670 = vrot.lane.b32.xlu2 %v1023_v18, %s2760_s23 }
 0x1eb   : > { %v1572_v34 = vpop.permute.xlu0 %1571 }
 0x1ec   : > { %v1602_v21 = vsel %vm1601_vm2, %v1570_v3, %v1572_v34  ;;  %v1574_v22 = vpop.permute.xlu1 %1573 }
 0x1ed   : > { %v3357_v8 = vadd.f32 %v1602_v21, %v3247_v28  ;;  %v1603_v25 = vsel %vm1601_vm2, %v1574_v22, %v1576_v20  ;;  %v1183_v27 = vpop.f32.mrf.mxu2 }
 0x1ee   : > { %v3361_v31 = vadd.f32 %v1603_v25, %v3267_v55  ;;  %v1344_v32 = vpop.f32.mrf.mxu3  ;;  %v856_v35 = vpop.f32.mrf.mxu0 }
 0x1ef   : > { %v1345_v36 = vadd.f32 %v1344_v32, %v1183_v27  ;;  %v1025_v37 = vpop.f32.mrf.mxu1 }
 0x1f0   : > { %v1026_v13 = vadd.f32 %v1025_v37, %v856_v35  ;;  %895 = vmatmul.bf16.gmra.mxu0 %v2437_v23 }
 0x1f1   : > { %1672 = vrot.lane.b32.xlu0 %v1345_v36, %s2760_s23  ;;  %1064 = vmatmul.bf16.gmra.mxu1 %v2441_v30 }
 0x1f2   : > { %1386 = vmatmul.bf16.gmra.mxu3 %v2441_v30  ;;  %1225 = vmatmul.bf16.gmra.mxu2 %v2437_v23 }
 0x1f3   : > { %1715 = vrot.lane.b32.xlu1 %v1026_v13, %s2761_s5  ;;  %v1588_v63 = vpop.permute.xlu2 %1587 }
 0x1f5   : > { %v1186_v28 = vpop.f32.mrf.mxu2  ;;  %v1578_v42 = vpop.permute.xlu0 %1577 }
 0x1f6   : > { %v1347_v0 = vpop.f32.mrf.mxu3  ;;  %v858_v38 = vpop.f32.mrf.mxu0 }
 0x1f7   : > { %v1348_v39 = vadd.f32 %v1347_v0, %v1186_v28  ;;  %v1027_v55 = vpop.f32.mrf.mxu1  ;;  %v2460_v28 = vld [vmem:[%s3666_s1 + $0x1f0] sm:$0xf]  ;;  %v2661_v0 = vld [vmem:[%s3666_s1 + $0x1f4] sm:$0xf0] }
 0x1f8   : > { %v1028_v41 = vadd.f32 %v1027_v55, %v858_v38  ;;  %v2462_v38 = vld [vmem:[%s3666_s1 + $0x1f8] sm:$0xf0]  ;;  %v2461_v43 = vor.u32 %v2661_v0, %v2460_v28 }
 0x1f9   : > { %1717 = vrot.lane.b32.xlu2 %v1348_v39, %s2761_s5 }
 0x1fa   : > { %1719 = vrot.lane.b32.xlu0 %v1028_v41, %s2761_s5 }
 0x1fb   : > { %v1580_v49 = vpop.permute.xlu1 %1579 }
 0x1fc   : > { %v1604_v52 = vsel %vm1601_vm2, %v1578_v42, %v1580_v49 }
 0x1fd   : > { %v3381_v40 = vadd.f32 %v1604_v52, %v3285_v5  ;;  %v1188_v57 = vpop.f32.mrf.mxu2  ;;  %v1594_v21 = vpop.permute.xlu2 %1593 }
 0x1fe   : > { %v1349_v54 = vpop.f32.mrf.mxu3  ;;  %v861_v14 = vpop.f32.mrf.mxu0 }
 0x1ff   : > { %v1350_v59 = vadd.f32 %v1349_v54, %v1188_v57  ;;  %v1030_v60 = vpop.f32.mrf.mxu1 }
 0x200   : > { %v1031_v62 = vadd.f32 %v1030_v60, %v861_v14  ;;  %900 = vmatmul.bf16.gmra.mxu0 %v2445_v53 }
 0x201   : > { %1721 = vrot.lane.b32.xlu1 %v1350_v59, %s2761_s5  ;;  %1069 = vmatmul.bf16.gmra.mxu1 %v2449_v58 }
 0x202   : > { %1391 = vmatmul.bf16.gmra.mxu3 %v2449_v58  ;;  %1230 = vmatmul.bf16.gmra.mxu2 %v2445_v53 }
 0x203   : > { %v1584_v56 = vpop.permute.xlu0 %1583  ;;  %1723 = vrot.lane.b32.xlu2 %v1031_v62, %s2761_s5 }
 0x204   : > { %v1605_v5 = vsel %vm1601_vm2, %v1582_v50, %v1584_v56 }
 0x205   : > { %v3387_v1 = vadd.f32 %v1605_v5, %v3289_v9  ;;  %v1586_v12 = vpop.permute.xlu1 %1585  ;;  %v1191_v61 = vpop.f32.mrf.mxu2  ;;  %v2659_v9 = vld [vmem:[%s3666_s1 + $0x1e4] sm:$0xf0] }
 0x206   : > { %v1606_v2 = vsel %vm1601_vm2, %v1586_v12, %v1588_v63  ;;  %v1352_v3 = vpop.f32.mrf.mxu3  ;;  %v863_v4 = vpop.f32.mrf.mxu0  ;;  %v2453_v17 = vor.u32 %v2659_v9, %v2452_v15 }
 0x207   : > { %v3391_v6 = vadd.f32 %v1606_v2, %v3309_v33  ;;  %v1353_v7 = vadd.f32 %v1352_v3, %v1191_v61  ;;  %v1032_v10 = vpop.f32.mrf.mxu1  ;;  %v2658_v33 = vld [vmem:[%s3666_s1 + $0x1e4] sm:$0xf] }
 0x208   : > { %v1033_v11 = vadd.f32 %v1032_v10, %v863_v4  ;;  %v2457_v48 = vor.u32 %v2658_v33, %v2454_v16 }
 0x209   : > { %1725 = vrot.lane.b32.xlu0 %v1353_v7, %s2761_s5 }
 0x20a   : > { %1727 = vrot.lane.b32.xlu1 %v1033_v11, %s2761_s5 }
 0x20b   : > { %v1600_v55 = vpop.permute.xlu2 %1599 }
 0x20c   : > { %v1590_v22 = vpop.permute.xlu0 %1589 }
 0x20d   : > { %v1193_v18 = vpop.f32.mrf.mxu2 }
 0x20e   : > { %v1354_v29 = vpop.f32.mrf.mxu3  ;;  %v866_v26 = vpop.f32.mrf.mxu0 }
 0x20f   : > { %v1355_v19 = vadd.f32 %v1354_v29, %v1193_v18  ;;  %v1035_v34 = vpop.f32.mrf.mxu1 }
 0x210   : > { %v1036_v20 = vadd.f32 %v1035_v34, %v866_v26  ;;  %905 = vmatmul.bf16.gmra.mxu0 %v2453_v17 }
 0x211   : > { %1729 = vrot.lane.b32.xlu2 %v1355_v19, %s2761_s5  ;;  %1074 = vmatmul.bf16.gmra.mxu1 %v2457_v48 }
 0x212   : > { %1396 = vmatmul.bf16.gmra.mxu3 %v2457_v48  ;;  %1235 = vmatmul.bf16.gmra.mxu2 %v2453_v17 }
 0x213   : > { %v1592_v23 = vpop.permute.xlu1 %1591  ;;  %1731 = vrot.lane.b32.xlu0 %v1036_v20, %s2761_s5 }
 0x214   : > { %v1607_v25 = vsel %vm1601_vm2, %v1590_v22, %v1592_v23  ;;  %v1647_v5 = vpop.permute.xlu2 %1646 }
 0x215   : > { %v3411_v27 = vadd.f32 %v1607_v25, %v3315_v45  ;;  %v1196_v30 = vpop.f32.mrf.mxu2  ;;  %v2660_v45 = vld [vmem:[%s3666_s1 + $0x1f4] sm:$0xf] }
 0x216   : > { %v1357_v32 = vpop.f32.mrf.mxu3  ;;  %v868_v35 = vpop.f32.mrf.mxu0  ;;  %v2465_v49 = vor.u32 %v2660_v45, %v2462_v38 }
 0x217   : > { %v1358_v36 = vadd.f32 %v1357_v32, %v1196_v30  ;;  %v1037_v37 = vpop.f32.mrf.mxu1 }
 0x218   : > { %v1038_v13 = vadd.f32 %v1037_v37, %v868_v35 }
 0x219   : > { %1733 = vrot.lane.b32.xlu1 %v1358_v36, %s2761_s5 }
 0x21a   : > { %1735 = vrot.lane.b32.xlu2 %v1038_v13, %s2761_s5 }
 0x21b   : > { %v1596_v39 = vpop.permute.xlu0 %1595 }
 0x21c   : > { %v1608_v41 = vsel %vm1601_vm2, %v1594_v21, %v1596_v39  ;;  %v1598_v42 = vpop.permute.xlu1 %1597 }
 0x21d   : > { %v3429_v44 = vadd.f32 %v1608_v41, %v3319_v47  ;;  %v1609_v51 = vsel %vm1601_vm2, %v1598_v42, %v1600_v55  ;;  %v1198_v46 = vpop.f32.mrf.mxu2 }
 0x21e   : > { %v3433_v50 = vadd.f32 %v1609_v51, %v3339_v24  ;;  %v1359_v52 = vpop.f32.mrf.mxu3  ;;  %v871_v53 = vpop.f32.mrf.mxu0 }
 0x21f   : > { %v1360_v57 = vadd.f32 %v1359_v52, %v1198_v46  ;;  %v1040_v58 = vpop.f32.mrf.mxu1 }
 0x220   : > { %v1041_v54 = vadd.f32 %v1040_v58, %v871_v53  ;;  %910 = vmatmul.bf16.gmra.mxu0 %v2461_v43 }
 0x221   : > { %1737 = vrot.lane.b32.xlu0 %v1360_v57, %s2761_s5  ;;  %1079 = vmatmul.bf16.gmra.mxu1 %v2465_v49 }
 0x222   : > { %1401 = vmatmul.bf16.gmra.mxu3 %v2465_v49  ;;  %1240 = vmatmul.bf16.gmra.mxu2 %v2461_v43 }
 0x223   : > { %1739 = vrot.lane.b32.xlu1 %v1041_v54, %s2761_s5  ;;  %v1653_v9 = vpop.permute.xlu2 %1652 }
 0x225   : > { %v1201_v47 = vpop.f32.mrf.mxu2  ;;  %v1643_v56 = vpop.permute.xlu0 %1642 }
 0x226   : > { %v1362_v14 = vpop.f32.mrf.mxu3  ;;  %v873_v59 = vpop.f32.mrf.mxu0 }
 0x227   : > { %v1363_v60 = vadd.f32 %v1362_v14, %v1201_v47  ;;  %v1042_v62 = vpop.f32.mrf.mxu1 }
 0x228   : > { %v1043_v24 = vadd.f32 %v1042_v62, %v873_v59 }
 0x229   : > { %1741 = vrot.lane.b32.xlu2 %v1363_v60, %s2761_s5 }
 0x22a   : > { %1743 = vrot.lane.b32.xlu0 %v1043_v24, %s2761_s5 }
 0x22b   : > { %v1645_v63 = vpop.permute.xlu1 %1644 }
 0x22c   : > { %v1675_v12 = vsel %vm1674_vm3, %v1643_v56, %v1645_v63 }
 0x22d   : > { %v3441_v61 = vadd.f32 %v1675_v12, %v3357_v8  ;;  %v1203_v2 = vpop.f32.mrf.mxu2  ;;  %v1659_v32 = vpop.permute.xlu2 %1658 }
 0x22e   : > { %v1364_v3 = vpop.f32.mrf.mxu3  ;;  %v876_v4 = vpop.f32.mrf.mxu0 }
 0x22f   : > { %v1365_v7 = vadd.f32 %v1364_v3, %v1203_v2  ;;  %v1045_v10 = vpop.f32.mrf.mxu1 }
 0x230   : > { %v1046_v11 = vadd.f32 %v1045_v10, %v876_v4 }
 0x231   : > { %1745 = vrot.lane.b32.xlu1 %v1365_v7, %s2761_s5  ;;  %s2763_s5 = smov 115  }
 0x232   : > { %1788 = vrot.lane.b32.xlu2 %v1046_v11, %s2762_s6 }
 0x233   : > { %v1649_v15 = vpop.permute.xlu0 %1648 }
 0x234   : > { %v1676_v33 = vsel %vm1674_vm3, %v1647_v5, %v1649_v15 }
 0x235   : > { %v3447_v16 = vadd.f32 %v1676_v33, %v3361_v31  ;;  %v1651_v8 = vpop.permute.xlu1 %1650  ;;  %v1206_v17 = vpop.f32.mrf.mxu2 }
 0x236   : > { %v1677_v18 = vsel %vm1674_vm3, %v1651_v8, %v1653_v9  ;;  %v1367_v48 = vpop.f32.mrf.mxu3  ;;  %v878_v29 = vpop.f32.mrf.mxu0 }
 0x237   : > { %v3451_v26 = vadd.f32 %v1677_v18, %v3381_v40  ;;  %v1368_v19 = vadd.f32 %v1367_v48, %v1206_v17  ;;  %v1047_v34 = vpop.f32.mrf.mxu1 }
 0x238   : > { %v1048_v20 = vadd.f32 %v1047_v34, %v878_v29 }
 0x239   : > { %1790 = vrot.lane.b32.xlu0 %v1368_v19, %s2762_s6 }
 0x23a   : > { %1792 = vrot.lane.b32.xlu1 %v1048_v20, %s2762_s6 }
 0x23b   : > { %v1665_v41 = vpop.permute.xlu2 %1664 }
 0x23c   : > { %v1655_v40 = vpop.permute.xlu0 %1654 }
 0x23d   : > { %v1208_v21 = vpop.f32.mrf.mxu2 }
 0x23e   : > { %v1369_v22 = vpop.f32.mrf.mxu3  ;;  %v881_v31 = vpop.f32.mrf.mxu0 }
 0x23f   : > { %v1370_v23 = vadd.f32 %v1369_v22, %v1208_v21  ;;  %v1050_v25 = vpop.f32.mrf.mxu1 }
 0x240   : > { %v1051_v30 = vadd.f32 %v1050_v25, %v881_v31 }
 0x241   : > { %1794 = vrot.lane.b32.xlu2 %v1370_v23, %s2762_s6 }
 0x242   : > { %1796 = vrot.lane.b32.xlu0 %v1051_v30, %s2762_s6 }
 0x243   : > { %v1657_v35 = vpop.permute.xlu1 %1656 }
 0x244   : > { %v1678_v36 = vsel %vm1674_vm3, %v1655_v40, %v1657_v35  ;;  %v1671_v56 = vpop.permute.xlu2 %1670 }
 0x245   : > { %v3459_v37 = vadd.f32 %v1678_v36, %v3387_v1  ;;  %v1211_v13 = vpop.f32.mrf.mxu2 }
 0x246   : > { %v1372_v28 = vpop.f32.mrf.mxu3  ;;  %v883_v0 = vpop.f32.mrf.mxu0 }
 0x247   : > { %v1373_v45 = vadd.f32 %v1372_v28, %v1211_v13  ;;  %v1052_v38 = vpop.f32.mrf.mxu1 }
 0x248   : > { %v1053_v39 = vadd.f32 %v1052_v38, %v883_v0 }
 0x249   : > { %1798 = vrot.lane.b32.xlu1 %v1373_v45, %s2762_s6 }
 0x24a   : > { %1800 = vrot.lane.b32.xlu2 %v1053_v39, %s2762_s6 }
 0x24b   : > { %v1661_v55 = vpop.permute.xlu0 %1660 }
 0x24c   : > { %v1679_v42 = vsel %vm1674_vm3, %v1659_v32, %v1661_v55  ;;  %v1663_v43 = vpop.permute.xlu1 %1662 }
 0x24d   : > { %v3465_v51 = vadd.f32 %v1679_v42, %v3391_v6  ;;  %v1680_v1 = vsel %vm1674_vm3, %v1663_v43, %v1665_v41  ;;  %v1213_v46 = vpop.f32.mrf.mxu2 }
 0x24e   : > { %v3469_v49 = vadd.f32 %v1680_v1, %v3411_v27  ;;  %v1374_v52 = vpop.f32.mrf.mxu3  ;;  %v886_v53 = vpop.f32.mrf.mxu0 }
 0x24f   : > { %v1375_v57 = vadd.f32 %v1374_v52, %v1213_v46  ;;  %v1055_v58 = vpop.f32.mrf.mxu1 }
 0x250   : > { %v1056_v54 = vadd.f32 %v1055_v58, %v886_v53 }
 0x251   : > { %1802 = vrot.lane.b32.xlu0 %v1375_v57, %s2762_s6 }
 0x252   : > { %1804 = vrot.lane.b32.xlu1 %v1056_v54, %s2762_s6 }
 0x253   : > { %v1718_v15 = vpop.permute.xlu2 %1717 }
 0x255   : > { %v1216_v47 = vpop.f32.mrf.mxu2  ;;  %v1667_v24 = vpop.permute.xlu0 %1666 }
 0x256   : > { %v1377_v14 = vpop.f32.mrf.mxu3  ;;  %v888_v59 = vpop.f32.mrf.mxu0 }
 0x257   : > { %v1378_v6 = vadd.f32 %v1377_v14, %v1216_v47  ;;  %v1057_v60 = vpop.f32.mrf.mxu1 }
 0x258   : > { %v1058_v62 = vadd.f32 %v1057_v60, %v888_v59 }
 0x259   : > { %1806 = vrot.lane.b32.xlu2 %v1378_v6, %s2762_s6 }
 0x25a   : > { %1808 = vrot.lane.b32.xlu0 %v1058_v62, %s2762_s6 }
 0x25b   : > { %v1669_v27 = vpop.permute.xlu1 %1668 }
 0x25c   : > { %v1681_v63 = vsel %vm1674_vm3, %v1667_v24, %v1669_v27 }
 0x25d   : > { %v3477_v5 = vadd.f32 %v1681_v63, %v3429_v44  ;;  %v1218_v12 = vpop.f32.mrf.mxu2  ;;  %v1724_v30 = vpop.permute.xlu2 %1723 }
 0x25e   : > { %v1379_v2 = vpop.f32.mrf.mxu3  ;;  %v891_v3 = vpop.f32.mrf.mxu0 }
 0x25f   : > { %v1380_v4 = vadd.f32 %v1379_v2, %v1218_v12  ;;  %v1060_v7 = vpop.f32.mrf.mxu1 }
 0x260   : > { %v1061_v10 = vadd.f32 %v1060_v7, %v891_v3 }
 0x261   : > { %1810 = vrot.lane.b32.xlu1 %v1380_v4, %s2762_s6 }
 0x262   : > { %1812 = vrot.lane.b32.xlu2 %v1061_v10, %s2762_s6 }
 0x263   : > { %v1673_v11 = vpop.permute.xlu0 %1672 }
 0x264   : > { %v1682_v9 = vsel %vm1674_vm3, %v1671_v56, %v1673_v11 }
 0x265   : > { %v3483_v33 = vadd.f32 %v1682_v9, %v3433_v50  ;;  %v1716_v44 = vpop.permute.xlu1 %1715  ;;  %v1221_v8 = vpop.f32.mrf.mxu2 }
 0x266   : > { %v1748_v17 = vsel %vm1747_vm4, %v1716_v44, %v1718_v15  ;;  %v1382_v18 = vpop.f32.mrf.mxu3  ;;  %v893_v48 = vpop.f32.mrf.mxu0 }
 0x267   : > { %v3487_v29 = vadd.f32 %v1748_v17, %v3441_v61  ;;  %v1383_v19 = vadd.f32 %v1382_v18, %v1221_v8  ;;  %v1062_v34 = vpop.f32.mrf.mxu1 }
 0x268   : > { %v1063_v20 = vadd.f32 %v1062_v34, %v893_v48 }
 0x269   : > { %1814 = vrot.lane.b32.xlu0 %v1383_v19, %s2762_s6 }
 0x26a   : > { %1816 = vrot.lane.b32.xlu1 %v1063_v20, %s2762_s6 }
 0x26b   : > { %v1730_v55 = vpop.permute.xlu2 %1729 }
 0x26c   : > { %v1720_v61 = vpop.permute.xlu0 %1719 }
 0x26d   : > { %v1223_v21 = vpop.f32.mrf.mxu2 }
 0x26e   : > { %v1384_v22 = vpop.f32.mrf.mxu3  ;;  %v896_v50 = vpop.f32.mrf.mxu0 }
 0x26f   : > { %v1385_v31 = vadd.f32 %v1384_v22, %v1223_v21  ;;  %v1065_v23 = vpop.f32.mrf.mxu1 }
 0x270   : > { %v1066_v25 = vadd.f32 %v1065_v23, %v896_v50 }
 0x271   : > { %1818 = vrot.lane.b32.xlu2 %v1385_v31, %s2762_s6 }
 0x272   : > { %1861 = vrot.lane.b32.xlu0 %v1066_v25, %s2763_s5 }
 0x273   : > { %v1722_v32 = vpop.permute.xlu1 %1721 }
 0x274   : > { %v1749_v40 = vsel %vm1747_vm4, %v1720_v61, %v1722_v32  ;;  %v1736_v24 = vpop.permute.xlu2 %1735 }
 0x275   : > { %v3495_v35 = vadd.f32 %v1749_v40, %v3447_v16  ;;  %v1226_v36 = vpop.f32.mrf.mxu2 }
 0x276   : > { %v1387_v13 = vpop.f32.mrf.mxu3  ;;  %v898_v28 = vpop.f32.mrf.mxu0 }
 0x277   : > { %v1388_v0 = vadd.f32 %v1387_v13, %v1226_v36  ;;  %v1067_v45 = vpop.f32.mrf.mxu1 }
 0x278   : > { %v1068_v38 = vadd.f32 %v1067_v45, %v898_v28 }
 0x279   : > { %1863 = vrot.lane.b32.xlu1 %v1388_v0, %s2763_s5 }
 0x27a   : > { %1865 = vrot.lane.b32.xlu2 %v1068_v38, %s2763_s5 }
 0x27b   : > { %v1726_v39 = vpop.permute.xlu0 %1725 }
 0x27c   : > { %v1750_v41 = vsel %vm1747_vm4, %v1724_v30, %v1726_v39  ;;  %v1728_v42 = vpop.permute.xlu1 %1727 }
 0x27d   : > { %v3501_v43 = vadd.f32 %v1750_v41, %v3451_v26  ;;  %v1751_v16 = vsel %vm1747_vm4, %v1728_v42, %v1730_v55  ;;  %v1228_v1 = vpop.f32.mrf.mxu2 }
 0x27e   : > { %v3505_v46 = vadd.f32 %v1751_v16, %v3459_v37  ;;  %v1389_v52 = vpop.f32.mrf.mxu3  ;;  %v901_v53 = vpop.f32.mrf.mxu0 }
 0x27f   : > { %v1390_v57 = vadd.f32 %v1389_v52, %v1228_v1  ;;  %v1070_v58 = vpop.f32.mrf.mxu1 }
 0x280   : > { %v1071_v54 = vadd.f32 %v1070_v58, %v901_v53 }
 0x281   : > { %1867 = vrot.lane.b32.xlu0 %v1390_v57, %s2763_s5 }
 0x282   : > { %1869 = vrot.lane.b32.xlu1 %v1071_v54, %s2763_s5 }
 0x283   : > { %v1742_v11 = vpop.permute.xlu2 %1741 }
 0x285   : > { %v1231_v47 = vpop.f32.mrf.mxu2  ;;  %v1732_v62 = vpop.permute.xlu0 %1731 }
 0x286   : > { %v1392_v14 = vpop.f32.mrf.mxu3  ;;  %v903_v59 = vpop.f32.mrf.mxu0 }
 0x287   : > { %v1393_v26 = vadd.f32 %v1392_v14, %v1231_v47  ;;  %v1072_v6 = vpop.f32.mrf.mxu1 }
 0x288   : > { %v1073_v60 = vadd.f32 %v1072_v6, %v903_v59 }
 0x289   : > { %1871 = vrot.lane.b32.xlu2 %v1393_v26, %s2763_s5 }
 0x28a   : > { %1873 = vrot.lane.b32.xlu0 %v1073_v60, %s2763_s5 }
 0x28b   : > { %v1734_v37 = vpop.permute.xlu1 %1733 }
 0x28c   : > { %v1752_v27 = vsel %vm1747_vm4, %v1732_v62, %v1734_v37  ;;  %v1789_v55 = vpop.permute.xlu2 %1788 }
 0x28d   : > { %v3513_v56 = vadd.f32 %v1752_v27, %v3465_v51  ;;  %v1233_v63 = vpop.f32.mrf.mxu2  ;;  %v3549_v27 = vld [vmem:[%s3667_s2] ss:$0 sm:$0xff] }
 0x28e   : > { %v1394_v12 = vpop.f32.mrf.mxu3  ;;  %v906_v2 = vpop.f32.mrf.mxu0 }
 0x28f   : > { %v1395_v3 = vadd.f32 %v1394_v12, %v1233_v63  ;;  %v1075_v4 = vpop.f32.mrf.mxu1 }
 0x290   : > { %v1076_v7 = vadd.f32 %v1075_v4, %v906_v2 }
 0x291   : > { %1875 = vrot.lane.b32.xlu1 %v1395_v3, %s2763_s5 }
 0x292   : > { %1877 = vrot.lane.b32.xlu2 %v1076_v7, %s2763_s5 }
 0x293   : > { %v1738_v10 = vpop.permute.xlu0 %1737 }
 0x294   : > { %v1753_v15 = vsel %vm1747_vm4, %v1736_v24, %v1738_v10 }
 0x295   : > { %v3519_v9 = vadd.f32 %v1753_v15, %v3469_v49  ;;  %v1740_v44 = vpop.permute.xlu1 %1739  ;;  %v1236_v51 = vpop.f32.mrf.mxu2 }
 0x296   : > { %v1754_v8 = vsel %vm1747_vm4, %v1740_v44, %v1742_v11  ;;  %v1397_v17 = vpop.f32.mrf.mxu3  ;;  %v908_v18 = vpop.f32.mrf.mxu0 }
 0x297   : > { %v3523_v48 = vadd.f32 %v1754_v8, %v3477_v5  ;;  %v1398_v19 = vadd.f32 %v1397_v17, %v1236_v51  ;;  %v1077_v34 = vpop.f32.mrf.mxu1 }
 0x298   : > { %v1078_v20 = vadd.f32 %v1077_v34, %v908_v18 }
 0x299   : > { %1879 = vrot.lane.b32.xlu0 %v1398_v19, %s2763_s5 }
 0x29a   : > { %1881 = vrot.lane.b32.xlu1 %v1078_v20, %s2763_s5 }
 0x29b   : > { %v1795_v42 = vpop.permute.xlu2 %1794 }
 0x29c   : > { %v1744_v25 = vpop.permute.xlu0 %1743 }
 0x29d   : > { %v1238_v21 = vpop.f32.mrf.mxu2 }
 0x29e   : > { %v1399_v22 = vpop.f32.mrf.mxu3  ;;  %v911_v49 = vpop.f32.mrf.mxu0 }
 0x29f   : > { %v1400_v50 = vadd.f32 %v1399_v22, %v1238_v21  ;;  %v1080_v31 = vpop.f32.mrf.mxu1 }
 0x2a0   : > { %v1081_v23 = vadd.f32 %v1080_v31, %v911_v49 }
 0x2a1   : > { %1883 = vrot.lane.b32.xlu2 %v1400_v50, %s2763_s5 }
 0x2a2   : > { %1885 = vrot.lane.b32.xlu0 %v1081_v23, %s2763_s5 }
 0x2a3   : > { %v1746_v5 = vpop.permute.xlu1 %1745 }
 0x2a4   : > { %v1755_v30 = vsel %vm1747_vm4, %v1744_v25, %v1746_v5  ;;  %v1801_v1 = vpop.permute.xlu2 %1800 }
 0x2a5   : > { %v3531_v61 = vadd.f32 %v1755_v30, %v3483_v33  ;;  %v1241_v32 = vpop.f32.mrf.mxu2 }
 0x2a6   : > { %v1402_v40 = vpop.f32.mrf.mxu3  ;;  %v913_v36 = vpop.f32.mrf.mxu0 }
 0x2a7   : > { %v1403_v13 = vadd.f32 %v1402_v40, %v1241_v32  ;;  %v1082_v28 = vpop.f32.mrf.mxu1 }
 0x2a8   : > { %v1083_v0 = vadd.f32 %v1082_v28, %v913_v36 }
 0x2a9   : > { %1887 = vrot.lane.b32.xlu1 %v1403_v13, %s2763_s5 }
 0x2aa   : > { %1889 = vrot.lane.b32.xlu2 %v1083_v0, %s2763_s5 }
 0x2ab   : > { %v1791_v41 = vpop.permute.xlu0 %1790 }
 0x2ac   : > { %v1793_v33 = vpop.permute.xlu1 %1792  ;;  %v1821_v60 = vsel %vm1820_vm5, %v1789_v55, %v1791_v41 }
 0x2ad   : > { %v1243_v45 = vpop.f32.mrf.mxu2  ;;  %v1837_v37 = vadd.f32 %v1821_v60, %v3487_v29  ;;  %v1822_v4 = vsel %vm1820_vm5, %v1793_v33, %v1795_v42 }
 0x2ae   : > { %v1404_v38 = vpop.f32.mrf.mxu3  ;;  %v1838_v10 = vadd.f32 %v1822_v4, %v3495_v35 }
 0x2af   : > { %v1405_v39 = vadd.f32 %v1404_v38, %v1243_v45 }
 0x2b1   : > { %1891 = vrot.lane.b32.xlu0 %v1405_v39, %s2763_s5 }
 0x2b3   : > { %v1807_v57 = vpop.permute.xlu2 %1806 }
 0x2b4   : > { %v1797_v16 = vpop.permute.xlu0 %1796 }
 0x2bb   : > { %v1799_v52 = vpop.permute.xlu1 %1798 }
 0x2bc   : > { %v3536_v47 = vpop.permute.xlu2 %1812  ;;  %v1823_v7 = vsel %vm1820_vm5, %v1797_v16, %v1799_v52 }
 0x2bd   : > { %v1839_v15 = vadd.f32 %v1823_v7, %v3501_v43 }
 0x2c3   : > { %v1803_v53 = vpop.permute.xlu0 %1802 }
 0x2c4   : > { %v1805_v58 = vpop.permute.xlu1 %1804  ;;  %v1824_v43 = vsel %vm1820_vm5, %v1801_v1, %v1803_v53 }
 0x2c5   : > { %v1840_v22 = vadd.f32 %v1824_v43, %v3505_v46  ;;  %v1825_v30 = vsel %vm1820_vm5, %v1805_v58, %v1807_v57 }
 0x2c6   : > { %v1841_v32 = vadd.f32 %v1825_v30, %v3513_v56 }
 0x2cb   : > { %v3542_v6 = vpop.permute.xlu2 %1818 }
 0x2cc   : > { %v1809_v54 = vpop.permute.xlu0 %1808 }
 0x2d3   : > { %v1811_v14 = vpop.permute.xlu1 %1810 }
 0x2d4   : > { %v1866_v63 = vpop.permute.xlu2 %1865  ;;  %v1826_v28 = vsel %vm1820_vm5, %v1809_v54, %v1811_v14 }
 0x2d5   : > { %v1842_v55 = vadd.f32 %v1826_v28, %v3519_v9 }
 0x2db   : > { %v3538_v59 = vpop.permute.xlu0 %1814 }
 0x2dc   : > { %v3540_v26 = vpop.permute.xlu1 %1816  ;;  %v1827_v33 = vsel %vm1820_vm5, %v3536_v47, %v3538_v59 }
 0x2dd   : > { %v1843_v1 = vadd.f32 %v1827_v33, %v3523_v48  ;;  %v1828_v58 = vsel %vm1820_vm5, %v3540_v26, %v3542_v6 }
 0x2de   : > { %v1844_v47 = vadd.f32 %v1828_v58, %v3531_v61 }
 0x2e3   : > { %v1872_v44 = vpop.permute.xlu2 %1871 }
 0x2e4   : > { %v1862_v62 = vpop.permute.xlu0 %1861 }
 0x2eb   : > { %v1864_v24 = vpop.permute.xlu1 %1863 }
 0x2ec   : > { %v1894_v12 = vsel %vm1893_vm6, %v1862_v62, %v1864_v24  ;;  %v1878_v23 = vpop.permute.xlu2 %1877 }
 0x2ed   : > { %v3552_v2 = vadd.f32 %v1894_v12, %v1837_v37 }
 0x2ef   : > { %v1922_v3 = vmul.f32 %v3549_v27, %v3552_v2 }
 0x2f1   : > { %1930 = vadd.xlane.f32.xlu1 %v1922_v3  ;;  %v1946_v29 = vmul.f32 %v1922_v3, %v1922_v3 }
 0x2f3   : > { %v1868_v11 = vpop.permute.xlu0 %1867  ;;  %1954 = vadd.xlane.f32.xlu2 %v1946_v29 }
 0x2f4   : > { %v1895_v51 = vsel %vm1893_vm6, %v1866_v63, %v1868_v11  ;;  %v1870_v8 = vpop.permute.xlu1 %1869 }
 0x2f5   : > { %v3561_v17 = vadd.f32 %v1895_v51, %v1838_v10  ;;  %v1896_v18 = vsel %vm1893_vm6, %v1870_v8, %v1872_v44 }
 0x2f6   : > { %v3564_v19 = vadd.f32 %v1896_v18, %v1839_v15 }
 0x2f7   : > { %v1923_v34 = vmul.f32 %v3549_v27, %v3561_v17 }
 0x2f8   : > { %v1924_v35 = vmul.f32 %v3549_v27, %v3564_v19 }
 0x2f9   : > { %v1947_v20 = vmul.f32 %v1923_v34, %v1923_v34 }
 0x2fa   : > { %v1948_v21 = vmul.f32 %v1924_v35, %v1924_v35 }
 0x2fb   : > { %1932 = vadd.xlane.f32.xlu2 %v1923_v34  ;;  %1956 = vadd.xlane.f32.xlu0 %v1947_v20  ;;  %v1884_v0 = vpop.permute.xlu2 %1883 }
 0x2fc   : > { %1958 = vadd.xlane.f32.xlu1 %v1948_v21  ;;  %v1874_v49 = vpop.permute.xlu0 %1873 }
 0x303   : > { %v1876_v50 = vpop.permute.xlu1 %1875  ;;  %1934 = vadd.xlane.f32.xlu0 %v1924_v35 }
 0x304   : > { %v1897_v31 = vsel %vm1893_vm6, %v1874_v49, %v1876_v50  ;;  %v1890_v14 = vpop.permute.xlu2 %1889 }
 0x305   : > { %v3573_v25 = vadd.f32 %v1897_v31, %v1840_v22 }
 0x307   : > { %v1925_v5 = vmul.f32 %v3549_v27, %v3573_v25 }
 0x309   : > { %1936 = vadd.xlane.f32.xlu2 %v1925_v5  ;;  %v1949_v45 = vmul.f32 %v1925_v5, %v1925_v5 }
 0x30b   : > { %v1880_v40 = vpop.permute.xlu0 %1879 }
 0x30c   : > { %v1898_v36 = vsel %vm1893_vm6, %v1878_v23, %v1880_v40  ;;  %v1882_v13 = vpop.permute.xlu1 %1881 }
 0x30d   : > { %v3580_v46 = vadd.f32 %v1898_v36, %v1841_v32  ;;  %v1899_v39 = vsel %vm1893_vm6, %v1882_v13, %v1884_v0 }
 0x30e   : > { %v3587_v41 = vadd.f32 %v1899_v39, %v1842_v55 }
 0x30f   : > { %v1926_v38 = vmul.f32 %v3549_v27, %v3580_v46 }
 0x310   : > { %v1927_v42 = vmul.f32 %v3549_v27, %v3587_v41 }
 0x311   : > { %1960 = vadd.xlane.f32.xlu2 %v1949_v45  ;;  %1938 = vadd.xlane.f32.xlu1 %v1926_v38  ;;  %v1950_v56 = vmul.f32 %v1926_v38, %v1926_v38 }
 0x312   : > { %v1951_v24 = vmul.f32 %v1927_v42, %v1927_v42 }
 0x313   : > { %1962 = vadd.xlane.f32.xlu0 %v1950_v56 }
 0x314   : > { %v1886_v16 = vpop.permute.xlu0 %1885 }
 0x319   : > { %1940 = vadd.xlane.f32.xlu2 %v1927_v42 }
 0x31b   : > { %v1888_v52 = vpop.permute.xlu1 %1887 }
 0x31c   : > { %v1900_v9 = vsel %vm1893_vm6, %v1886_v16, %v1888_v52 }
 0x31d   : > { %v3596_v53 = vadd.f32 %v1900_v9, %v1843_v1 }
 0x31f   : > { %v1928_v57 = vmul.f32 %v3549_v27, %v3596_v53 }
 0x321   : > { %1942 = vadd.xlane.f32.xlu0 %v1928_v57  ;;  %v1952_v54 = vmul.f32 %v1928_v57, %v1928_v57 }
 0x323   : > { %1966 = vadd.xlane.f32.xlu2 %v1952_v54  ;;  %v1892_v59 = vpop.permute.xlu0 %1891 }
 0x324   : > { %v1901_v48 = vsel %vm1893_vm6, %v1890_v14, %v1892_v59 }
 0x325   : > { %v3605_v60 = vadd.f32 %v1901_v48, %v1844_v47 }
 0x327   : > { %v1929_v62 = vmul.f32 %v3549_v27, %v3605_v60 }
 0x329   : > { %1944 = vadd.xlane.f32.xlu1 %v1929_v62  ;;  %v1953_v37 = vmul.f32 %v1929_v62, %v1929_v62 }
 0x32b   : > { %1968 = vadd.xlane.f32.xlu0 %v1953_v37 }
 0x331   : > { %1964 = vadd.xlane.f32.xlu1 %v1951_v24 }
 0x364   : > { %v1931_v26 = vpop.xlane.xlu1 %1930 }
 0x365   : > { %v1970_v6 = vmul.f32 0.125, %v1931_v26 }
 0x366   : > { %v1955_v63 = vpop.xlane.xlu2 %1954 }
 0x367   : > { %v1986_v12 = vmul.f32 %v1970_v6, %v1970_v6  ;;  %v1978_v61 = vmul.f32 0.125, %v1955_v63  ;;  %v2010_v38 = vsub.f32 %v3552_v2, %v1970_v6 }
 0x369   : > { %v1994_v3 = vsub.f32 %v1978_v61, %v1986_v12 }
 0x36b   : > { %v2002_v4 = vmax.f32 %v1994_v3, 0.0 }
 0x36d   : > { %v2018_v7 = vadd.f32 1e-05, %v2002_v4 }
 0x36e   : > { %v1933_v29 = vpop.xlane.xlu2 %1932  ;;  %v1957_v10 = vpop.xlane.xlu0 %1956 }
 0x36f   : > { %2733 = vrsqrt.f32 %v2018_v7  ;;  %v1971_v11 = vmul.f32 0.125, %v1933_v29  ;;  %v1979_v44 = vmul.f32 0.125, %v1957_v10  ;;  %v1959_v34 = vpop.xlane.xlu1 %1958  ;;  %vm2032_vm8 = vweird.f32 %v2018_v7 }
 0x370   : > { %v1980_v22 = vmul.f32 0.125, %v1959_v34 }
 0x371   : > { %v1987_v15 = vmul.f32 %v1971_v11, %v1971_v11  ;;  %v2011_v2 = vsub.f32 %v3561_v17, %v1971_v11 }
 0x373   : > { %v1995_v27 = vsub.f32 %v1979_v44, %v1987_v15 }
 0x375   : > { %v2734_v51 = vpop.eup %2733  ;;  %v2003_v8 = vmax.f32 %v1995_v27, 0.0 }
 0x376   : > { %v2027_v18 = vmul.f32 %v2734_v51, %v2018_v7  ;;  %v1935_v35 = vpop.xlane.xlu0 %1934  ;;  %vm2033_vm7 = vweird.f32 %v2734_v51 }
 0x377   : > { %v2019_v20 = vadd.f32 1e-05, %v2003_v8  ;;  %v3609_v21 = vmul.f32 0.125, %v1935_v35  ;;  %vm2034_vm9 = vmor %vm2032_vm8, %vm2033_vm7 }
 0x378   : > { %v2028_v43 = vmul.f32 %v2734_v51, %v2027_v18 }
 0x379   : > { %2735 = vrsqrt.f32 %v2019_v20  ;;  %v1988_v49 = vmul.f32 %v3609_v21, %v3609_v21  ;;  %vm2042_vm11 = vweird.f32 %v2019_v20 }
 0x37a   : > { %v2029_v50 = vmul.f32 0.5, %v2028_v43 }
 0x37b   : > { %v1996_v31 = vsub.f32 %v1980_v22, %v1988_v49  ;;  %v2012_v49 = vsub.f32 %v3564_v19, %v3609_v21 }
 0x37c   : > { %v2030_v23 = vsub.f32 1.5, %v2029_v50  ;;  %v1937_v5 = vpop.xlane.xlu2 %1936 }
 0x37d   : > { %v2004_v30 = vmax.f32 %v1996_v31, 0.0  ;;  %v3613_v28 = vmul.f32 0.125, %v1937_v5 }
 0x37e   : > { %v2031_v40 = vmul.f32 %v2734_v51, %v2030_v23 }
 0x37f   : > { %v2736_v32 = vpop.eup %2735  ;;  %v2020_v36 = vadd.f32 1e-05, %v2004_v30  ;;  %v1989_v42 = vmul.f32 %v3613_v28, %v3613_v28 }
 0x380   : > { %v2037_v13 = vmul.f32 %v2736_v32, %v2019_v20  ;;  %v2035_v45 = vsel %vm2034_vm9, %v2734_v51, %v2031_v40  ;;  %vm2043_vm10 = vweird.f32 %v2736_v32  ;;  %v2013_v40 = vsub.f32 %v3573_v25, %v3613_v28 }
 0x381   : > { %2737 = vrsqrt.f32 %v2020_v36  ;;  %v2106_v16 = vmul.f32 %v2035_v45, %v2010_v38  ;;  %vm2044_vm12 = vmor %vm2042_vm11, %vm2043_vm10  ;;  %vm2052_vm14 = vweird.f32 %v2020_v36 }
 0x382   : > { %v2038_v0 = vmul.f32 %v2736_v32, %v2037_v13 }
 0x383   : > { %v2114_v59 = vmul.f32 0.2, %v2106_v16 }
 0x384   : > { %v2039_v39 = vmul.f32 0.5, %v2038_v0  ;;  %v1961_v55 = vpop.xlane.xlu2 %1960  ;;  %v1939_v56 = vpop.xlane.xlu1 %1938 }
 0x385   : > { %v1981_v33 = vmul.f32 0.125, %v1961_v55  ;;  %v3618_v57 = vmul.f32 0.125, %v1939_v56  ;;  %v2122_v3 = vmax.f32 %v2106_v16, %v2114_v59 }
 0x386   : > { %v2040_v1 = vsub.f32 1.5, %v2039_v39  ;;  %v1963_v47 = vpop.xlane.xlu0 %1962 }
 0x387   : > { %v2738_v52 = vpop.eup %2737  ;;  %v1997_v9 = vsub.f32 %v1981_v33, %v1989_v42  ;;  %v1990_v26 = vmul.f32 %v3618_v57, %v3618_v57  ;;  %v1982_v6 = vmul.f32 0.125, %v1963_v47 }
 0x388   : > { %v2041_v58 = vmul.f32 %v2736_v32, %v2040_v1  ;;  %v2047_v54 = vmul.f32 %v2738_v52, %v2020_v36  ;;  %vm2053_vm13 = vweird.f32 %v2738_v52 }
 0x389   : > { %v2005_v14 = vmax.f32 %v1997_v9, 0.0  ;;  %v1998_v7 = vsub.f32 %v1982_v6, %v1990_v26  ;;  %vm2054_vm15 = vmor %vm2052_vm14, %vm2053_vm13 }
 0x38a   : > { %v2045_v48 = vsel %vm2044_vm12, %v2736_v32, %v2041_v58  ;;  %v2048_v62 = vmul.f32 %v2738_v52, %v2047_v54 }
 0x38b   : > { %v2107_v37 = vmul.f32 %v2045_v48, %v2011_v2  ;;  %v2021_v24 = vadd.f32 1e-05, %v2005_v14  ;;  %v2006_v11 = vmax.f32 %v1998_v7, 0.0 }
 0x38c   : > { %v2049_v63 = vmul.f32 0.5, %v2048_v62  ;;  %v1941_v61 = vpop.xlane.xlu2 %1940 }
 0x38d   : > { %v2115_v12 = vmul.f32 0.2, %v2107_v37  ;;  %2739 = vrsqrt.f32 %v2021_v24  ;;  %v3632_v34 = vadd.f32 1e-05, %v2006_v11  ;;  %vm2062_vm1 = vweird.f32 %v2021_v24 }
 0x38e   : > { %v2050_v17 = vsub.f32 1.5, %v2049_v63  ;;  %v3645_v42 = vmul.f32 0.125, %v1941_v61 }
 0x38f   : > { %v2123_v4 = vmax.f32 %v2107_v37, %v2115_v12  ;;  %2741 = vrsqrt.f32 %v3632_v34  ;;  %vm2072_vm8 = vweird.f32 %v3632_v34 }
 0x390   : > { %v2051_v15 = vmul.f32 %v2738_v52, %v2050_v17  ;;  %v1991_v54 = vmul.f32 %v3645_v42, %v3645_v42 }
 0x391   : > { %v2697_v29 = vpack.c.bf16 %v2123_v4, %v2122_v3 }
 0x392   : > { %v2055_v43 = vsel %vm2054_vm15, %v2738_v52, %v2051_v15 }
 0x393   : > { %v2740_v10 = vpop.eup %2739  ;;  %2698 = vst [vmem:[%s3627_s10] sm:$0xff] %v2697_v29   ;;  %v2108_v23 = vmul.f32 %v2055_v43, %v2012_v49  ;;  %v2014_v49 = vsub.f32 %v3580_v46, %v3618_v57 }
 0x394   : > { %v2057_v44 = vmul.f32 %v2740_v10, %v2021_v24  ;;  %v1943_v27 = vpop.xlane.xlu0 %1942  ;;  %vm2063_vm0 = vweird.f32 %v2740_v10 }
 0x395   : > { %v3630_v51 = vmul.f32 0.125, %v1943_v27  ;;  %vm2064_vm2 = vmor %vm2062_vm1, %vm2063_vm0  ;;  %v2116_v19 = vmul.f32 0.2, %v2108_v23  ;;  %v2742_v55 = vpop.eup %2741 }
 0x396   : > { %v2058_v8 = vmul.f32 %v2740_v10, %v2057_v44  ;;  %v1967_v18 = vpop.xlane.xlu2 %1966  ;;  %v2067_v16 = vmul.f32 %v2742_v55, %v3632_v34  ;;  %vm2073_vm6 = vweird.f32 %v2742_v55 }
 0x397   : > { %v1992_v35 = vmul.f32 %v3630_v51, %v3630_v51  ;;  %v1984_v20 = vmul.f32 0.125, %v1967_v18  ;;  %v2124_v25 = vmax.f32 %v2108_v23, %v2116_v19  ;;  %v2016_v15 = vsub.f32 %v3596_v53, %v3630_v51  ;;  %vm2074_vm9 = vmor %vm2072_vm8, %vm2073_vm6 }
 0x398   : > { %v2059_v22 = vmul.f32 0.5, %v2058_v8  ;;  %v2068_v48 = vmul.f32 %v2742_v55, %v2067_v16 }
 0x399   : > { %v2000_v50 = vsub.f32 %v1984_v20, %v1992_v35 }
 0x39a   : > { %v2060_v31 = vsub.f32 1.5, %v2059_v22  ;;  %v2069_v6 = vmul.f32 0.5, %v2068_v48 }
 0x39b   : > { %v2008_v5 = vmax.f32 %v2000_v50, 0.0 }
 0x39c   : > { %v2061_v30 = vmul.f32 %v2740_v10, %v2060_v31  ;;  %v1945_v32 = vpop.xlane.xlu1 %1944  ;;  %v2070_v4 = vsub.f32 1.5, %v2069_v6 }
 0x39d   : > { %v2024_v36 = vadd.f32 1e-05, %v2008_v5  ;;  %v3641_v13 = vmul.f32 0.125, %v1945_v32 }
 0x39e   : > { %v2065_v0 = vsel %vm2064_vm2, %v2740_v10, %v2061_v30  ;;  %v1969_v45 = vpop.xlane.xlu0 %1968  ;;  %v2071_v11 = vmul.f32 %v2742_v55, %v2070_v4  ;;  %v2015_v30 = vsub.f32 %v3587_v41, %v3645_v42 }
 0x39f   : > { %v2109_v21 = vmul.f32 %v2065_v0, %v2013_v40  ;;  %2743 = vrsqrt.f32 %v2024_v36  ;;  %v1993_v38 = vmul.f32 %v3641_v13, %v3641_v13  ;;  %v1985_v39 = vmul.f32 0.125, %v1969_v45 }
 0x3a0   : > { %vm2092_vm4 = vweird.f32 %v2024_v36  ;;  %v2075_v20 = vsel %vm2074_vm9, %v2742_v55, %v2071_v11  ;;  %v2017_v43 = vsub.f32 %v3605_v60, %v3641_v13 }
 0x3a1   : > { %v2117_v56 = vmul.f32 0.2, %v2109_v21  ;;  %v2001_v33 = vsub.f32 %v1985_v39, %v1993_v38  ;;  %v2110_v34 = vmul.f32 %v2075_v20, %v2014_v49 }
 0x3a3   : > { %v2125_v28 = vmax.f32 %v2109_v21, %v2117_v56  ;;  %v2009_v1 = vmax.f32 %v2001_v33, 0.0 }
 0x3a4   : > { %v1965_v52 = vpop.xlane.xlu1 %1964 }
 0x3a5   : > { %v2744_v9 = vpop.eup %2743  ;;  %v2702_v58 = vpack.c.bf16 %v2125_v28, %v2124_v25  ;;  %v1983_v47 = vmul.f32 0.125, %v1965_v52  ;;  %v2025_v14 = vadd.f32 1e-05, %v2009_v1 }
 0x3a6   : > { %v2087_v2 = vmul.f32 %v2744_v9, %v2024_v36  ;;  %vm2093_vm3 = vweird.f32 %v2744_v9  ;;  %v2118_v36 = vmul.f32 0.2, %v2110_v34 }
 0x3a7   : > { %2714 = vst [vmem:[%s3627_s10 + $0x8] sm:$0xff] %v2702_v58   ;;  %v1999_v59 = vsub.f32 %v1983_v47, %v1991_v54  ;;  %2745 = vrsqrt.f32 %v2025_v14  ;;  %vm2094_vm5 = vmor %vm2092_vm4, %vm2093_vm3  ;;  %vm2102_vm10 = vweird.f32 %v2025_v14 }
 0x3a8   : > { %v2088_v62 = vmul.f32 %v2744_v9, %v2087_v2  ;;  %v2126_v0 = vmax.f32 %v2110_v34, %v2118_v36 }
 0x3a9   : > { %v2007_v37 = vmax.f32 %v1999_v59, 0.0 }
 0x3aa   : > { %v2089_v24 = vmul.f32 0.5, %v2088_v62 }
 0x3ab   : > { %v2023_v26 = vadd.f32 1e-05, %v2007_v37 }
 0x3ac   : > { %v2090_v63 = vsub.f32 1.5, %v2089_v24 }
 0x3ad   : > { %2747 = vrsqrt.f32 %v2023_v26  ;;  %v2746_v12 = vpop.eup %2745  ;;  %vm2082_vm13 = vweird.f32 %v2023_v26 }
 0x3ae   : > { %v2091_v61 = vmul.f32 %v2744_v9, %v2090_v63  ;;  %v2097_v3 = vmul.f32 %v2746_v12, %v2025_v14  ;;  %vm2103_vm7 = vweird.f32 %v2746_v12 }
 0x3af   : > { %vm2104_vm11 = vmor %vm2102_vm10, %vm2103_vm7 }
 0x3b0   : > { %v2098_v7 = vmul.f32 %v2746_v12, %v2097_v3  ;;  %v2095_v29 = vsel %vm2094_vm5, %v2744_v9, %v2091_v61 }
 0x3b1   : > { %v2112_v8 = vmul.f32 %v2095_v29, %v2016_v15 }
 0x3b2   : > { %v2099_v10 = vmul.f32 0.5, %v2098_v7 }
 0x3b3   : > { %v2748_v17 = vpop.eup %2747  ;;  %v2120_v51 = vmul.f32 0.2, %v2112_v8 }
 0x3b4   : > { %v2077_v44 = vmul.f32 %v2748_v17, %v2023_v26  ;;  %v2100_v27 = vsub.f32 1.5, %v2099_v10  ;;  %vm2083_vm12 = vweird.f32 %v2748_v17 }
 0x3b5   : > { %vm2084_vm14 = vmor %vm2082_vm13, %vm2083_vm12  ;;  %v2128_v60 = vmax.f32 %v2112_v8, %v2120_v51 }
 0x3b6   : > { %v2078_v18 = vmul.f32 %v2748_v17, %v2077_v44  ;;  %v2101_v35 = vmul.f32 %v2746_v12, %v2100_v27 }
 0x3b8   : > { %v2079_v22 = vmul.f32 0.5, %v2078_v18  ;;  %v2105_v53 = vsel %vm2104_vm11, %v2746_v12, %v2101_v35 }
 0x3b9   : > { %v2113_v50 = vmul.f32 %v2105_v53, %v2017_v43 }
 0x3ba   : > { %v2080_v31 = vsub.f32 1.5, %v2079_v22 }
 0x3bb   : > { %v2121_v23 = vmul.f32 0.2, %v2113_v50 }
 0x3bc   : > { %v2081_v5 = vmul.f32 %v2748_v17, %v2080_v31 }
 0x3bd   : > { %v2129_v32 = vmax.f32 %v2113_v50, %v2121_v23 }
 0x3be   : > { %v2085_v40 = vsel %vm2084_vm14, %v2748_v17, %v2081_v5 }
 0x3bf   : > { %v2111_v46 = vmul.f32 %v2085_v40, %v2015_v30  ;;  %v2712_v57 = vpack.c.bf16 %v2129_v32, %v2128_v60 }
 0x3c1   : > { %v2119_v13 = vmul.f32 0.2, %v2111_v46  ;;  %2716 = vst [vmem:[%s3627_s10 + $0x18] sm:$0xff] %v2712_v57  }
 0x3c3   : > { %v2127_v45 = vmax.f32 %v2111_v46, %v2119_v13 }
 0x3c5   : > { %v2707_v19 = vpack.c.bf16 %v2127_v45, %v2126_v0 }
 0x3c7   : > { %2715 = vst [vmem:[%s3627_s10 + $0x10] sm:$0xff] %v2707_v19  }
 0x3c8 PF: > { %s13_s12 = sadd.s32 1, %s2755_s12  }
 0x3c9   : > { %p10_p4 = scmp.ge.s32.totalorder %s13_s12, 4  }
 0x3cb   :  { %12 = sbr.rel (!%p10_p4) target bundleno = 1 (0x1), region = 62 }

// kernel: _lambda_.9
= control target key start
LH: loop header
LB: loop body
LE: loop exit
PB: predicated region body
PF: predicated region fallthrough
CT: control target
= control target key end

     0   :  { %s4151_s12 = smov 0   ;;  %s4487_s0 = inlined_call_operand.vmem [shape: bf16[2,4096,128], index: 0, kind: input, shape index: {}]   ;;  %s4488_s1 = inlined_call_operand.vmem [shape: bf16[8,4096], index: 1, kind: input, shape index: {}]   ;;  %s4489_s2 = inlined_call_operand.vmem [shape: f32[8,1], index: 2, kind: input, shape index: {}]   ;;  %s4490_s3 = inlined_call_operand.vmem [shape: f32[2,8,128], index: 3, kind: output, shape index: {}]  }
   0x1 LB: > { %s2821_s13 = sadd.s32 4294967295, %s4128_s12   ;;  %p2825_p0 = scmp.ge.s32.totalorder %s4128_s12, 1  ;;  %s4128_s12 = sphi %s4151_s12, %s13_s12  }
   0x2   : > { %p137_p1 = scmp.lt.s32.totalorder %s4128_s12, 3 }
   0x4   : > { %p138_p2 = pnand %p2825_p0, %p137_p1 }
   0x5   : > { %p160_p3 = scmp.lt.s32.totalorder (!%p138_p2), %s2821_s13, 1 }
   0x6   : > { %141 = sbr.rel (%p138_p2) target bundleno = 413 (0x19d), region = 32 }
   0xb   : > { %s4492_s13 = smov (!%p160_p3, %s2821_s13), 1  ;;  %v170_v28 = vld [vmem:[%s4488_s1 + $0x8] sm:$0xff]  ;;  %v169_v29 = vld [vmem:[%s4488_s1] sm:$0xff]  ;;  %v4130_v59 = vmov 0  }
   0xc   : > { %s3855_s14 = sshll.u32 %s4492_s13, 11  ;;  %v721_v32 = vunpack.c.l.b16 %v170_v28  ;;  %v719_v33 = vunpack.c.l.b16 %v169_v29  ;;  %v722_v36 = vunpack.c.h.b16 %v170_v28  ;;  %v720_v37 = vunpack.c.h.b16 %v169_v29  ;;  %v697_v56 = vld [vmem:[%s4489_s2] sm:$0xff]  ;;  %4121 = vset.pattern.permute.xlu0 %v4130_v59 }
   0xd   : > { %s4165_s17 = scalar_lea.vmem %s4487_s0, %s3855_s14  ;;  %700 = vperm.xlu0 %4121, %v697_v56  }
   0xe   : > { %v3863_v0 = vld [vmem:[%s4165_s17 + $0x38] sm:$0xff]  ;;  %v3862_v4 = vld [vmem:[%s4165_s17 + $0x30] sm:$0xff]  ;;  %v3861_v8 = vld [vmem:[%s4165_s17 + $0x28] sm:$0xff]  ;;  %v753_v42 = vpack.c.b16 %v721_v32, %v721_v32  ;;  %v751_v43 = vpack.c.b16 %v719_v33, %v719_v33  ;;  %v754_v44 = vpack.c.b16 %v722_v36, %v722_v36  ;;  %v752_v45 = vpack.c.b16 %v720_v37, %v720_v37 }
   0xf   : > { %v3871_v1 = vld [vmem:[%s4165_s17 + $0x78] sm:$0xff]  ;;  %2351 = vmatpush.bf16.msra.mxu0 %v3863_v0  ;;  %v3870_v5 = vld [vmem:[%s4165_s17 + $0x70] sm:$0xff]  ;;  %v3869_v9 = vld [vmem:[%s4165_s17 + $0x68] sm:$0xff] }
  0x10   : > { %v3879_v2 = vld [vmem:[%s4165_s17 + $0xb8] sm:$0xff]  ;;  %2364 = vmatpush.bf16.msra.mxu1 %v3871_v1  ;;  %v3878_v6 = vld [vmem:[%s4165_s17 + $0xb0] sm:$0xff]  ;;  %v3877_v10 = vld [vmem:[%s4165_s17 + $0xa8] sm:$0xff] }
  0x11   : > { %v3887_v3 = vld [vmem:[%s4165_s17 + $0xf8] sm:$0xff]  ;;  %2377 = vmatpush.bf16.msra.mxu2 %v3879_v2  ;;  %v3886_v7 = vld [vmem:[%s4165_s17 + $0xf0] sm:$0xff]  ;;  %v3885_v11 = vld [vmem:[%s4165_s17 + $0xe8] sm:$0xff] }
  0x12   : > { %2390 = vmatpush.bf16.msra.mxu3 %v3887_v3  ;;  %v3860_v12 = vld [vmem:[%s4165_s17 + $0x20] sm:$0xff]  ;;  %v3859_v16 = vld [vmem:[%s4165_s17 + $0x18] sm:$0xff]  ;;  %v3858_v20 = vld [vmem:[%s4165_s17 + $0x10] sm:$0xff] }
  0x13   : > { %2352 = vmatpush.bf16.msra.mxu0 %v3862_v4  ;;  %v3868_v13 = vld [vmem:[%s4165_s17 + $0x60] sm:$0xff]  ;;  %v3867_v17 = vld [vmem:[%s4165_s17 + $0x58] sm:$0xff]  ;;  %v3866_v21 = vld [vmem:[%s4165_s17 + $0x50] sm:$0xff] }
  0x14   : > { %2365 = vmatpush.bf16.msra.mxu1 %v3870_v5  ;;  %v3876_v14 = vld [vmem:[%s4165_s17 + $0xa0] sm:$0xff]  ;;  %v3875_v18 = vld [vmem:[%s4165_s17 + $0x98] sm:$0xff]  ;;  %v3874_v22 = vld [vmem:[%s4165_s17 + $0x90] sm:$0xff] }
  0x15   : > { %2378 = vmatpush.bf16.msra.mxu2 %v3878_v6  ;;  %v3884_v15 = vld [vmem:[%s4165_s17 + $0xe0] sm:$0xff]  ;;  %v3883_v19 = vld [vmem:[%s4165_s17 + $0xd8] sm:$0xff]  ;;  %v3882_v23 = vld [vmem:[%s4165_s17 + $0xd0] sm:$0xff] }
  0x16   : > { %2391 = vmatpush.bf16.msra.mxu3 %v3886_v7  ;;  %v3857_v24 = vld [vmem:[%s4165_s17 + $0x8] sm:$0xff]  ;;  %v3856_v30 = vld [vmem:[%s4165_s17] sm:$0xff]  ;;  %v3895_v38 = vld [vmem:[%s4165_s17 + $0x138] sm:$0xff] }
  0x17   : > { %2353 = vmatpush.bf16.msra.mxu0 %v3861_v8  ;;  %v3865_v25 = vld [vmem:[%s4165_s17 + $0x48] sm:$0xff]  ;;  %v3864_v31 = vld [vmem:[%s4165_s17 + $0x40] sm:$0xff]  ;;  %v3903_v39 = vld [vmem:[%s4165_s17 + $0x178] sm:$0xff] }
  0x18   : > { %2366 = vmatpush.bf16.msra.mxu1 %v3869_v9  ;;  %v3873_v26 = vld [vmem:[%s4165_s17 + $0x88] sm:$0xff]  ;;  %v3872_v34 = vld [vmem:[%s4165_s17 + $0x80] sm:$0xff]  ;;  %v3911_v40 = vld [vmem:[%s4165_s17 + $0x1b8] sm:$0xff] }
  0x19   : > { %2379 = vmatpush.bf16.msra.mxu2 %v3877_v10  ;;  %v3881_v27 = vld [vmem:[%s4165_s17 + $0xc8] sm:$0xff]  ;;  %v3880_v35 = vld [vmem:[%s4165_s17 + $0xc0] sm:$0xff]  ;;  %v3919_v41 = vld [vmem:[%s4165_s17 + $0x1f8] sm:$0xff] }
  0x1a   : > { %2392 = vmatpush.bf16.msra.mxu3 %v3885_v11  ;;  %v3894_v46 = vld [vmem:[%s4165_s17 + $0x130] sm:$0xff]  ;;  %v3893_v50 = vld [vmem:[%s4165_s17 + $0x128] sm:$0xff]  ;;  %v3892_v54 = vld [vmem:[%s4165_s17 + $0x120] sm:$0xff] }
  0x1b   : > { %2354 = vmatpush.bf16.msra.mxu0 %v3860_v12  ;;  %v3902_v47 = vld [vmem:[%s4165_s17 + $0x170] sm:$0xff]  ;;  %v3901_v51 = vld [vmem:[%s4165_s17 + $0x168] sm:$0xff]  ;;  %v3900_v55 = vld [vmem:[%s4165_s17 + $0x160] sm:$0xff] }
  0x1c   : > { %2367 = vmatpush.bf16.msra.mxu1 %v3868_v13  ;;  %v3910_v48 = vld [vmem:[%s4165_s17 + $0x1b0] sm:$0xff]  ;;  %v3909_v52 = vld [vmem:[%s4165_s17 + $0x1a8] sm:$0xff]  ;;  %v3908_v57 = vld [vmem:[%s4165_s17 + $0x1a0] sm:$0xff] }
  0x1d   : > { %2380 = vmatpush.bf16.msra.mxu2 %v3876_v14  ;;  %v3918_v49 = vld [vmem:[%s4165_s17 + $0x1f0] sm:$0xff]  ;;  %v3917_v53 = vld [vmem:[%s4165_s17 + $0x1e8] sm:$0xff]  ;;  %v3916_v58 = vld [vmem:[%s4165_s17 + $0x1e0] sm:$0xff] }
  0x1e   : > { %2393 = vmatpush.bf16.msra.mxu3 %v3884_v15  ;;  %v3891_v60 = vld [vmem:[%s4165_s17 + $0x118] sm:$0xff]  ;;  %v3890_v0 = vld [vmem:[%s4165_s17 + $0x110] sm:$0xff]  ;;  %v3889_v4 = vld [vmem:[%s4165_s17 + $0x108] sm:$0xff] }
  0x1f   : > { %2355 = vmatpush.bf16.msra.mxu0 %v3859_v16  ;;  %v3899_v61 = vld [vmem:[%s4165_s17 + $0x158] sm:$0xff]  ;;  %v3898_v1 = vld [vmem:[%s4165_s17 + $0x150] sm:$0xff]  ;;  %v3897_v5 = vld [vmem:[%s4165_s17 + $0x148] sm:$0xff] }
  0x20   : > { %2368 = vmatpush.bf16.msra.mxu1 %v3867_v17  ;;  %v3907_v62 = vld [vmem:[%s4165_s17 + $0x198] sm:$0xff]  ;;  %v3906_v2 = vld [vmem:[%s4165_s17 + $0x190] sm:$0xff]  ;;  %v3905_v6 = vld [vmem:[%s4165_s17 + $0x188] sm:$0xff] }
  0x21   : > { %2381 = vmatpush.bf16.msra.mxu2 %v3875_v18  ;;  %v3915_v63 = vld [vmem:[%s4165_s17 + $0x1d8] sm:$0xff]  ;;  %v3914_v3 = vld [vmem:[%s4165_s17 + $0x1d0] sm:$0xff]  ;;  %v3913_v7 = vld [vmem:[%s4165_s17 + $0x1c8] sm:$0xff] }
  0x22   : > { %2394 = vmatpush.bf16.msra.mxu3 %v3883_v19  ;;  %v172_v8 = vld [vmem:[%s4488_s1 + $0x18] sm:$0xff]  ;;  %v171_v9 = vld [vmem:[%s4488_s1 + $0x10] sm:$0xff]  ;;  %v3888_v10 = vld [vmem:[%s4165_s17 + $0x100] sm:$0xff] }
  0x23   : > { %2356 = vmatpush.bf16.msra.mxu0 %v3858_v20  ;;  %v3896_v11 = vld [vmem:[%s4165_s17 + $0x140] sm:$0xff]  ;;  %v725_v12 = vunpack.c.l.b16 %v172_v8  ;;  %v723_v13 = vunpack.c.l.b16 %v171_v9  ;;  %v726_v16 = vunpack.c.h.b16 %v172_v8  ;;  %v724_v17 = vunpack.c.h.b16 %v171_v9  ;;  %v3927_v18 = vld [vmem:[%s4165_s17 + $0x238] sm:$0xff]  ;;  %v3942_v28 = vld [vmem:[%s4165_s17 + $0x2b0] sm:$0xff] }
  0x24   : > { %2369 = vmatpush.bf16.msra.mxu1 %v3866_v21  ;;  %v3904_v14 = vld [vmem:[%s4165_s17 + $0x180] sm:$0xff]  ;;  %v3935_v19 = vld [vmem:[%s4165_s17 + $0x278] sm:$0xff]  ;;  %v3950_v29 = vld [vmem:[%s4165_s17 + $0x2f0] sm:$0xff] }
  0x25   : > { %2382 = vmatpush.bf16.msra.mxu2 %v3874_v22  ;;  %v3912_v15 = vld [vmem:[%s4165_s17 + $0x1c0] sm:$0xff]  ;;  %v3943_v20 = vld [vmem:[%s4165_s17 + $0x2b8] sm:$0xff]  ;;  %v757_v22 = vpack.c.b16 %v725_v12, %v725_v12  ;;  %v3941_v32 = vld [vmem:[%s4165_s17 + $0x2a8] sm:$0xff] }
  0x26   : > { %2395 = vmatpush.bf16.msra.mxu3 %v3882_v23  ;;  %v3951_v21 = vld [vmem:[%s4165_s17 + $0x2f8] sm:$0xff]  ;;  %v755_v23 = vpack.c.b16 %v723_v13, %v723_v13  ;;  %v3949_v33 = vld [vmem:[%s4165_s17 + $0x2e8] sm:$0xff]  ;;  %v3940_v36 = vld [vmem:[%s4165_s17 + $0x2a0] sm:$0xff] }
  0x27   : > { %2357 = vmatpush.bf16.msra.mxu0 %v3857_v24  ;;  %v758_v24 = vpack.c.b16 %v726_v16, %v726_v16  ;;  %v3948_v37 = vld [vmem:[%s4165_s17 + $0x2e0] sm:$0xff]  ;;  %v3957_v8 = vld [vmem:[%s4165_s17 + $0x328] sm:$0xff]  ;;  %v3955_v16 = vld [vmem:[%s4165_s17 + $0x318] sm:$0xff] }
  0x28   : > { %2370 = vmatpush.bf16.msra.mxu1 %v3865_v25  ;;  %v756_v25 = vpack.c.b16 %v724_v17, %v724_v17  ;;  %v3936_v56 = vld [vmem:[%s4165_s17 + $0x280] sm:$0xff]  ;;  %v3965_v9 = vld [vmem:[%s4165_s17 + $0x368] sm:$0xff]  ;;  %v3963_v17 = vld [vmem:[%s4165_s17 + $0x358] sm:$0xff] }
  0x29   : > { %2383 = vmatpush.bf16.msra.mxu2 %v3873_v26  ;;  %v3926_v26 = vld [vmem:[%s4165_s17 + $0x230] sm:$0xff]  ;;  %v3956_v12 = vld [vmem:[%s4165_s17 + $0x320] sm:$0xff] }
  0x2a   : > { %2396 = vmatpush.bf16.msra.mxu3 %v3881_v27  ;;  %v3934_v27 = vld [vmem:[%s4165_s17 + $0x270] sm:$0xff]  ;;  %v3964_v13 = vld [vmem:[%s4165_s17 + $0x360] sm:$0xff] }
  0x2b   : > { %2358 = vmatpush.bf16.msra.mxu0 %v3856_v30  ;;  %v3925_v30 = vld [vmem:[%s4165_s17 + $0x228] sm:$0xff] }
  0x2c   : > { %2371 = vmatpush.bf16.msra.mxu1 %v3864_v31  ;;  %v3933_v31 = vld [vmem:[%s4165_s17 + $0x268] sm:$0xff] }
  0x2d   : > { %2384 = vmatpush.bf16.msra.mxu2 %v3872_v34  ;;  %v3924_v34 = vld [vmem:[%s4165_s17 + $0x220] sm:$0xff] }
  0x2e   : > { %2397 = vmatpush.bf16.msra.mxu3 %v3880_v35  ;;  %2359 = vmatmul.bf16.vlgmr.msra.gmra.mxu0 %v751_v43  ;;  %v3932_v35 = vld [vmem:[%s4165_s17 + $0x260] sm:$0xff]  ;;  %v3930_v43 = vld [vmem:[%s4165_s17 + $0x250] sm:$0xff] }
  0x2f   : > { %2403 = vmatpush.bf16.msrb.mxu0 %v3895_v38  ;;  %2372 = vmatmul.bf16.vlgmr.msra.gmra.mxu1 %v752_v45  ;;  %v3923_v38 = vld [vmem:[%s4165_s17 + $0x218] sm:$0xff]  ;;  %v3946_v45 = vld [vmem:[%s4165_s17 + $0x2d0] sm:$0xff] }
  0x30   : > { %2416 = vmatpush.bf16.msrb.mxu1 %v3903_v39  ;;  %2385 = vmatmul.bf16.vlgmr.msra.gmra.mxu2 %v753_v42  ;;  %v3931_v39 = vld [vmem:[%s4165_s17 + $0x258] sm:$0xff]  ;;  %v3922_v42 = vld [vmem:[%s4165_s17 + $0x210] sm:$0xff] }
  0x31   : > { %2429 = vmatpush.bf16.msrb.mxu2 %v3911_v40  ;;  %2398 = vmatmul.bf16.vlgmr.msra.gmra.mxu3 %v754_v44  ;;  %v3939_v40 = vld [vmem:[%s4165_s17 + $0x298] sm:$0xff]  ;;  %v3938_v44 = vld [vmem:[%s4165_s17 + $0x290] sm:$0xff] }
  0x32   : > { %2442 = vmatpush.bf16.msrb.mxu3 %v3919_v41  ;;  %v3947_v41 = vld [vmem:[%s4165_s17 + $0x2d8] sm:$0xff] }
  0x33   : > { %2404 = vmatpush.bf16.msrb.mxu0 %v3894_v46  ;;  %v3921_v46 = vld [vmem:[%s4165_s17 + $0x208] sm:$0xff] }
  0x34   : > { %2417 = vmatpush.bf16.msrb.mxu1 %v3902_v47  ;;  %v3929_v47 = vld [vmem:[%s4165_s17 + $0x248] sm:$0xff] }
  0x35   : > { %2430 = vmatpush.bf16.msrb.mxu2 %v3910_v48  ;;  %v3937_v48 = vld [vmem:[%s4165_s17 + $0x288] sm:$0xff] }
  0x36   : > { %2443 = vmatpush.bf16.msrb.mxu3 %v3918_v49  ;;  %v3945_v49 = vld [vmem:[%s4165_s17 + $0x2c8] sm:$0xff] }
  0x37   : > { %2405 = vmatpush.bf16.msrb.mxu0 %v3893_v50  ;;  %v173_v50 = vld [vmem:[%s4488_s1 + $0x20] sm:$0xff] }
  0x38   : > { %2418 = vmatpush.bf16.msrb.mxu1 %v3901_v51  ;;  %v174_v51 = vld [vmem:[%s4488_s1 + $0x28] sm:$0xff] }
  0x39   : > { %2431 = vmatpush.bf16.msrb.mxu2 %v3909_v52  ;;  %v3920_v52 = vld [vmem:[%s4165_s17 + $0x200] sm:$0xff]  ;;  %v730_v59 = vunpack.c.h.b16 %v174_v51 }
  0x3a   : > { %2444 = vmatpush.bf16.msrb.mxu3 %v3917_v53  ;;  %v3928_v53 = vld [vmem:[%s4165_s17 + $0x240] sm:$0xff] }
  0x3b   : > { %2406 = vmatpush.bf16.msrb.mxu0 %v3892_v54  ;;  %v727_v54 = vunpack.c.l.b16 %v173_v50 }
  0x3c   : > { %2419 = vmatpush.bf16.msrb.mxu1 %v3900_v55  ;;  %v729_v55 = vunpack.c.l.b16 %v174_v51  ;;  %v3997_v51 = vld [vmem:[%s4165_s17 + $0x468] sm:$0xff] }
  0x3d   : > { %2432 = vmatpush.bf16.msrb.mxu2 %v3908_v57  ;;  %v3944_v57 = vld [vmem:[%s4165_s17 + $0x2c0] sm:$0xff] }
  0x3e   : > { %2445 = vmatpush.bf16.msrb.mxu3 %v3916_v58  ;;  %v728_v58 = vunpack.c.h.b16 %v173_v50  ;;  %v3989_v50 = vld [vmem:[%s4165_s17 + $0x428] sm:$0xff] }
  0x3f   : > { %2407 = vmatpush.bf16.msrb.mxu0 %v3891_v60  ;;  %v3959_v60 = vld [vmem:[%s4165_s17 + $0x338] sm:$0xff] }
  0x40   : > { %2420 = vmatpush.bf16.msrb.mxu1 %v3899_v61  ;;  %v3967_v61 = vld [vmem:[%s4165_s17 + $0x378] sm:$0xff] }
  0x41   : > { %2433 = vmatpush.bf16.msrb.mxu2 %v3907_v62  ;;  %v3975_v62 = vld [vmem:[%s4165_s17 + $0x3b8] sm:$0xff] }
  0x42   : > { %2446 = vmatpush.bf16.msrb.mxu3 %v3915_v63  ;;  %v3983_v63 = vld [vmem:[%s4165_s17 + $0x3f8] sm:$0xff] }
  0x43   : > { %2408 = vmatpush.bf16.msrb.mxu0 %v3890_v0  ;;  %v759_v0 = vpack.c.b16 %v727_v54, %v727_v54  ;;  %v3988_v54 = vld [vmem:[%s4165_s17 + $0x420] sm:$0xff] }
  0x44   : > { %2421 = vmatpush.bf16.msrb.mxu1 %v3898_v1  ;;  %v761_v1 = vpack.c.b16 %v729_v55, %v729_v55  ;;  %v3996_v55 = vld [vmem:[%s4165_s17 + $0x460] sm:$0xff] }
  0x45   : > { %2434 = vmatpush.bf16.msrb.mxu2 %v3906_v2  ;;  %v760_v2 = vpack.c.b16 %v728_v58, %v728_v58  ;;  %v3987_v58 = vld [vmem:[%s4165_s17 + $0x418] sm:$0xff] }
  0x46   : > { %2447 = vmatpush.bf16.msrb.mxu3 %v3914_v3  ;;  %v762_v3 = vpack.c.b16 %v730_v59, %v730_v59  ;;  %v3995_v59 = vld [vmem:[%s4165_s17 + $0x458] sm:$0xff] }
  0x47   : > { %2409 = vmatpush.bf16.msrb.mxu0 %v3889_v4  ;;  %v3958_v4 = vld [vmem:[%s4165_s17 + $0x330] sm:$0xff] }
  0x48   : > { %2422 = vmatpush.bf16.msrb.mxu1 %v3897_v5  ;;  %v3966_v5 = vld [vmem:[%s4165_s17 + $0x370] sm:$0xff] }
  0x49   : > { %2435 = vmatpush.bf16.msrb.mxu2 %v3905_v6  ;;  %v3974_v6 = vld [vmem:[%s4165_s17 + $0x3b0] sm:$0xff] }
  0x4a   : > { %2448 = vmatpush.bf16.msrb.mxu3 %v3913_v7  ;;  %v3982_v7 = vld [vmem:[%s4165_s17 + $0x3f0] sm:$0xff] }
  0x4b   : > { %2410 = vmatpush.bf16.msrb.mxu0 %v3888_v10  ;;  %v3973_v10 = vld [vmem:[%s4165_s17 + $0x3a8] sm:$0xff] }
  0x4c   : > { %2423 = vmatpush.bf16.msrb.mxu1 %v3896_v11  ;;  %v3981_v11 = vld [vmem:[%s4165_s17 + $0x3e8] sm:$0xff] }
  0x4d   : > { %2436 = vmatpush.bf16.msrb.mxu2 %v3904_v14  ;;  %v3972_v14 = vld [vmem:[%s4165_s17 + $0x3a0] sm:$0xff] }
  0x4e   : > { %2449 = vmatpush.bf16.msrb.mxu3 %v3912_v15  ;;  %2411 = vmatmul.bf16.vlgmr.msrb.gmra.mxu0 %v755_v23  ;;  %v3980_v15 = vld [vmem:[%s4165_s17 + $0x3e0] sm:$0xff]  ;;  %v3978_v23 = vld [vmem:[%s4165_s17 + $0x3d0] sm:$0xff] }
  0x4f   : > { %2455 = vmatpush.bf16.msra.mxu0 %v3927_v18  ;;  %2424 = vmatmul.bf16.vlgmr.msrb.gmra.mxu1 %v756_v25  ;;  %v3971_v18 = vld [vmem:[%s4165_s17 + $0x398] sm:$0xff]  ;;  %v3961_v25 = vld [vmem:[%s4165_s17 + $0x348] sm:$0xff] }
  0x50   : > { %2468 = vmatpush.bf16.msra.mxu1 %v3935_v19  ;;  %2437 = vmatmul.bf16.vlgmr.msrb.gmra.mxu2 %v757_v22  ;;  %v3979_v19 = vld [vmem:[%s4165_s17 + $0x3d8] sm:$0xff]  ;;  %v3970_v22 = vld [vmem:[%s4165_s17 + $0x390] sm:$0xff] }
  0x51   : > { %2481 = vmatpush.bf16.msra.mxu2 %v3943_v20  ;;  %2450 = vmatmul.bf16.vlgmr.msrb.gmra.mxu3 %v758_v24  ;;  %v3954_v20 = vld [vmem:[%s4165_s17 + $0x310] sm:$0xff]  ;;  %v3953_v24 = vld [vmem:[%s4165_s17 + $0x308] sm:$0xff] }
  0x52   : > { %2494 = vmatpush.bf16.msra.mxu3 %v3951_v21  ;;  %v3962_v21 = vld [vmem:[%s4165_s17 + $0x350] sm:$0xff] }
  0x53   : > { %2456 = vmatpush.bf16.msra.mxu0 %v3926_v26  ;;  %v3969_v26 = vld [vmem:[%s4165_s17 + $0x388] sm:$0xff] }
  0x54   : > { %2469 = vmatpush.bf16.msra.mxu1 %v3934_v27  ;;  %v3977_v27 = vld [vmem:[%s4165_s17 + $0x3c8] sm:$0xff] }
  0x55   : > { %2482 = vmatpush.bf16.msra.mxu2 %v3942_v28  ;;  %v175_v28 = vld [vmem:[%s4488_s1 + $0x30] sm:$0xff] }
  0x56   : > { %2495 = vmatpush.bf16.msra.mxu3 %v3950_v29  ;;  %v176_v29 = vld [vmem:[%s4488_s1 + $0x38] sm:$0xff] }
  0x57   : > { %2457 = vmatpush.bf16.msra.mxu0 %v3925_v30  ;;  %v3952_v30 = vld [vmem:[%s4165_s17 + $0x300] sm:$0xff] }
  0x58   : > { %2470 = vmatpush.bf16.msra.mxu1 %v3933_v31  ;;  %v3960_v31 = vld [vmem:[%s4165_s17 + $0x340] sm:$0xff] }
  0x59   : > { %2483 = vmatpush.bf16.msra.mxu2 %v3941_v32  ;;  %v731_v32 = vunpack.c.l.b16 %v175_v28 }
  0x5a   : > { %2496 = vmatpush.bf16.msra.mxu3 %v3949_v33  ;;  %v733_v33 = vunpack.c.l.b16 %v176_v29 }
  0x5b   : > { %2458 = vmatpush.bf16.msra.mxu0 %v3924_v34  ;;  %v3968_v34 = vld [vmem:[%s4165_s17 + $0x380] sm:$0xff] }
  0x5c   : > { %2471 = vmatpush.bf16.msra.mxu1 %v3932_v35  ;;  %v3976_v35 = vld [vmem:[%s4165_s17 + $0x3c0] sm:$0xff] }
  0x5d   : > { %2484 = vmatpush.bf16.msra.mxu2 %v3940_v36  ;;  %v732_v36 = vunpack.c.h.b16 %v175_v28  ;;  %v4021_v28 = vld [vmem:[%s4165_s17 + $0x528] sm:$0xff] }
  0x5e   : > { %2497 = vmatpush.bf16.msra.mxu3 %v3948_v37  ;;  %v734_v37 = vunpack.c.h.b16 %v176_v29  ;;  %v4029_v29 = vld [vmem:[%s4165_s17 + $0x568] sm:$0xff] }
  0x5f   : > { %2459 = vmatpush.bf16.msra.mxu0 %v3923_v38  ;;  %v3991_v38 = vld [vmem:[%s4165_s17 + $0x438] sm:$0xff] }
  0x60   : > { %2472 = vmatpush.bf16.msra.mxu1 %v3931_v39  ;;  %v3999_v39 = vld [vmem:[%s4165_s17 + $0x478] sm:$0xff] }
  0x61   : > { %2485 = vmatpush.bf16.msra.mxu2 %v3939_v40  ;;  %v4007_v40 = vld [vmem:[%s4165_s17 + $0x4b8] sm:$0xff] }
  0x62   : > { %2498 = vmatpush.bf16.msra.mxu3 %v3947_v41  ;;  %v4015_v41 = vld [vmem:[%s4165_s17 + $0x4f8] sm:$0xff] }
  0x63   : > { %2460 = vmatpush.bf16.msra.mxu0 %v3922_v42  ;;  %v763_v42 = vpack.c.b16 %v731_v32, %v731_v32 }
  0x64   : > { %2473 = vmatpush.bf16.msra.mxu1 %v3930_v43  ;;  %v765_v43 = vpack.c.b16 %v733_v33, %v733_v33 }
  0x65   : > { %2486 = vmatpush.bf16.msra.mxu2 %v3938_v44  ;;  %v764_v44 = vpack.c.b16 %v732_v36, %v732_v36 }
  0x66   : > { %2499 = vmatpush.bf16.msra.mxu3 %v3946_v45  ;;  %v766_v45 = vpack.c.b16 %v734_v37, %v734_v37 }
  0x67   : > { %2461 = vmatpush.bf16.msra.mxu0 %v3921_v46  ;;  %v3990_v46 = vld [vmem:[%s4165_s17 + $0x430] sm:$0xff] }
  0x68   : > { %2474 = vmatpush.bf16.msra.mxu1 %v3929_v47  ;;  %v3998_v47 = vld [vmem:[%s4165_s17 + $0x470] sm:$0xff] }
  0x69   : > { %2487 = vmatpush.bf16.msra.mxu2 %v3937_v48  ;;  %v4006_v48 = vld [vmem:[%s4165_s17 + $0x4b0] sm:$0xff] }
  0x6a   : > { %2500 = vmatpush.bf16.msra.mxu3 %v3945_v49  ;;  %v4014_v49 = vld [vmem:[%s4165_s17 + $0x4f0] sm:$0xff] }
  0x6b   : > { %2462 = vmatpush.bf16.msra.mxu0 %v3920_v52  ;;  %v4005_v52 = vld [vmem:[%s4165_s17 + $0x4a8] sm:$0xff] }
  0x6c   : > { %2475 = vmatpush.bf16.msra.mxu1 %v3928_v53  ;;  %v4013_v53 = vld [vmem:[%s4165_s17 + $0x4e8] sm:$0xff] }
  0x6d   : > { %2488 = vmatpush.bf16.msra.mxu2 %v3936_v56  ;;  %v4004_v56 = vld [vmem:[%s4165_s17 + $0x4a0] sm:$0xff] }
  0x6e   : > { %2501 = vmatpush.bf16.msra.mxu3 %v3944_v57  ;;  %2463 = vmatmul.bf16.vlgmr.msra.gmra.mxu0 %v759_v0  ;;  %v4012_v57 = vld [vmem:[%s4165_s17 + $0x4e0] sm:$0xff]  ;;  %v4002_v0 = vld [vmem:[%s4165_s17 + $0x490] sm:$0xff] }
  0x6f   : > { %2507 = vmatpush.bf16.msrb.mxu0 %v3959_v60  ;;  %2476 = vmatmul.bf16.vlgmr.msra.gmra.mxu1 %v760_v2  ;;  %v4003_v60 = vld [vmem:[%s4165_s17 + $0x498] sm:$0xff]  ;;  %v3985_v2 = vld [vmem:[%s4165_s17 + $0x408] sm:$0xff] }
  0x70   : > { %2520 = vmatpush.bf16.msrb.mxu1 %v3967_v61  ;;  %2489 = vmatmul.bf16.vlgmr.msra.gmra.mxu2 %v761_v1  ;;  %v4011_v61 = vld [vmem:[%s4165_s17 + $0x4d8] sm:$0xff]  ;;  %v4010_v1 = vld [vmem:[%s4165_s17 + $0x4d0] sm:$0xff] }
  0x71   : > { %2533 = vmatpush.bf16.msrb.mxu2 %v3975_v62  ;;  %2502 = vmatmul.bf16.vlgmr.msra.gmra.mxu3 %v762_v3  ;;  %v3986_v62 = vld [vmem:[%s4165_s17 + $0x410] sm:$0xff]  ;;  %v3993_v3 = vld [vmem:[%s4165_s17 + $0x448] sm:$0xff] }
  0x72   : > { %2546 = vmatpush.bf16.msrb.mxu3 %v3983_v63  ;;  %v3994_v63 = vld [vmem:[%s4165_s17 + $0x450] sm:$0xff] }
  0x73   : > { %2508 = vmatpush.bf16.msrb.mxu0 %v3958_v4  ;;  %v4001_v4 = vld [vmem:[%s4165_s17 + $0x488] sm:$0xff] }
  0x74   : > { %2521 = vmatpush.bf16.msrb.mxu1 %v3966_v5  ;;  %v4009_v5 = vld [vmem:[%s4165_s17 + $0x4c8] sm:$0xff] }
  0x75   : > { %2534 = vmatpush.bf16.msrb.mxu2 %v3974_v6  ;;  %v177_v6 = vld [vmem:[%s4488_s1 + $0x40] sm:$0xff] }
  0x76   : > { %2547 = vmatpush.bf16.msrb.mxu3 %v3982_v7  ;;  %v178_v7 = vld [vmem:[%s4488_s1 + $0x48] sm:$0xff] }
  0x77   : > { %2509 = vmatpush.bf16.msrb.mxu0 %v3957_v8  ;;  %v3984_v8 = vld [vmem:[%s4165_s17 + $0x400] sm:$0xff] }
  0x78   : > { %2522 = vmatpush.bf16.msrb.mxu1 %v3965_v9  ;;  %v3992_v9 = vld [vmem:[%s4165_s17 + $0x440] sm:$0xff] }
  0x79   : > { %2535 = vmatpush.bf16.msrb.mxu2 %v3973_v10  ;;  %v735_v10 = vunpack.c.l.b16 %v177_v6 }
  0x7a   : > { %2548 = vmatpush.bf16.msrb.mxu3 %v3981_v11  ;;  %v737_v11 = vunpack.c.l.b16 %v178_v7 }
  0x7b   : > { %2510 = vmatpush.bf16.msrb.mxu0 %v3956_v12  ;;  %v4000_v12 = vld [vmem:[%s4165_s17 + $0x480] sm:$0xff] }
  0x7c   : > { %2523 = vmatpush.bf16.msrb.mxu1 %v3964_v13  ;;  %v4008_v13 = vld [vmem:[%s4165_s17 + $0x4c0] sm:$0xff] }
  0x7d   : > { %2536 = vmatpush.bf16.msrb.mxu2 %v3972_v14  ;;  %v736_v14 = vunpack.c.h.b16 %v177_v6 }
  0x7e   : > { %2549 = vmatpush.bf16.msrb.mxu3 %v3980_v15  ;;  %v738_v15 = vunpack.c.h.b16 %v178_v7  ;;  %v4055_v7 = vld [vmem:[%s4165_s17 + $0x638] sm:$0xff] }
  0x7f   : > { %2511 = vmatpush.bf16.msrb.mxu0 %v3955_v16  ;;  %v4023_v16 = vld [vmem:[%s4165_s17 + $0x538] sm:$0xff]  ;;  %v701_v33 = vpop.permute.xlu0 %700 }
  0x80   : > { %2524 = vmatpush.bf16.msrb.mxu1 %v3963_v17  ;;  %v4031_v17 = vld [vmem:[%s4165_s17 + $0x578] sm:$0xff] }
  0x81   : > { %2537 = vmatpush.bf16.msrb.mxu2 %v3971_v18  ;;  %v4039_v18 = vld [vmem:[%s4165_s17 + $0x5b8] sm:$0xff] }
  0x82   : > { %2550 = vmatpush.bf16.msrb.mxu3 %v3979_v19  ;;  %v4047_v19 = vld [vmem:[%s4165_s17 + $0x5f8] sm:$0xff] }
  0x83   : > { %2512 = vmatpush.bf16.msrb.mxu0 %v3954_v20  ;;  %v767_v20 = vpack.c.b16 %v735_v10, %v735_v10  ;;  %v4079_v10 = vld [vmem:[%s4165_s17 + $0x6f8] sm:$0xff] }
  0x84   : > { %2525 = vmatpush.bf16.msrb.mxu1 %v3962_v21  ;;  %v769_v21 = vpack.c.b16 %v737_v11, %v737_v11 }
  0x85   : > { %2538 = vmatpush.bf16.msrb.mxu2 %v3970_v22  ;;  %v768_v22 = vpack.c.b16 %v736_v14, %v736_v14 }
  0x86   : > { %2551 = vmatpush.bf16.msrb.mxu3 %v3978_v23  ;;  %v770_v23 = vpack.c.b16 %v738_v15, %v738_v15  ;;  %v4054_v15 = vld [vmem:[%s4165_s17 + $0x630] sm:$0xff] }
  0x87   : > { %2513 = vmatpush.bf16.msrb.mxu0 %v3953_v24  ;;  %v4022_v24 = vld [vmem:[%s4165_s17 + $0x530] sm:$0xff] }
  0x88   : > { %2526 = vmatpush.bf16.msrb.mxu1 %v3961_v25  ;;  %v4030_v25 = vld [vmem:[%s4165_s17 + $0x570] sm:$0xff] }
  0x89   : > { %2539 = vmatpush.bf16.msrb.mxu2 %v3969_v26  ;;  %v4038_v26 = vld [vmem:[%s4165_s17 + $0x5b0] sm:$0xff] }
  0x8a   : > { %2552 = vmatpush.bf16.msrb.mxu3 %v3977_v27  ;;  %v4046_v27 = vld [vmem:[%s4165_s17 + $0x5f0] sm:$0xff] }
  0x8b   : > { %2514 = vmatpush.bf16.msrb.mxu0 %v3952_v30  ;;  %v4037_v30 = vld [vmem:[%s4165_s17 + $0x5a8] sm:$0xff] }
  0x8c   : > { %2527 = vmatpush.bf16.msrb.mxu1 %v3960_v31  ;;  %v4045_v31 = vld [vmem:[%s4165_s17 + $0x5e8] sm:$0xff] }
  0x8d   : > { %2540 = vmatpush.bf16.msrb.mxu2 %v3968_v34  ;;  %v4020_v34 = vld [vmem:[%s4165_s17 + $0x520] sm:$0xff] }
  0x8e   : > { %2553 = vmatpush.bf16.msrb.mxu3 %v3976_v35  ;;  %2515 = vmatmul.bf16.vlgmr.msrb.gmra.mxu0 %v763_v42  ;;  %v4028_v35 = vld [vmem:[%s4165_s17 + $0x560] sm:$0xff]  ;;  %v4027_v42 = vld [vmem:[%s4165_s17 + $0x558] sm:$0xff] }
  0x8f   : > { %2559 = vmatpush.bf16.msra.mxu0 %v3991_v38  ;;  %2528 = vmatmul.bf16.vlgmr.msrb.gmra.mxu1 %v764_v44  ;;  %v4036_v38 = vld [vmem:[%s4165_s17 + $0x5a0] sm:$0xff]  ;;  %v4043_v44 = vld [vmem:[%s4165_s17 + $0x5d8] sm:$0xff] }
  0x90   : > { %2572 = vmatpush.bf16.msra.mxu1 %v3999_v39  ;;  %2541 = vmatmul.bf16.vlgmr.msrb.gmra.mxu2 %v765_v43  ;;  %v4044_v39 = vld [vmem:[%s4165_s17 + $0x5e0] sm:$0xff]  ;;  %v4035_v43 = vld [vmem:[%s4165_s17 + $0x598] sm:$0xff] }
  0x91   : > { %2585 = vmatpush.bf16.msra.mxu2 %v4007_v40  ;;  %2554 = vmatmul.bf16.vlgmr.msrb.gmra.mxu3 %v766_v45 }
  0x92   : > { %2598 = vmatpush.bf16.msra.mxu3 %v4015_v41  ;;  %v4019_v41 = vld [vmem:[%s4165_s17 + $0x518] sm:$0xff] }
  0x93   : > { %2560 = vmatpush.bf16.msra.mxu0 %v3990_v46 }
  0x94   : > { %2573 = vmatpush.bf16.msra.mxu1 %v3998_v47 }
  0x95   : > { %2586 = vmatpush.bf16.msra.mxu2 %v4006_v48 }
  0x96   : > { %2599 = vmatpush.bf16.msra.mxu3 %v4014_v49  ;;  %v4018_v49 = vld [vmem:[%s4165_s17 + $0x510] sm:$0xff] }
  0x97   : > { %2561 = vmatpush.bf16.msra.mxu0 %v3989_v50  ;;  %v4026_v50 = vld [vmem:[%s4165_s17 + $0x550] sm:$0xff] }
  0x98   : > { %2574 = vmatpush.bf16.msra.mxu1 %v3997_v51 }
  0x99   : > { %2587 = vmatpush.bf16.msra.mxu2 %v4005_v52 }
  0x9a   : > { %2600 = vmatpush.bf16.msra.mxu3 %v4013_v53  ;;  %v4034_v53 = vld [vmem:[%s4165_s17 + $0x590] sm:$0xff] }
  0x9b   : > { %2562 = vmatpush.bf16.msra.mxu0 %v3988_v54  ;;  %v4042_v54 = vld [vmem:[%s4165_s17 + $0x5d0] sm:$0xff] }
  0x9c   : > { %2575 = vmatpush.bf16.msra.mxu1 %v3996_v55  ;;  %v4017_v55 = vld [vmem:[%s4165_s17 + $0x508] sm:$0xff] }
  0x9d   : > { %2588 = vmatpush.bf16.msra.mxu2 %v4004_v56  ;;  %v4025_v56 = vld [vmem:[%s4165_s17 + $0x548] sm:$0xff] }
  0x9e   : > { %2601 = vmatpush.bf16.msra.mxu3 %v4012_v57  ;;  %v4033_v57 = vld [vmem:[%s4165_s17 + $0x588] sm:$0xff] }
  0x9f   : > { %2563 = vmatpush.bf16.msra.mxu0 %v3987_v58  ;;  %v4041_v58 = vld [vmem:[%s4165_s17 + $0x5c8] sm:$0xff] }
  0xa0   : > { %2576 = vmatpush.bf16.msra.mxu1 %v3995_v59  ;;  %v179_v59 = vld [vmem:[%s4488_s1 + $0x50] sm:$0xff] }
  0xa1   : > { %2589 = vmatpush.bf16.msra.mxu2 %v4003_v60  ;;  %v180_v60 = vld [vmem:[%s4488_s1 + $0x58] sm:$0xff] }
  0xa2   : > { %2602 = vmatpush.bf16.msra.mxu3 %v4011_v61  ;;  %v742_v6 = vunpack.c.h.b16 %v180_v60 }
  0xa3   : > { %2564 = vmatpush.bf16.msra.mxu0 %v3986_v62 }
  0xa4   : > { %2577 = vmatpush.bf16.msra.mxu1 %v3994_v63  ;;  %v4016_v63 = vld [vmem:[%s4165_s17 + $0x500] sm:$0xff]  ;;  %v774_v14 = vpack.c.b16 %v742_v6, %v742_v6  ;;  %v4094_v6 = vld [vmem:[%s4165_s17 + $0x770] sm:$0xff] }
  0xa5   : > { %2590 = vmatpush.bf16.msra.mxu2 %v4002_v0  ;;  %v4024_v0 = vld [vmem:[%s4165_s17 + $0x540] sm:$0xff] }
  0xa6   : > { %2603 = vmatpush.bf16.msra.mxu3 %v4010_v1  ;;  %v739_v1 = vunpack.c.l.b16 %v179_v59 }
  0xa7   : > { %2565 = vmatpush.bf16.msra.mxu0 %v3985_v2  ;;  %v741_v2 = vunpack.c.l.b16 %v180_v60 }
  0xa8   : > { %2578 = vmatpush.bf16.msra.mxu1 %v3993_v3  ;;  %v4032_v3 = vld [vmem:[%s4165_s17 + $0x580] sm:$0xff]  ;;  %v771_v11 = vpack.c.b16 %v739_v1, %v739_v1 }
  0xa9   : > { %2591 = vmatpush.bf16.msra.mxu2 %v4001_v4  ;;  %v4040_v4 = vld [vmem:[%s4165_s17 + $0x5c0] sm:$0xff] }
  0xaa   : > { %2604 = vmatpush.bf16.msra.mxu3 %v4009_v5  ;;  %v740_v5 = vunpack.c.h.b16 %v179_v59 }
  0xab   : > { %2566 = vmatpush.bf16.msra.mxu0 %v3984_v8  ;;  %v2360_v32 = vpop.f32.mrf.mxu0  ;;  %v4063_v8 = vld [vmem:[%s4165_s17 + $0x678] sm:$0xff] }
  0xac   : > { %2579 = vmatpush.bf16.msra.mxu1 %v3992_v9  ;;  %v2373_v36 = vpop.f32.mrf.mxu1  ;;  %v2361_v37 = vadd.f32 %v2360_v32, %v701_v33  ;;  %v4071_v9 = vld [vmem:[%s4165_s17 + $0x6b8] sm:$0xff] }
  0xad   : > { %2592 = vmatpush.bf16.msra.mxu2 %v4000_v12  ;;  %v773_v12 = vpack.c.b16 %v741_v2, %v741_v2  ;;  %v4059_v32 = vld [vmem:[%s4165_s17 + $0x658] sm:$0xff] }
  0xae   : > { %2605 = vmatpush.bf16.msra.mxu3 %v4008_v13  ;;  %2567 = vmatmul.bf16.vlgmr.msra.gmra.mxu0 %v767_v20  ;;  %v2374_v40 = vadd.f32 %v2373_v36, %v2361_v37  ;;  %v772_v13 = vpack.c.b16 %v740_v5, %v740_v5  ;;  %v4061_v20 = vld [vmem:[%s4165_s17 + $0x668] sm:$0xff]  ;;  %v4067_v33 = vld [vmem:[%s4165_s17 + $0x698] sm:$0xff]  ;;  %v4086_v5 = vld [vmem:[%s4165_s17 + $0x730] sm:$0xff] }
  0xaf   : > { %2611 = vmatpush.bf16.msrb.mxu0 %v4023_v16  ;;  %2580 = vmatmul.bf16.vlgmr.msra.gmra.mxu1 %v768_v22  ;;  %v4062_v16 = vld [vmem:[%s4165_s17 + $0x670] sm:$0xff]  ;;  %v4077_v22 = vld [vmem:[%s4165_s17 + $0x6e8] sm:$0xff] }
  0xb0   : > { %2624 = vmatpush.bf16.msrb.mxu1 %v4031_v17  ;;  %2593 = vmatmul.bf16.vlgmr.msra.gmra.mxu2 %v769_v21  ;;  %v4070_v17 = vld [vmem:[%s4165_s17 + $0x6b0] sm:$0xff]  ;;  %v4069_v21 = vld [vmem:[%s4165_s17 + $0x6a8] sm:$0xff] }
  0xb1   : > { %2637 = vmatpush.bf16.msrb.mxu2 %v4039_v18  ;;  %2606 = vmatmul.bf16.vlgmr.msra.gmra.mxu3 %v770_v23  ;;  %v4078_v18 = vld [vmem:[%s4165_s17 + $0x6f0] sm:$0xff] }
  0xb2   : > { %2650 = vmatpush.bf16.msrb.mxu3 %v4047_v19  ;;  %v4053_v19 = vld [vmem:[%s4165_s17 + $0x628] sm:$0xff] }
  0xb3   : > { %2612 = vmatpush.bf16.msrb.mxu0 %v4022_v24  ;;  %v2386_v45 = vpop.f32.mrf.mxu2  ;;  %v2362_v48 = vpop.f32.mrf.mxu0  ;;  %v4052_v24 = vld [vmem:[%s4165_s17 + $0x620] sm:$0xff] }
  0xb4   : > { %2625 = vmatpush.bf16.msrb.mxu1 %v4030_v25  ;;  %v2399_v46 = vpop.f32.mrf.mxu3  ;;  %v2387_v47 = vadd.f32 %v2386_v45, %v2374_v40  ;;  %v2375_v51 = vpop.f32.mrf.mxu1  ;;  %v4060_v25 = vld [vmem:[%s4165_s17 + $0x660] sm:$0xff]  ;;  %v4058_v40 = vld [vmem:[%s4165_s17 + $0x650] sm:$0xff]  ;;  %v4049_v45 = vld [vmem:[%s4165_s17 + $0x608] sm:$0xff] }
  0xb5   : > { %2638 = vmatpush.bf16.msrb.mxu2 %v4038_v26  ;;  %v4073_v48 = vld [vmem:[%s4165_s17 + $0x6c8] sm:$0xff] }
  0xb6   : > { %2651 = vmatpush.bf16.msrb.mxu3 %v4046_v27  ;;  %v4382_v52 = vadd.f32 %v2399_v46, %v2387_v47  ;;  %v4057_v46 = vld [vmem:[%s4165_s17 + $0x648] sm:$0xff] }
  0xb7   : > { %2613 = vmatpush.bf16.msrb.mxu0 %v4021_v28  ;;  %v4068_v28 = vld [vmem:[%s4165_s17 + $0x6a0] sm:$0xff]  ;;  %v4065_v47 = vld [vmem:[%s4165_s17 + $0x688] sm:$0xff] }
  0xb8   : > { %2626 = vmatpush.bf16.msrb.mxu1 %v4029_v29  ;;  %v4076_v29 = vld [vmem:[%s4165_s17 + $0x6e0] sm:$0xff] }
  0xb9   : > { %2639 = vmatpush.bf16.msrb.mxu2 %v4037_v30 }
  0xba   : > { %2652 = vmatpush.bf16.msrb.mxu3 %v4045_v31  ;;  %v4051_v31 = vld [vmem:[%s4165_s17 + $0x618] sm:$0xff] }
  0xbb   : > { %2614 = vmatpush.bf16.msrb.mxu0 %v4020_v34  ;;  %v2388_v61 = vpop.f32.mrf.mxu2  ;;  %v4075_v34 = vld [vmem:[%s4165_s17 + $0x6d8] sm:$0xff] }
  0xbc   : > { %2627 = vmatpush.bf16.msrb.mxu1 %v4028_v35  ;;  %v2401_v62 = vpop.f32.mrf.mxu3  ;;  %v4087_v61 = vld [vmem:[%s4165_s17 + $0x738] sm:$0xff] }
  0xbd   : > { %2640 = vmatpush.bf16.msrb.mxu2 %v4036_v38  ;;  %v4095_v62 = vld [vmem:[%s4165_s17 + $0x778] sm:$0xff] }
  0xbe   : > { %2653 = vmatpush.bf16.msrb.mxu3 %v4044_v39  ;;  %v4050_v39 = vld [vmem:[%s4165_s17 + $0x610] sm:$0xff] }
  0xbf   : > { %2615 = vmatpush.bf16.msrb.mxu0 %v4019_v41 }
  0xc0   : > { %2628 = vmatpush.bf16.msrb.mxu1 %v4027_v42 }
  0xc1   : > { %2641 = vmatpush.bf16.msrb.mxu2 %v4035_v43  ;;  %v4066_v43 = vld [vmem:[%s4165_s17 + $0x690] sm:$0xff] }
  0xc2   : > { %2654 = vmatpush.bf16.msrb.mxu3 %v4043_v44  ;;  %v4074_v44 = vld [vmem:[%s4165_s17 + $0x6d0] sm:$0xff] }
  0xc3   : > { %2616 = vmatpush.bf16.msrb.mxu0 %v4018_v49  ;;  %v181_v49 = vld [vmem:[%s4488_s1 + $0x60] sm:$0xff] }
  0xc4   : > { %2629 = vmatpush.bf16.msrb.mxu1 %v4026_v50  ;;  %v182_v50 = vld [vmem:[%s4488_s1 + $0x68] sm:$0xff]  ;;  %v744_v59 = vunpack.c.h.b16 %v181_v49 }
  0xc5   : > { %2642 = vmatpush.bf16.msrb.mxu2 %v4034_v53  ;;  %v4048_v53 = vld [vmem:[%s4165_s17 + $0x600] sm:$0xff]  ;;  %v746_v60 = vunpack.c.h.b16 %v182_v50 }
  0xc6   : > { %2655 = vmatpush.bf16.msrb.mxu3 %v4042_v54  ;;  %v4056_v54 = vld [vmem:[%s4165_s17 + $0x640] sm:$0xff] }
  0xc7   : > { %2617 = vmatpush.bf16.msrb.mxu0 %v4017_v55  ;;  %v743_v55 = vunpack.c.l.b16 %v181_v49  ;;  %v4096_v49 = vld [vmem:[%s4165_s17 + $0x780] sm:$0xff] }
  0xc8   : > { %2630 = vmatpush.bf16.msrb.mxu1 %v4025_v56  ;;  %v745_v56 = vunpack.c.l.b16 %v182_v50  ;;  %v4104_v50 = vld [vmem:[%s4165_s17 + $0x7c0] sm:$0xff] }
  0xc9   : > { %2643 = vmatpush.bf16.msrb.mxu2 %v4033_v57  ;;  %v4064_v57 = vld [vmem:[%s4165_s17 + $0x680] sm:$0xff]  ;;  %v775_v1 = vpack.c.b16 %v743_v55, %v743_v55 }
  0xca   : > { %2656 = vmatpush.bf16.msrb.mxu3 %v4041_v58  ;;  %v4072_v58 = vld [vmem:[%s4165_s17 + $0x6c0] sm:$0xff]  ;;  %v777_v2 = vpack.c.b16 %v745_v56, %v745_v56 }
  0xcb   : > { %2618 = vmatpush.bf16.msrb.mxu0 %v4016_v63  ;;  %v2412_v23 = vpop.f32.mrf.mxu0  ;;  %v4103_v63 = vld [vmem:[%s4165_s17 + $0x7b8] sm:$0xff] }
  0xcc   : > { %2631 = vmatpush.bf16.msrb.mxu1 %v4024_v0  ;;  %v2413_v26 = vadd.f32 %v2412_v23, %v4382_v52  ;;  %v2425_v27 = vpop.f32.mrf.mxu1  ;;  %v4111_v0 = vld [vmem:[%s4165_s17 + $0x7f8] sm:$0xff] }
  0xcd   : > { %2644 = vmatpush.bf16.msrb.mxu2 %v4032_v3  ;;  %v776_v3 = vpack.c.b16 %v744_v59, %v744_v59  ;;  %v4099_v23 = vld [vmem:[%s4165_s17 + $0x798] sm:$0xff] }
  0xce   : > { %2657 = vmatpush.bf16.msrb.mxu3 %v4040_v4  ;;  %2619 = vmatmul.bf16.vlgmr.msrb.gmra.mxu0 %v771_v11  ;;  %v2426_v30 = vadd.f32 %v2425_v27, %v2413_v26  ;;  %v778_v4 = vpack.c.b16 %v746_v60, %v746_v60  ;;  %v4101_v11 = vld [vmem:[%s4165_s17 + $0x7a8] sm:$0xff] }
  0xcf   : > { %2663 = vmatpush.bf16.msra.mxu0 %v4055_v7  ;;  %2632 = vmatmul.bf16.vlgmr.msrb.gmra.mxu1 %v772_v13  ;;  %v4102_v7 = vld [vmem:[%s4165_s17 + $0x7b0] sm:$0xff] }
  0xd0   : > { %2676 = vmatpush.bf16.msra.mxu1 %v4063_v8  ;;  %2645 = vmatmul.bf16.vlgmr.msrb.gmra.mxu2 %v773_v12  ;;  %v4110_v8 = vld [vmem:[%s4165_s17 + $0x7f0] sm:$0xff]  ;;  %v4109_v12 = vld [vmem:[%s4165_s17 + $0x7e8] sm:$0xff] }
  0xd1   : > { %2689 = vmatpush.bf16.msra.mxu2 %v4071_v9  ;;  %2658 = vmatmul.bf16.vlgmr.msrb.gmra.mxu3 %v774_v14  ;;  %v4085_v9 = vld [vmem:[%s4165_s17 + $0x728] sm:$0xff] }
  0xd2   : > { %2702 = vmatpush.bf16.msra.mxu3 %v4079_v10  ;;  %v4093_v10 = vld [vmem:[%s4165_s17 + $0x768] sm:$0xff] }
  0xd3   : > { %2664 = vmatpush.bf16.msra.mxu0 %v4054_v15  ;;  %v2438_v35 = vpop.f32.mrf.mxu2  ;;  %v2414_v38 = vpop.f32.mrf.mxu0  ;;  %v4084_v15 = vld [vmem:[%s4165_s17 + $0x720] sm:$0xff] }
  0xd4   : > { %2677 = vmatpush.bf16.msra.mxu1 %v4062_v16  ;;  %v2439_v36 = vadd.f32 %v2438_v35, %v2426_v30  ;;  %v2451_v37 = vpop.f32.mrf.mxu3  ;;  %v2427_v42 = vpop.f32.mrf.mxu1  ;;  %v4092_v16 = vld [vmem:[%s4165_s17 + $0x760] sm:$0xff]  ;;  %v4082_v30 = vld [vmem:[%s4165_s17 + $0x710] sm:$0xff]  ;;  %v4081_v35 = vld [vmem:[%s4165_s17 + $0x708] sm:$0xff] }
  0xd5   : > { %2690 = vmatpush.bf16.msra.mxu2 %v4070_v17  ;;  %v4097_v38 = vld [vmem:[%s4165_s17 + $0x788] sm:$0xff] }
  0xd6   : > { %2703 = vmatpush.bf16.msra.mxu3 %v4078_v18  ;;  %v4423_v41 = vadd.f32 %v2451_v37, %v2439_v36  ;;  %v4100_v18 = vld [vmem:[%s4165_s17 + $0x7a0] sm:$0xff]  ;;  %v4089_v36 = vld [vmem:[%s4165_s17 + $0x748] sm:$0xff]  ;;  %v183_v37 = vld [vmem:[%s4488_s1 + $0x70] sm:$0xff] }
  0xd7   : > { %2665 = vmatpush.bf16.msra.mxu0 %v4053_v19  ;;  %v4108_v19 = vld [vmem:[%s4165_s17 + $0x7e0] sm:$0xff] }
  0xd8   : > { %2678 = vmatpush.bf16.msra.mxu1 %v4061_v20 }
  0xd9   : > { %2691 = vmatpush.bf16.msra.mxu2 %v4069_v21  ;;  %v4083_v21 = vld [vmem:[%s4165_s17 + $0x718] sm:$0xff] }
  0xda   : > { %2704 = vmatpush.bf16.msra.mxu3 %v4077_v22  ;;  %v4091_v22 = vld [vmem:[%s4165_s17 + $0x758] sm:$0xff] }
  0xdb   : > { %2666 = vmatpush.bf16.msra.mxu0 %v4052_v24  ;;  %v2440_v51 = vpop.f32.mrf.mxu2  ;;  %v4107_v24 = vld [vmem:[%s4165_s17 + $0x7d8] sm:$0xff] }
  0xdc   : > { %2679 = vmatpush.bf16.msra.mxu1 %v4060_v25  ;;  %v2453_v52 = vpop.f32.mrf.mxu3 }
  0xdd   : > { %2692 = vmatpush.bf16.msra.mxu2 %v4068_v28 }
  0xde   : > { %2705 = vmatpush.bf16.msra.mxu3 %v4076_v29 }
  0xdf   : > { %2667 = vmatpush.bf16.msra.mxu0 %v4051_v31  ;;  %v4090_v31 = vld [vmem:[%s4165_s17 + $0x750] sm:$0xff] }
  0xe0   : > { %2680 = vmatpush.bf16.msra.mxu1 %v4059_v32 }
  0xe1   : > { %2693 = vmatpush.bf16.msra.mxu2 %v4067_v33  ;;  %v4098_v33 = vld [vmem:[%s4165_s17 + $0x790] sm:$0xff] }
  0xe2   : > { %2706 = vmatpush.bf16.msra.mxu3 %v4075_v34  ;;  %v4106_v34 = vld [vmem:[%s4165_s17 + $0x7d0] sm:$0xff] }
  0xe3   : > { %2668 = vmatpush.bf16.msra.mxu0 %v4050_v39  ;;  %v4105_v39 = vld [vmem:[%s4165_s17 + $0x7c8] sm:$0xff] }
  0xe4   : > { %2681 = vmatpush.bf16.msra.mxu1 %v4058_v40  ;;  %v184_v40 = vld [vmem:[%s4488_s1 + $0x78] sm:$0xff] }
  0xe5   : > { %2694 = vmatpush.bf16.msra.mxu2 %v4066_v43  ;;  %v747_v43 = vunpack.c.l.b16 %v183_v37 }
  0xe6   : > { %2707 = vmatpush.bf16.msra.mxu3 %v4074_v44  ;;  %v748_v44 = vunpack.c.h.b16 %v183_v37 }
  0xe7   : > { %2669 = vmatpush.bf16.msra.mxu0 %v4049_v45  ;;  %v4080_v45 = vld [vmem:[%s4165_s17 + $0x700] sm:$0xff]  ;;  %v779_v51 = vpack.c.b16 %v747_v43, %v747_v43 }
  0xe8   : > { %2682 = vmatpush.bf16.msra.mxu1 %v4057_v46  ;;  %v4088_v46 = vld [vmem:[%s4165_s17 + $0x740] sm:$0xff]  ;;  %v780_v52 = vpack.c.b16 %v748_v44, %v748_v44  ;;  %s2828_s17 = sshll.u32 %s4492_s13, 3 }
  0xe9   : > { %2695 = vmatpush.bf16.msra.mxu2 %v4065_v47  ;;  %v749_v47 = vunpack.c.l.b16 %v184_v40  ;;  %s168_s30 = scalar_lea.vmem %s4490_s3, %s2828_s17 }
  0xea   : > { %2708 = vmatpush.bf16.msra.mxu3 %v4073_v48  ;;  %v750_v48 = vunpack.c.h.b16 %v184_v40 }
  0xeb   : > { %2670 = vmatpush.bf16.msra.mxu0 %v4048_v53  ;;  %v2464_v13 = vpop.f32.mrf.mxu0  ;;  %v781_v53 = vpack.c.b16 %v749_v47, %v749_v47 }
  0xec   : > { %2683 = vmatpush.bf16.msra.mxu1 %v4056_v54  ;;  %v2465_v14 = vadd.f32 %v2464_v13, %v4423_v41  ;;  %v2477_v17 = vpop.f32.mrf.mxu1  ;;  %v782_v54 = vpack.c.b16 %v750_v48, %v750_v48 }
  0xed   : > { %2696 = vmatpush.bf16.msra.mxu2 %v4064_v57 }
  0xee   : > { %2709 = vmatpush.bf16.msra.mxu3 %v4072_v58  ;;  %2671 = vmatmul.bf16.vlgmr.msra.gmra.mxu0 %v775_v1  ;;  %v2478_v20 = vadd.f32 %v2477_v17, %v2465_v14 }
  0xef   : > { %2715 = vmatpush.bf16.msrb.mxu0 %v4087_v61  ;;  %2684 = vmatmul.bf16.vlgmr.msra.gmra.mxu1 %v776_v3 }
  0xf0   : > { %2728 = vmatpush.bf16.msrb.mxu1 %v4095_v62  ;;  %2697 = vmatmul.bf16.vlgmr.msra.gmra.mxu2 %v777_v2 }
  0xf1   : > { %2741 = vmatpush.bf16.msrb.mxu2 %v4103_v63  ;;  %2710 = vmatmul.bf16.vlgmr.msra.gmra.mxu3 %v778_v4 }
  0xf2   : > { %2754 = vmatpush.bf16.msrb.mxu3 %v4111_v0 }
  0xf3   : > { %2716 = vmatpush.bf16.msrb.mxu0 %v4086_v5  ;;  %v2490_v25 = vpop.f32.mrf.mxu2  ;;  %v2466_v28 = vpop.f32.mrf.mxu0 }
  0xf4   : > { %2729 = vmatpush.bf16.msrb.mxu1 %v4094_v6  ;;  %v2491_v26 = vadd.f32 %v2490_v25, %v2478_v20  ;;  %v2503_v27 = vpop.f32.mrf.mxu3  ;;  %v2479_v32 = vpop.f32.mrf.mxu1 }
  0xf5   : > { %2742 = vmatpush.bf16.msrb.mxu2 %v4102_v7 }
  0xf6   : > { %2755 = vmatpush.bf16.msrb.mxu3 %v4110_v8  ;;  %v2504_v29 = vadd.f32 %v2503_v27, %v2491_v26 }
  0xf7   : > { %2717 = vmatpush.bf16.msrb.mxu0 %v4085_v9 }
  0xf8   : > { %2730 = vmatpush.bf16.msrb.mxu1 %v4093_v10 }
  0xf9   : > { %2743 = vmatpush.bf16.msrb.mxu2 %v4101_v11 }
  0xfa   : > { %2756 = vmatpush.bf16.msrb.mxu3 %v4109_v12 }
  0xfb   : > { %2718 = vmatpush.bf16.msrb.mxu0 %v4084_v15  ;;  %v2492_v41 = vpop.f32.mrf.mxu2 }
  0xfc   : > { %2731 = vmatpush.bf16.msrb.mxu1 %v4092_v16  ;;  %v2505_v42 = vpop.f32.mrf.mxu3 }
  0xfd   : > { %2744 = vmatpush.bf16.msrb.mxu2 %v4100_v18 }
  0xfe   : > { %2757 = vmatpush.bf16.msrb.mxu3 %v4108_v19 }
  0xff   : > { %2719 = vmatpush.bf16.msrb.mxu0 %v4083_v21 }
 0x100   : > { %2732 = vmatpush.bf16.msrb.mxu1 %v4091_v22 }
 0x101   : > { %2745 = vmatpush.bf16.msrb.mxu2 %v4099_v23 }
 0x102   : > { %2758 = vmatpush.bf16.msrb.mxu3 %v4107_v24 }
 0x103   : > { %2720 = vmatpush.bf16.msrb.mxu0 %v4082_v30 }
 0x104   : > { %2733 = vmatpush.bf16.msrb.mxu1 %v4090_v31 }
 0x105   : > { %2746 = vmatpush.bf16.msrb.mxu2 %v4098_v33 }
 0x106   : > { %2759 = vmatpush.bf16.msrb.mxu3 %v4106_v34 }
 0x107   : > { %2721 = vmatpush.bf16.msrb.mxu0 %v4081_v35 }
 0x108   : > { %2734 = vmatpush.bf16.msrb.mxu1 %v4089_v36 }
 0x109   : > { %2747 = vmatpush.bf16.msrb.mxu2 %v4097_v38 }
 0x10a   : > { %2760 = vmatpush.bf16.msrb.mxu3 %v4105_v39 }
 0x10b   : > { %2722 = vmatpush.bf16.msrb.mxu0 %v4080_v45  ;;  %v2516_v55 = vpop.f32.mrf.mxu0 }
 0x10c   : > { %2735 = vmatpush.bf16.msrb.mxu1 %v4088_v46  ;;  %v2517_v56 = vadd.f32 %v2516_v55, %v2504_v29  ;;  %v2529_v57 = vpop.f32.mrf.mxu1 }
 0x10d   : > { %2748 = vmatpush.bf16.msrb.mxu2 %v4096_v49 }
 0x10e   : > { %2761 = vmatpush.bf16.msrb.mxu3 %v4104_v50  ;;  %2723 = vmatmul.bf16.vlgmr.msrb.gmra.mxu0 %v779_v51  ;;  %v2530_v58 = vadd.f32 %v2529_v57, %v2517_v56 }
 0x10f   : > { %2736 = vmatmul.bf16.vlgmr.msrb.gmra.mxu1 %v780_v52 }
 0x110   : > { %2749 = vmatmul.bf16.vlgmr.msrb.gmra.mxu2 %v781_v53 }
 0x111   : > { %2762 = vmatmul.bf16.vlgmr.msrb.gmra.mxu3 %v782_v54 }
 0x113   : > { %v2542_v59 = vpop.f32.mrf.mxu2  ;;  %v2518_v62 = vpop.f32.mrf.mxu0 }
 0x114   : > { %v2543_v60 = vadd.f32 %v2542_v59, %v2530_v58  ;;  %v2555_v61 = vpop.f32.mrf.mxu3  ;;  %v2531_v0 = vpop.f32.mrf.mxu1 }
 0x116   : > { %v2556_v63 = vadd.f32 %v2555_v61, %v2543_v60 }
 0x11b   : > { %v2544_v1 = vpop.f32.mrf.mxu2 }
 0x11c   : > { %v2557_v2 = vpop.f32.mrf.mxu3 }
 0x12b   : > { %v2568_v3 = vpop.f32.mrf.mxu0 }
 0x12c   : > { %v2569_v4 = vadd.f32 %v2568_v3, %v2556_v63  ;;  %v2581_v5 = vpop.f32.mrf.mxu1 }
 0x12e   : > { %v2582_v6 = vadd.f32 %v2581_v5, %v2569_v4 }
 0x133   : > { %v2594_v7 = vpop.f32.mrf.mxu2  ;;  %v2570_v10 = vpop.f32.mrf.mxu0 }
 0x134   : > { %v2595_v8 = vadd.f32 %v2594_v7, %v2582_v6  ;;  %v2607_v9 = vpop.f32.mrf.mxu3  ;;  %v2583_v12 = vpop.f32.mrf.mxu1 }
 0x136   : > { %v2608_v11 = vadd.f32 %v2607_v9, %v2595_v8 }
 0x13b   : > { %v2596_v13 = vpop.f32.mrf.mxu2 }
 0x13c   : > { %v2609_v14 = vpop.f32.mrf.mxu3 }
 0x14b   : > { %v2620_v15 = vpop.f32.mrf.mxu0 }
 0x14c   : > { %v2633_v16 = vpop.f32.mrf.mxu1  ;;  %v2621_v26 = vadd.f32 %v2620_v15, %v2608_v11 }
 0x14e   : > { %v2634_v30 = vadd.f32 %v2633_v16, %v2621_v26 }
 0x153   : > { %v2646_v17 = vpop.f32.mrf.mxu2  ;;  %v2622_v19 = vpop.f32.mrf.mxu0 }
 0x154   : > { %v2659_v18 = vpop.f32.mrf.mxu3  ;;  %v2635_v20 = vpop.f32.mrf.mxu1  ;;  %v2647_v31 = vadd.f32 %v2646_v17, %v2634_v30 }
 0x156   : > { %v2660_v34 = vadd.f32 %v2659_v18, %v2647_v31 }
 0x15b   : > { %v2648_v21 = vpop.f32.mrf.mxu2 }
 0x15c   : > { %v2661_v22 = vpop.f32.mrf.mxu3 }
 0x16b   : > { %v2672_v23 = vpop.f32.mrf.mxu0 }
 0x16c   : > { %v2685_v24 = vpop.f32.mrf.mxu1  ;;  %v2673_v35 = vadd.f32 %v2672_v23, %v2660_v34 }
 0x16e   : > { %v2686_v36 = vadd.f32 %v2685_v24, %v2673_v35 }
 0x173   : > { %v2698_v25 = vpop.f32.mrf.mxu2  ;;  %v2674_v28 = vpop.f32.mrf.mxu0 }
 0x174   : > { %v2711_v27 = vpop.f32.mrf.mxu3  ;;  %v2687_v29 = vpop.f32.mrf.mxu1  ;;  %v2699_v37 = vadd.f32 %v2698_v25, %v2686_v36 }
 0x176   : > { %v2712_v38 = vadd.f32 %v2711_v27, %v2699_v37 }
 0x17b   : > { %v2700_v32 = vpop.f32.mrf.mxu2 }
 0x17c   : > { %v2713_v33 = vpop.f32.mrf.mxu3 }
 0x18b   : > { %v2724_v39 = vpop.f32.mrf.mxu0 }
 0x18c   : > { %v2737_v40 = vpop.f32.mrf.mxu1  ;;  %v2725_v41 = vadd.f32 %v2724_v39, %v2712_v38 }
 0x18e   : > { %v2738_v42 = vadd.f32 %v2737_v40, %v2725_v41 }
 0x193   : > { %v2750_v43 = vpop.f32.mrf.mxu2  ;;  %v2726_v46 = vpop.f32.mrf.mxu0 }
 0x194   : > { %v2763_v44 = vpop.f32.mrf.mxu3  ;;  %v2751_v45 = vadd.f32 %v2750_v43, %v2738_v42  ;;  %v2739_v47 = vpop.f32.mrf.mxu1 }
 0x196   : > { %v2764_v48 = vadd.f32 %v2763_v44, %v2751_v45 }
 0x198   : > { %2767 = vst [vmem:[%s168_s30] sm:$0xff] %v2764_v48 }
 0x19b   : > { %v2752_v49 = vpop.f32.mrf.mxu2 }
 0x19c   : > { %v2765_v50 = vpop.f32.mrf.mxu3 }
 0x19d PF: > { %s13_s12 = sadd.s32 1, %s4128_s12  }
 0x19e   : > { %p10_p4 = scmp.ge.s32.totalorder %s13_s12, 4  }
 0x1a0   :  { %12 = sbr.rel (!%p10_p4) target bundleno = 1 (0x1), region = 62 }

</bundles_post_ra>
